<compile_context>
chip_gen: v7x
topology: tpu7x:2x2x1
jax: 0.10.0
libtpu: 0.0.40
codegen_flags: <defaults>
</compile_context>

<pallas_src>
import jax
import jax.numpy as jnp
import numpy as np
from jax import lax
from jax.experimental import pallas as pl
from jax.experimental.pallas import tpu as pltpu

EPS = 1e-5
CH_ALIGN = 128  # lane width: keep every channel axis a multiple of 128


def _round_up(x, m):
    return (x + m - 1) // m * m


def _double_conv_kernel(x_ref, w1_ref, w2_ref, ws_ref,
                        g1_ref, be1_ref, g2_ref, be2_ref, gs_ref, bes_ref,
                        out_ref, xpad_ref, ypad_ref):
    N, H, W, Cin = x_ref.shape            # channel dims already lane-padded
    Cout = out_ref.shape[-1]
    NHW = N * H * W
    inv_nhw = jnp.float32(1.0 / NHW)

    def store_padded(pad_ref, interior):
        """Write `interior` (N,H,W,C) into pad_ref center; zero only the 1-px halo."""
        C = pad_ref.shape[-1]
        zrow = jnp.zeros((N, 1, W + 2, C), jnp.float32)
        zcol = jnp.zeros((N, H + 2, 1, C), jnp.float32)
        pad_ref[:, 0:1, :, :] = zrow
        pad_ref[:, H + 1:H + 2, :, :] = zrow
        pad_ref[:, :, 0:1, :] = zcol
        pad_ref[:, :, W + 1:W + 2, :] = zcol
        pad_ref[:, 1:H + 1, 1:W + 1, :] = interior

    def im2col(pad_ref):
        """(N,H+2,W+2,C) padded ref -> (N*H*W, 9*C) patch (tap order kh,kw matches HWIO weights)."""
        C = pad_ref.shape[-1]
        taps = [pad_ref[:, kh:kh + H, kw:kw + W, :].reshape(NHW, C)
                for kh in range(3) for kw in range(3)]
        return jnp.concatenate(taps, axis=-1)   # lane-dense: each tap is a 128-multiple

    def bn_train(acc, g_ref, b_ref):
        """Single-pass training-mode BN folded into one scale/shift FMA."""
        s = jnp.sum(acc, axis=0, keepdims=True)
        ss = jnp.sum(acc * acc, axis=0, keepdims=True)
        m = s * inv_nhw
        var = jnp.maximum(ss * inv_nhw - m * m, 0.0)
        scale = g_ref[...] * lax.rsqrt(var + EPS)          # (1, C)
        shift = b_ref[...] - m * scale                     # (1, C)
        return acc * scale + shift

    x = x_ref[...]

    # ---- conv1: 3x3, pad=1, as one fused im2col matmul on the MXU ----
    # (conv bias omitted: exactly cancelled by the BN mean subtraction below)
    store_padded(xpad_ref, x)
    acc1 = jnp.dot(im2col(xpad_ref), w1_ref[...], preferred_element_type=jnp.float32)
    y1 = jnp.maximum(bn_train(acc1, g1_ref, be1_ref), 0.0)          # (NHW, Cout)

    # ---- conv2: 3x3, pad=1 ----
    store_padded(ypad_ref, y1.reshape(N, H, W, Cout))
    acc2 = jnp.dot(im2col(ypad_ref), w2_ref[...], preferred_element_type=jnp.float32)
    y2 = bn_train(acc2, g2_ref, be2_ref)

    # ---- shortcut: 1x1 conv (no bias) + BN ----
    accs = jnp.dot(x.reshape(NHW, Cin), ws_ref[...], preferred_element_type=jnp.float32)
    ys = bn_train(accs, gs_ref, bes_ref)

    # ---- residual add + final ReLU; lane-dense (C multiple of 128) store ----
    out_ref[...] = jnp.maximum(y2 + ys, 0.0).reshape(N, H, W, Cout)


def double_conv_forward(x_nchw, params):
    """x_nchw: (N, Cin, H, W) float32 -> (N, Cout, H, W) float32."""
    x = jnp.transpose(x_nchw, (0, 2, 3, 1)).astype(jnp.float32)     # NCHW -> NHWC
    N, H, W, Cin = x.shape
    Cout = params["w1"].shape[-1]
    Cin_p = _round_up(Cin, CH_ALIGN)
    Cout_p = _round_up(Cout, CH_ALIGN)

    # Channel padding only (no-op at realistic, already-aligned channel counts).
    # Spatial padding is done inside the kernel to avoid an HBM round-trip.
    xp = jnp.pad(x, ((0, 0), (0, 0), (0, 0), (0, Cin_p - Cin)))

    def pad_w(w, ci, co):
        pads = ((0, 0),) * (w.ndim - 2) + ((0, ci - w.shape[-2]), (0, co - w.shape[-1]))
        return jnp.pad(w, pads)

    # HWIO weights, reshaped so one matmul covers all 9 taps (rows ordered kh,kw,cin).
    w1 = pad_w(params["w1"], Cin_p, Cout_p).reshape(9 * Cin_p, Cout_p)
    w2 = pad_w(params["w2"], Cout_p, Cout_p).reshape(9 * Cout_p, Cout_p)
    ws = pad_w(params["ws"], Cin_p, Cout_p)

    def pad_v(v):
        v = v.reshape(1, -1)
        return jnp.pad(v, ((0, 0), (0, Cout_p - v.shape[-1])))

    args = (xp, w1, w2, ws,
            pad_v(params["g1"]), pad_v(params["be1"]),
            pad_v(params["g2"]), pad_v(params["be2"]),
            pad_v(params["gs"]), pad_v(params["bes"]))

    out_p = pl.pallas_call(
        _double_conv_kernel,
        out_shape=jax.ShapeDtypeStruct((N, H, W, Cout_p), jnp.float32),
        in_specs=[pl.BlockSpec(memory_space=pltpu.MemorySpace.VMEM)] * len(args),
        out_specs=pl.BlockSpec(memory_space=pltpu.MemorySpace.VMEM),
        scratch_shapes=[
            pltpu.VMEM((N, H + 2, W + 2, Cin_p), jnp.float32),   # padded x
            pltpu.VMEM((N, H + 2, W + 2, Cout_p), jnp.float32),  # padded y1
        ],
        compiler_params=pltpu.CompilerParams(
            vmem_limit_bytes=32 * 1024 * 1024),
    )(*args)

    out = out_p[..., :Cout]                                  # drop padded channels
    return jnp.transpose(out, (0, 3, 1, 2))                  # NHWC -> NCHW


# ---------------- pure-JAX reference (for correctness check) ----------------
def _bn_train(y_nhwc, gamma, beta):
    m = jnp.mean(y_nhwc, axis=(0, 1, 2), keepdims=True)
    v = jnp.mean((y_nhwc - m) ** 2, axis=(0, 1, 2), keepdims=True)
    return (y_nhwc - m) * lax.rsqrt(v + EPS) * gamma.reshape(1, 1, 1, -1) + beta.reshape(1, 1, 1, -1)


def _conv_nhwc(x, w_hwio):
    return lax.conv_general_dilated(
        x, w_hwio, window_strides=(1, 1), padding="SAME",
        dimension_numbers=("NHWC", "HWIO", "NHWC"))


def reference_forward(x_nchw, p):
    x = jnp.transpose(x_nchw, (0, 2, 3, 1))
    y = _conv_nhwc(x, p["w1"]) + p["b1"].reshape(1, 1, 1, -1)   # biases kept here on purpose
    y = jnp.maximum(_bn_train(y, p["g1"], p["be1"]), 0.0)
    y = _conv_nhwc(y, p["w2"]) + p["b2"].reshape(1, 1, 1, -1)
    y = _bn_train(y, p["g2"], p["be2"])
    s = _conv_nhwc(x, p["ws"].reshape(1, 1, *p["ws"].shape))
    s = _bn_train(s, p["gs"], p["bes"])
    out = jnp.maximum(y + s, 0.0)
    return jnp.transpose(out, (0, 3, 1, 2))


def make_params(key, in_ch, out_ch):
    ks = jax.random.split(key, 8)
    return {
        "w1": 0.1 * jax.random.normal(ks[0], (3, 3, in_ch, out_ch), jnp.float32),
        "b1": 0.1 * jax.random.normal(ks[1], (1, out_ch), jnp.float32),
        "g1": 1.0 + 0.1 * jax.random.normal(ks[2], (1, out_ch), jnp.float32),
        "be1": 0.1 * jax.random.normal(ks[3], (1, out_ch), jnp.float32),
        "w2": 0.1 * jax.random.normal(ks[4], (3, 3, out_ch, out_ch), jnp.float32),
        "b2": 0.1 * jax.random.normal(ks[5], (1, out_ch), jnp.float32),
        "g2": 1.0 + 0.05 * jax.random.normal(ks[6], (1, out_ch), jnp.float32),
        "be2": 0.05 * jax.random.normal(ks[7], (1, out_ch), jnp.float32),
        "ws": 0.1 * jax.random.normal(ks[0], (in_ch, out_ch), jnp.float32),
        "gs": jnp.ones((1, out_ch), jnp.float32),
        "bes": jnp.zeros((1, out_ch), jnp.float32),
    }


if __name__ == "__main__":
    key = jax.random.PRNGKey(0)
    kx, kp = jax.random.split(key)

    N, Cin, Cout, H, W = 2, 4, 8, 16, 16
    x = jax.random.normal(kx, (N, Cin, H, W), jnp.float32)
    params = make_params(kp, Cin, Cout)

    out = jax.block_until_ready(double_conv_forward(x, params))
    ref = jax.block_until_ready(reference_forward(x, params))
    np.testing.assert_allclose(np.asarray(out), np.asarray(ref), rtol=2e-4, atol=2e-4)

    print("KERNEL_OK")
</pallas_src>

<mosaic_0001>
module attributes {stable_mosaic.version = 11 : i64} {
  func.func @_double_conv_kernel(%arg0: memref<2x16x16x128xf32, #tpu.memory_space<vmem>>, %arg1: memref<1152x128xf32, #tpu.memory_space<vmem>>, %arg2: memref<1152x128xf32, #tpu.memory_space<vmem>>, %arg3: memref<128x128xf32, #tpu.memory_space<vmem>>, %arg4: memref<1x128xf32, #tpu.memory_space<vmem>>, %arg5: memref<1x128xf32, #tpu.memory_space<vmem>>, %arg6: memref<1x128xf32, #tpu.memory_space<vmem>>, %arg7: memref<1x128xf32, #tpu.memory_space<vmem>>, %arg8: memref<1x128xf32, #tpu.memory_space<vmem>>, %arg9: memref<1x128xf32, #tpu.memory_space<vmem>>, %arg10: memref<2x16x16x128xf32, #tpu.memory_space<vmem>>, %arg11: memref<2x18x18x128xf32, #tpu.memory_space<vmem>>, %arg12: memref<2x18x18x128xf32, #tpu.memory_space<vmem>>) attributes {dimension_semantics = [], scalar_prefetch = 0 : i64, scratch_operands = 2 : i64, tpu.core_type = #tpu.core_type<tc>} {
    %c0 = arith.constant 0 : index
    %c0_0 = arith.constant 0 : index
    %c0_1 = arith.constant 0 : index
    %c0_2 = arith.constant 0 : index
    %0 = vector.load %arg0[%c0, %c0_0, %c0_1, %c0_2] : memref<2x16x16x128xf32, #tpu.memory_space<vmem>>, vector<2x16x16x128xf32>
    %cst = arith.constant 0.000000e+00 : f32
    %1 = vector.broadcast %cst : f32 to vector<2x1x18x128xf32>
    %cst_3 = arith.constant 0.000000e+00 : f32
    %2 = vector.broadcast %cst_3 : f32 to vector<2x18x1x128xf32>
    %c0_4 = arith.constant 0 : index
    %c0_5 = arith.constant 0 : index
    %c0_6 = arith.constant 0 : index
    %c0_7 = arith.constant 0 : index
    %3 = vector.load %arg11[%c0_4, %c0_5, %c0_6, %c0_7] : memref<2x18x18x128xf32, #tpu.memory_space<vmem>>, vector<2x1x18x128xf32>
    tpu.vector_store %arg11[%c0_4, %c0_5, %c0_6, %c0_7], %1 {strides = array<i32>} : memref<2x18x18x128xf32, #tpu.memory_space<vmem>>, vector<2x1x18x128xf32>,
    %c0_8 = arith.constant 0 : index
    %c17 = arith.constant 17 : index
    %c0_9 = arith.constant 0 : index
    %c0_10 = arith.constant 0 : index
    %4 = vector.load %arg11[%c0_8, %c17, %c0_9, %c0_10] : memref<2x18x18x128xf32, #tpu.memory_space<vmem>>, vector<2x1x18x128xf32>
    tpu.vector_store %arg11[%c0_8, %c17, %c0_9, %c0_10], %1 {strides = array<i32>} : memref<2x18x18x128xf32, #tpu.memory_space<vmem>>, vector<2x1x18x128xf32>,
    %c0_11 = arith.constant 0 : index
    %c0_12 = arith.constant 0 : index
    %c0_13 = arith.constant 0 : index
    %c0_14 = arith.constant 0 : index
    %5 = vector.load %arg11[%c0_11, %c0_12, %c0_13, %c0_14] : memref<2x18x18x128xf32, #tpu.memory_space<vmem>>, vector<2x18x1x128xf32>
    tpu.vector_store %arg11[%c0_11, %c0_12, %c0_13, %c0_14], %2 {strides = array<i32>} : memref<2x18x18x128xf32, #tpu.memory_space<vmem>>, vector<2x18x1x128xf32>,
    %c0_15 = arith.constant 0 : index
    %c0_16 = arith.constant 0 : index
    %c17_17 = arith.constant 17 : index
    %c0_18 = arith.constant 0 : index
    %6 = vector.load %arg11[%c0_15, %c0_16, %c17_17, %c0_18] : memref<2x18x18x128xf32, #tpu.memory_space<vmem>>, vector<2x18x1x128xf32>
    tpu.vector_store %arg11[%c0_15, %c0_16, %c17_17, %c0_18], %2 {strides = array<i32>} : memref<2x18x18x128xf32, #tpu.memory_space<vmem>>, vector<2x18x1x128xf32>,
    %c0_19 = arith.constant 0 : index
    %c1 = arith.constant 1 : index
    %c1_20 = arith.constant 1 : index
    %c0_21 = arith.constant 0 : index
    %7 = vector.load %arg11[%c0_19, %c1, %c1_20, %c0_21] : memref<2x18x18x128xf32, #tpu.memory_space<vmem>>, vector<2x16x16x128xf32>
    tpu.vector_store %arg11[%c0_19, %c1, %c1_20, %c0_21], %0 {strides = array<i32>} : memref<2x18x18x128xf32, #tpu.memory_space<vmem>>, vector<2x16x16x128xf32>,
    %c0_22 = arith.constant 0 : index
    %c0_23 = arith.constant 0 : index
    %c0_24 = arith.constant 0 : index
    %c0_25 = arith.constant 0 : index
    %8 = vector.load %arg11[%c0_22, %c0_23, %c0_24, %c0_25] : memref<2x18x18x128xf32, #tpu.memory_space<vmem>>, vector<2x16x16x128xf32>
    %9 = vector.shape_cast %8 : vector<2x16x16x128xf32> to vector<512x128xf32>
    %c0_26 = arith.constant 0 : index
    %c0_27 = arith.constant 0 : index
    %c1_28 = arith.constant 1 : index
    %c0_29 = arith.constant 0 : index
    %10 = vector.load %arg11[%c0_26, %c0_27, %c1_28, %c0_29] : memref<2x18x18x128xf32, #tpu.memory_space<vmem>>, vector<2x16x16x128xf32>
    %11 = vector.shape_cast %10 : vector<2x16x16x128xf32> to vector<512x128xf32>
    %c0_30 = arith.constant 0 : index
    %c0_31 = arith.constant 0 : index
    %c2 = arith.constant 2 : index
    %c0_32 = arith.constant 0 : index
    %12 = vector.load %arg11[%c0_30, %c0_31, %c2, %c0_32] : memref<2x18x18x128xf32, #tpu.memory_space<vmem>>, vector<2x16x16x128xf32>
    %13 = vector.shape_cast %12 : vector<2x16x16x128xf32> to vector<512x128xf32>
    %c0_33 = arith.constant 0 : index
    %c1_34 = arith.constant 1 : index
    %c0_35 = arith.constant 0 : index
    %c0_36 = arith.constant 0 : index
    %14 = vector.load %arg11[%c0_33, %c1_34, %c0_35, %c0_36] : memref<2x18x18x128xf32, #tpu.memory_space<vmem>>, vector<2x16x16x128xf32>
    %15 = vector.shape_cast %14 : vector<2x16x16x128xf32> to vector<512x128xf32>
    %c0_37 = arith.constant 0 : index
    %c1_38 = arith.constant 1 : index
    %c1_39 = arith.constant 1 : index
    %c0_40 = arith.constant 0 : index
    %16 = vector.load %arg11[%c0_37, %c1_38, %c1_39, %c0_40] : memref<2x18x18x128xf32, #tpu.memory_space<vmem>>, vector<2x16x16x128xf32>
    %17 = vector.shape_cast %16 : vector<2x16x16x128xf32> to vector<512x128xf32>
    %c0_41 = arith.constant 0 : index
    %c1_42 = arith.constant 1 : index
    %c2_43 = arith.constant 2 : index
    %c0_44 = arith.constant 0 : index
    %18 = vector.load %arg11[%c0_41, %c1_42, %c2_43, %c0_44] : memref<2x18x18x128xf32, #tpu.memory_space<vmem>>, vector<2x16x16x128xf32>
    %19 = vector.shape_cast %18 : vector<2x16x16x128xf32> to vector<512x128xf32>
    %c0_45 = arith.constant 0 : index
    %c2_46 = arith.constant 2 : index
    %c0_47 = arith.constant 0 : index
    %c0_48 = arith.constant 0 : index
    %20 = vector.load %arg11[%c0_45, %c2_46, %c0_47, %c0_48] : memref<2x18x18x128xf32, #tpu.memory_space<vmem>>, vector<2x16x16x128xf32>
    %21 = vector.shape_cast %20 : vector<2x16x16x128xf32> to vector<512x128xf32>
    %c0_49 = arith.constant 0 : index
    %c2_50 = arith.constant 2 : index
    %c1_51 = arith.constant 1 : index
    %c0_52 = arith.constant 0 : index
    %22 = vector.load %arg11[%c0_49, %c2_50, %c1_51, %c0_52] : memref<2x18x18x128xf32, #tpu.memory_space<vmem>>, vector<2x16x16x128xf32>
    %23 = vector.shape_cast %22 : vector<2x16x16x128xf32> to vector<512x128xf32>
    %c0_53 = arith.constant 0 : index
    %c2_54 = arith.constant 2 : index
    %c2_55 = arith.constant 2 : index
    %c0_56 = arith.constant 0 : index
    %24 = vector.load %arg11[%c0_53, %c2_54, %c2_55, %c0_56] : memref<2x18x18x128xf32, #tpu.memory_space<vmem>>, vector<2x16x16x128xf32>
    %25 = vector.shape_cast %24 : vector<2x16x16x128xf32> to vector<512x128xf32>
    %26 = tpu.concatenate %9, %11, %13, %15, %17, %19, %21, %23, %25 in 1 : vector<512x128xf32>, vector<512x128xf32>, vector<512x128xf32>, vector<512x128xf32>, vector<512x128xf32>, vector<512x128xf32>, vector<512x128xf32>, vector<512x128xf32>, vector<512x128xf32> -> vector<512x1152xf32>
    %c0_57 = arith.constant 0 : index
    %c0_58 = arith.constant 0 : index
    %27 = vector.load %arg1[%c0_57, %c0_58] : memref<1152x128xf32, #tpu.memory_space<vmem>>, vector<1152x128xf32>
    %cst_59 = arith.constant dense<0.000000e+00> : vector<512x128xf32>
    %28 = tpu.matmul %26, %27, %cst_59 {dimension_numbers = #tpu.dot_dimension_numbers<[1], [0], [0], [1], [0, 0, 1, 1], [], []>} : vector<512x1152xf32>, vector<1152x128xf32>, vector<512x128xf32> -> vector<512x128xf32>
    %cst_60 = arith.constant dense<0.000000e+00> : vector<128xf32>
    %29 = vector.multi_reduction <add>, %28, %cst_60 [0] : vector<512x128xf32> to vector<128xf32>
    %30 = vector.shape_cast %29 : vector<128xf32> to vector<1x128xf32>
    %31 = arith.mulf %28, %28 : vector<512x128xf32>
    %cst_61 = arith.constant dense<0.000000e+00> : vector<128xf32>
    %32 = vector.multi_reduction <add>, %31, %cst_61 [0] : vector<512x128xf32> to vector<128xf32>
    %33 = vector.shape_cast %32 : vector<128xf32> to vector<1x128xf32>
    %cst_62 = arith.constant 0.001953125 : f32
    %34 = vector.broadcast %cst_62 : f32 to vector<1x128xf32>
    %35 = arith.mulf %30, %34 : vector<1x128xf32>
    %cst_63 = arith.constant 0.001953125 : f32
    %36 = vector.broadcast %cst_63 : f32 to vector<1x128xf32>
    %37 = arith.mulf %33, %36 : vector<1x128xf32>
    %38 = arith.mulf %35, %35 : vector<1x128xf32>
    %39 = arith.subf %37, %38 : vector<1x128xf32>
    %cst_64 = arith.constant 0.000000e+00 : f32
    %40 = vector.broadcast %cst_64 : f32 to vector<1x128xf32>
    %41 = arith.maximumf %39, %40 : vector<1x128xf32>
    %c0_65 = arith.constant 0 : index
    %c0_66 = arith.constant 0 : index
    %42 = vector.load %arg4[%c0_65, %c0_66] : memref<1x128xf32, #tpu.memory_space<vmem>>, vector<1x128xf32>
    %cst_67 = arith.constant 9.99999974E-6 : f32
    %43 = vector.broadcast %cst_67 : f32 to vector<1x128xf32>
    %44 = arith.addf %41, %43 : vector<1x128xf32>
    %45 = math.rsqrt %44 : vector<1x128xf32>
    %46 = arith.mulf %42, %45 : vector<1x128xf32>
    %c0_68 = arith.constant 0 : index
    %c0_69 = arith.constant 0 : index
    %47 = vector.load %arg5[%c0_68, %c0_69] : memref<1x128xf32, #tpu.memory_space<vmem>>, vector<1x128xf32>
    %48 = arith.mulf %35, %46 : vector<1x128xf32>
    %49 = arith.subf %47, %48 : vector<1x128xf32>
    %50 = vector.broadcast %46 : vector<1x128xf32> to vector<512x128xf32>
    %51 = arith.mulf %28, %50 : vector<512x128xf32>
    %52 = vector.broadcast %49 : vector<1x128xf32> to vector<512x128xf32>
    %53 = arith.addf %51, %52 : vector<512x128xf32>
    %cst_70 = arith.constant 0.000000e+00 : f32
    %54 = vector.broadcast %cst_70 : f32 to vector<512x128xf32>
    %55 = arith.maximumf %53, %54 : vector<512x128xf32>
    %56 = vector.shape_cast %55 : vector<512x128xf32> to vector<2x16x16x128xf32>
    %cst_71 = arith.constant 0.000000e+00 : f32
    %57 = vector.broadcast %cst_71 : f32 to vector<2x1x18x128xf32>
    %cst_72 = arith.constant 0.000000e+00 : f32
    %58 = vector.broadcast %cst_72 : f32 to vector<2x18x1x128xf32>
    %c0_73 = arith.constant 0 : index
    %c0_74 = arith.constant 0 : index
    %c0_75 = arith.constant 0 : index
    %c0_76 = arith.constant 0 : index
    %59 = vector.load %arg12[%c0_73, %c0_74, %c0_75, %c0_76] : memref<2x18x18x128xf32, #tpu.memory_space<vmem>>, vector<2x1x18x128xf32>
    tpu.vector_store %arg12[%c0_73, %c0_74, %c0_75, %c0_76], %57 {strides = array<i32>} : memref<2x18x18x128xf32, #tpu.memory_space<vmem>>, vector<2x1x18x128xf32>,
    %c0_77 = arith.constant 0 : index
    %c17_78 = arith.constant 17 : index
    %c0_79 = arith.constant 0 : index
    %c0_80 = arith.constant 0 : index
    %60 = vector.load %arg12[%c0_77, %c17_78, %c0_79, %c0_80] : memref<2x18x18x128xf32, #tpu.memory_space<vmem>>, vector<2x1x18x128xf32>
    tpu.vector_store %arg12[%c0_77, %c17_78, %c0_79, %c0_80], %57 {strides = array<i32>} : memref<2x18x18x128xf32, #tpu.memory_space<vmem>>, vector<2x1x18x128xf32>,
    %c0_81 = arith.constant 0 : index
    %c0_82 = arith.constant 0 : index
    %c0_83 = arith.constant 0 : index
    %c0_84 = arith.constant 0 : index
    %61 = vector.load %arg12[%c0_81, %c0_82, %c0_83, %c0_84] : memref<2x18x18x128xf32, #tpu.memory_space<vmem>>, vector<2x18x1x128xf32>
    tpu.vector_store %arg12[%c0_81, %c0_82, %c0_83, %c0_84], %58 {strides = array<i32>} : memref<2x18x18x128xf32, #tpu.memory_space<vmem>>, vector<2x18x1x128xf32>,
    %c0_85 = arith.constant 0 : index
    %c0_86 = arith.constant 0 : index
    %c17_87 = arith.constant 17 : index
    %c0_88 = arith.constant 0 : index
    %62 = vector.load %arg12[%c0_85, %c0_86, %c17_87, %c0_88] : memref<2x18x18x128xf32, #tpu.memory_space<vmem>>, vector<2x18x1x128xf32>
    tpu.vector_store %arg12[%c0_85, %c0_86, %c17_87, %c0_88], %58 {strides = array<i32>} : memref<2x18x18x128xf32, #tpu.memory_space<vmem>>, vector<2x18x1x128xf32>,
    %c0_89 = arith.constant 0 : index
    %c1_90 = arith.constant 1 : index
    %c1_91 = arith.constant 1 : index
    %c0_92 = arith.constant 0 : index
    %63 = vector.load %arg12[%c0_89, %c1_90, %c1_91, %c0_92] : memref<2x18x18x128xf32, #tpu.memory_space<vmem>>, vector<2x16x16x128xf32>
    tpu.vector_store %arg12[%c0_89, %c1_90, %c1_91, %c0_92], %56 {strides = array<i32>} : memref<2x18x18x128xf32, #tpu.memory_space<vmem>>, vector<2x16x16x128xf32>,
    %c0_93 = arith.constant 0 : index
    %c0_94 = arith.constant 0 : index
    %c0_95 = arith.constant 0 : index
    %c0_96 = arith.constant 0 : index
    %64 = vector.load %arg12[%c0_93, %c0_94, %c0_95, %c0_96] : memref<2x18x18x128xf32, #tpu.memory_space<vmem>>, vector<2x16x16x128xf32>
    %65 = vector.shape_cast %64 : vector<2x16x16x128xf32> to vector<512x128xf32>
    %c0_97 = arith.constant 0 : index
    %c0_98 = arith.constant 0 : index
    %c1_99 = arith.constant 1 : index
    %c0_100 = arith.constant 0 : index
    %66 = vector.load %arg12[%c0_97, %c0_98, %c1_99, %c0_100] : memref<2x18x18x128xf32, #tpu.memory_space<vmem>>, vector<2x16x16x128xf32>
    %67 = vector.shape_cast %66 : vector<2x16x16x128xf32> to vector<512x128xf32>
    %c0_101 = arith.constant 0 : index
    %c0_102 = arith.constant 0 : index
    %c2_103 = arith.constant 2 : index
    %c0_104 = arith.constant 0 : index
    %68 = vector.load %arg12[%c0_101, %c0_102, %c2_103, %c0_104] : memref<2x18x18x128xf32, #tpu.memory_space<vmem>>, vector<2x16x16x128xf32>
    %69 = vector.shape_cast %68 : vector<2x16x16x128xf32> to vector<512x128xf32>
    %c0_105 = arith.constant 0 : index
    %c1_106 = arith.constant 1 : index
    %c0_107 = arith.constant 0 : index
    %c0_108 = arith.constant 0 : index
    %70 = vector.load %arg12[%c0_105, %c1_106, %c0_107, %c0_108] : memref<2x18x18x128xf32, #tpu.memory_space<vmem>>, vector<2x16x16x128xf32>
    %71 = vector.shape_cast %70 : vector<2x16x16x128xf32> to vector<512x128xf32>
    %c0_109 = arith.constant 0 : index
    %c1_110 = arith.constant 1 : index
    %c1_111 = arith.constant 1 : index
    %c0_112 = arith.constant 0 : index
    %72 = vector.load %arg12[%c0_109, %c1_110, %c1_111, %c0_112] : memref<2x18x18x128xf32, #tpu.memory_space<vmem>>, vector<2x16x16x128xf32>
    %73 = vector.shape_cast %72 : vector<2x16x16x128xf32> to vector<512x128xf32>
    %c0_113 = arith.constant 0 : index
    %c1_114 = arith.constant 1 : index
    %c2_115 = arith.constant 2 : index
    %c0_116 = arith.constant 0 : index
    %74 = vector.load %arg12[%c0_113, %c1_114, %c2_115, %c0_116] : memref<2x18x18x128xf32, #tpu.memory_space<vmem>>, vector<2x16x16x128xf32>
    %75 = vector.shape_cast %74 : vector<2x16x16x128xf32> to vector<512x128xf32>
    %c0_117 = arith.constant 0 : index
    %c2_118 = arith.constant 2 : index
    %c0_119 = arith.constant 0 : index
    %c0_120 = arith.constant 0 : index
    %76 = vector.load %arg12[%c0_117, %c2_118, %c0_119, %c0_120] : memref<2x18x18x128xf32, #tpu.memory_space<vmem>>, vector<2x16x16x128xf32>
    %77 = vector.shape_cast %76 : vector<2x16x16x128xf32> to vector<512x128xf32>
    %c0_121 = arith.constant 0 : index
    %c2_122 = arith.constant 2 : index
    %c1_123 = arith.constant 1 : index
    %c0_124 = arith.constant 0 : index
    %78 = vector.load %arg12[%c0_121, %c2_122, %c1_123, %c0_124] : memref<2x18x18x128xf32, #tpu.memory_space<vmem>>, vector<2x16x16x128xf32>
    %79 = vector.shape_cast %78 : vector<2x16x16x128xf32> to vector<512x128xf32>
    %c0_125 = arith.constant 0 : index
    %c2_126 = arith.constant 2 : index
    %c2_127 = arith.constant 2 : index
    %c0_128 = arith.constant 0 : index
    %80 = vector.load %arg12[%c0_125, %c2_126, %c2_127, %c0_128] : memref<2x18x18x128xf32, #tpu.memory_space<vmem>>, vector<2x16x16x128xf32>
    %81 = vector.shape_cast %80 : vector<2x16x16x128xf32> to vector<512x128xf32>
    %82 = tpu.concatenate %65, %67, %69, %71, %73, %75, %77, %79, %81 in 1 : vector<512x128xf32>, vector<512x128xf32>, vector<512x128xf32>, vector<512x128xf32>, vector<512x128xf32>, vector<512x128xf32>, vector<512x128xf32>, vector<512x128xf32>, vector<512x128xf32> -> vector<512x1152xf32>
    %c0_129 = arith.constant 0 : index
    %c0_130 = arith.constant 0 : index
    %83 = vector.load %arg2[%c0_129, %c0_130] : memref<1152x128xf32, #tpu.memory_space<vmem>>, vector<1152x128xf32>
    %cst_131 = arith.constant dense<0.000000e+00> : vector<512x128xf32>
    %84 = tpu.matmul %82, %83, %cst_131 {dimension_numbers = #tpu.dot_dimension_numbers<[1], [0], [0], [1], [0, 0, 1, 1], [], []>} : vector<512x1152xf32>, vector<1152x128xf32>, vector<512x128xf32> -> vector<512x128xf32>
    %cst_132 = arith.constant dense<0.000000e+00> : vector<128xf32>
    %85 = vector.multi_reduction <add>, %84, %cst_132 [0] : vector<512x128xf32> to vector<128xf32>
    %86 = vector.shape_cast %85 : vector<128xf32> to vector<1x128xf32>
    %87 = arith.mulf %84, %84 : vector<512x128xf32>
    %cst_133 = arith.constant dense<0.000000e+00> : vector<128xf32>
    %88 = vector.multi_reduction <add>, %87, %cst_133 [0] : vector<512x128xf32> to vector<128xf32>
    %89 = vector.shape_cast %88 : vector<128xf32> to vector<1x128xf32>
    %cst_134 = arith.constant 0.001953125 : f32
    %90 = vector.broadcast %cst_134 : f32 to vector<1x128xf32>
    %91 = arith.mulf %86, %90 : vector<1x128xf32>
    %cst_135 = arith.constant 0.001953125 : f32
    %92 = vector.broadcast %cst_135 : f32 to vector<1x128xf32>
    %93 = arith.mulf %89, %92 : vector<1x128xf32>
    %94 = arith.mulf %91, %91 : vector<1x128xf32>
    %95 = arith.subf %93, %94 : vector<1x128xf32>
    %cst_136 = arith.constant 0.000000e+00 : f32
    %96 = vector.broadcast %cst_136 : f32 to vector<1x128xf32>
    %97 = arith.maximumf %95, %96 : vector<1x128xf32>
    %c0_137 = arith.constant 0 : index
    %c0_138 = arith.constant 0 : index
    %98 = vector.load %arg6[%c0_137, %c0_138] : memref<1x128xf32, #tpu.memory_space<vmem>>, vector<1x128xf32>
    %cst_139 = arith.constant 9.99999974E-6 : f32
    %99 = vector.broadcast %cst_139 : f32 to vector<1x128xf32>
    %100 = arith.addf %97, %99 : vector<1x128xf32>
    %101 = math.rsqrt %100 : vector<1x128xf32>
    %102 = arith.mulf %98, %101 : vector<1x128xf32>
    %c0_140 = arith.constant 0 : index
    %c0_141 = arith.constant 0 : index
    %103 = vector.load %arg7[%c0_140, %c0_141] : memref<1x128xf32, #tpu.memory_space<vmem>>, vector<1x128xf32>
    %104 = arith.mulf %91, %102 : vector<1x128xf32>
    %105 = arith.subf %103, %104 : vector<1x128xf32>
    %106 = vector.broadcast %102 : vector<1x128xf32> to vector<512x128xf32>
    %107 = arith.mulf %84, %106 : vector<512x128xf32>
    %108 = vector.broadcast %105 : vector<1x128xf32> to vector<512x128xf32>
    %109 = arith.addf %107, %108 : vector<512x128xf32>
    %110 = vector.shape_cast %0 : vector<2x16x16x128xf32> to vector<512x128xf32>
    %c0_142 = arith.constant 0 : index
    %c0_143 = arith.constant 0 : index
    %111 = vector.load %arg3[%c0_142, %c0_143] : memref<128x128xf32, #tpu.memory_space<vmem>>, vector<128x128xf32>
    %cst_144 = arith.constant dense<0.000000e+00> : vector<512x128xf32>
    %112 = tpu.matmul %110, %111, %cst_144 {dimension_numbers = #tpu.dot_dimension_numbers<[1], [0], [0], [1], [0, 0, 1, 1], [], []>} : vector<512x128xf32>, vector<128x128xf32>, vector<512x128xf32> -> vector<512x128xf32>
    %cst_145 = arith.constant dense<0.000000e+00> : vector<128xf32>
    %113 = vector.multi_reduction <add>, %112, %cst_145 [0] : vector<512x128xf32> to vector<128xf32>
    %114 = vector.shape_cast %113 : vector<128xf32> to vector<1x128xf32>
    %115 = arith.mulf %112, %112 : vector<512x128xf32>
    %cst_146 = arith.constant dense<0.000000e+00> : vector<128xf32>
    %116 = vector.multi_reduction <add>, %115, %cst_146 [0] : vector<512x128xf32> to vector<128xf32>
    %117 = vector.shape_cast %116 : vector<128xf32> to vector<1x128xf32>
    %cst_147 = arith.constant 0.001953125 : f32
    %118 = vector.broadcast %cst_147 : f32 to vector<1x128xf32>
    %119 = arith.mulf %114, %118 : vector<1x128xf32>
    %cst_148 = arith.constant 0.001953125 : f32
    %120 = vector.broadcast %cst_148 : f32 to vector<1x128xf32>
    %121 = arith.mulf %117, %120 : vector<1x128xf32>
    %122 = arith.mulf %119, %119 : vector<1x128xf32>
    %123 = arith.subf %121, %122 : vector<1x128xf32>
    %cst_149 = arith.constant 0.000000e+00 : f32
    %124 = vector.broadcast %cst_149 : f32 to vector<1x128xf32>
    %125 = arith.maximumf %123, %124 : vector<1x128xf32>
    %c0_150 = arith.constant 0 : index
    %c0_151 = arith.constant 0 : index
    %126 = vector.load %arg8[%c0_150, %c0_151] : memref<1x128xf32, #tpu.memory_space<vmem>>, vector<1x128xf32>
    %cst_152 = arith.constant 9.99999974E-6 : f32
    %127 = vector.broadcast %cst_152 : f32 to vector<1x128xf32>
    %128 = arith.addf %125, %127 : vector<1x128xf32>
    %129 = math.rsqrt %128 : vector<1x128xf32>
    %130 = arith.mulf %126, %129 : vector<1x128xf32>
    %c0_153 = arith.constant 0 : index
    %c0_154 = arith.constant 0 : index
    %131 = vector.load %arg9[%c0_153, %c0_154] : memref<1x128xf32, #tpu.memory_space<vmem>>, vector<1x128xf32>
    %132 = arith.mulf %119, %130 : vector<1x128xf32>
    %133 = arith.subf %131, %132 : vector<1x128xf32>
    %134 = vector.broadcast %130 : vector<1x128xf32> to vector<512x128xf32>
    %135 = arith.mulf %112, %134 : vector<512x128xf32>
    %136 = vector.broadcast %133 : vector<1x128xf32> to vector<512x128xf32>
    %137 = arith.addf %135, %136 : vector<512x128xf32>
    %138 = arith.addf %109, %137 : vector<512x128xf32>
    %cst_155 = arith.constant 0.000000e+00 : f32
    %139 = vector.broadcast %cst_155 : f32 to vector<512x128xf32>
    %140 = arith.maximumf %138, %139 : vector<512x128xf32>
    %141 = vector.shape_cast %140 : vector<512x128xf32> to vector<2x16x16x128xf32>
    %c0_156 = arith.constant 0 : index
    %c0_157 = arith.constant 0 : index
    %c0_158 = arith.constant 0 : index
    %c0_159 = arith.constant 0 : index
    %142 = vector.load %arg10[%c0_156, %c0_157, %c0_158, %c0_159] : memref<2x16x16x128xf32, #tpu.memory_space<vmem>>, vector<2x16x16x128xf32>
    tpu.vector_store %arg10[%c0_156, %c0_157, %c0_158, %c0_159], %141 {strides = array<i32>} : memref<2x16x16x128xf32, #tpu.memory_space<vmem>>, vector<2x16x16x128xf32>,
    return
  }
}

</mosaic_0001>

<bundles_post_ra>
// kernel: tpu_custom_call.1
= control target key start
LH: loop header
LB: loop body
LE: loop exit
PB: predicated region body
PF: predicated region fallthrough
CT: control target
= control target key end

     0   :  { %15 = vsyncpa [#allocation5], 0  ;;  %s15242_s0 = inlined_call_operand.hbm [shape: f32[2,16,16,128], index: 0, kind: input, shape index: {}]   ;;  %s15243_s1 = inlined_call_operand.hbm [shape: f32[1152,128], index: 1, kind: input, shape index: {}]   ;;  %s15244_s2 = inlined_call_operand.hbm [shape: f32[1152,128], index: 2, kind: input, shape index: {}]   ;;  %s15245_s3 = inlined_call_operand.hbm [shape: f32[128,128], index: 3, kind: input, shape index: {}]   ;;  %s15246_s4 = inlined_call_operand.vmem [shape: f32[1,128], index: 4, kind: input, shape index: {}]   ;;  %s15247_s5 = inlined_call_operand.vmem [shape: f32[1,128], index: 5, kind: input, shape index: {}]   ;;  %s15248_s6 = inlined_call_operand.vmem [shape: f32[1,128], index: 6, kind: input, shape index: {}]   ;;  %s15249_s7 = inlined_call_operand.vmem [shape: f32[1,128], index: 7, kind: input, shape index: {}]   ;;  %s15250_s8 = inlined_call_operand.vmem [shape: f32[1,128], index: 8, kind: input, shape index: {}]   ;;  %s15251_s9 = inlined_call_operand.vmem [shape: f32[1,128], index: 9, kind: input, shape index: {}]   ;;  %s15252_s10 = inlined_call_operand.hbm [shape: f32[2,16,16,128], index: 10, kind: output, shape index: {}]  }
   0x1   :  { %16 = vsyncpa [#allocation8], 0 }
   0x2   :  { %17 = vsyncpa [#allocation11], 0 }
   0x3   :  { %18 = vsyncpa [#allocation6], 0  ;;  %s9575_s13 = smov [#allocation7]   ;;  %s9576_s15 = smov [#allocation4]  }
   0x4   :  { %s36_s14 = sshll.u32 %s9575_s13, 4  ;;  %s24_s16 = sshll.u32 %s9576_s15, 4  ;;  %s37_s14 = int_to_ptr.vmem [resolvable:$true] %s36_s14  ;;  %s9639_s16 = int_to_ptr.vmem [resolvable:$true] %s24_s16 }
   0x5   :  { %s9457_s19 = scalar_lea.hbm %s15243_s1, 18432 }
   0x6   :  { %p9458_p0 = scmp.ne.s32.totalorder %s15243_s1, %s9457_s19  ;;  %p9461_p1 = scmp.lt.u32.totalorder %s9457_s19, %s15243_s1 }
   0x8   :  { %p9463_p2 = pnand %p9461_p1, %p9458_p0 }
   0xa   :  { %9466 = shalt.err (!%p9463_p2)
}
   0xb   :  { %s9467_s24 = scalar_lea.vmem %s37_s14, 18432  ;;  %p9472_p4 = scmp.lt.s32.totalorder %s37_s14, %s37_s14 }
   0xc   :  { %p9468_p3 = scmp.ne.s32.totalorder %s37_s14, %s9467_s24  ;;  %p9473_p5 = scmp.lt.s32.totalorder %s9467_s24, %s9467_s24 }
   0xe   :  { %p9474_p6 = por %p9473_p5, %p9472_p4 }
  0x10   :  { %p9475_p7 = pnand %p9474_p6, %p9468_p3 }
  0x12   :  { %9478 = shalt.err (!%p9475_p7)
}
  0x13   :  { %s9577_s25 = smov 128   ;;  %s9578_s26 = smov 8  }
  0x14   :  { %42 = dma.hbm_to_vmem [thread:$0]  %s15243_s1, 18432, %s37_s14, [#allocation8], %s9577_s25, %s9577_s25, %s9578_s26  }
  0x15   :  { %s9479_s11 = scalar_lea.hbm %s15242_s0, 8192 }
  0x16   :  { %p9480_p8 = scmp.ne.s32.totalorder %s15242_s0, %s9479_s11  ;;  %p9483_p9 = scmp.lt.u32.totalorder %s9479_s11, %s15242_s0 }
  0x18   :  { %p9485_p10 = pnand %p9483_p9, %p9480_p8 }
  0x1a   :  { %9488 = shalt.err (!%p9485_p10)
}
  0x1b   :  { %s9489_s18 = scalar_lea.vmem %s9639_s16, 8192  ;;  %p9494_p12 = scmp.lt.s32.totalorder %s9639_s16, %s9639_s16 }
  0x1c   :  { %p9490_p11 = scmp.ne.s32.totalorder %s9639_s16, %s9489_s18  ;;  %p9495_p13 = scmp.lt.s32.totalorder %s9489_s18, %s9489_s18 }
  0x1e   :  { %p9496_p0 = por %p9495_p13, %p9494_p12 }
  0x20   :  { %p9497_p1 = pnand %p9496_p0, %p9490_p11 }
  0x22   :  { %9500 = shalt.err (!%p9497_p1)
}
  0x23   :  { %30 = dma.hbm_to_vmem [thread:$0]  %s15242_s0, 8192, %s9639_s16, [#allocation5], %s9577_s25, %s9577_s25, %s9578_s26  }
  0x24   :  { %s9579_s19 = smov [#allocation9]   ;;  %s9580_s21 = smov [#allocation10]  }
  0x25   :  { %s48_s20 = sshll.u32 %s9579_s19, 4  ;;  %s60_s22 = sshll.u32 %s9580_s21, 4  ;;  %s49_s20 = int_to_ptr.vmem [resolvable:$true] %s48_s20  ;;  %s9676_s22 = int_to_ptr.vmem [resolvable:$true] %s60_s22 }
  0x26   :  { %s9501_s27 = scalar_lea.hbm %s15244_s2, 18432 }
  0x27   :  { %p9502_p2 = scmp.ne.s32.totalorder %s15244_s2, %s9501_s27  ;;  %p9505_p3 = scmp.lt.u32.totalorder %s9501_s27, %s15244_s2 }
  0x29   :  { %p9507_p4 = pnand %p9505_p3, %p9502_p2 }
  0x2b   :  { %9510 = shalt.err (!%p9507_p4)
}
  0x2c   :  { %s9511_s0 = scalar_lea.vmem %s49_s20, 18432  ;;  %p9516_p6 = scmp.lt.s32.totalorder %s49_s20, %s49_s20 }
  0x2d   :  { %p9512_p5 = scmp.ne.s32.totalorder %s49_s20, %s9511_s0  ;;  %p9517_p7 = scmp.lt.s32.totalorder %s9511_s0, %s9511_s0 }
  0x2f   :  { %p9518_p8 = por %p9517_p7, %p9516_p6 }
  0x31   :  { %p9519_p9 = pnand %p9518_p8, %p9512_p5 }
  0x33   :  { %9522 = shalt.err (!%p9519_p9)
}
  0x34   :  { %54 = dma.hbm_to_vmem [thread:$0]  %s15244_s2, 18432, %s49_s20, [#allocation8], %s9577_s25, %s9577_s25, %s9578_s26  }
  0x35   :  { %s9523_s17 = scalar_lea.hbm %s15245_s3, 2048 }
  0x36   :  { %p9524_p10 = scmp.ne.s32.totalorder %s15245_s3, %s9523_s17  ;;  %p9527_p11 = scmp.lt.u32.totalorder %s9523_s17, %s15245_s3 }
  0x38   :  { %p9529_p12 = pnand %p9527_p11, %p9524_p10 }
  0x3a   :  { %9532 = shalt.err (!%p9529_p12)
}
  0x3b   :  { %s9533_s21 = scalar_lea.vmem %s9676_s22, 2048  ;;  %p9538_p0 = scmp.lt.s32.totalorder %s9676_s22, %s9676_s22 }
  0x3c   :  { %p9534_p13 = scmp.ne.s32.totalorder %s9676_s22, %s9533_s21  ;;  %p9539_p1 = scmp.lt.s32.totalorder %s9533_s21, %s9533_s21 }
  0x3e   :  { %p9540_p2 = por %p9539_p1, %p9538_p0 }
  0x40   :  { %p9541_p3 = pnand %p9540_p2, %p9534_p13 }
  0x42   :  { %9544 = shalt.err (!%p9541_p3)
}
  0x43   :  { %66 = dma.hbm_to_vmem [thread:$0]  %s15245_s3, 2048, %s9676_s22, [#allocation11], %s9577_s25, %s9577_s25, %s9578_s26  }
  0x44   :  { %9567 = dma.done.wait [#allocation5], 8192  }
  0x45   :  { %9568 = vsyncadd [#allocation5], 4294959104 }
  0x46   :  { %9569 = dma.done.wait [#allocation8], 36864  }
  0x47   :  { %9570 = vsyncadd [#allocation8], 4294930432 }
  0x48   :  { %9571 = dma.done.wait [#allocation11], 2048  }
  0x49   :  { %9572 = vsyncadd [#allocation11], 4294965248  ;;  %v15253_v0 = vmov 0.0|0.0   ;;  %v9582_v1 = vmov 0.0   ;;  %v882_v2 = vld [vmem:[#allocation7] sm:$0xff]  ;;  %v883_v3 = vld [vmem:[#allocation7 + $0x8] sm:$0xff] }
  0x4a   :  { %8109 = vmatprep.subr.bf16.mxu0 %v15253_v0  ;;  %155 = vst [vmem:[#allocation2] sm:$0xff] %v9582_v1  ;;  %156 = vst [vmem:[#allocation2 + $0x8] sm:$0xff] %v9582_v1  ;;  %v884_v4 = vld [vmem:[#allocation7 + $0x10] sm:$0xff]  ;;  %v8110_v5 = vpack.c.bf16 %v883_v3, %v882_v2  ;;  %v885_v6 = vld [vmem:[#allocation7 + $0x18] sm:$0xff] }
  0x4b   :  { %157 = vst [vmem:[#allocation2 + $0x10] sm:$0x3] %v9582_v1  ;;  %158 = vst [vmem:[#allocation2 + $0x1b0] sm:$0xff] %v9582_v1  ;;  %v8113_v7 = vpack.c.bf16 %v885_v6, %v884_v4  ;;  %v886_v8 = vld [vmem:[#allocation7 + $0x20] sm:$0xff]  ;;  %v887_v9 = vld [vmem:[#allocation7 + $0x28] sm:$0xff] }
  0x4c   :  { %159 = vst [vmem:[#allocation2 + $0x1b8] sm:$0xff] %v9582_v1  ;;  %160 = vst [vmem:[#allocation2 + $0x1c0] sm:$0x3] %v9582_v1  ;;  %8111 = vmatpush1.bf16.msra.mxu0 %v8110_v5  ;;  %v8116_v10 = vpack.c.bf16 %v887_v9, %v886_v8  ;;  %v888_v11 = vld [vmem:[#allocation7 + $0x30] sm:$0xff]  ;;  %v889_v12 = vld [vmem:[#allocation7 + $0x38] sm:$0xff] }
  0x4d   :  { %162 = vst [vmem:[#allocation2 + $0x198] sm:$0xff] %v9582_v1  ;;  %163 = vst [vmem:[#allocation2 + $0x1a0] sm:$0xff] %v9582_v1  ;;  %8112 = vmatprep.subr.bf16.mxu0 %v15253_v0  ;;  %v8119_v14 = vpack.c.bf16 %v889_v12, %v888_v11  ;;  %v890_v15 = vld [vmem:[#allocation7 + $0x40] sm:$0xff]  ;;  %v891_v16 = vld [vmem:[#allocation7 + $0x48] sm:$0xff] }
  0x4e   :  { %164 = vst [vmem:[#allocation2 + $0x1a8] sm:$0x3] %v9582_v1  ;;  %165 = vst [vmem:[#allocation2 + $0x348] sm:$0xff] %v9582_v1  ;;  %v9885_v17 = vld [vmem:[#allocation4] sm:$0xff]  ;;  %v9887_v18 = vld [vmem:[#allocation4 + $0x8] sm:$0xff]  ;;  %v8122_v23 = vpack.c.bf16 %v891_v16, %v890_v15 }
  0x4f   :  { %166 = vst [vmem:[#allocation2 + $0x350] sm:$0xff] %v9582_v1  ;;  %167 = vst [vmem:[#allocation2 + $0x358] sm:$0x3] %v9582_v1  ;;  %v9891_v19 = vld [vmem:[#allocation4 + $0x10] sm:$0xff]  ;;  %v9894_v20 = vld [vmem:[#allocation4 + $0x18] sm:$0xff] }
  0x50   :  { %169 = vst [vmem:[#allocation2 + $0x18] sm:$0x1] %v9582_v1  ;;  %170 = vst [vmem:[#allocation2 + $0x30] sm:$0x1] %v9582_v1  ;;  %8114 = vmatpush1.bf16.msra.mxu0 %v8113_v7  ;;  %v9896_v21 = vld [vmem:[#allocation4 + $0x20] sm:$0xff]  ;;  %v9898_v22 = vld [vmem:[#allocation4 + $0x28] sm:$0xff] }
  0x51   :  { %171 = vst [vmem:[#allocation2 + $0x48] sm:$0x1] %v9582_v1  ;;  %172 = vst [vmem:[#allocation2 + $0x60] sm:$0x1] %v9582_v1  ;;  %8115 = vmatprep.subr.bf16.mxu0 %v15253_v0  ;;  %v369_v13 = vld [vmem:[#allocation2 + $0x1] sm:$0xff]  ;;  %v892_v24 = vld [vmem:[#allocation7 + $0x50] sm:$0xff] }
  0x52   :  { %173 = vst [vmem:[#allocation2 + $0x78] sm:$0x1] %v9582_v1  ;;  %174 = vst [vmem:[#allocation2 + $0x90] sm:$0x1] %v9582_v1  ;;  %1090 = vmatprep.mubr.f32.mxu0 %v369_v13  ;;  %v893_v25 = vld [vmem:[#allocation7 + $0x58] sm:$0xff]  ;;  %v9903_v26 = vld [vmem:[#allocation4 + $0x30] sm:$0xff] }
  0x53   :  { %175 = vst [vmem:[#allocation2 + $0xa8] sm:$0x1] %v9582_v1  ;;  %176 = vst [vmem:[#allocation2 + $0xc0] sm:$0x1] %v9582_v1  ;;  %v9907_v27 = vld [vmem:[#allocation4 + $0x38] sm:$0xff]  ;;  %v9909_v28 = vld [vmem:[#allocation4 + $0x40] sm:$0xff]  ;;  %v8125_v34 = vpack.c.bf16 %v893_v25, %v892_v24 }
  0x54   :  { %177 = vst [vmem:[#allocation2 + $0xd8] sm:$0x1] %v9582_v1  ;;  %178 = vst [vmem:[#allocation2 + $0xf0] sm:$0x1] %v9582_v1  ;;  %8117 = vmatpush1.bf16.msra.mxu0 %v8116_v10  ;;  %v9911_v29 = vld [vmem:[#allocation4 + $0x48] sm:$0xff]  ;;  %v9916_v30 = vld [vmem:[#allocation4 + $0x50] sm:$0xff] }
  0x55   :  { %179 = vst [vmem:[#allocation2 + $0x108] sm:$0x1] %v9582_v1  ;;  %180 = vst [vmem:[#allocation2 + $0x120] sm:$0x1] %v9582_v1  ;;  %8118 = vmatprep.subr.bf16.mxu0 %v15253_v0  ;;  %v9919_v31 = vld [vmem:[#allocation4 + $0x58] sm:$0xff]  ;;  %v9921_v32 = vld [vmem:[#allocation4 + $0x60] sm:$0xff] }
  0x56   :  { %181 = vst [vmem:[#allocation2 + $0x138] sm:$0x1] %v9582_v1  ;;  %182 = vst [vmem:[#allocation2 + $0x150] sm:$0x1] %v9582_v1  ;;  %v9923_v33 = vld [vmem:[#allocation4 + $0x68] sm:$0xff]  ;;  %v9928_v35 = vld [vmem:[#allocation4 + $0x70] sm:$0xff] }
  0x57   :  { %183 = vst [vmem:[#allocation2 + $0x168] sm:$0x1] %v9582_v1  ;;  %184 = vst [vmem:[#allocation2 + $0x180] sm:$0x1] %v9582_v1  ;;  %v894_v36 = vld [vmem:[#allocation7 + $0x60] sm:$0xff]  ;;  %v895_v37 = vld [vmem:[#allocation7 + $0x68] sm:$0xff] }
  0x58   :  { %187 = vst [vmem:[#allocation2 + $0x1c8] sm:$0x1] %v9582_v1  ;;  %188 = vst [vmem:[#allocation2 + $0x1e0] sm:$0x1] %v9582_v1  ;;  %8120 = vmatpush1.bf16.msra.mxu0 %v8119_v14  ;;  %v9932_v38 = vld [vmem:[#allocation4 + $0x78] sm:$0xff]  ;;  %v9935_v39 = vld [vmem:[#allocation4 + $0x80] sm:$0xff]  ;;  %v8128_v41 = vpack.c.bf16 %v895_v37, %v894_v36 }
  0x59   :  { %189 = vst [vmem:[#allocation2 + $0x1f8] sm:$0x1] %v9582_v1  ;;  %190 = vst [vmem:[#allocation2 + $0x210] sm:$0x1] %v9582_v1  ;;  %8121 = vmatprep.subr.bf16.mxu0 %v15253_v0  ;;  %v9937_v40 = vld [vmem:[#allocation4 + $0x88] sm:$0xff]  ;;  %v9941_v42 = vld [vmem:[#allocation4 + $0x90] sm:$0xff] }
  0x5a   :  { %191 = vst [vmem:[#allocation2 + $0x228] sm:$0x1] %v9582_v1  ;;  %192 = vst [vmem:[#allocation2 + $0x240] sm:$0x1] %v9582_v1  ;;  %v896_v43 = vld [vmem:[#allocation7 + $0x70] sm:$0xff]  ;;  %v897_v44 = vld [vmem:[#allocation7 + $0x78] sm:$0xff] }
  0x5b   :  { %193 = vst [vmem:[#allocation2 + $0x258] sm:$0x1] %v9582_v1  ;;  %194 = vst [vmem:[#allocation2 + $0x270] sm:$0x1] %v9582_v1  ;;  %v9945_v45 = vld [vmem:[#allocation4 + $0x98] sm:$0xff]  ;;  %v8131_v46 = vpack.c.bf16 %v897_v44, %v896_v43  ;;  %v9948_v47 = vld [vmem:[#allocation4 + $0xa0] sm:$0xff] }
  0x5c   :  { %195 = vst [vmem:[#allocation2 + $0x288] sm:$0x1] %v9582_v1  ;;  %196 = vst [vmem:[#allocation2 + $0x2a0] sm:$0x1] %v9582_v1  ;;  %8123 = vmatpush1.bf16.msra.mxu0 %v8122_v23  ;;  %v9950_v48 = vld [vmem:[#allocation4 + $0xa8] sm:$0xff]  ;;  %v898_v49 = vld [vmem:[#allocation7 + $0x80] sm:$0xff] }
  0x5d   :  { %197 = vst [vmem:[#allocation2 + $0x2b8] sm:$0x1] %v9582_v1  ;;  %198 = vst [vmem:[#allocation2 + $0x2d0] sm:$0x1] %v9582_v1  ;;  %8124 = vmatprep.subr.bf16.mxu0 %v15253_v0  ;;  %v899_v50 = vld [vmem:[#allocation7 + $0x88] sm:$0xff]  ;;  %v9955_v51 = vld [vmem:[#allocation4 + $0xb0] sm:$0xff] }
  0x5e   :  { %199 = vst [vmem:[#allocation2 + $0x2e8] sm:$0x1] %v9582_v1  ;;  %200 = vst [vmem:[#allocation2 + $0x300] sm:$0x1] %v9582_v1  ;;  %v9958_v52 = vld [vmem:[#allocation4 + $0xb8] sm:$0xff]  ;;  %v8134_v53 = vpack.c.bf16 %v899_v50, %v898_v49  ;;  %v900_v54 = vld [vmem:[#allocation7 + $0x90] sm:$0xff] }
  0x5f   :  { %201 = vst [vmem:[#allocation2 + $0x318] sm:$0x1] %v9582_v1  ;;  %202 = vst [vmem:[#allocation2 + $0x330] sm:$0x1] %v9582_v1  ;;  %v901_v55 = vld [vmem:[#allocation7 + $0x98] sm:$0xff]  ;;  %v9962_v56 = vld [vmem:[#allocation4 + $0xc0] sm:$0xff] }
  0x60   :  { %205 = vst [vmem:[#allocation2 + $0x29] sm:$0x1] %v9582_v1  ;;  %206 = vst [vmem:[#allocation2 + $0x41] sm:$0x1] %v9582_v1  ;;  %8126 = vmatpush1.bf16.msra.mxu0 %v8125_v34  ;;  %v8137_v57 = vpack.c.bf16 %v901_v55, %v900_v54  ;;  %v902_v58 = vld [vmem:[#allocation7 + $0xa0] sm:$0xff]  ;;  %v903_v59 = vld [vmem:[#allocation7 + $0xa8] sm:$0xff] }
  0x61   :  { %207 = vst [vmem:[#allocation2 + $0x59] sm:$0x1] %v9582_v1  ;;  %208 = vst [vmem:[#allocation2 + $0x71] sm:$0x1] %v9582_v1  ;;  %8127 = vmatprep.subr.bf16.mxu0 %v15253_v0  ;;  %v9966_v60 = vld [vmem:[#allocation4 + $0xc8] sm:$0xff]  ;;  %v8140_v61 = vpack.c.bf16 %v903_v59, %v902_v58  ;;  %v904_v62 = vld [vmem:[#allocation7 + $0xb0] sm:$0xff] }
  0x62   :  { %209 = vst [vmem:[#allocation2 + $0x89] sm:$0x1] %v9582_v1  ;;  %210 = vst [vmem:[#allocation2 + $0xa1] sm:$0x1] %v9582_v1  ;;  %v905_v63 = vld [vmem:[#allocation7 + $0xb8] sm:$0xff]  ;;  %v9970_v2 = vld [vmem:[#allocation4 + $0xd0] sm:$0xff] }
  0x63   :  { %211 = vst [vmem:[#allocation2 + $0xb9] sm:$0x1] %v9582_v1  ;;  %212 = vst [vmem:[#allocation2 + $0xd1] sm:$0x1] %v9582_v1  ;;  %v8143_v3 = vpack.c.bf16 %v905_v63, %v904_v62  ;;  %v906_v4 = vld [vmem:[#allocation7 + $0xc0] sm:$0xff]  ;;  %v907_v5 = vld [vmem:[#allocation7 + $0xc8] sm:$0xff] }
  0x64   :  { %213 = vst [vmem:[#allocation2 + $0xe9] sm:$0x1] %v9582_v1  ;;  %214 = vst [vmem:[#allocation2 + $0x101] sm:$0x1] %v9582_v1  ;;  %8129 = vmatpush1.bf16.msra.mxu0 %v8128_v41  ;;  %v9974_v6 = vld [vmem:[#allocation4 + $0xd8] sm:$0xff]  ;;  %v8146_v7 = vpack.c.bf16 %v907_v5, %v906_v4  ;;  %v908_v8 = vld [vmem:[#allocation7 + $0xd0] sm:$0xff] }
  0x65   :  { %215 = vst [vmem:[#allocation2 + $0x119] sm:$0x1] %v9582_v1  ;;  %216 = vst [vmem:[#allocation2 + $0x131] sm:$0x1] %v9582_v1  ;;  %8130 = vmatprep.subr.bf16.mxu0 %v15253_v0  ;;  %v909_v9 = vld [vmem:[#allocation7 + $0xd8] sm:$0xff]  ;;  %v9978_v10 = vld [vmem:[#allocation4 + $0xe0] sm:$0xff] }
  0x66   :  { %217 = vst [vmem:[#allocation2 + $0x149] sm:$0x1] %v9582_v1  ;;  %218 = vst [vmem:[#allocation2 + $0x161] sm:$0x1] %v9582_v1  ;;  %v8149_v11 = vpack.c.bf16 %v909_v9, %v908_v8  ;;  %v910_v12 = vld [vmem:[#allocation7 + $0xe0] sm:$0xff]  ;;  %v911_v13 = vld [vmem:[#allocation7 + $0xe8] sm:$0xff] }
  0x67   :  { %219 = vst [vmem:[#allocation2 + $0x179] sm:$0x1] %v9582_v1  ;;  %220 = vst [vmem:[#allocation2 + $0x191] sm:$0x1] %v9582_v1  ;;  %v9982_v14 = vld [vmem:[#allocation4 + $0xe8] sm:$0xff]  ;;  %v8152_v15 = vpack.c.bf16 %v911_v13, %v910_v12  ;;  %v912_v16 = vld [vmem:[#allocation7 + $0xf0] sm:$0xff] }
  0x68   :  { %223 = vst [vmem:[#allocation2 + $0x1d9] sm:$0x1] %v9582_v1  ;;  %224 = vst [vmem:[#allocation2 + $0x1f1] sm:$0x1] %v9582_v1  ;;  %8132 = vmatpush1.bf16.msra.mxu0 %v8131_v46  ;;  %v913_v23 = vld [vmem:[#allocation7 + $0xf8] sm:$0xff]  ;;  %v914_v25 = vld [vmem:[#allocation7 + $0x100] sm:$0xff] }
  0x69   :  { %225 = vst [vmem:[#allocation2 + $0x209] sm:$0x1] %v9582_v1  ;;  %226 = vst [vmem:[#allocation2 + $0x221] sm:$0x1] %v9582_v1  ;;  %8133 = vmatprep.subr.bf16.mxu0 %v15253_v0  ;;  %v8155_v24 = vpack.c.bf16 %v913_v23, %v912_v16  ;;  %v915_v34 = vld [vmem:[#allocation7 + $0x108] sm:$0xff]  ;;  %v916_v43 = vld [vmem:[#allocation7 + $0x110] sm:$0xff] }
  0x6a   :  { %227 = vst [vmem:[#allocation2 + $0x239] sm:$0x1] %v9582_v1  ;;  %228 = vst [vmem:[#allocation2 + $0x251] sm:$0x1] %v9582_v1  ;;  %v8158_v37 = vpack.c.bf16 %v915_v34, %v914_v25  ;;  %v370_v41 = vld [vmem:[#allocation2 + $0x9] sm:$0xff]  ;;  %v917_v44 = vld [vmem:[#allocation7 + $0x118] sm:$0xff] }
  0x6b   :  { %229 = vst [vmem:[#allocation2 + $0x269] sm:$0x1] %v9582_v1  ;;  %230 = vst [vmem:[#allocation2 + $0x281] sm:$0x1] %v9582_v1  ;;  %v9988_v46 = vld [vmem:[#allocation4 + $0x100] sm:$0xff]  ;;  %v8161_v49 = vpack.c.bf16 %v917_v44, %v916_v43  ;;  %v9992_v54 = vld [vmem:[#allocation4 + $0x108] sm:$0xff] }
  0x6c   :  { %231 = vst [vmem:[#allocation2 + $0x299] sm:$0x1] %v9582_v1  ;;  %232 = vst [vmem:[#allocation2 + $0x2b1] sm:$0x1] %v9582_v1  ;;  %8135 = vmatpush1.bf16.msra.mxu0 %v8134_v53  ;;  %v918_v50 = vld [vmem:[#allocation7 + $0x120] sm:$0xff]  ;;  %v919_v53 = vld [vmem:[#allocation7 + $0x128] sm:$0xff] }
  0x6d   :  { %233 = vst [vmem:[#allocation2 + $0x2c9] sm:$0x1] %v9582_v1  ;;  %234 = vst [vmem:[#allocation2 + $0x2e1] sm:$0x1] %v9582_v1  ;;  %8136 = vmatprep.subr.bf16.mxu0 %v15253_v0  ;;  %v920_v58 = vld [vmem:[#allocation7 + $0x130] sm:$0xff]  ;;  %v921_v59 = vld [vmem:[#allocation7 + $0x138] sm:$0xff] }
  0x6e   :  { %235 = vst [vmem:[#allocation2 + $0x2f9] sm:$0x1] %v9582_v1  ;;  %236 = vst [vmem:[#allocation2 + $0x311] sm:$0x1] %v9582_v1  ;;  %v922_v62 = vld [vmem:[#allocation7 + $0x140] sm:$0xff]  ;;  %v923_v63 = vld [vmem:[#allocation7 + $0x148] sm:$0xff] }
  0x6f   :  { %237 = vst [vmem:[#allocation2 + $0x329] sm:$0x1] %v9582_v1  ;;  %238 = vst [vmem:[#allocation2 + $0x341] sm:$0x1] %v9582_v1  ;;  %v924_v5 = vld [vmem:[#allocation7 + $0x150] sm:$0xff]  ;;  %v10016_v8 = vld [vmem:[#allocation4 + $0x120] sm:$0xff] }
  0x70   :  { %3369 = vst [vmem:[#allocation3] sm:$0xff] %v9582_v1  ;;  %3370 = vst [vmem:[#allocation3 + $0x8] sm:$0xff] %v9582_v1  ;;  %8138 = vmatpush1.bf16.msra.mxu0 %v8137_v57  ;;  %v8164_v57 = vpack.c.bf16 %v919_v53, %v918_v50  ;;  %v927_v12 = vld [vmem:[#allocation7 + $0x168] sm:$0xff]  ;;  %v928_v16 = vld [vmem:[#allocation7 + $0x170] sm:$0xff] }
  0x71   :  { %3371 = vst [vmem:[#allocation3 + $0x10] sm:$0x3] %v9582_v1  ;;  %3372 = vst [vmem:[#allocation3 + $0x1b0] sm:$0xff] %v9582_v1  ;;  %8139 = vmatprep.subr.bf16.mxu0 %v15253_v0  ;;  %v10024_v13 = vld [vmem:[#allocation4 + $0x128] sm:$0xff]  ;;  %v929_v23 = vld [vmem:[#allocation7 + $0x178] sm:$0xff] }
  0x72   :  { %3373 = vst [vmem:[#allocation3 + $0x1b8] sm:$0xff] %v9582_v1  ;;  %3374 = vst [vmem:[#allocation3 + $0x1c0] sm:$0x3] %v9582_v1  ;;  %v930_v34 = vld [vmem:[#allocation7 + $0x180] sm:$0xff]  ;;  %v932_v43 = vld [vmem:[#allocation7 + $0x190] sm:$0xff] }
  0x73   :  { %3376 = vst [vmem:[#allocation3 + $0x198] sm:$0xff] %v9582_v1  ;;  %3377 = vst [vmem:[#allocation3 + $0x1a0] sm:$0xff] %v9582_v1  ;;  %v933_v44 = vld [vmem:[#allocation7 + $0x198] sm:$0xff]  ;;  %v934_v53 = vld [vmem:[#allocation7 + $0x1a0] sm:$0xff] }
  0x74   :  { %3378 = vst [vmem:[#allocation3 + $0x1a8] sm:$0x3] %v9582_v1  ;;  %3379 = vst [vmem:[#allocation3 + $0x348] sm:$0xff] %v9582_v1  ;;  %8141 = vmatpush1.bf16.msra.mxu0 %v8140_v61  ;;  %v10000_v61 = vld [vmem:[#allocation4 + $0x110] sm:$0xff] }
  0x75   :  { %3380 = vst [vmem:[#allocation3 + $0x350] sm:$0xff] %v9582_v1  ;;  %3381 = vst [vmem:[#allocation3 + $0x358] sm:$0x3] %v9582_v1  ;;  %8142 = vmatprep.subr.bf16.mxu0 %v15253_v0 }
  0x76   :  { %3383 = vst [vmem:[#allocation3 + $0x18] sm:$0x1] %v9582_v1  ;;  %3384 = vst [vmem:[#allocation3 + $0x30] sm:$0x1] %v9582_v1 }
  0x77   :  { %3385 = vst [vmem:[#allocation3 + $0x48] sm:$0x1] %v9582_v1  ;;  %3386 = vst [vmem:[#allocation3 + $0x60] sm:$0x1] %v9582_v1 }
  0x78   :  { %3387 = vst [vmem:[#allocation3 + $0x78] sm:$0x1] %v9582_v1  ;;  %3388 = vst [vmem:[#allocation3 + $0x90] sm:$0x1] %v9582_v1  ;;  %8144 = vmatpush1.bf16.msra.mxu0 %v8143_v3  ;;  %v10008_v3 = vld [vmem:[#allocation4 + $0x118] sm:$0xff] }
  0x79   :  { %3389 = vst [vmem:[#allocation3 + $0xa8] sm:$0x1] %v9582_v1  ;;  %3390 = vst [vmem:[#allocation3 + $0xc0] sm:$0x1] %v9582_v1  ;;  %8145 = vmatprep.subr.bf16.mxu0 %v15253_v0 }
  0x7a   :  { %3391 = vst [vmem:[#allocation3 + $0xd8] sm:$0x1] %v9582_v1  ;;  %3392 = vst [vmem:[#allocation3 + $0xf0] sm:$0x1] %v9582_v1 }
  0x7b   :  { %3393 = vst [vmem:[#allocation3 + $0x108] sm:$0x1] %v9582_v1  ;;  %3394 = vst [vmem:[#allocation3 + $0x120] sm:$0x1] %v9582_v1 }
  0x7c   :  { %3395 = vst [vmem:[#allocation3 + $0x138] sm:$0x1] %v9582_v1  ;;  %3396 = vst [vmem:[#allocation3 + $0x150] sm:$0x1] %v9582_v1  ;;  %8147 = vmatpush1.bf16.msra.mxu0 %v8146_v7  ;;  %v925_v7 = vld [vmem:[#allocation7 + $0x158] sm:$0xff] }
  0x7d   :  { %3397 = vst [vmem:[#allocation3 + $0x168] sm:$0x1] %v9582_v1  ;;  %3398 = vst [vmem:[#allocation3 + $0x180] sm:$0x1] %v9582_v1  ;;  %8148 = vmatprep.subr.bf16.mxu0 %v15253_v0 }
  0x7e   :  { %3401 = vst [vmem:[#allocation3 + $0x1c8] sm:$0x1] %v9582_v1  ;;  %3402 = vst [vmem:[#allocation3 + $0x1e0] sm:$0x1] %v9582_v1 }
  0x7f   :  { %3403 = vst [vmem:[#allocation3 + $0x1f8] sm:$0x1] %v9582_v1  ;;  %3404 = vst [vmem:[#allocation3 + $0x210] sm:$0x1] %v9582_v1 }
  0x80   :  { %3405 = vst [vmem:[#allocation3 + $0x228] sm:$0x1] %v9582_v1  ;;  %3406 = vst [vmem:[#allocation3 + $0x240] sm:$0x1] %v9582_v1  ;;  %8150 = vmatpush1.bf16.msra.mxu0 %v8149_v11  ;;  %v926_v11 = vld [vmem:[#allocation7 + $0x160] sm:$0xff] }
  0x81   :  { %3407 = vst [vmem:[#allocation3 + $0x258] sm:$0x1] %v9582_v1  ;;  %3408 = vst [vmem:[#allocation3 + $0x270] sm:$0x1] %v9582_v1  ;;  %8151 = vmatprep.subr.bf16.mxu0 %v15253_v0 }
  0x82   :  { %3409 = vst [vmem:[#allocation3 + $0x288] sm:$0x1] %v9582_v1  ;;  %3410 = vst [vmem:[#allocation3 + $0x2a0] sm:$0x1] %v9582_v1 }
  0x83   :  { %3411 = vst [vmem:[#allocation3 + $0x2b8] sm:$0x1] %v9582_v1  ;;  %3412 = vst [vmem:[#allocation3 + $0x2d0] sm:$0x1] %v9582_v1 }
  0x84   :  { %3413 = vst [vmem:[#allocation3 + $0x2e8] sm:$0x1] %v9582_v1  ;;  %3414 = vst [vmem:[#allocation3 + $0x300] sm:$0x1] %v9582_v1  ;;  %8153 = vmatpush1.bf16.msra.mxu0 %v8152_v15 }
  0x85   :  { %3415 = vst [vmem:[#allocation3 + $0x318] sm:$0x1] %v9582_v1  ;;  %3416 = vst [vmem:[#allocation3 + $0x330] sm:$0x1] %v9582_v1  ;;  %8154 = vmatprep.subr.bf16.mxu0 %v15253_v0 }
  0x86   :  { %3419 = vst [vmem:[#allocation3 + $0x29] sm:$0x1] %v9582_v1  ;;  %3420 = vst [vmem:[#allocation3 + $0x41] sm:$0x1] %v9582_v1 }
  0x87   :  { %3421 = vst [vmem:[#allocation3 + $0x59] sm:$0x1] %v9582_v1  ;;  %3422 = vst [vmem:[#allocation3 + $0x71] sm:$0x1] %v9582_v1 }
  0x88   :  { %3423 = vst [vmem:[#allocation3 + $0x89] sm:$0x1] %v9582_v1  ;;  %3424 = vst [vmem:[#allocation3 + $0xa1] sm:$0x1] %v9582_v1  ;;  %8156 = vmatpush1.bf16.msra.mxu0 %v8155_v24  ;;  %v10032_v24 = vld [vmem:[#allocation4 + $0x130] sm:$0xff] }
  0x89   :  { %3425 = vst [vmem:[#allocation3 + $0xb9] sm:$0x1] %v9582_v1  ;;  %3426 = vst [vmem:[#allocation3 + $0xd1] sm:$0x1] %v9582_v1  ;;  %8157 = vmatprep.subr.bf16.mxu0 %v15253_v0 }
  0x8a   :  { %3427 = vst [vmem:[#allocation3 + $0xe9] sm:$0x1] %v9582_v1  ;;  %3428 = vst [vmem:[#allocation3 + $0x101] sm:$0x1] %v9582_v1 }
  0x8b   :  { %3429 = vst [vmem:[#allocation3 + $0x119] sm:$0x1] %v9582_v1  ;;  %3430 = vst [vmem:[#allocation3 + $0x131] sm:$0x1] %v9582_v1 }
  0x8c   :  { %3431 = vst [vmem:[#allocation3 + $0x149] sm:$0x1] %v9582_v1  ;;  %3432 = vst [vmem:[#allocation3 + $0x161] sm:$0x1] %v9582_v1 }
  0x8d   :  { %3433 = vst [vmem:[#allocation3 + $0x179] sm:$0x1] %v9582_v1  ;;  %3434 = vst [vmem:[#allocation3 + $0x191] sm:$0x1] %v9582_v1 }
  0x8e   :  { %3437 = vst [vmem:[#allocation3 + $0x1d9] sm:$0x1] %v9582_v1  ;;  %3438 = vst [vmem:[#allocation3 + $0x1f1] sm:$0x1] %v9582_v1 }
  0x8f   :  { %3439 = vst [vmem:[#allocation3 + $0x209] sm:$0x1] %v9582_v1  ;;  %3440 = vst [vmem:[#allocation3 + $0x221] sm:$0x1] %v9582_v1 }
  0x90   :  { %3441 = vst [vmem:[#allocation3 + $0x239] sm:$0x1] %v9582_v1  ;;  %3442 = vst [vmem:[#allocation3 + $0x251] sm:$0x1] %v9582_v1 }
  0x91   :  { %3443 = vst [vmem:[#allocation3 + $0x269] sm:$0x1] %v9582_v1  ;;  %3444 = vst [vmem:[#allocation3 + $0x281] sm:$0x1] %v9582_v1 }
  0x92   :  { %3445 = vst [vmem:[#allocation3 + $0x299] sm:$0x1] %v9582_v1  ;;  %3446 = vst [vmem:[#allocation3 + $0x2b1] sm:$0x1] %v9582_v1 }
  0x93   :  { %3447 = vst [vmem:[#allocation3 + $0x2c9] sm:$0x1] %v9582_v1  ;;  %3448 = vst [vmem:[#allocation3 + $0x2e1] sm:$0x1] %v9582_v1 }
  0x94   :  { %3449 = vst [vmem:[#allocation3 + $0x2f9] sm:$0x1] %v9582_v1  ;;  %3450 = vst [vmem:[#allocation3 + $0x311] sm:$0x1] %v9582_v1 }
  0x95   :  { %3451 = vst [vmem:[#allocation3 + $0x329] sm:$0x1] %v9582_v1  ;;  %3452 = vst [vmem:[#allocation3 + $0x341] sm:$0x1] %v9582_v1 }
  0x96   :  { %168 = vst [vmem:[#allocation2] sm:$0x1] %v9582_v1  ;;  %185 = vst [vmem:[#allocation2 + $0x198] sm:$0x1] %v9582_v1 }
  0x97   :  { %186 = vst [vmem:[#allocation2 + $0x1b0] sm:$0x1] %v9582_v1  ;;  %203 = vst [vmem:[#allocation2 + $0x348] sm:$0x1] %v9582_v1 }
  0x98   :  { %204 = vst [vmem:[#allocation2 + $0x11] sm:$0x1] %v9582_v1  ;;  %221 = vst [vmem:[#allocation2 + $0x1a9] sm:$0x1] %v9582_v1 }
  0x99   :  { %222 = vst [vmem:[#allocation2 + $0x1c1] sm:$0x1] %v9582_v1  ;;  %239 = vst [vmem:[#allocation2 + $0x359] sm:$0x1] %v9582_v1 }
  0x9a   :  { %3382 = vst [vmem:[#allocation3] sm:$0x1] %v9582_v1  ;;  %3399 = vst [vmem:[#allocation3 + $0x198] sm:$0x1] %v9582_v1 }
  0x9b   :  { %3400 = vst [vmem:[#allocation3 + $0x1b0] sm:$0x1] %v9582_v1  ;;  %3417 = vst [vmem:[#allocation3 + $0x348] sm:$0x1] %v9582_v1 }
  0x9c   :  { %3418 = vst [vmem:[#allocation3 + $0x11] sm:$0x1] %v9582_v1  ;;  %3435 = vst [vmem:[#allocation3 + $0x1a9] sm:$0x1] %v9582_v1 }
  0x9d   :  { %3436 = vst [vmem:[#allocation3 + $0x1c1] sm:$0x1] %v9582_v1  ;;  %3453 = vst [vmem:[#allocation3 + $0x359] sm:$0x1] %v9582_v1  ;;  %v305_v36 = vld [vmem:[#allocation2] sm:$0xff] }
  0x9e   :  { %241 = vst [vmem:[#allocation2 + $0x19] sm:$0xff] %v9885_v17  ;;  %242 = vst [vmem:[#allocation2 + $0x21] sm:$0xff] %v9887_v18  ;;  %1091 = vmatmul.mubr.f32.vlgmr.msra.gmra.mrb[0].mxu0 %v305_v36  ;;  %v931_v36 = vld [vmem:[#allocation7 + $0x188] sm:$0xff] }
  0x9f   :  { %243 = vst [vmem:[#allocation2 + $0x31] sm:$0xff] %v9891_v19  ;;  %244 = vst [vmem:[#allocation2 + $0x39] sm:$0xff] %v9894_v20  ;;  %8159 = vmatpush1.bf16.msra.mxu0 %v8158_v37  ;;  %1095 = vmatprep.mubr.f32.mxu0 %v370_v41  ;;  %v10040_v37 = vld [vmem:[#allocation4 + $0x138] sm:$0xff] }
  0xa0   :  { %245 = vst [vmem:[#allocation2 + $0x49] sm:$0xff] %v9896_v21  ;;  %246 = vst [vmem:[#allocation2 + $0x51] sm:$0xff] %v9898_v22  ;;  %8160 = vmatprep.subr.bf16.mxu0 %v15253_v0 }
  0xa1   :  { %247 = vst [vmem:[#allocation2 + $0x61] sm:$0xff] %v9903_v26  ;;  %248 = vst [vmem:[#allocation2 + $0x69] sm:$0xff] %v9907_v27 }
  0xa2   :  { %249 = vst [vmem:[#allocation2 + $0x79] sm:$0xff] %v9909_v28  ;;  %250 = vst [vmem:[#allocation2 + $0x81] sm:$0xff] %v9911_v29  ;;  %1096 = vmatmul.mubr.f32.gmra.mrb[2].mxu0 %v9582_v1 }
  0xa3   :  { %251 = vst [vmem:[#allocation2 + $0x91] sm:$0xff] %v9916_v30  ;;  %252 = vst [vmem:[#allocation2 + $0x99] sm:$0xff] %v9919_v31  ;;  %1100 = vmatprep.mubr.f32.mxu0 %v9885_v17  ;;  %8162 = vmatpush1.bf16.msra.mxu0 %v8161_v49  ;;  %v8167_v17 = vpack.c.bf16 %v921_v59, %v920_v58  ;;  %v10048_v49 = vld [vmem:[#allocation4 + $0x140] sm:$0xff]  ;;  %v10056_v58 = vld [vmem:[#allocation4 + $0x148] sm:$0xff] }
  0xa4   :  { %253 = vst [vmem:[#allocation2 + $0xa9] sm:$0xff] %v9921_v32  ;;  %254 = vst [vmem:[#allocation2 + $0xb1] sm:$0xff] %v9923_v33  ;;  %8163 = vmatprep.subr.bf16.mxu0 %v15253_v0 }
  0xa5   :  { %255 = vst [vmem:[#allocation2 + $0xc1] sm:$0xff] %v9928_v35  ;;  %256 = vst [vmem:[#allocation2 + $0xc9] sm:$0xff] %v9932_v38  ;;  %v9997_v55 = vld [vmem:[#allocation2 + $0x18] sm:$0xff]  ;;  %v10005_v1 = vld [vmem:[#allocation2 + $0x20] sm:$0xff] }
  0xa6   :  { %257 = vst [vmem:[#allocation2 + $0xd9] sm:$0xff] %v9935_v39  ;;  %258 = vst [vmem:[#allocation2 + $0xe1] sm:$0xff] %v9937_v40  ;;  %1101 = vmatmul.mubr.f32.gmra.mrb[4].mxu0 %v9997_v55  ;;  %v10013_v4 = vld [vmem:[#allocation2 + $0x30] sm:$0xff]  ;;  %v10021_v9 = vld [vmem:[#allocation2 + $0x38] sm:$0xff] }
  0xa7   :  { %259 = vst [vmem:[#allocation2 + $0xf1] sm:$0xff] %v9941_v42  ;;  %260 = vst [vmem:[#allocation2 + $0xf9] sm:$0xff] %v9945_v45  ;;  %1105 = vmatprep.mubr.f32.mxu0 %v9887_v18  ;;  %8165 = vmatpush1.bf16.msra.mxu0 %v8164_v57  ;;  %v8170_v18 = vpack.c.bf16 %v923_v63, %v922_v62  ;;  %v10029_v15 = vld [vmem:[#allocation2 + $0x48] sm:$0xff]  ;;  %v10037_v25 = vld [vmem:[#allocation2 + $0x50] sm:$0xff] }
  0xa8   :  { %261 = vst [vmem:[#allocation2 + $0x109] sm:$0xff] %v9948_v47  ;;  %262 = vst [vmem:[#allocation2 + $0x111] sm:$0xff] %v9950_v48  ;;  %8166 = vmatprep.subr.bf16.mxu0 %v15253_v0  ;;  %v10045_v41 = vld [vmem:[#allocation2 + $0x60] sm:$0xff]  ;;  %v10053_v50 = vld [vmem:[#allocation2 + $0x68] sm:$0xff] }
  0xa9   :  { %263 = vst [vmem:[#allocation2 + $0x121] sm:$0xff] %v9955_v51  ;;  %264 = vst [vmem:[#allocation2 + $0x129] sm:$0xff] %v9958_v52  ;;  %v935_v57 = vld [vmem:[#allocation7 + $0x1a8] sm:$0xff]  ;;  %v10061_v59 = vld [vmem:[#allocation2 + $0x78] sm:$0xff] }
  0xaa   :  { %265 = vst [vmem:[#allocation2 + $0x139] sm:$0xff] %v9962_v56  ;;  %266 = vst [vmem:[#allocation2 + $0x141] sm:$0xff] %v9966_v60  ;;  %1106 = vmatmul.mubr.f32.gmra.mrb[6].mxu0 %v10005_v1  ;;  %v10069_v62 = vld [vmem:[#allocation2 + $0x80] sm:$0xff]  ;;  %v10077_v63 = vld [vmem:[#allocation2 + $0x90] sm:$0xff] }
  0xab   :  { %267 = vst [vmem:[#allocation2 + $0x151] sm:$0xff] %v9970_v2  ;;  %268 = vst [vmem:[#allocation2 + $0x159] sm:$0xff] %v9974_v6  ;;  %1110 = vmatprep.mubr.f32.mxu0 %v9891_v19  ;;  %8168 = vmatpush1.bf16.msra.mxu0 %v8167_v17  ;;  %v8173_v19 = vpack.c.bf16 %v925_v7, %v924_v5  ;;  %v10064_v17 = vld [vmem:[#allocation4 + $0x150] sm:$0xff]  ;;  %v937_v5 = vld [vmem:[#allocation7 + $0x1b8] sm:$0xff] }
  0xac   :  { %269 = vst [vmem:[#allocation2 + $0x169] sm:$0xff] %v9978_v10  ;;  %270 = vst [vmem:[#allocation2 + $0x171] sm:$0xff] %v9982_v14  ;;  %8169 = vmatprep.subr.bf16.mxu0 %v15253_v0  ;;  %v10084_v7 = vld [vmem:[#allocation2 + $0x98] sm:$0xff] }
  0xad   :  { %273 = vst [vmem:[#allocation2 + $0x1c9] sm:$0xff] %v9988_v46  ;;  %274 = vst [vmem:[#allocation2 + $0x1d1] sm:$0xff] %v9992_v54 }
  0xae   :  { %275 = vst [vmem:[#allocation2 + $0x1e1] sm:$0xff] %v10000_v61  ;;  %276 = vst [vmem:[#allocation2 + $0x1e9] sm:$0xff] %v10008_v3  ;;  %1111 = vmatmul.mubr.f32.gmra.mrb[8].mxu0 %v10013_v4 }
  0xaf   :  { %277 = vst [vmem:[#allocation2 + $0x1f9] sm:$0xff] %v10016_v8  ;;  %1115 = vmatprep.mubr.f32.mxu0 %v9894_v20  ;;  %8171 = vmatpush1.bf16.msra.mxu0 %v8170_v18  ;;  %278 = vst [vmem:[#allocation2 + $0x201] sm:$0xff] %v10024_v13  ;;  %v8176_v20 = vpack.c.bf16 %v927_v12, %v926_v11  ;;  %v10079_v18 = vld [vmem:[#allocation4 + $0x160] sm:$0xff]  ;;  %v10086_v11 = vld [vmem:[#allocation4 + $0x168] sm:$0xff] }
  0xb0   :  { %8172 = vmatprep.subr.bf16.mxu0 %v15253_v0  ;;  %279 = vst [vmem:[#allocation2 + $0x211] sm:$0xff] %v10032_v24  ;;  %280 = vst [vmem:[#allocation2 + $0x219] sm:$0xff] %v10040_v37  ;;  %v10094_v12 = vld [vmem:[#allocation4 + $0x170] sm:$0xff] }
  0xb1   :  { %281 = vst [vmem:[#allocation2 + $0x229] sm:$0xff] %v10048_v49  ;;  %282 = vst [vmem:[#allocation2 + $0x231] sm:$0xff] %v10056_v58 }
  0xb2   :  { %1116 = vmatmul.mubr.f32.gmra.mrb[10].mxu0 %v10021_v9  ;;  %283 = vst [vmem:[#allocation2 + $0x241] sm:$0xff] %v10064_v17  ;;  %285 = vst [vmem:[#allocation2 + $0x259] sm:$0xff] %v10079_v18 }
  0xb3   :  { %1120 = vmatprep.mubr.f32.mxu0 %v9896_v21  ;;  %8174 = vmatpush1.bf16.msra.mxu0 %v8173_v19  ;;  %v8179_v21 = vpack.c.bf16 %v929_v23, %v928_v16  ;;  %286 = vst [vmem:[#allocation2 + $0x261] sm:$0xff] %v10086_v11  ;;  %287 = vst [vmem:[#allocation2 + $0x271] sm:$0xff] %v10094_v12  ;;  %v10108_v16 = vld [vmem:[#allocation4 + $0x180] sm:$0xff] }
  0xb4   :  { %8175 = vmatprep.subr.bf16.mxu0 %v15253_v0  ;;  %v938_v23 = vld [vmem:[#allocation7 + $0x1c0] sm:$0xff]  ;;  %289 = vst [vmem:[#allocation2 + $0x289] sm:$0xff] %v10108_v16 }
  0xb6   :  { %1121 = vmatmul.mubr.f32.gmra.mrb[12].mxu0 %v10029_v15 }
  0xb7   :  { %1125 = vmatprep.mubr.f32.mxu0 %v9898_v22  ;;  %8177 = vmatpush1.bf16.msra.mxu0 %v8176_v20  ;;  %v8182_v22 = vpack.c.bf16 %v931_v36, %v930_v34  ;;  %v10101_v20 = vld [vmem:[#allocation4 + $0x178] sm:$0xff]  ;;  %v10115_v36 = vld [vmem:[#allocation4 + $0x188] sm:$0xff] }
  0xb8   :  { %8178 = vmatprep.subr.bf16.mxu0 %v15253_v0  ;;  %288 = vst [vmem:[#allocation2 + $0x279] sm:$0xff] %v10101_v20  ;;  %290 = vst [vmem:[#allocation2 + $0x291] sm:$0xff] %v10115_v36 }
  0xba   :  { %1126 = vmatmul.mubr.f32.gmra.mrb[14].mxu0 %v10037_v25 }
  0xbb   :  { %1130 = vmatprep.mubr.f32.mxu0 %v9903_v26  ;;  %8180 = vmatpush1.bf16.msra.mxu0 %v8179_v21  ;;  %v8185_v26 = vpack.c.bf16 %v933_v44, %v932_v43  ;;  %v939_v21 = vld [vmem:[#allocation7 + $0x1c8] sm:$0xff]  ;;  %v10130_v43 = vld [vmem:[#allocation4 + $0x198] sm:$0xff]  ;;  %v10137_v44 = vld [vmem:[#allocation4 + $0x1a0] sm:$0xff] }
  0xbc   :  { %8181 = vmatprep.subr.bf16.mxu0 %v15253_v0  ;;  %v8194_v34 = vpack.c.bf16 %v939_v21, %v938_v23  ;;  %292 = vst [vmem:[#allocation2 + $0x2a9] sm:$0xff] %v10130_v43  ;;  %293 = vst [vmem:[#allocation2 + $0x2b9] sm:$0xff] %v10137_v44  ;;  %v942_v23 = vld [vmem:[#allocation7 + $0x1e0] sm:$0xff]  ;;  %v943_v21 = vld [vmem:[#allocation7 + $0x1e8] sm:$0xff] }
  0xbe   :  { %1131 = vmatmul.mubr.f32.gmra.mrb[16].mxu0 %v10045_v41 }
  0xbf   :  { %1135 = vmatprep.mubr.f32.mxu0 %v9907_v27  ;;  %8183 = vmatpush1.bf16.msra.mxu0 %v8182_v22  ;;  %v8188_v27 = vpack.c.bf16 %v935_v57, %v934_v53  ;;  %v10123_v22 = vld [vmem:[#allocation4 + $0x190] sm:$0xff]  ;;  %v941_v53 = vld [vmem:[#allocation7 + $0x1d8] sm:$0xff] }
  0xc0   :  { %8184 = vmatprep.subr.bf16.mxu0 %v15253_v0  ;;  %291 = vst [vmem:[#allocation2 + $0x2a1] sm:$0xff] %v10123_v22 }
  0xc2   :  { %1136 = vmatmul.mubr.f32.gmra.mrb[18].mxu0 %v10053_v50 }
  0xc3   :  { %1140 = vmatprep.mubr.f32.mxu0 %v9909_v28  ;;  %8186 = vmatpush1.bf16.msra.mxu0 %v8185_v26  ;;  %v10072_v28 = vld [vmem:[#allocation4 + $0x158] sm:$0xff]  ;;  %v940_v26 = vld [vmem:[#allocation7 + $0x1d0] sm:$0xff] }
  0xc4   :  { %8187 = vmatprep.subr.bf16.mxu0 %v15253_v0  ;;  %284 = vst [vmem:[#allocation2 + $0x249] sm:$0xff] %v10072_v28  ;;  %v8197_v57 = vpack.c.bf16 %v941_v53, %v940_v26  ;;  %v10173_v26 = vld [vmem:[#allocation4 + $0x1c8] sm:$0xff]  ;;  %v10181_v53 = vld [vmem:[#allocation4 + $0x1d0] sm:$0xff] }
  0xc5   :  { %298 = vst [vmem:[#allocation2 + $0x2f1] sm:$0xff] %v10173_v26  ;;  %299 = vst [vmem:[#allocation2 + $0x301] sm:$0xff] %v10181_v53 }
  0xc6   :  { %1141 = vmatmul.mubr.f32.gmra.mrb[20].mxu0 %v10061_v59 }
  0xc7   :  { %1145 = vmatprep.mubr.f32.mxu0 %v9911_v29  ;;  %8189 = vmatpush1.bf16.msra.mxu0 %v8188_v27  ;;  %v936_v29 = vld [vmem:[#allocation7 + $0x1b0] sm:$0xff]  ;;  %v10144_v27 = vld [vmem:[#allocation4 + $0x1a8] sm:$0xff] }
  0xc8   :  { %8190 = vmatprep.subr.bf16.mxu0 %v15253_v0  ;;  %v8191_v19 = vpack.c.bf16 %v937_v5, %v936_v29  ;;  %294 = vst [vmem:[#allocation2 + $0x2c1] sm:$0xff] %v10144_v27  ;;  %v10152_v29 = vld [vmem:[#allocation4 + $0x1b0] sm:$0xff]  ;;  %v10159_v5 = vld [vmem:[#allocation4 + $0x1b8] sm:$0xff] }
  0xc9   :  { %295 = vst [vmem:[#allocation2 + $0x2d1] sm:$0xff] %v10152_v29  ;;  %296 = vst [vmem:[#allocation2 + $0x2d9] sm:$0xff] %v10159_v5 }
  0xca   :  { %1146 = vmatmul.mubr.f32.gmra.mrb[22].mxu0 %v10069_v62 }
  0xcb   :  { %1150 = vmatprep.mubr.f32.mxu0 %v9916_v30  ;;  %8192 = vmatpush1.bf16.msra.mxu0 %v8191_v19  ;;  %v10092_v30 = vld [vmem:[#allocation2 + $0xa8] sm:$0xff]  ;;  %v10166_v19 = vld [vmem:[#allocation4 + $0x1c0] sm:$0xff] }
  0xcc   :  { %8193 = vmatprep.subr.bf16.mxu0 %v15253_v0  ;;  %297 = vst [vmem:[#allocation2 + $0x2e9] sm:$0xff] %v10166_v19 }
  0xce   :  { %1151 = vmatmul.mubr.f32.gmra.mrb[24].mxu0 %v10077_v63 }
  0xcf   :  { %1155 = vmatprep.mubr.f32.mxu0 %v9919_v31  ;;  %v10099_v31 = vld [vmem:[#allocation2 + $0xb0] sm:$0xff]  ;;  %8195 = vmatpush1.bf16.msra.mxu0 %v8194_v34  ;;  %v8200_v34 = vpack.c.bf16 %v943_v21, %v942_v23  ;;  %v10195_v23 = vld [vmem:[#allocation4 + $0x1e0] sm:$0xff] }
  0xd0   :  { %8196 = vmatprep.subr.bf16.mxu0 %v15253_v0  ;;  %v944_v21 = vld [vmem:[#allocation7 + $0x1f0] sm:$0xff]  ;;  %301 = vst [vmem:[#allocation2 + $0x319] sm:$0xff] %v10195_v23 }
  0xd2   :  { %1156 = vmatmul.mubr.f32.gmra.mrb[26].mxu0 %v10084_v7 }
  0xd3   :  { %1160 = vmatprep.mubr.f32.mxu0 %v9921_v32  ;;  %v10106_v32 = vld [vmem:[#allocation2 + $0xc0] sm:$0xff]  ;;  %8198 = vmatpush1.bf16.msra.mxu0 %v8197_v57  ;;  %v10188_v57 = vld [vmem:[#allocation4 + $0x1d8] sm:$0xff] }
  0xd4   :  { %8199 = vmatprep.subr.bf16.mxu0 %v15253_v0  ;;  %300 = vst [vmem:[#allocation2 + $0x309] sm:$0xff] %v10188_v57 }
  0xd6   :  { %1161 = vmatmul.mubr.f32.gmra.mrb[28].mxu0 %v10092_v30 }
  0xd7   :  { %1165 = vmatprep.mubr.f32.mxu0 %v9923_v33  ;;  %v10113_v33 = vld [vmem:[#allocation2 + $0xc8] sm:$0xff]  ;;  %8201 = vmatpush1.bf16.msra.mxu0 %v8200_v34  ;;  %v945_v34 = vld [vmem:[#allocation7 + $0x1f8] sm:$0xff] }
  0xd8   :  { %8202 = vmatprep.subr.bf16.mxu0 %v15253_v0  ;;  %v8203_v0 = vpack.c.bf16 %v945_v34, %v944_v21  ;;  %v401_v21 = vld [vmem:[#allocation2 + $0x1b1] sm:$0xff]  ;;  %v402_v34 = vld [vmem:[#allocation2 + $0x1b9] sm:$0xff] }
  0xda   :  { %1166 = vmatmul.mubr.f32.gmra.mrb[30].mxu0 %v10099_v31 }
  0xdb   :  { %1170 = vmatprep.mubr.f32.mxu0 %v9928_v35  ;;  %v10121_v35 = vld [vmem:[#allocation2 + $0xd8] sm:$0xff]  ;;  %8204 = vmatpush1.bf16.msra.mxu0 %v8203_v0  ;;  %v337_v0 = vld [vmem:[#allocation2 + $0x1b0] sm:$0xff] }
  0xde   :  { %1171 = vmatmul.mubr.f32.gmra.mrb[32].mxu0 %v10106_v32 }
  0xdf   :  { %1175 = vmatprep.mubr.f32.mxu0 %v9932_v38  ;;  %v10128_v38 = vld [vmem:[#allocation2 + $0xe0] sm:$0xff] }
  0xe2   :  { %1176 = vmatmul.mubr.f32.gmra.mrb[34].mxu0 %v10113_v33 }
  0xe3   :  { %1180 = vmatprep.mubr.f32.mxu0 %v9935_v39  ;;  %v10135_v39 = vld [vmem:[#allocation2 + $0xf0] sm:$0xff] }
  0xe6   :  { %1181 = vmatmul.mubr.f32.gmra.mrb[36].mxu0 %v10121_v35 }
  0xe7   :  { %1185 = vmatprep.mubr.f32.mxu0 %v9937_v40  ;;  %v10142_v40 = vld [vmem:[#allocation2 + $0xf8] sm:$0xff] }
  0xea   :  { %1186 = vmatmul.mubr.f32.gmra.mrb[38].mxu0 %v10128_v38 }
  0xeb   :  { %1190 = vmatprep.mubr.f32.mxu0 %v9941_v42  ;;  %v10150_v42 = vld [vmem:[#allocation2 + $0x108] sm:$0xff] }
  0xee   :  { %1191 = vmatmul.mubr.f32.gmra.mrb[40].mxu0 %v10135_v39 }
  0xef   :  { %1195 = vmatprep.mubr.f32.mxu0 %v9945_v45  ;;  %v10157_v45 = vld [vmem:[#allocation2 + $0x110] sm:$0xff] }
  0xf2   :  { %1196 = vmatmul.mubr.f32.gmra.mrb[42].mxu0 %v10142_v40 }
  0xf3   :  { %1200 = vmatprep.mubr.f32.mxu0 %v9948_v47  ;;  %v10164_v47 = vld [vmem:[#allocation2 + $0x120] sm:$0xff] }
  0xf6   :  { %1201 = vmatmul.mubr.f32.gmra.mrb[44].mxu0 %v10150_v42 }
  0xf7   :  { %1205 = vmatprep.mubr.f32.mxu0 %v9950_v48  ;;  %v10171_v48 = vld [vmem:[#allocation2 + $0x128] sm:$0xff] }
  0xfa   :  { %1206 = vmatmul.mubr.f32.gmra.mrb[46].mxu0 %v10157_v45 }
  0xfb   :  { %1210 = vmatprep.mubr.f32.mxu0 %v9955_v51  ;;  %v10179_v51 = vld [vmem:[#allocation2 + $0x138] sm:$0xff] }
  0xfe   :  { %1211 = vmatmul.mubr.f32.gmra.mrb[48].mxu0 %v10164_v47 }
  0xff   :  { %1215 = vmatprep.mubr.f32.mxu0 %v9958_v52  ;;  %v10186_v52 = vld [vmem:[#allocation2 + $0x140] sm:$0xff] }
 0x100   :  { %15421 = vst [vmem:[#allocation17_spill] sm:$0xff] %v10186_v52 }
 0x102   :  { %1216 = vmatmul.mubr.f32.gmra.mrb[50].mxu0 %v10171_v48 }
 0x103   :  { %1220 = vmatprep.mubr.f32.mxu0 %v9962_v56  ;;  %v10193_v56 = vld [vmem:[#allocation2 + $0x150] sm:$0xff] }
 0x104   :  { %15422 = vst [vmem:[#allocation18_spill] sm:$0xff] %v10193_v56 }
 0x106   :  { %1221 = vmatmul.mubr.f32.gmra.mrb[52].mxu0 %v10179_v51 }
 0x107   :  { %1225 = vmatprep.mubr.f32.mxu0 %v9966_v60  ;;  %v10200_v60 = vld [vmem:[#allocation2 + $0x158] sm:$0xff] }
 0x108   :  { %15423 = vst [vmem:[#allocation19_spill] sm:$0xff] %v10200_v60 }
 0x10a   :  { %1226 = vmatmul.mubr.f32.gmra.mrb[54].mxu0 %v10186_v52  ;;  %v10202_v52 = vld [vmem:[#allocation4 + $0x1e8] sm:$0xff] }
 0x10b   :  { %1230 = vmatprep.mubr.f32.mxu0 %v9970_v2  ;;  %302 = vst [vmem:[#allocation2 + $0x321] sm:$0xff] %v10202_v52  ;;  %v15424_v2 = vmov 0.0|0.0  }
 0x10c   :  { %8205 = vmatprep.subr.bf16.mxu0 %v15424_v2 }
 0x10e   :  { %1231 = vmatmul.mubr.f32.gmra.mrb[56].mxu0 %v10193_v56  ;;  %v10208_v56 = vld [vmem:[#allocation2 + $0x168] sm:$0xff] }
 0x10f   :  { %1235 = vmatprep.mubr.f32.mxu0 %v9974_v6  ;;  %v10212_v6 = vld [vmem:[#allocation2 + $0x170] sm:$0xff] }
 0x112   :  { %1236 = vmatmul.mubr.f32.gmra.mrb[58].mxu0 %v10200_v60  ;;  %v9388_v60 = vld [vmem:[#allocation2 + $0x8] sm:$0xff] }
 0x113   :  { %1240 = vmatprep.mubr.f32.mxu0 %v9978_v10  ;;  %v10216_v10 = vld [vmem:[#allocation2 + $0x1c8] sm:$0xff] }
 0x116   :  { %1241 = vmatmul.mubr.f32.gmra.mrb[60].mxu0 %v10208_v56 }
 0x117   :  { %1245 = vmatprep.mubr.f32.mxu0 %v9982_v14  ;;  %v10220_v14 = vld [vmem:[#allocation2 + $0x1d0] sm:$0xff] }
 0x11a   :  { %1246 = vmatmul.mubr.f32.gmra.mrb[62].mxu0 %v10212_v6 }
 0x11b   :  { %1250 = vmatprep.mubr.f32.mxu0 %v401_v21  ;;  %v10224_v21 = vld [vmem:[#allocation2 + $0x1e0] sm:$0xff] }
 0x11e   :  { %1251 = vmatmul.mubr.f32.gmra.mrb[64].mxu0 %v337_v0  ;;  %v10329_v0 = vld [vmem:[#allocation4 + $0xf8] sm:$0xff] }
 0x11f   :  { %1255 = vmatprep.mubr.f32.mxu0 %v402_v34  ;;  %15429 = vst [vmem:[#allocation24_spill] sm:$0xff] %v10329_v0  ;;  %272 = vst [vmem:[#allocation2 + $0x189] sm:$0xff] %v10329_v0  ;;  %v946_v34 = vld [vmem:[#allocation7 + $0x200] sm:$0xff] }
 0x122   :  { %1256 = vmatmul.mubr.f32.gmra.mrb[66].mxu0 %v9388_v60  ;;  %v10228_v60 = vld [vmem:[#allocation2 + $0x1e8] sm:$0xff] }
 0x123   :  { %1260 = vmatprep.mubr.f32.mxu0 %v9988_v46  ;;  %v10232_v46 = vld [vmem:[#allocation2 + $0x1f8] sm:$0xff] }
 0x126   :  { %1261 = vmatmul.mubr.f32.gmra.mrb[68].mxu0 %v10216_v10 }
 0x127   :  { %1265 = vmatprep.mubr.f32.mxu0 %v9992_v54  ;;  %v10236_v54 = vld [vmem:[#allocation2 + $0x200] sm:$0xff] }
 0x12a   :  { %1266 = vmatmul.mubr.f32.gmra.mrb[70].mxu0 %v10220_v14 }
 0x12b   :  { %1270 = vmatprep.mubr.f32.mxu0 %v10000_v61  ;;  %v10240_v61 = vld [vmem:[#allocation2 + $0x210] sm:$0xff] }
 0x12e   :  { %1271 = vmatmul.mubr.f32.gmra.mrb[72].mxu0 %v10224_v21 }
 0x12f   :  { %1275 = vmatprep.mubr.f32.mxu0 %v10008_v3  ;;  %v10244_v3 = vld [vmem:[#allocation2 + $0x218] sm:$0xff] }
 0x132   :  { %1276 = vmatmul.mubr.f32.gmra.mrb[74].mxu0 %v10228_v60 }
 0x133   :  { %1280 = vmatprep.mubr.f32.mxu0 %v10016_v8  ;;  %v10248_v8 = vld [vmem:[#allocation2 + $0x228] sm:$0xff] }
 0x136   :  { %1281 = vmatmul.mubr.f32.gmra.mrb[76].mxu0 %v10232_v46 }
 0x137   :  { %1285 = vmatprep.mubr.f32.mxu0 %v10024_v13  ;;  %v10252_v13 = vld [vmem:[#allocation2 + $0x230] sm:$0xff] }
 0x13a   :  { %1286 = vmatmul.mubr.f32.gmra.mrb[78].mxu0 %v10236_v54 }
 0x13b   :  { %1290 = vmatprep.mubr.f32.mxu0 %v10032_v24  ;;  %v10256_v24 = vld [vmem:[#allocation2 + $0x240] sm:$0xff] }
 0x13e   :  { %1291 = vmatmul.mubr.f32.gmra.mrb[80].mxu0 %v10240_v61 }
 0x13f   :  { %1295 = vmatprep.mubr.f32.mxu0 %v10040_v37  ;;  %v10260_v37 = vld [vmem:[#allocation2 + $0x248] sm:$0xff] }
 0x142   :  { %1296 = vmatmul.mubr.f32.gmra.mrb[82].mxu0 %v10244_v3 }
 0x143   :  { %1300 = vmatprep.mubr.f32.mxu0 %v10048_v49  ;;  %v10264_v49 = vld [vmem:[#allocation2 + $0x258] sm:$0xff] }
 0x146   :  { %1301 = vmatmul.mubr.f32.gmra.mrb[84].mxu0 %v10248_v8 }
 0x147   :  { %1305 = vmatprep.mubr.f32.mxu0 %v10056_v58  ;;  %v10268_v58 = vld [vmem:[#allocation2 + $0x260] sm:$0xff] }
 0x14a   :  { %1306 = vmatmul.mubr.f32.gmra.mrb[86].mxu0 %v10252_v13 }
 0x14b   :  { %1310 = vmatprep.mubr.f32.mxu0 %v10064_v17  ;;  %v10272_v17 = vld [vmem:[#allocation2 + $0x270] sm:$0xff] }
 0x14e   :  { %1311 = vmatmul.mubr.f32.gmra.mrb[88].mxu0 %v10256_v24 }
 0x14f   :  { %1315 = vmatprep.mubr.f32.mxu0 %v10072_v28  ;;  %v10276_v28 = vld [vmem:[#allocation2 + $0x278] sm:$0xff] }
 0x152   :  { %1316 = vmatmul.mubr.f32.gmra.mrb[90].mxu0 %v10260_v37 }
 0x153   :  { %1320 = vmatprep.mubr.f32.mxu0 %v10079_v18  ;;  %v10280_v18 = vld [vmem:[#allocation2 + $0x288] sm:$0xff] }
 0x156   :  { %1321 = vmatmul.mubr.f32.gmra.mrb[92].mxu0 %v10264_v49 }
 0x157   :  { %1325 = vmatprep.mubr.f32.mxu0 %v10086_v11  ;;  %v10284_v11 = vld [vmem:[#allocation2 + $0x290] sm:$0xff] }
 0x15a   :  { %1326 = vmatmul.mubr.f32.gmra.mrb[94].mxu0 %v10268_v58 }
 0x15b   :  { %1330 = vmatprep.mubr.f32.mxu0 %v10094_v12  ;;  %v10288_v12 = vld [vmem:[#allocation2 + $0x2a0] sm:$0xff] }
 0x15e   :  { %1331 = vmatmul.mubr.f32.gmra.mrb[96].mxu0 %v10272_v17 }
 0x15f   :  { %1335 = vmatprep.mubr.f32.mxu0 %v10101_v20  ;;  %v10292_v20 = vld [vmem:[#allocation2 + $0x2a8] sm:$0xff] }
 0x162   :  { %1336 = vmatmul.mubr.f32.gmra.mrb[98].mxu0 %v10276_v28 }
 0x163   :  { %1340 = vmatprep.mubr.f32.mxu0 %v10108_v16  ;;  %v10296_v16 = vld [vmem:[#allocation2 + $0x2b8] sm:$0xff] }
 0x166   :  { %1341 = vmatmul.mubr.f32.gmra.mrb[100].mxu0 %v10280_v18 }
 0x167   :  { %1345 = vmatprep.mubr.f32.mxu0 %v10115_v36  ;;  %v10300_v36 = vld [vmem:[#allocation2 + $0x2c0] sm:$0xff] }
 0x16a   :  { %1346 = vmatmul.mubr.f32.gmra.mrb[102].mxu0 %v10284_v11 }
 0x16b   :  { %1350 = vmatprep.mubr.f32.mxu0 %v10123_v22  ;;  %v10304_v22 = vld [vmem:[#allocation2 + $0x2d0] sm:$0xff] }
 0x16e   :  { %1351 = vmatmul.mubr.f32.gmra.mrb[104].mxu0 %v10288_v12 }
 0x16f   :  { %1355 = vmatprep.mubr.f32.mxu0 %v10130_v43  ;;  %v10308_v43 = vld [vmem:[#allocation2 + $0x2d8] sm:$0xff] }
 0x172   :  { %1356 = vmatmul.mubr.f32.gmra.mrb[106].mxu0 %v10292_v20 }
 0x173   :  { %1360 = vmatprep.mubr.f32.mxu0 %v10137_v44  ;;  %v10312_v44 = vld [vmem:[#allocation2 + $0x2e8] sm:$0xff] }
 0x176   :  { %1361 = vmatmul.mubr.f32.gmra.mrb[108].mxu0 %v10296_v16 }
 0x177   :  { %1365 = vmatprep.mubr.f32.mxu0 %v10144_v27  ;;  %v10316_v27 = vld [vmem:[#allocation2 + $0x2f0] sm:$0xff] }
 0x178   :  { %15425 = vst [vmem:[#allocation20_spill] sm:$0xff] %v10316_v27 }
 0x17a   :  { %1366 = vmatmul.mubr.f32.gmra.mrb[110].mxu0 %v10300_v36 }
 0x17b   :  { %1370 = vmatprep.mubr.f32.mxu0 %v10152_v29  ;;  %v10320_v29 = vld [vmem:[#allocation2 + $0x300] sm:$0xff] }
 0x17c   :  { %15426 = vst [vmem:[#allocation21_spill] sm:$0xff] %v10320_v29 }
 0x17e   :  { %1371 = vmatmul.mubr.f32.gmra.mrb[112].mxu0 %v10304_v22 }
 0x17f   :  { %1375 = vmatprep.mubr.f32.mxu0 %v10159_v5  ;;  %v10322_v5 = vld [vmem:[#allocation4 + $0xf0] sm:$0xff] }
 0x180   :  { %15427 = vst [vmem:[#allocation22_spill] sm:$0xff] %v10322_v5  ;;  %271 = vst [vmem:[#allocation2 + $0x181] sm:$0xff] %v10322_v5  ;;  %v433_v5 = vld [vmem:[#allocation2 + $0x2] sm:$0xff] }
 0x182   :  { %1376 = vmatmul.mubr.f32.gmra.mrb[114].mxu0 %v10308_v43 }
 0x183   :  { %1380 = vmatprep.mubr.f32.mxu0 %v10166_v19  ;;  %v10327_v19 = vld [vmem:[#allocation2 + $0x308] sm:$0xff] }
 0x184   :  { %15428 = vst [vmem:[#allocation23_spill] sm:$0xff] %v10327_v19 }
 0x186   :  { %1381 = vmatmul.mubr.f32.gmra.mrb[116].mxu0 %v10312_v44 }
 0x187   :  { %1385 = vmatprep.mubr.f32.mxu0 %v10173_v26  ;;  %v10334_v26 = vld [vmem:[#allocation2 + $0x318] sm:$0xff] }
 0x188   :  { %15430 = vst [vmem:[#allocation25_spill] sm:$0xff] %v10334_v26 }
 0x18a   :  { %1386 = vmatmul.mubr.f32.gmra.mrb[118].mxu0 %v10316_v27  ;;  %v951_v27 = vld [vmem:[#allocation7 + $0x228] sm:$0xff] }
 0x18b   :  { %1390 = vmatprep.mubr.f32.mxu0 %v10181_v53  ;;  %v10338_v53 = vld [vmem:[#allocation2 + $0x320] sm:$0xff] }
 0x18c   :  { %15431 = vst [vmem:[#allocation26_spill] sm:$0xff] %v10338_v53 }
 0x18e   :  { %1391 = vmatmul.mubr.f32.gmra.mrb[120].mxu0 %v10320_v29  ;;  %v948_v29 = vld [vmem:[#allocation7 + $0x210] sm:$0xff] }
 0x18f   :  { %1395 = vmatprep.mubr.f32.mxu0 %v10188_v57  ;;  %v947_v57 = vld [vmem:[#allocation7 + $0x208] sm:$0xff] }
 0x190   :  { %v8206_v0 = vpack.c.bf16 %v947_v57, %v946_v34  ;;  %v952_v34 = vld [vmem:[#allocation7 + $0x230] sm:$0xff]  ;;  %v10360_v57 = vld [vmem:[#allocation2 + $0x3a] sm:$0xff] }
 0x192   :  { %1396 = vmatmul.mubr.f32.gmra.mrb[122].mxu0 %v10327_v19  ;;  %v949_v19 = vld [vmem:[#allocation7 + $0x218] sm:$0xff] }
 0x193   :  { %1400 = vmatprep.mubr.f32.mxu0 %v10195_v23  ;;  %v434_v23 = vld [vmem:[#allocation2 + $0xa] sm:$0xff] }
 0x196   :  { %1401 = vmatmul.mubr.f32.gmra.mrb[124].mxu0 %v10334_v26  ;;  %v8209_v26 = vpack.c.bf16 %v949_v19, %v948_v29  ;;  %v954_v19 = vld [vmem:[#allocation7 + $0x240] sm:$0xff] }
 0x197   :  { %1405 = vmatprep.mubr.f32.mxu0 %v10202_v52  ;;  %v950_v52 = vld [vmem:[#allocation7 + $0x220] sm:$0xff] }
 0x19a   :  { %1406 = vmatmul.mubr.f32.gmra.mrb[126].mxu0 %v10338_v53  ;;  %v10345_v53 = vld [vmem:[#allocation2 + $0x1a] sm:$0xff] }
 0x19b   :  { %1475 = vmatprep.mubr.f32.mxu0 %v9997_v55  ;;  %v8212_v55 = vpack.c.bf16 %v951_v27, %v950_v52  ;;  %v10355_v27 = vld [vmem:[#allocation2 + $0x32] sm:$0xff]  ;;  %v958_v52 = vld [vmem:[#allocation7 + $0x260] sm:$0xff] }
 0x19e   :  { %1476 = vmatmul.mubr.f32.vlgmr.msra.gmra.mrb[0].mxu0 %v433_v5  ;;  %v953_v5 = vld [vmem:[#allocation7 + $0x238] sm:$0xff] }
 0x19f   :  { %8207 = vmatpush1.bf16.msra.mxu0 %v8206_v0  ;;  %1480 = vmatprep.mubr.f32.mxu0 %v10005_v1  ;;  %v10350_v1 = vld [vmem:[#allocation2 + $0x22] sm:$0xff]  ;;  %v8215_v29 = vpack.c.bf16 %v953_v5, %v952_v34  ;;  %v960_v5 = vld [vmem:[#allocation7 + $0x270] sm:$0xff] }
 0x1a0   :  { %8208 = vmatprep.subr.bf16.mxu0 %v15424_v2 }
 0x1a2   :  { %1481 = vmatmul.mubr.f32.gmra.mrb[2].mxu0 %v434_v23 }
 0x1a3   :  { %1485 = vmatprep.mubr.f32.mxu0 %v10013_v4  ;;  %8210 = vmatpush1.bf16.msra.mxu0 %v8209_v26  ;;  %v955_v4 = vld [vmem:[#allocation7 + $0x248] sm:$0xff]  ;;  %v956_v26 = vld [vmem:[#allocation7 + $0x250] sm:$0xff] }
 0x1a4   :  { %8211 = vmatprep.subr.bf16.mxu0 %v15424_v2  ;;  %v8218_v0 = vpack.c.bf16 %v955_v4, %v954_v19  ;;  %v962_v4 = vld [vmem:[#allocation7 + $0x280] sm:$0xff] }
 0x1a6   :  { %1486 = vmatmul.mubr.f32.gmra.mrb[4].mxu0 %v10345_v53 }
 0x1a7   :  { %1490 = vmatprep.mubr.f32.mxu0 %v10021_v9  ;;  %8213 = vmatpush1.bf16.msra.mxu0 %v8212_v55  ;;  %v957_v9 = vld [vmem:[#allocation7 + $0x258] sm:$0xff]  ;;  %v10365_v55 = vld [vmem:[#allocation2 + $0x4a] sm:$0xff] }
 0x1a8   :  { %8214 = vmatprep.subr.bf16.mxu0 %v15424_v2  ;;  %v8221_v23 = vpack.c.bf16 %v957_v9, %v956_v26  ;;  %v964_v9 = vld [vmem:[#allocation7 + $0x290] sm:$0xff] }
 0x1aa   :  { %1491 = vmatmul.mubr.f32.gmra.mrb[6].mxu0 %v10350_v1 }
 0x1ab   :  { %1495 = vmatprep.mubr.f32.mxu0 %v10029_v15  ;;  %8216 = vmatpush1.bf16.msra.mxu0 %v8215_v29  ;;  %v959_v15 = vld [vmem:[#allocation7 + $0x268] sm:$0xff]  ;;  %v10370_v29 = vld [vmem:[#allocation2 + $0x52] sm:$0xff] }
 0x1ac   :  { %8217 = vmatprep.subr.bf16.mxu0 %v15424_v2  ;;  %v8224_v34 = vpack.c.bf16 %v959_v15, %v958_v52  ;;  %v966_v15 = vld [vmem:[#allocation7 + $0x2a0] sm:$0xff] }
 0x1ae   :  { %1496 = vmatmul.mubr.f32.gmra.mrb[8].mxu0 %v10355_v27 }
 0x1af   :  { %1500 = vmatprep.mubr.f32.mxu0 %v10037_v25  ;;  %8219 = vmatpush1.bf16.msra.mxu0 %v8218_v0  ;;  %v961_v25 = vld [vmem:[#allocation7 + $0x278] sm:$0xff]  ;;  %v10375_v0 = vld [vmem:[#allocation2 + $0x62] sm:$0xff] }
 0x1b0   :  { %8220 = vmatprep.subr.bf16.mxu0 %v15424_v2  ;;  %v8227_v19 = vpack.c.bf16 %v961_v25, %v960_v5  ;;  %v968_v25 = vld [vmem:[#allocation7 + $0x2b0] sm:$0xff] }
 0x1b2   :  { %1501 = vmatmul.mubr.f32.gmra.mrb[10].mxu0 %v10360_v57 }
 0x1b3   :  { %1505 = vmatprep.mubr.f32.mxu0 %v10045_v41  ;;  %8222 = vmatpush1.bf16.msra.mxu0 %v8221_v23  ;;  %v963_v41 = vld [vmem:[#allocation7 + $0x288] sm:$0xff] }
 0x1b4   :  { %8223 = vmatprep.subr.bf16.mxu0 %v15424_v2  ;;  %v8230_v26 = vpack.c.bf16 %v963_v41, %v962_v4  ;;  %v10380_v23 = vld [vmem:[#allocation2 + $0x6a] sm:$0xff]  ;;  %v10399_v4 = vld [vmem:[#allocation2 + $0x9a] sm:$0xff] }
 0x1b5   :  { %v10404_v41 = vld [vmem:[#allocation2 + $0xaa] sm:$0xff] }
 0x1b6   :  { %1506 = vmatmul.mubr.f32.gmra.mrb[12].mxu0 %v10365_v55 }
 0x1b7   :  { %1510 = vmatprep.mubr.f32.mxu0 %v10053_v50  ;;  %8225 = vmatpush1.bf16.msra.mxu0 %v8224_v34  ;;  %v965_v50 = vld [vmem:[#allocation7 + $0x298] sm:$0xff] }
 0x1b8   :  { %8226 = vmatprep.subr.bf16.mxu0 %v15424_v2  ;;  %v8233_v52 = vpack.c.bf16 %v965_v50, %v964_v9  ;;  %v10385_v34 = vld [vmem:[#allocation2 + $0x7a] sm:$0xff]  ;;  %v971_v9 = vld [vmem:[#allocation7 + $0x2c8] sm:$0xff] }
 0x1ba   :  { %1511 = vmatmul.mubr.f32.gmra.mrb[14].mxu0 %v10370_v29 }
 0x1bb   :  { %1515 = vmatprep.mubr.f32.mxu0 %v10061_v59  ;;  %8228 = vmatpush1.bf16.msra.mxu0 %v8227_v19  ;;  %v967_v59 = vld [vmem:[#allocation7 + $0x2a8] sm:$0xff]  ;;  %v969_v19 = vld [vmem:[#allocation7 + $0x2b8] sm:$0xff] }
 0x1bc   :  { %8229 = vmatprep.subr.bf16.mxu0 %v15424_v2  ;;  %v8236_v5 = vpack.c.bf16 %v967_v59, %v966_v15  ;;  %v973_v15 = vld [vmem:[#allocation7 + $0x2d8] sm:$0xff] }
 0x1be   :  { %1516 = vmatmul.mubr.f32.gmra.mrb[16].mxu0 %v10375_v0 }
 0x1bf   :  { %1520 = vmatprep.mubr.f32.mxu0 %v10069_v62  ;;  %8231 = vmatpush1.bf16.msra.mxu0 %v8230_v26  ;;  %v10390_v62 = vld [vmem:[#allocation2 + $0x82] sm:$0xff] }
 0x1c0   :  { %8232 = vmatprep.subr.bf16.mxu0 %v15424_v2  ;;  %v970_v26 = vld [vmem:[#allocation7 + $0x2c0] sm:$0xff] }
 0x1c1   :  { %v8242_v50 = vpack.c.bf16 %v971_v9, %v970_v26  ;;  %v10455_v26 = vld [vmem:[#allocation2 + $0x13a] sm:$0xff]  ;;  %v10459_v9 = vld [vmem:[#allocation2 + $0x142] sm:$0xff] }
 0x1c2   :  { %1521 = vmatmul.mubr.f32.gmra.mrb[18].mxu0 %v10380_v23 }
 0x1c3   :  { %1525 = vmatprep.mubr.f32.mxu0 %v10077_v63  ;;  %8234 = vmatpush1.bf16.msra.mxu0 %v8233_v52  ;;  %v10395_v63 = vld [vmem:[#allocation2 + $0x92] sm:$0xff] }
 0x1c4   :  { %8235 = vmatprep.subr.bf16.mxu0 %v15424_v2  ;;  %v972_v52 = vld [vmem:[#allocation7 + $0x2d0] sm:$0xff] }
 0x1c5   :  { %v8245_v59 = vpack.c.bf16 %v973_v15, %v972_v52  ;;  %v10465_v52 = vld [vmem:[#allocation4 + $0x1f0] sm:$0xff] }
 0x1c6   :  { %1526 = vmatmul.mubr.f32.gmra.mrb[20].mxu0 %v10385_v34  ;;  %303 = vst [vmem:[#allocation2 + $0x331] sm:$0xff] %v10465_v52  ;;  %v976_v15 = vld [vmem:[#allocation7 + $0x2f0] sm:$0xff] }
 0x1c7   :  { %1530 = vmatprep.mubr.f32.mxu0 %v10084_v7  ;;  %8237 = vmatpush1.bf16.msra.mxu0 %v8236_v5  ;;  %v8239_v7 = vpack.c.bf16 %v969_v19, %v968_v25  ;;  %v974_v5 = vld [vmem:[#allocation7 + $0x2e0] sm:$0xff]  ;;  %v975_v25 = vld [vmem:[#allocation7 + $0x2e8] sm:$0xff] }
 0x1c8   :  { %8238 = vmatprep.subr.bf16.mxu0 %v15424_v2  ;;  %v15432_v19 = vld [vmem:[#allocation17_spill] sm:$0xff] }
 0x1c9   :  { %15435 = vst [vmem:[#allocation17_spill] sm:$0xff] %v10465_v52  ;;  %v10597_v52 = vld [vmem:[#allocation2 + $0x31a] sm:$0xff] }
 0x1ca   :  { %1531 = vmatmul.mubr.f32.gmra.mrb[22].mxu0 %v10390_v62  ;;  %15448 = vst [vmem:[#allocation27_spill] sm:$0xff] %v10597_v52 }
 0x1cb   :  { %1535 = vmatprep.mubr.f32.mxu0 %v10092_v30  ;;  %8240 = vmatpush1.bf16.msra.mxu0 %v8239_v7  ;;  %v10408_v30 = vld [vmem:[#allocation2 + $0xb2] sm:$0xff]  ;;  %v8248_v7 = vpack.c.bf16 %v975_v25, %v974_v5  ;;  %v10470_v5 = vld [vmem:[#allocation2 + $0x15a] sm:$0xff] }
 0x1cc   :  { %8241 = vmatprep.subr.bf16.mxu0 %v15424_v2 }
 0x1ce   :  { %1536 = vmatmul.mubr.f32.gmra.mrb[24].mxu0 %v10395_v63 }
 0x1cf   :  { %1540 = vmatprep.mubr.f32.mxu0 %v10099_v31  ;;  %v10412_v31 = vld [vmem:[#allocation2 + $0xc2] sm:$0xff]  ;;  %8243 = vmatpush1.bf16.msra.mxu0 %v8242_v50  ;;  %v10463_v50 = vld [vmem:[#allocation2 + $0x152] sm:$0xff] }
 0x1d0   :  { %8244 = vmatprep.subr.bf16.mxu0 %v15424_v2 }
 0x1d2   :  { %1541 = vmatmul.mubr.f32.gmra.mrb[26].mxu0 %v10399_v4 }
 0x1d3   :  { %1545 = vmatprep.mubr.f32.mxu0 %v10106_v32  ;;  %v10416_v32 = vld [vmem:[#allocation2 + $0xca] sm:$0xff]  ;;  %8246 = vmatpush1.bf16.msra.mxu0 %v8245_v59  ;;  %v977_v59 = vld [vmem:[#allocation7 + $0x2f8] sm:$0xff] }
 0x1d4   :  { %8247 = vmatprep.subr.bf16.mxu0 %v15424_v2  ;;  %v8251_v25 = vpack.c.bf16 %v977_v59, %v976_v15  ;;  %v466_v15 = vld [vmem:[#allocation2 + $0x1ba] sm:$0xff]  ;;  %v10486_v59 = vld [vmem:[#allocation2 + $0x1ca] sm:$0xff] }
 0x1d6   :  { %1546 = vmatmul.mubr.f32.gmra.mrb[28].mxu0 %v10404_v41 }
 0x1d7   :  { %1550 = vmatprep.mubr.f32.mxu0 %v10113_v33  ;;  %v10421_v33 = vld [vmem:[#allocation2 + $0xda] sm:$0xff]  ;;  %8249 = vmatpush1.bf16.msra.mxu0 %v8248_v7 }
 0x1d8   :  { %8250 = vmatprep.subr.bf16.mxu0 %v15424_v2  ;;  %v10472_v7 = vld [vmem:[#allocation4 + $0x1f8] sm:$0xff] }
 0x1d9   :  { %304 = vst [vmem:[#allocation2 + $0x339] sm:$0xff] %v10472_v7 }
 0x1da   :  { %1551 = vmatmul.mubr.f32.gmra.mrb[30].mxu0 %v10408_v30 }
 0x1db   :  { %1555 = vmatprep.mubr.f32.mxu0 %v10121_v35  ;;  %v10425_v35 = vld [vmem:[#allocation2 + $0xe2] sm:$0xff]  ;;  %8252 = vmatpush1.bf16.msra.mxu0 %v8251_v25  ;;  %v10490_v25 = vld [vmem:[#allocation2 + $0x1d2] sm:$0xff] }
 0x1dc   :  { %8253 = vmatprep.subr.bf16.mxu0 %v15424_v2 }
 0x1de   :  { %1556 = vmatmul.mubr.f32.gmra.mrb[32].mxu0 %v10412_v31 }
 0x1df   :  { %1560 = vmatprep.mubr.f32.mxu0 %v10128_v38  ;;  %v10429_v38 = vld [vmem:[#allocation2 + $0xf2] sm:$0xff] }
 0x1e2   :  { %1561 = vmatmul.mubr.f32.gmra.mrb[34].mxu0 %v10416_v32 }
 0x1e3   :  { %1565 = vmatprep.mubr.f32.mxu0 %v10135_v39  ;;  %v10433_v39 = vld [vmem:[#allocation2 + $0xfa] sm:$0xff] }
 0x1e6   :  { %1566 = vmatmul.mubr.f32.gmra.mrb[36].mxu0 %v10421_v33 }
 0x1e7   :  { %1570 = vmatprep.mubr.f32.mxu0 %v10142_v40  ;;  %v10438_v40 = vld [vmem:[#allocation2 + $0x10a] sm:$0xff] }
 0x1ea   :  { %1571 = vmatmul.mubr.f32.gmra.mrb[38].mxu0 %v10425_v35 }
 0x1eb   :  { %1575 = vmatprep.mubr.f32.mxu0 %v10150_v42  ;;  %v10442_v42 = vld [vmem:[#allocation2 + $0x112] sm:$0xff] }
 0x1ee   :  { %1576 = vmatmul.mubr.f32.gmra.mrb[40].mxu0 %v10429_v38 }
 0x1ef   :  { %1580 = vmatprep.mubr.f32.mxu0 %v10157_v45  ;;  %v10446_v45 = vld [vmem:[#allocation2 + $0x122] sm:$0xff] }
 0x1f2   :  { %1581 = vmatmul.mubr.f32.gmra.mrb[42].mxu0 %v10433_v39 }
 0x1f3   :  { %1585 = vmatprep.mubr.f32.mxu0 %v10164_v47  ;;  %v10450_v47 = vld [vmem:[#allocation2 + $0x12a] sm:$0xff] }
 0x1f6   :  { %1586 = vmatmul.mubr.f32.gmra.mrb[44].mxu0 %v10438_v40 }
 0x1f7   :  { %1590 = vmatprep.mubr.f32.mxu0 %v10171_v48  ;;  %v15433_v48 = vld [vmem:[#allocation18_spill] sm:$0xff] }
 0x1f8   :  { %15436 = vst [vmem:[#allocation18_spill] sm:$0xff] %v10472_v7  ;;  %v10594_v7 = vld [vmem:[#allocation2 + $0x30a] sm:$0xff] }
 0x1fa   :  { %1591 = vmatmul.mubr.f32.gmra.mrb[46].mxu0 %v10442_v42 }
 0x1fb   :  { %1595 = vmatprep.mubr.f32.mxu0 %v10179_v51  ;;  %v15434_v51 = vld [vmem:[#allocation19_spill] sm:$0xff] }
 0x1fe   :  { %1596 = vmatmul.mubr.f32.gmra.mrb[48].mxu0 %v10446_v45 }
 0x1ff   :  { %1600 = vmatprep.mubr.f32.mxu0 %v15432_v19  ;;  %v527_v19 = vld [vmem:[#allocation2 + $0x180] sm:$0xff] }
 0x202   :  { %1601 = vmatmul.mubr.f32.gmra.mrb[50].mxu0 %v10450_v47 }
 0x203   :  { %1605 = vmatprep.mubr.f32.mxu0 %v15433_v48  ;;  %v528_v48 = vld [vmem:[#allocation2 + $0x188] sm:$0xff] }
 0x206   :  { %1606 = vmatmul.mubr.f32.gmra.mrb[52].mxu0 %v10455_v26 }
 0x207   :  { %1610 = vmatprep.mubr.f32.mxu0 %v15434_v51  ;;  %v465_v51 = vld [vmem:[#allocation2 + $0x1b2] sm:$0xff] }
 0x20a   :  { %1611 = vmatmul.mubr.f32.gmra.mrb[54].mxu0 %v10459_v9 }
 0x20b   :  { %1615 = vmatprep.mubr.f32.mxu0 %v10208_v56  ;;  %v10477_v56 = vld [vmem:[#allocation2 + $0x16a] sm:$0xff] }
 0x20e   :  { %1616 = vmatmul.mubr.f32.gmra.mrb[56].mxu0 %v10463_v50 }
 0x20f   :  { %1620 = vmatprep.mubr.f32.mxu0 %v10212_v6  ;;  %v10480_v6 = vld [vmem:[#allocation2 + $0x172] sm:$0xff] }
 0x212   :  { %1621 = vmatmul.mubr.f32.gmra.mrb[58].mxu0 %v10470_v5 }
 0x213   :  { %1625 = vmatprep.mubr.f32.mxu0 %v527_v19  ;;  %v10578_v19 = vld [vmem:[#allocation2 + $0x2da] sm:$0xff] }
 0x216   :  { %1626 = vmatmul.mubr.f32.gmra.mrb[60].mxu0 %v10477_v56 }
 0x217   :  { %1630 = vmatprep.mubr.f32.mxu0 %v528_v48  ;;  %v10582_v48 = vld [vmem:[#allocation2 + $0x2ea] sm:$0xff] }
 0x21a   :  { %1631 = vmatmul.mubr.f32.gmra.mrb[62].mxu0 %v10480_v6 }
 0x21b   :  { %1635 = vmatprep.mubr.f32.mxu0 %v10216_v10  ;;  %v10494_v10 = vld [vmem:[#allocation2 + $0x1e2] sm:$0xff] }
 0x21e   :  { %1636 = vmatmul.mubr.f32.gmra.mrb[64].mxu0 %v465_v51  ;;  %v10586_v51 = vld [vmem:[#allocation2 + $0x2f2] sm:$0xff] }
 0x21f   :  { %1640 = vmatprep.mubr.f32.mxu0 %v10220_v14  ;;  %v10498_v14 = vld [vmem:[#allocation2 + $0x1ea] sm:$0xff] }
 0x222   :  { %1641 = vmatmul.mubr.f32.gmra.mrb[66].mxu0 %v466_v15  ;;  %v10590_v15 = vld [vmem:[#allocation2 + $0x302] sm:$0xff] }
 0x223   :  { %1645 = vmatprep.mubr.f32.mxu0 %v10224_v21  ;;  %v10502_v21 = vld [vmem:[#allocation2 + $0x1fa] sm:$0xff] }
 0x226   :  { %1646 = vmatmul.mubr.f32.gmra.mrb[68].mxu0 %v10486_v59 }
 0x227   :  { %1650 = vmatprep.mubr.f32.mxu0 %v10228_v60  ;;  %v10506_v60 = vld [vmem:[#allocation2 + $0x202] sm:$0xff] }
 0x22a   :  { %1651 = vmatmul.mubr.f32.gmra.mrb[70].mxu0 %v10490_v25 }
 0x22b   :  { %1655 = vmatprep.mubr.f32.mxu0 %v10232_v46  ;;  %v10510_v46 = vld [vmem:[#allocation2 + $0x212] sm:$0xff] }
 0x22e   :  { %1656 = vmatmul.mubr.f32.gmra.mrb[72].mxu0 %v10494_v10 }
 0x22f   :  { %1660 = vmatprep.mubr.f32.mxu0 %v10236_v54  ;;  %v10514_v54 = vld [vmem:[#allocation2 + $0x21a] sm:$0xff] }
 0x232   :  { %1661 = vmatmul.mubr.f32.gmra.mrb[74].mxu0 %v10498_v14 }
 0x233   :  { %1665 = vmatprep.mubr.f32.mxu0 %v10240_v61  ;;  %v10518_v61 = vld [vmem:[#allocation2 + $0x22a] sm:$0xff] }
 0x236   :  { %1666 = vmatmul.mubr.f32.gmra.mrb[76].mxu0 %v10502_v21 }
 0x237   :  { %1670 = vmatprep.mubr.f32.mxu0 %v10244_v3  ;;  %v10522_v3 = vld [vmem:[#allocation2 + $0x232] sm:$0xff] }
 0x23a   :  { %1671 = vmatmul.mubr.f32.gmra.mrb[78].mxu0 %v10506_v60 }
 0x23b   :  { %1675 = vmatprep.mubr.f32.mxu0 %v10248_v8  ;;  %v10526_v8 = vld [vmem:[#allocation2 + $0x242] sm:$0xff] }
 0x23e   :  { %1676 = vmatmul.mubr.f32.gmra.mrb[80].mxu0 %v10510_v46 }
 0x23f   :  { %1680 = vmatprep.mubr.f32.mxu0 %v10252_v13  ;;  %v10530_v13 = vld [vmem:[#allocation2 + $0x24a] sm:$0xff] }
 0x242   :  { %1681 = vmatmul.mubr.f32.gmra.mrb[82].mxu0 %v10514_v54 }
 0x243   :  { %1685 = vmatprep.mubr.f32.mxu0 %v10256_v24  ;;  %v10534_v24 = vld [vmem:[#allocation2 + $0x25a] sm:$0xff] }
 0x246   :  { %1686 = vmatmul.mubr.f32.gmra.mrb[84].mxu0 %v10518_v61 }
 0x247   :  { %1690 = vmatprep.mubr.f32.mxu0 %v10260_v37  ;;  %v10538_v37 = vld [vmem:[#allocation2 + $0x262] sm:$0xff] }
 0x24a   :  { %1691 = vmatmul.mubr.f32.gmra.mrb[86].mxu0 %v10522_v3 }
 0x24b   :  { %1695 = vmatprep.mubr.f32.mxu0 %v10264_v49  ;;  %v10542_v49 = vld [vmem:[#allocation2 + $0x272] sm:$0xff] }
 0x24e   :  { %1696 = vmatmul.mubr.f32.gmra.mrb[88].mxu0 %v10526_v8 }
 0x24f   :  { %1700 = vmatprep.mubr.f32.mxu0 %v10268_v58  ;;  %v10546_v58 = vld [vmem:[#allocation2 + $0x27a] sm:$0xff] }
 0x252   :  { %1701 = vmatmul.mubr.f32.gmra.mrb[90].mxu0 %v10530_v13 }
 0x253   :  { %1705 = vmatprep.mubr.f32.mxu0 %v10272_v17  ;;  %v10550_v17 = vld [vmem:[#allocation2 + $0x28a] sm:$0xff] }
 0x256   :  { %1706 = vmatmul.mubr.f32.gmra.mrb[92].mxu0 %v10534_v24 }
 0x257   :  { %1710 = vmatprep.mubr.f32.mxu0 %v10276_v28  ;;  %v10554_v28 = vld [vmem:[#allocation2 + $0x292] sm:$0xff] }
 0x25a   :  { %1711 = vmatmul.mubr.f32.gmra.mrb[94].mxu0 %v10538_v37 }
 0x25b   :  { %1715 = vmatprep.mubr.f32.mxu0 %v10280_v18  ;;  %v10558_v18 = vld [vmem:[#allocation2 + $0x2a2] sm:$0xff] }
 0x25e   :  { %1716 = vmatmul.mubr.f32.gmra.mrb[96].mxu0 %v10542_v49 }
 0x25f   :  { %1720 = vmatprep.mubr.f32.mxu0 %v10284_v11  ;;  %v10562_v11 = vld [vmem:[#allocation2 + $0x2aa] sm:$0xff] }
 0x262   :  { %1721 = vmatmul.mubr.f32.gmra.mrb[98].mxu0 %v10546_v58 }
 0x263   :  { %1725 = vmatprep.mubr.f32.mxu0 %v10288_v12  ;;  %v10566_v12 = vld [vmem:[#allocation2 + $0x2ba] sm:$0xff] }
 0x266   :  { %1726 = vmatmul.mubr.f32.gmra.mrb[100].mxu0 %v10550_v17 }
 0x267   :  { %1730 = vmatprep.mubr.f32.mxu0 %v10292_v20  ;;  %v10570_v20 = vld [vmem:[#allocation2 + $0x2c2] sm:$0xff] }
 0x26a   :  { %1731 = vmatmul.mubr.f32.gmra.mrb[102].mxu0 %v10554_v28 }
 0x26b   :  { %1735 = vmatprep.mubr.f32.mxu0 %v10296_v16  ;;  %v10574_v16 = vld [vmem:[#allocation2 + $0x2d2] sm:$0xff] }
 0x26c   :  { %15437 = vst [vmem:[#allocation19_spill] sm:$0xff] %v10574_v16 }
 0x26e   :  { %1736 = vmatmul.mubr.f32.gmra.mrb[104].mxu0 %v10558_v18 }
 0x26f   :  { %1740 = vmatprep.mubr.f32.mxu0 %v10300_v36  ;;  %v15438_v36 = vld [vmem:[#allocation20_spill] sm:$0xff] }
 0x270   :  { %15439 = vst [vmem:[#allocation20_spill] sm:$0xff] %v10578_v19 }
 0x272   :  { %1741 = vmatmul.mubr.f32.gmra.mrb[106].mxu0 %v10562_v11 }
 0x273   :  { %1745 = vmatprep.mubr.f32.mxu0 %v10304_v22  ;;  %v15440_v22 = vld [vmem:[#allocation21_spill] sm:$0xff] }
 0x274   :  { %15441 = vst [vmem:[#allocation21_spill] sm:$0xff] %v10582_v48 }
 0x276   :  { %1746 = vmatmul.mubr.f32.gmra.mrb[108].mxu0 %v10566_v12 }
 0x277   :  { %1750 = vmatprep.mubr.f32.mxu0 %v10308_v43  ;;  %v15442_v43 = vld [vmem:[#allocation23_spill] sm:$0xff] }
 0x278   :  { %15443 = vst [vmem:[#allocation23_spill] sm:$0xff] %v10586_v51 }
 0x27a   :  { %1751 = vmatmul.mubr.f32.gmra.mrb[110].mxu0 %v10570_v20 }
 0x27b   :  { %1755 = vmatprep.mubr.f32.mxu0 %v10312_v44  ;;  %v15444_v44 = vld [vmem:[#allocation25_spill] sm:$0xff] }
 0x27c   :  { %15445 = vst [vmem:[#allocation25_spill] sm:$0xff] %v10590_v15 }
 0x27e   :  { %1756 = vmatmul.mubr.f32.gmra.mrb[112].mxu0 %v10574_v16  ;;  %v981_v16 = vld [vmem:[#allocation7 + $0x318] sm:$0xff] }
 0x27f   :  { %1760 = vmatprep.mubr.f32.mxu0 %v15438_v36  ;;  %v15446_v36 = vld [vmem:[#allocation26_spill] sm:$0xff] }
 0x280   :  { %15447 = vst [vmem:[#allocation26_spill] sm:$0xff] %v10594_v7 }
 0x282   :  { %1761 = vmatmul.mubr.f32.gmra.mrb[114].mxu0 %v10578_v19  ;;  %v980_v19 = vld [vmem:[#allocation7 + $0x310] sm:$0xff] }
 0x283   :  { %1765 = vmatprep.mubr.f32.mxu0 %v15440_v22  ;;  %v559_v22 = vld [vmem:[#allocation2 + $0x330] sm:$0xff] }
 0x286   :  { %1766 = vmatmul.mubr.f32.gmra.mrb[116].mxu0 %v10582_v48  ;;  %v979_v48 = vld [vmem:[#allocation7 + $0x308] sm:$0xff] }
 0x287   :  { %1770 = vmatprep.mubr.f32.mxu0 %v15442_v43  ;;  %v560_v43 = vld [vmem:[#allocation2 + $0x338] sm:$0xff] }
 0x28a   :  { %1771 = vmatmul.mubr.f32.gmra.mrb[118].mxu0 %v10586_v51  ;;  %v10600_v51 = vld [vmem:[#allocation2 + $0x322] sm:$0xff] }
 0x28b   :  { %1775 = vmatprep.mubr.f32.mxu0 %v15444_v44  ;;  %15449 = vst [vmem:[#allocation28_spill] sm:$0xff] %v10600_v51  ;;  %v978_v44 = vld [vmem:[#allocation7 + $0x300] sm:$0xff] }
 0x28e   :  { %1776 = vmatmul.mubr.f32.gmra.mrb[120].mxu0 %v10590_v15  ;;  %v8254_v15 = vpack.c.bf16 %v979_v48, %v978_v44  ;;  %v984_v48 = vld [vmem:[#allocation7 + $0x330] sm:$0xff]  ;;  %v985_v44 = vld [vmem:[#allocation7 + $0x338] sm:$0xff] }
 0x28f   :  { %1780 = vmatprep.mubr.f32.mxu0 %v15446_v36  ;;  %v561_v36 = vld [vmem:[#allocation2 + $0x19] sm:$0xff] }
 0x292   :  { %1781 = vmatmul.mubr.f32.gmra.mrb[122].mxu0 %v10594_v7  ;;  %v8257_v7 = vpack.c.bf16 %v981_v16, %v980_v19  ;;  %v8263_v16 = vpack.c.bf16 %v985_v44, %v984_v48  ;;  %v986_v19 = vld [vmem:[#allocation7 + $0x340] sm:$0xff]  ;;  %v992_v44 = vld [vmem:[#allocation7 + $0x370] sm:$0xff] }
 0x293   :  { %1785 = vmatprep.mubr.f32.mxu0 %v559_v22  ;;  %v562_v22 = vld [vmem:[#allocation2 + $0x21] sm:$0xff] }
 0x296   :  { %1786 = vmatmul.mubr.f32.gmra.mrb[124].mxu0 %v10597_v52  ;;  %v983_v52 = vld [vmem:[#allocation7 + $0x328] sm:$0xff] }
 0x297   :  { %1790 = vmatprep.mubr.f32.mxu0 %v560_v43  ;;  %v982_v43 = vld [vmem:[#allocation7 + $0x320] sm:$0xff] }
 0x29a   :  { %1791 = vmatmul.mubr.f32.gmra.mrb[126].mxu0 %v10600_v51  ;;  %v10607_v51 = vld [vmem:[#allocation2 + $0x31] sm:$0xff] }
 0x29b   :  { %1860 = vmatprep.mubr.f32.mxu0 %v10345_v53  ;;  %v8260_v53 = vpack.c.bf16 %v983_v52, %v982_v43  ;;  %v10617_v52 = vld [vmem:[#allocation2 + $0x49] sm:$0xff]  ;;  %v990_v43 = vld [vmem:[#allocation7 + $0x360] sm:$0xff] }
 0x29e   :  { %1861 = vmatmul.mubr.f32.vlgmr.msra.gmra.mrb[0].mxu0 %v561_v36  ;;  %v10622_v36 = vld [vmem:[#allocation2 + $0x51] sm:$0xff] }
 0x29f   :  { %8255 = vmatpush1.bf16.msra.mxu0 %v8254_v15  ;;  %1865 = vmatprep.mubr.f32.mxu0 %v10350_v1  ;;  %v10612_v1 = vld [vmem:[#allocation2 + $0x39] sm:$0xff]  ;;  %v988_v15 = vld [vmem:[#allocation7 + $0x350] sm:$0xff] }
 0x2a0   :  { %8256 = vmatprep.subr.bf16.mxu0 %v15424_v2 }
 0x2a2   :  { %1866 = vmatmul.mubr.f32.gmra.mrb[2].mxu0 %v562_v22 }
 0x2a3   :  { %1870 = vmatprep.mubr.f32.mxu0 %v10355_v27  ;;  %8258 = vmatpush1.bf16.msra.mxu0 %v8257_v7  ;;  %v987_v27 = vld [vmem:[#allocation7 + $0x348] sm:$0xff] }
 0x2a4   :  { %8259 = vmatprep.subr.bf16.mxu0 %v15424_v2  ;;  %v8266_v7 = vpack.c.bf16 %v987_v27, %v986_v19  ;;  %v994_v27 = vld [vmem:[#allocation7 + $0x380] sm:$0xff] }
 0x2a6   :  { %1871 = vmatmul.mubr.f32.gmra.mrb[4].mxu0 %v10607_v51 }
 0x2a7   :  { %1875 = vmatprep.mubr.f32.mxu0 %v10360_v57  ;;  %8261 = vmatpush1.bf16.msra.mxu0 %v8260_v53  ;;  %v989_v57 = vld [vmem:[#allocation7 + $0x358] sm:$0xff]  ;;  %v10627_v53 = vld [vmem:[#allocation2 + $0x61] sm:$0xff] }
 0x2a8   :  { %8262 = vmatprep.subr.bf16.mxu0 %v15424_v2  ;;  %v8269_v22 = vpack.c.bf16 %v989_v57, %v988_v15  ;;  %v996_v57 = vld [vmem:[#allocation7 + $0x390] sm:$0xff] }
 0x2aa   :  { %1876 = vmatmul.mubr.f32.gmra.mrb[6].mxu0 %v10612_v1 }
 0x2ab   :  { %1880 = vmatprep.mubr.f32.mxu0 %v10365_v55  ;;  %8264 = vmatpush1.bf16.msra.mxu0 %v8263_v16  ;;  %v991_v55 = vld [vmem:[#allocation7 + $0x368] sm:$0xff] }
 0x2ac   :  { %8265 = vmatprep.subr.bf16.mxu0 %v15424_v2  ;;  %v8272_v48 = vpack.c.bf16 %v991_v55, %v990_v43  ;;  %v10632_v16 = vld [vmem:[#allocation2 + $0x69] sm:$0xff]  ;;  %v998_v55 = vld [vmem:[#allocation7 + $0x3a0] sm:$0xff] }
 0x2ae   :  { %1881 = vmatmul.mubr.f32.gmra.mrb[8].mxu0 %v10617_v52 }
 0x2af   :  { %1885 = vmatprep.mubr.f32.mxu0 %v10370_v29  ;;  %8267 = vmatpush1.bf16.msra.mxu0 %v8266_v7  ;;  %v993_v29 = vld [vmem:[#allocation7 + $0x378] sm:$0xff] }
 0x2b0   :  { %8268 = vmatprep.subr.bf16.mxu0 %v15424_v2  ;;  %v8275_v19 = vpack.c.bf16 %v993_v29, %v992_v44  ;;  %v10637_v7 = vld [vmem:[#allocation2 + $0x79] sm:$0xff]  ;;  %v1000_v29 = vld [vmem:[#allocation7 + $0x3b0] sm:$0xff] }
 0x2b2   :  { %1886 = vmatmul.mubr.f32.gmra.mrb[10].mxu0 %v10622_v36 }
 0x2b3   :  { %1890 = vmatprep.mubr.f32.mxu0 %v10375_v0  ;;  %8270 = vmatpush1.bf16.msra.mxu0 %v8269_v22  ;;  %v995_v0 = vld [vmem:[#allocation7 + $0x388] sm:$0xff] }
 0x2b4   :  { %8271 = vmatprep.subr.bf16.mxu0 %v15424_v2  ;;  %v8278_v15 = vpack.c.bf16 %v995_v0, %v994_v27  ;;  %v10642_v22 = vld [vmem:[#allocation2 + $0x81] sm:$0xff]  ;;  %v10661_v27 = vld [vmem:[#allocation2 + $0xb1] sm:$0xff] }
 0x2b5   :  { %v10666_v0 = vld [vmem:[#allocation2 + $0xc1] sm:$0xff] }
 0x2b6   :  { %1891 = vmatmul.mubr.f32.gmra.mrb[12].mxu0 %v10627_v53 }
 0x2b7   :  { %1895 = vmatprep.mubr.f32.mxu0 %v10380_v23  ;;  %8273 = vmatpush1.bf16.msra.mxu0 %v8272_v48  ;;  %v997_v23 = vld [vmem:[#allocation7 + $0x398] sm:$0xff] }
 0x2b8   :  { %8274 = vmatprep.subr.bf16.mxu0 %v15424_v2  ;;  %v8281_v43 = vpack.c.bf16 %v997_v23, %v996_v57  ;;  %v10647_v48 = vld [vmem:[#allocation2 + $0x91] sm:$0xff]  ;;  %v1003_v57 = vld [vmem:[#allocation7 + $0x3c8] sm:$0xff] }
 0x2ba   :  { %1896 = vmatmul.mubr.f32.gmra.mrb[14].mxu0 %v10632_v16 }
 0x2bb   :  { %1900 = vmatprep.mubr.f32.mxu0 %v10385_v34  ;;  %8276 = vmatpush1.bf16.msra.mxu0 %v8275_v19  ;;  %v999_v34 = vld [vmem:[#allocation7 + $0x3a8] sm:$0xff]  ;;  %v1001_v19 = vld [vmem:[#allocation7 + $0x3b8] sm:$0xff] }
 0x2bc   :  { %8277 = vmatprep.subr.bf16.mxu0 %v15424_v2  ;;  %v8284_v44 = vpack.c.bf16 %v999_v34, %v998_v55  ;;  %v1005_v55 = vld [vmem:[#allocation7 + $0x3d8] sm:$0xff] }
 0x2be   :  { %1901 = vmatmul.mubr.f32.gmra.mrb[16].mxu0 %v10637_v7 }
 0x2bf   :  { %1905 = vmatprep.mubr.f32.mxu0 %v10390_v62  ;;  %8279 = vmatpush1.bf16.msra.mxu0 %v8278_v15  ;;  %v10652_v62 = vld [vmem:[#allocation2 + $0x99] sm:$0xff] }
 0x2c0   :  { %8280 = vmatprep.subr.bf16.mxu0 %v15424_v2  ;;  %v1002_v15 = vld [vmem:[#allocation7 + $0x3c0] sm:$0xff] }
 0x2c1   :  { %v8290_v23 = vpack.c.bf16 %v1003_v57, %v1002_v15  ;;  %v1009_v15 = vld [vmem:[#allocation7 + $0x3f8] sm:$0xff] }
 0x2c2   :  { %1906 = vmatmul.mubr.f32.gmra.mrb[18].mxu0 %v10642_v22 }
 0x2c3   :  { %1910 = vmatprep.mubr.f32.mxu0 %v10395_v63  ;;  %8282 = vmatpush1.bf16.msra.mxu0 %v8281_v43  ;;  %v10657_v63 = vld [vmem:[#allocation2 + $0xa9] sm:$0xff] }
 0x2c4   :  { %8283 = vmatprep.subr.bf16.mxu0 %v15424_v2  ;;  %v1004_v43 = vld [vmem:[#allocation7 + $0x3d0] sm:$0xff] }
 0x2c5   :  { %v8293_v34 = vpack.c.bf16 %v1005_v55, %v1004_v43  ;;  %v15451_v43 = vld [vmem:[#allocation24_spill] sm:$0xff]  ;;  %v1010_v55 = vld [vmem:[#allocation7 + $0x400] sm:$0xff] }
 0x2c6   :  { %1911 = vmatmul.mubr.f32.gmra.mrb[20].mxu0 %v10647_v48 }
 0x2c7   :  { %1915 = vmatprep.mubr.f32.mxu0 %v10399_v4  ;;  %8285 = vmatpush1.bf16.msra.mxu0 %v8284_v44  ;;  %v8287_v4 = vpack.c.bf16 %v1001_v19, %v1000_v29  ;;  %v1006_v44 = vld [vmem:[#allocation7 + $0x3e0] sm:$0xff]  ;;  %v1007_v29 = vld [vmem:[#allocation7 + $0x3e8] sm:$0xff] }
 0x2c8   :  { %8286 = vmatprep.subr.bf16.mxu0 %v15424_v2  ;;  %v8296_v19 = vpack.c.bf16 %v1007_v29, %v1006_v44  ;;  %v594_v44 = vld [vmem:[#allocation2 + $0x1d1] sm:$0xff] }
 0x2ca   :  { %1916 = vmatmul.mubr.f32.gmra.mrb[22].mxu0 %v10652_v62 }
 0x2cb   :  { %1920 = vmatprep.mubr.f32.mxu0 %v10404_v41  ;;  %8288 = vmatpush1.bf16.msra.mxu0 %v8287_v4  ;;  %v10670_v41 = vld [vmem:[#allocation2 + $0xc9] sm:$0xff] }
 0x2cc   :  { %8289 = vmatprep.subr.bf16.mxu0 %v15424_v2  ;;  %v1008_v4 = vld [vmem:[#allocation7 + $0x3f0] sm:$0xff] }
 0x2cd   :  { %v8299_v57 = vpack.c.bf16 %v1009_v15, %v1008_v4  ;;  %v10760_v4 = vld [vmem:[#allocation2 + $0x201] sm:$0xff]  ;;  %v1013_v15 = vld [vmem:[#allocation7 + $0x418] sm:$0xff] }
 0x2ce   :  { %1921 = vmatmul.mubr.f32.gmra.mrb[24].mxu0 %v10657_v63 }
 0x2cf   :  { %1925 = vmatprep.mubr.f32.mxu0 %v10408_v30  ;;  %v10674_v30 = vld [vmem:[#allocation2 + $0xd9] sm:$0xff]  ;;  %8291 = vmatpush1.bf16.msra.mxu0 %v8290_v23  ;;  %v10731_v23 = vld [vmem:[#allocation2 + $0x182] sm:$0xff] }
 0x2d0   :  { %8292 = vmatprep.subr.bf16.mxu0 %v15424_v2 }
 0x2d2   :  { %1926 = vmatmul.mubr.f32.gmra.mrb[26].mxu0 %v10661_v27 }
 0x2d3   :  { %1930 = vmatprep.mubr.f32.mxu0 %v10412_v31  ;;  %v10678_v31 = vld [vmem:[#allocation2 + $0xe1] sm:$0xff]  ;;  %8294 = vmatpush1.bf16.msra.mxu0 %v8293_v34 }
 0x2d4   :  { %8295 = vmatprep.subr.bf16.mxu0 %v15424_v2  ;;  %v1011_v34 = vld [vmem:[#allocation7 + $0x408] sm:$0xff] }
 0x2d5   :  { %v10742_v29 = vpack.c.bf16 %v1011_v34, %v1010_v55  ;;  %v1017_v55 = vld [vmem:[#allocation7 + $0x438] sm:$0xff] }
 0x2d6   :  { %1931 = vmatmul.mubr.f32.gmra.mrb[28].mxu0 %v10666_v0 }
 0x2d7   :  { %1935 = vmatprep.mubr.f32.mxu0 %v10416_v32  ;;  %v10683_v32 = vld [vmem:[#allocation2 + $0xf1] sm:$0xff]  ;;  %8297 = vmatpush1.bf16.msra.mxu0 %v8296_v19  ;;  %v10748_v19 = vld [vmem:[#allocation2 + $0x1e1] sm:$0xff] }
 0x2d8   :  { %8298 = vmatprep.subr.bf16.mxu0 %v15424_v2  ;;  %8589 = vmatprep.subr.bf16.mxu1 %v10742_v29 }
 0x2d9   :  { %8597 = vmatpush3.bf16.msra.mxu1 %v10742_v29 }
 0x2da   :  { %1936 = vmatmul.mubr.f32.gmra.mrb[30].mxu0 %v10670_v41 }
 0x2db   :  { %1940 = vmatprep.mubr.f32.mxu0 %v10421_v33  ;;  %v10687_v33 = vld [vmem:[#allocation2 + $0xf9] sm:$0xff]  ;;  %8300 = vmatpush1.bf16.msra.mxu0 %v8299_v57 }
 0x2dc   :  { %8302 = vmatprep.subr.bf16.mxu0 %v10742_v29 }
 0x2de   :  { %1941 = vmatmul.mubr.f32.gmra.mrb[32].mxu0 %v10674_v30 }
 0x2df   :  { %1945 = vmatprep.mubr.f32.mxu0 %v10425_v35  ;;  %v10691_v35 = vld [vmem:[#allocation2 + $0x109] sm:$0xff] }
 0x2e2   :  { %1946 = vmatmul.mubr.f32.gmra.mrb[34].mxu0 %v10678_v31 }
 0x2e3   :  { %1950 = vmatprep.mubr.f32.mxu0 %v10429_v38  ;;  %v10695_v38 = vld [vmem:[#allocation2 + $0x111] sm:$0xff] }
 0x2e6   :  { %1951 = vmatmul.mubr.f32.gmra.mrb[36].mxu0 %v10683_v32 }
 0x2e7   :  { %1955 = vmatprep.mubr.f32.mxu0 %v10433_v39  ;;  %v10700_v39 = vld [vmem:[#allocation2 + $0x121] sm:$0xff] }
 0x2ea   :  { %1956 = vmatmul.mubr.f32.gmra.mrb[38].mxu0 %v10687_v33 }
 0x2eb   :  { %1960 = vmatprep.mubr.f32.mxu0 %v10438_v40  ;;  %v10704_v40 = vld [vmem:[#allocation2 + $0x129] sm:$0xff] }
 0x2ee   :  { %1961 = vmatmul.mubr.f32.gmra.mrb[40].mxu0 %v10691_v35 }
 0x2ef   :  { %1965 = vmatprep.mubr.f32.mxu0 %v10442_v42  ;;  %v10708_v42 = vld [vmem:[#allocation2 + $0x139] sm:$0xff] }
 0x2f2   :  { %1966 = vmatmul.mubr.f32.gmra.mrb[42].mxu0 %v10695_v38 }
 0x2f3   :  { %1970 = vmatprep.mubr.f32.mxu0 %v10446_v45  ;;  %v10712_v45 = vld [vmem:[#allocation2 + $0x141] sm:$0xff] }
 0x2f6   :  { %1971 = vmatmul.mubr.f32.gmra.mrb[44].mxu0 %v10700_v39 }
 0x2f7   :  { %1975 = vmatprep.mubr.f32.mxu0 %v10450_v47  ;;  %v10717_v47 = vld [vmem:[#allocation2 + $0x151] sm:$0xff] }
 0x2fa   :  { %1976 = vmatmul.mubr.f32.gmra.mrb[46].mxu0 %v10704_v40 }
 0x2fb   :  { %1980 = vmatprep.mubr.f32.mxu0 %v10455_v26  ;;  %v10721_v26 = vld [vmem:[#allocation2 + $0x159] sm:$0xff] }
 0x2fe   :  { %1981 = vmatmul.mubr.f32.gmra.mrb[48].mxu0 %v10708_v42 }
 0x2ff   :  { %1985 = vmatprep.mubr.f32.mxu0 %v10459_v9  ;;  %v10725_v9 = vld [vmem:[#allocation2 + $0x169] sm:$0xff] }
 0x302   :  { %1986 = vmatmul.mubr.f32.gmra.mrb[50].mxu0 %v10712_v45 }
 0x303   :  { %1990 = vmatprep.mubr.f32.mxu0 %v10463_v50  ;;  %v10729_v50 = vld [vmem:[#allocation2 + $0x171] sm:$0xff] }
 0x306   :  { %1991 = vmatmul.mubr.f32.gmra.mrb[52].mxu0 %v10717_v47 }
 0x307   :  { %1995 = vmatprep.mubr.f32.mxu0 %v10470_v5  ;;  %v10735_v5 = vld [vmem:[#allocation2 + $0x18a] sm:$0xff] }
 0x30a   :  { %1996 = vmatmul.mubr.f32.gmra.mrb[54].mxu0 %v10721_v26 }
 0x30b   :  { %2000 = vmatprep.mubr.f32.mxu0 %v10477_v56  ;;  %v15450_v56 = vld [vmem:[#allocation22_spill] sm:$0xff] }
 0x30e   :  { %2001 = vmatmul.mubr.f32.gmra.mrb[56].mxu0 %v10725_v9 }
 0x30f   :  { %2005 = vmatprep.mubr.f32.mxu0 %v10480_v6  ;;  %v593_v6 = vld [vmem:[#allocation2 + $0x1c9] sm:$0xff] }
 0x312   :  { %2006 = vmatmul.mubr.f32.gmra.mrb[58].mxu0 %v10729_v50 }
 0x313   :  { %2010 = vmatprep.mubr.f32.mxu0 %v10731_v23 }
 0x316   :  { %2011 = vmatmul.mubr.f32.gmra.mrb[60].mxu0 %v15450_v56  ;;  %v10796_v56 = vld [vmem:[#allocation2 + $0x261] sm:$0xff] }
 0x317   :  { %2015 = vmatprep.mubr.f32.mxu0 %v10735_v5 }
 0x31a   :  { %2016 = vmatmul.mubr.f32.gmra.mrb[62].mxu0 %v15451_v43  ;;  %v1015_v43 = vld [vmem:[#allocation7 + $0x428] sm:$0xff] }
 0x31b   :  { %2020 = vmatprep.mubr.f32.mxu0 %v10486_v59  ;;  %v10752_v59 = vld [vmem:[#allocation2 + $0x1e9] sm:$0xff] }
 0x31e   :  { %2021 = vmatmul.mubr.f32.gmra.mrb[64].mxu0 %v593_v6 }
 0x31f   :  { %2025 = vmatprep.mubr.f32.mxu0 %v10490_v25  ;;  %v10756_v25 = vld [vmem:[#allocation2 + $0x1f9] sm:$0xff] }
 0x322   :  { %2026 = vmatmul.mubr.f32.gmra.mrb[66].mxu0 %v594_v44  ;;  %v1018_v44 = vld [vmem:[#allocation7 + $0x440] sm:$0xff] }
 0x323   :  { %2030 = vmatprep.mubr.f32.mxu0 %v10494_v10  ;;  %v10764_v10 = vld [vmem:[#allocation2 + $0x211] sm:$0xff] }
 0x326   :  { %2031 = vmatmul.mubr.f32.gmra.mrb[68].mxu0 %v10748_v19 }
 0x327   :  { %2035 = vmatprep.mubr.f32.mxu0 %v10498_v14  ;;  %v10768_v14 = vld [vmem:[#allocation2 + $0x219] sm:$0xff] }
 0x32a   :  { %2036 = vmatmul.mubr.f32.gmra.mrb[70].mxu0 %v10752_v59 }
 0x32b   :  { %2040 = vmatprep.mubr.f32.mxu0 %v10502_v21  ;;  %v10772_v21 = vld [vmem:[#allocation2 + $0x229] sm:$0xff] }
 0x32e   :  { %2041 = vmatmul.mubr.f32.gmra.mrb[72].mxu0 %v10756_v25 }
 0x32f   :  { %2045 = vmatprep.mubr.f32.mxu0 %v10506_v60  ;;  %v1012_v60 = vld [vmem:[#allocation7 + $0x410] sm:$0xff] }
 0x330   :  { %v10778_v57 = vpack.c.bf16 %v1013_v15, %v1012_v60  ;;  %v10832_v60 = vld [vmem:[#allocation2 + $0x2b9] sm:$0xff] }
 0x331   :  { %15454 = vst [vmem:[#allocation29_spill] sm:$0xff] %v10832_v60 }
 0x332   :  { %2046 = vmatmul.mubr.f32.gmra.mrb[74].mxu0 %v10760_v4  ;;  %8590 = vmatprep.subr.bf16.mxu1 %v10778_v57 }
 0x333   :  { %2050 = vmatprep.mubr.f32.mxu0 %v10510_v46  ;;  %v10776_v46 = vld [vmem:[#allocation2 + $0x231] sm:$0xff]  ;;  %8598 = vmatpush3.bf16.msra.mxu1 %v10778_v57 }
 0x336   :  { %2051 = vmatmul.mubr.f32.gmra.mrb[76].mxu0 %v10764_v10 }
 0x337   :  { %2055 = vmatprep.mubr.f32.mxu0 %v10514_v54  ;;  %v10784_v54 = vld [vmem:[#allocation2 + $0x241] sm:$0xff] }
 0x33a   :  { %2056 = vmatmul.mubr.f32.gmra.mrb[78].mxu0 %v10768_v14 }
 0x33b   :  { %2060 = vmatprep.mubr.f32.mxu0 %v10518_v61  ;;  %v10788_v61 = vld [vmem:[#allocation2 + $0x249] sm:$0xff] }
 0x33e   :  { %2061 = vmatmul.mubr.f32.gmra.mrb[80].mxu0 %v10772_v21 }
 0x33f   :  { %2065 = vmatprep.mubr.f32.mxu0 %v10522_v3  ;;  %v10792_v3 = vld [vmem:[#allocation2 + $0x259] sm:$0xff] }
 0x342   :  { %2066 = vmatmul.mubr.f32.gmra.mrb[82].mxu0 %v10776_v46 }
 0x343   :  { %2070 = vmatprep.mubr.f32.mxu0 %v10526_v8  ;;  %v10800_v8 = vld [vmem:[#allocation2 + $0x271] sm:$0xff] }
 0x346   :  { %2071 = vmatmul.mubr.f32.gmra.mrb[84].mxu0 %v10784_v54 }
 0x347   :  { %2075 = vmatprep.mubr.f32.mxu0 %v10530_v13  ;;  %v10804_v13 = vld [vmem:[#allocation2 + $0x279] sm:$0xff] }
 0x34a   :  { %2076 = vmatmul.mubr.f32.gmra.mrb[86].mxu0 %v10788_v61 }
 0x34b   :  { %2080 = vmatprep.mubr.f32.mxu0 %v10534_v24  ;;  %v10808_v24 = vld [vmem:[#allocation2 + $0x289] sm:$0xff] }
 0x34e   :  { %2081 = vmatmul.mubr.f32.gmra.mrb[88].mxu0 %v10792_v3 }
 0x34f   :  { %2085 = vmatprep.mubr.f32.mxu0 %v10538_v37  ;;  %v1014_v37 = vld [vmem:[#allocation7 + $0x420] sm:$0xff] }
 0x350   :  { %v10814_v6 = vpack.c.bf16 %v1015_v43, %v1014_v37  ;;  %v1021_v37 = vld [vmem:[#allocation7 + $0x458] sm:$0xff]  ;;  %v10840_v43 = vld [vmem:[#allocation2 + $0x2c1] sm:$0xff] }
 0x351   :  { %15455 = vst [vmem:[#allocation30_spill] sm:$0xff] %v10840_v43 }
 0x352   :  { %2086 = vmatmul.mubr.f32.gmra.mrb[90].mxu0 %v10796_v56  ;;  %8591 = vmatprep.subr.bf16.mxu1 %v10814_v6 }
 0x353   :  { %2090 = vmatprep.mubr.f32.mxu0 %v10542_v49  ;;  %v10812_v49 = vld [vmem:[#allocation2 + $0x291] sm:$0xff]  ;;  %8599 = vmatpush3.bf16.msra.mxu1 %v10814_v6 }
 0x356   :  { %2091 = vmatmul.mubr.f32.gmra.mrb[92].mxu0 %v10800_v8 }
 0x357   :  { %2095 = vmatprep.mubr.f32.mxu0 %v10546_v58  ;;  %v10820_v58 = vld [vmem:[#allocation2 + $0x2a1] sm:$0xff] }
 0x358   :  { %15452 = vst [vmem:[#allocation22_spill] sm:$0xff] %v10820_v58 }
 0x35a   :  { %2096 = vmatmul.mubr.f32.gmra.mrb[94].mxu0 %v10804_v13 }
 0x35b   :  { %2100 = vmatprep.mubr.f32.mxu0 %v10550_v17  ;;  %v1016_v17 = vld [vmem:[#allocation7 + $0x430] sm:$0xff] }
 0x35c   :  { %v10826_v34 = vpack.c.bf16 %v1017_v55, %v1016_v17  ;;  %v1023_v55 = vld [vmem:[#allocation7 + $0x468] sm:$0xff] }
 0x35e   :  { %2101 = vmatmul.mubr.f32.gmra.mrb[96].mxu0 %v10808_v24  ;;  %8592 = vmatprep.subr.bf16.mxu1 %v10826_v34 }
 0x35f   :  { %2105 = vmatprep.mubr.f32.mxu0 %v10554_v28  ;;  %v10824_v28 = vld [vmem:[#allocation2 + $0x2a9] sm:$0xff]  ;;  %8600 = vmatpush3.bf16.msra.mxu1 %v10826_v34 }
 0x360   :  { %15453 = vst [vmem:[#allocation24_spill] sm:$0xff] %v10824_v28 }
 0x362   :  { %2106 = vmatmul.mubr.f32.gmra.mrb[98].mxu0 %v10812_v49 }
 0x363   :  { %2110 = vmatprep.mubr.f32.mxu0 %v10558_v18  ;;  %v1019_v18 = vld [vmem:[#allocation7 + $0x448] sm:$0xff] }
 0x364   :  { %v10834_v15 = vpack.c.bf16 %v1019_v18, %v1018_v44  ;;  %v15456_v44 = vld [vmem:[#allocation19_spill] sm:$0xff] }
 0x365   :  { %v10848_v18 = vld [vmem:[#allocation2 + $0x2d1] sm:$0xff] }
 0x366   :  { %2111 = vmatmul.mubr.f32.gmra.mrb[100].mxu0 %v10820_v58  ;;  %8593 = vmatprep.subr.bf16.mxu1 %v10834_v15  ;;  %15457 = vst [vmem:[#allocation19_spill] sm:$0xff] %v10848_v18  ;;  %v10873_v58 = vld [vmem:[#allocation2 + $0x301] sm:$0xff] }
 0x367   :  { %2115 = vmatprep.mubr.f32.mxu0 %v10562_v11  ;;  %8601 = vmatpush3.bf16.msra.mxu1 %v10834_v15  ;;  %v1020_v11 = vld [vmem:[#allocation7 + $0x450] sm:$0xff] }
 0x368   :  { %v10842_v17 = vpack.c.bf16 %v1021_v37, %v1020_v11  ;;  %v1025_v11 = vld [vmem:[#allocation7 + $0x478] sm:$0xff] }
 0x369   :  { %v15458_v37 = vld [vmem:[#allocation20_spill] sm:$0xff] }
 0x36a   :  { %2116 = vmatmul.mubr.f32.gmra.mrb[102].mxu0 %v10824_v28  ;;  %8594 = vmatprep.subr.bf16.mxu1 %v10842_v17 }
 0x36b   :  { %2120 = vmatprep.mubr.f32.mxu0 %v10566_v12  ;;  %8602 = vmatpush3.bf16.msra.mxu1 %v10842_v17  ;;  %v1022_v12 = vld [vmem:[#allocation7 + $0x460] sm:$0xff] }
 0x36e   :  { %2121 = vmatmul.mubr.f32.gmra.mrb[104].mxu0 %v10832_v60  ;;  %v10850_v60 = vpack.c.bf16 %v1023_v55, %v1022_v12  ;;  %v842_v12 = vld [vmem:[#allocation2 + $0x152] sm:$0xff]  ;;  %v15460_v55 = vld [vmem:[#allocation21_spill] sm:$0xff] }
 0x36f   :  { %2125 = vmatprep.mubr.f32.mxu0 %v10570_v20  ;;  %v1024_v20 = vld [vmem:[#allocation7 + $0x470] sm:$0xff]  ;;  %7793 = vmatprep.mubr.f32.mxu1 %v842_v12 }
 0x370   :  { %8595 = vmatprep.subr.bf16.mxu1 %v10850_v60  ;;  %v10858_v28 = vpack.c.bf16 %v1025_v11, %v1024_v20  ;;  %v15461_v20 = vld [vmem:[#allocation23_spill] sm:$0xff] }
 0x371   :  { %8603 = vmatpush3.bf16.msra.mxu1 %v10850_v60  ;;  %v10869_v11 = vld [vmem:[#allocation2 + $0x2f1] sm:$0xff]  ;;  %v10878_v12 = vld [vmem:[#allocation2 + $0x309] sm:$0xff] }
 0x372   :  { %2126 = vmatmul.mubr.f32.gmra.mrb[106].mxu0 %v10840_v43  ;;  %v10856_v43 = vld [vmem:[#allocation2 + $0x2d9] sm:$0xff]  ;;  %8596 = vmatprep.subr.bf16.mxu1 %v10858_v28  ;;  %15464 = vst [vmem:[#allocation21_spill] sm:$0xff] %v10878_v12 }
 0x373   :  { %2130 = vmatprep.mubr.f32.mxu0 %v15456_v44  ;;  %15459 = vst [vmem:[#allocation20_spill] sm:$0xff] %v10856_v43  ;;  %v10864_v44 = vld [vmem:[#allocation2 + $0x2e9] sm:$0xff] }
 0x375   :  { %8604 = vmatpush3.bf16.msra.mxu1 %v10858_v28 }
 0x376   :  { %2131 = vmatmul.mubr.f32.gmra.mrb[108].mxu0 %v10848_v18  ;;  %v843_v18 = vld [vmem:[#allocation2 + $0x15a] sm:$0xff]  ;;  %8333 = vmatprep.subr.bf16.mxu1 %v15424_v2 }
 0x377   :  { %2135 = vmatprep.mubr.f32.mxu0 %v15458_v37  ;;  %v844_v37 = vld [vmem:[#allocation2 + $0x16a] sm:$0xff]  ;;  %v10893_v2 = vld [vmem:[#allocation2 + $0x33a] sm:$0xff] }
 0x378   :  { %7794 = vmatmul.mubr.f32.vlgmr.msra.gmra.mrb[0].mxu1 %v843_v18  ;;  %v15463_v18 = vld [vmem:[#allocation26_spill] sm:$0xff] }
 0x379   :  { %7796 = vmatprep.mubr.f32.mxu1 %v844_v37  ;;  %v15467_v37 = vld [vmem:[#allocation28_spill] sm:$0xff] }
 0x37a   :  { %2136 = vmatmul.mubr.f32.gmra.mrb[110].mxu0 %v10856_v43  ;;  %v15462_v43 = vld [vmem:[#allocation25_spill] sm:$0xff] }
 0x37b   :  { %2140 = vmatprep.mubr.f32.mxu0 %v15460_v55  ;;  %v845_v55 = vld [vmem:[#allocation2 + $0x172] sm:$0xff] }
 0x37c   :  { %7797 = vmatmul.mubr.f32.gmra.mrb[2].mxu1 %v845_v55  ;;  %v10887_v55 = vld [vmem:[#allocation2 + $0x321] sm:$0xff] }
 0x37d   :  { %7799 = vmatprep.mubr.f32.mxu1 %v10731_v23  ;;  %15468 = vst [vmem:[#allocation25_spill] sm:$0xff] %v10887_v55  ;;  %v10889_v23 = vld [vmem:[#allocation2 + $0x332] sm:$0xff] }
 0x37e   :  { %2141 = vmatmul.mubr.f32.gmra.mrb[112].mxu0 %v10864_v44 }
 0x37f   :  { %2145 = vmatprep.mubr.f32.mxu0 %v15461_v20  ;;  %v15465_v20 = vld [vmem:[#allocation27_spill] sm:$0xff] }
 0x380   :  { %7800 = vmatmul.mubr.f32.gmra.mrb[4].mxu1 %v10735_v5  ;;  %v849_v5 = vld [vmem:[#allocation2 + $0x1a2] sm:$0xff] }
 0x382   :  { %2146 = vmatmul.mubr.f32.gmra.mrb[114].mxu0 %v10869_v11 }
 0x383   :  { %2150 = vmatprep.mubr.f32.mxu0 %v15462_v43  ;;  %v10883_v43 = vld [vmem:[#allocation2 + $0x319] sm:$0xff] }
 0x384   :  { %15466 = vst [vmem:[#allocation23_spill] sm:$0xff] %v10883_v43 }
 0x386   :  { %2151 = vmatmul.mubr.f32.gmra.mrb[116].mxu0 %v10873_v58 }
 0x387   :  { %2155 = vmatprep.mubr.f32.mxu0 %v15463_v18  ;;  %v848_v18 = vld [vmem:[#allocation2 + $0x19a] sm:$0xff] }
 0x388   :  { %7802 = vmatprep.mubr.f32.mxu1 %v848_v18  ;;  %v691_v18 = vld [vmem:[#allocation2 + $0x38] sm:$0xff] }
 0x389   :  { %7803 = vmatmul.mubr.f32.gmra.mrb[6].mxu1 %v849_v5  ;;  %v852_v5 = vld [vmem:[#allocation2 + $0x1fa] sm:$0xff] }
 0x38a   :  { %2156 = vmatmul.mubr.f32.gmra.mrb[118].mxu0 %v10878_v12  ;;  %v690_v12 = vld [vmem:[#allocation2 + $0x30] sm:$0xff] }
 0x38b   :  { %2160 = vmatprep.mubr.f32.mxu0 %v15465_v20  ;;  %v15469_v20 = vld [vmem:[#allocation17_spill] sm:$0xff] }
 0x38e   :  { %2161 = vmatmul.mubr.f32.gmra.mrb[120].mxu0 %v10883_v43  ;;  %v15470_v43 = vld [vmem:[#allocation18_spill] sm:$0xff] }
 0x38f   :  { %2165 = vmatprep.mubr.f32.mxu0 %v15467_v37  ;;  %v850_v37 = vld [vmem:[#allocation2 + $0x1e2] sm:$0xff] }
 0x390   :  { %7805 = vmatprep.mubr.f32.mxu1 %v850_v37  ;;  %v864_v37 = vld [vmem:[#allocation2 + $0x28a] sm:$0xff] }
 0x392   :  { %2166 = vmatmul.mubr.f32.gmra.mrb[122].mxu0 %v10887_v55  ;;  %v851_v55 = vld [vmem:[#allocation2 + $0x1ea] sm:$0xff] }
 0x393   :  { %2170 = vmatprep.mubr.f32.mxu0 %v10889_v23  ;;  %7806 = vmatmul.mubr.f32.gmra.mrb[8].mxu1 %v851_v55  ;;  %v861_v55 = vld [vmem:[#allocation2 + $0x262] sm:$0xff] }
 0x394   :  { %7808 = vmatprep.mubr.f32.mxu1 %v852_v5  ;;  %v866_v5 = vld [vmem:[#allocation2 + $0x2a2] sm:$0xff] }
 0x396   :  { %2171 = vmatmul.mubr.f32.gmra.mrb[124].mxu0 %v15469_v20  ;;  %v862_v20 = vld [vmem:[#allocation2 + $0x272] sm:$0xff] }
 0x397   :  { %2175 = vmatprep.mubr.f32.mxu0 %v10893_v2 }
 0x39a   :  { %2176 = vmatmul.mubr.f32.gmra.mrb[126].mxu0 %v15470_v43  ;;  %v692_v43 = vld [vmem:[#allocation2 + $0x48] sm:$0xff] }
 0x39b   :  { %2245 = vmatprep.mubr.f32.mxu0 %v10607_v51  ;;  %v853_v51 = vld [vmem:[#allocation2 + $0x202] sm:$0xff] }
 0x39c   :  { %7809 = vmatmul.mubr.f32.gmra.mrb[10].mxu1 %v853_v51  ;;  %v868_v51 = vld [vmem:[#allocation2 + $0x2ba] sm:$0xff] }
 0x39e   :  { %2246 = vmatmul.mubr.f32.vlgmr.msra.gmra.mrb[0].mxu0 %v690_v12  ;;  %v859_v12 = vld [vmem:[#allocation2 + $0x24a] sm:$0xff] }
 0x39f   :  { %8304 = vmatpush3.bf16.msra.mxu0 %v10742_v29  ;;  %2250 = vmatprep.mubr.f32.mxu0 %v10612_v1  ;;  %v693_v29 = vld [vmem:[#allocation2 + $0x50] sm:$0xff] }
 0x3a0   :  { %8306 = vmatprep.subr.bf16.mxu0 %v10778_v57  ;;  %v854_v1 = vld [vmem:[#allocation2 + $0x212] sm:$0xff] }
 0x3a1   :  { %7811 = vmatprep.mubr.f32.mxu1 %v854_v1  ;;  %v870_v1 = vld [vmem:[#allocation2 + $0x2d2] sm:$0xff] }
 0x3a2   :  { %2251 = vmatmul.mubr.f32.gmra.mrb[2].mxu0 %v691_v18  ;;  %v704_v18 = vld [vmem:[#allocation2 + $0xd8] sm:$0xff] }
 0x3a3   :  { %2255 = vmatprep.mubr.f32.mxu0 %v10617_v52  ;;  %8308 = vmatpush3.bf16.msra.mxu0 %v10778_v57  ;;  %v694_v52 = vld [vmem:[#allocation2 + $0x60] sm:$0xff] }
 0x3a4   :  { %8310 = vmatprep.subr.bf16.mxu0 %v10814_v6  ;;  %v855_v57 = vld [vmem:[#allocation2 + $0x21a] sm:$0xff] }
 0x3a5   :  { %7812 = vmatmul.mubr.f32.gmra.mrb[12].mxu1 %v855_v57  ;;  %v872_v57 = vld [vmem:[#allocation2 + $0x2ea] sm:$0xff] }
 0x3a6   :  { %2256 = vmatmul.mubr.f32.gmra.mrb[4].mxu0 %v692_v43  ;;  %v706_v43 = vld [vmem:[#allocation2 + $0xf0] sm:$0xff] }
 0x3a7   :  { %2260 = vmatprep.mubr.f32.mxu0 %v10622_v36  ;;  %8312 = vmatpush3.bf16.msra.mxu0 %v10814_v6  ;;  %v695_v36 = vld [vmem:[#allocation2 + $0x68] sm:$0xff] }
 0x3a8   :  { %8314 = vmatprep.subr.bf16.mxu0 %v10826_v34  ;;  %v856_v6 = vld [vmem:[#allocation2 + $0x22a] sm:$0xff] }
 0x3a9   :  { %7814 = vmatprep.mubr.f32.mxu1 %v856_v6  ;;  %v874_v6 = vld [vmem:[#allocation2 + $0x302] sm:$0xff] }
 0x3aa   :  { %2261 = vmatmul.mubr.f32.gmra.mrb[6].mxu0 %v693_v29  ;;  %v708_v29 = vld [vmem:[#allocation2 + $0x108] sm:$0xff] }
 0x3ab   :  { %2265 = vmatprep.mubr.f32.mxu0 %v10627_v53  ;;  %8316 = vmatpush3.bf16.msra.mxu0 %v10826_v34  ;;  %v696_v53 = vld [vmem:[#allocation2 + $0x78] sm:$0xff] }
 0x3ac   :  { %8318 = vmatprep.subr.bf16.mxu0 %v10834_v15  ;;  %v857_v34 = vld [vmem:[#allocation2 + $0x232] sm:$0xff] }
 0x3ad   :  { %7815 = vmatmul.mubr.f32.gmra.mrb[14].mxu1 %v857_v34  ;;  %v876_v34 = vld [vmem:[#allocation2 + $0x31a] sm:$0xff] }
 0x3ae   :  { %2266 = vmatmul.mubr.f32.gmra.mrb[8].mxu0 %v694_v52  ;;  %v710_v52 = vld [vmem:[#allocation2 + $0x120] sm:$0xff] }
 0x3af   :  { %2270 = vmatprep.mubr.f32.mxu0 %v10632_v16  ;;  %8320 = vmatpush3.bf16.msra.mxu0 %v10834_v15  ;;  %v697_v16 = vld [vmem:[#allocation2 + $0x80] sm:$0xff] }
 0x3b0   :  { %8322 = vmatprep.subr.bf16.mxu0 %v10842_v17  ;;  %v858_v15 = vld [vmem:[#allocation2 + $0x242] sm:$0xff] }
 0x3b1   :  { %7817 = vmatprep.mubr.f32.mxu1 %v858_v15  ;;  %v782_v15 = vld [vmem:[#allocation2 + $0x181] sm:$0xff] }
 0x3b2   :  { %2271 = vmatmul.mubr.f32.gmra.mrb[10].mxu0 %v695_v36  ;;  %7818 = vmatmul.mubr.f32.gmra.mrb[16].mxu1 %v859_v12  ;;  %v712_v36 = vld [vmem:[#allocation2 + $0x138] sm:$0xff] }
 0x3b3   :  { %2275 = vmatprep.mubr.f32.mxu0 %v10637_v7  ;;  %8324 = vmatpush3.bf16.msra.mxu0 %v10842_v17  ;;  %v698_v7 = vld [vmem:[#allocation2 + $0x90] sm:$0xff]  ;;  %v699_v17 = vld [vmem:[#allocation2 + $0x98] sm:$0xff] }
 0x3b4   :  { %8326 = vmatprep.subr.bf16.mxu0 %v10850_v60  ;;  %v784_v12 = vld [vmem:[#allocation2 + $0x199] sm:$0xff] }
 0x3b6   :  { %2276 = vmatmul.mubr.f32.gmra.mrb[12].mxu0 %v696_v53  ;;  %v714_v53 = vld [vmem:[#allocation2 + $0x150] sm:$0xff] }
 0x3b7   :  { %2280 = vmatprep.mubr.f32.mxu0 %v10642_v22  ;;  %8328 = vmatpush3.bf16.msra.mxu0 %v10850_v60  ;;  %v860_v22 = vld [vmem:[#allocation2 + $0x25a] sm:$0xff]  ;;  %v700_v60 = vld [vmem:[#allocation2 + $0xa8] sm:$0xff] }
 0x3b8   :  { %8330 = vmatprep.subr.bf16.mxu0 %v10858_v28  ;;  %7820 = vmatprep.mubr.f32.mxu1 %v860_v22  ;;  %v720_v22 = vld [vmem:[#allocation2 + $0x198] sm:$0xff] }
 0x3b9   :  { %7821 = vmatmul.mubr.f32.gmra.mrb[18].mxu1 %v861_v55  ;;  %v723_v55 = vld [vmem:[#allocation2 + $0x1e8] sm:$0xff] }
 0x3ba   :  { %2281 = vmatmul.mubr.f32.gmra.mrb[14].mxu0 %v697_v16  ;;  %7823 = vmatprep.mubr.f32.mxu1 %v862_v20  ;;  %v716_v16 = vld [vmem:[#allocation2 + $0x168] sm:$0xff]  ;;  %v725_v20 = vld [vmem:[#allocation2 + $0x200] sm:$0xff] }
 0x3bb   :  { %2285 = vmatprep.mubr.f32.mxu0 %v10647_v48  ;;  %8332 = vmatpush3.bf16.msra.mxu0 %v10858_v28  ;;  %v701_v48 = vld [vmem:[#allocation2 + $0xb0] sm:$0xff]  ;;  %v702_v28 = vld [vmem:[#allocation2 + $0xc0] sm:$0xff] }
 0x3be   :  { %2286 = vmatmul.mubr.f32.gmra.mrb[16].mxu0 %v698_v7  ;;  %v783_v7 = vld [vmem:[#allocation2 + $0x189] sm:$0xff] }
 0x3bf   :  { %2290 = vmatprep.mubr.f32.mxu0 %v10652_v62  ;;  %v863_v62 = vld [vmem:[#allocation2 + $0x27a] sm:$0xff] }
 0x3c0   :  { %7824 = vmatmul.mubr.f32.gmra.mrb[20].mxu1 %v863_v62 }
 0x3c1   :  { %7826 = vmatprep.mubr.f32.mxu1 %v864_v37  ;;  %v15471_v37 = vld [vmem:[#allocation22_spill] sm:$0xff] }
 0x3c2   :  { %2291 = vmatmul.mubr.f32.gmra.mrb[18].mxu0 %v699_v17  ;;  %v880_v17 = vld [vmem:[#allocation2 + $0x34a] sm:$0xff] }
 0x3c3   :  { %2295 = vmatprep.mubr.f32.mxu0 %v10657_v63  ;;  %v703_v63 = vld [vmem:[#allocation2 + $0xc8] sm:$0xff] }
 0x3c6   :  { %2296 = vmatmul.mubr.f32.gmra.mrb[20].mxu0 %v700_v60  ;;  %v881_v60 = vld [vmem:[#allocation2 + $0x352] sm:$0xff] }
 0x3c7   :  { %2300 = vmatprep.mubr.f32.mxu0 %v10661_v27  ;;  %v865_v27 = vld [vmem:[#allocation2 + $0x292] sm:$0xff] }
 0x3c8   :  { %7827 = vmatmul.mubr.f32.gmra.mrb[22].mxu1 %v865_v27  ;;  %v739_v27 = vld [vmem:[#allocation2 + $0x2a8] sm:$0xff] }
 0x3c9   :  { %7829 = vmatprep.mubr.f32.mxu1 %v866_v5  ;;  %v15473_v5 = vld [vmem:[#allocation29_spill] sm:$0xff] }
 0x3ca   :  { %2301 = vmatmul.mubr.f32.gmra.mrb[22].mxu0 %v701_v48  ;;  %v724_v48 = vld [vmem:[#allocation2 + $0x1f8] sm:$0xff] }
 0x3cb   :  { %2305 = vmatprep.mubr.f32.mxu0 %v10666_v0  ;;  %v705_v0 = vld [vmem:[#allocation2 + $0xe0] sm:$0xff] }
 0x3ce   :  { %2306 = vmatmul.mubr.f32.gmra.mrb[24].mxu0 %v702_v28  ;;  %v726_v28 = vld [vmem:[#allocation2 + $0x210] sm:$0xff] }
 0x3cf   :  { %2310 = vmatprep.mubr.f32.mxu0 %v10670_v41  ;;  %v867_v41 = vld [vmem:[#allocation2 + $0x2aa] sm:$0xff] }
 0x3d0   :  { %7830 = vmatmul.mubr.f32.gmra.mrb[24].mxu1 %v867_v41  ;;  %v741_v41 = vld [vmem:[#allocation2 + $0x2c0] sm:$0xff] }
 0x3d1   :  { %7832 = vmatprep.mubr.f32.mxu1 %v868_v51 }
 0x3d2   :  { %2311 = vmatmul.mubr.f32.gmra.mrb[26].mxu0 %v703_v63 }
 0x3d3   :  { %2315 = vmatprep.mubr.f32.mxu0 %v10674_v30  ;;  %v707_v30 = vld [vmem:[#allocation2 + $0xf8] sm:$0xff] }
 0x3d6   :  { %2316 = vmatmul.mubr.f32.gmra.mrb[28].mxu0 %v704_v18  ;;  %v15472_v18 = vld [vmem:[#allocation24_spill] sm:$0xff] }
 0x3d7   :  { %2320 = vmatprep.mubr.f32.mxu0 %v10678_v31  ;;  %v869_v31 = vld [vmem:[#allocation2 + $0x2c2] sm:$0xff] }
 0x3d8   :  { %7833 = vmatmul.mubr.f32.gmra.mrb[26].mxu1 %v869_v31  ;;  %v742_v31 = vld [vmem:[#allocation2 + $0x2d0] sm:$0xff] }
 0x3d9   :  { %7835 = vmatprep.mubr.f32.mxu1 %v870_v1  ;;  %v743_v1 = vld [vmem:[#allocation2 + $0x2d8] sm:$0xff] }
 0x3da   :  { %2321 = vmatmul.mubr.f32.gmra.mrb[30].mxu0 %v705_v0 }
 0x3db   :  { %2325 = vmatprep.mubr.f32.mxu0 %v10683_v32  ;;  %v709_v32 = vld [vmem:[#allocation2 + $0x110] sm:$0xff] }
 0x3de   :  { %2326 = vmatmul.mubr.f32.gmra.mrb[32].mxu0 %v706_v43  ;;  %v15474_v43 = vld [vmem:[#allocation30_spill] sm:$0xff] }
 0x3df   :  { %2330 = vmatprep.mubr.f32.mxu0 %v10687_v33  ;;  %v871_v33 = vld [vmem:[#allocation2 + $0x2da] sm:$0xff] }
 0x3e0   :  { %7836 = vmatmul.mubr.f32.gmra.mrb[28].mxu1 %v871_v33 }
 0x3e1   :  { %7838 = vmatprep.mubr.f32.mxu1 %v872_v57 }
 0x3e2   :  { %2331 = vmatmul.mubr.f32.gmra.mrb[34].mxu0 %v707_v30 }
 0x3e3   :  { %2335 = vmatprep.mubr.f32.mxu0 %v10691_v35  ;;  %v711_v35 = vld [vmem:[#allocation2 + $0x128] sm:$0xff] }
 0x3e6   :  { %2336 = vmatmul.mubr.f32.gmra.mrb[36].mxu0 %v708_v29  ;;  %v15475_v29 = vld [vmem:[#allocation19_spill] sm:$0xff] }
 0x3e7   :  { %2340 = vmatprep.mubr.f32.mxu0 %v10695_v38  ;;  %v873_v38 = vld [vmem:[#allocation2 + $0x2f2] sm:$0xff] }
 0x3e8   :  { %7839 = vmatmul.mubr.f32.gmra.mrb[30].mxu1 %v873_v38 }
 0x3e9   :  { %7841 = vmatprep.mubr.f32.mxu1 %v874_v6  ;;  %v745_v6 = vld [vmem:[#allocation2 + $0x2f0] sm:$0xff] }
 0x3ea   :  { %2341 = vmatmul.mubr.f32.gmra.mrb[38].mxu0 %v709_v32  ;;  %v15476_v32 = vld [vmem:[#allocation20_spill] sm:$0xff] }
 0x3eb   :  { %2345 = vmatprep.mubr.f32.mxu0 %v10700_v39  ;;  %v713_v39 = vld [vmem:[#allocation2 + $0x140] sm:$0xff] }
 0x3ee   :  { %2346 = vmatmul.mubr.f32.gmra.mrb[40].mxu0 %v710_v52 }
 0x3ef   :  { %2350 = vmatprep.mubr.f32.mxu0 %v10704_v40  ;;  %v875_v40 = vld [vmem:[#allocation2 + $0x30a] sm:$0xff] }
 0x3f0   :  { %7842 = vmatmul.mubr.f32.gmra.mrb[32].mxu1 %v875_v40 }
 0x3f1   :  { %7844 = vmatprep.mubr.f32.mxu1 %v876_v34 }
 0x3f2   :  { %2351 = vmatmul.mubr.f32.gmra.mrb[42].mxu0 %v711_v35 }
 0x3f3   :  { %2355 = vmatprep.mubr.f32.mxu0 %v10708_v42  ;;  %v715_v42 = vld [vmem:[#allocation2 + $0x158] sm:$0xff] }
 0x3f6   :  { %2356 = vmatmul.mubr.f32.gmra.mrb[44].mxu0 %v712_v36  ;;  %v744_v36 = vld [vmem:[#allocation2 + $0x2e8] sm:$0xff] }
 0x3f7   :  { %2360 = vmatprep.mubr.f32.mxu0 %v10712_v45  ;;  %v877_v45 = vld [vmem:[#allocation2 + $0x322] sm:$0xff] }
 0x3f8   :  { %7845 = vmatmul.mubr.f32.gmra.mrb[34].mxu1 %v877_v45 }
 0x3f9   :  { %7847 = vmatprep.mubr.f32.mxu1 %v10889_v23  ;;  %v785_v23 = vld [vmem:[#allocation2 + $0x1a1] sm:$0xff] }
 0x3fa   :  { %2361 = vmatmul.mubr.f32.gmra.mrb[46].mxu0 %v713_v39 }
 0x3fb   :  { %2365 = vmatprep.mubr.f32.mxu0 %v10717_v47  ;;  %v717_v47 = vld [vmem:[#allocation2 + $0x170] sm:$0xff] }
 0x3fc   :  { %7848 = vmatmul.mubr.f32.gmra.mrb[36].mxu1 %v10893_v2  ;;  %v722_v2 = vld [vmem:[#allocation2 + $0x1e0] sm:$0xff] }
 0x3fd   :  { %7850 = vmatprep.mubr.f32.mxu1 %v880_v17  ;;  %v748_v17 = vld [vmem:[#allocation2 + $0x318] sm:$0xff] }
 0x3fe   :  { %2366 = vmatmul.mubr.f32.gmra.mrb[48].mxu0 %v714_v53 }
 0x3ff   :  { %2370 = vmatprep.mubr.f32.mxu0 %v10721_v26  ;;  %v718_v26 = vld [vmem:[#allocation2 + $0x180] sm:$0xff] }
 0x400   :  { %7851 = vmatmul.mubr.f32.gmra.mrb[38].mxu1 %v881_v60  ;;  %v749_v60 = vld [vmem:[#allocation2 + $0x320] sm:$0xff] }
 0x402   :  { %2371 = vmatmul.mubr.f32.gmra.mrb[50].mxu0 %v715_v42 }
 0x403   :  { %2375 = vmatprep.mubr.f32.mxu0 %v10725_v9  ;;  %v719_v9 = vld [vmem:[#allocation2 + $0x188] sm:$0xff] }
 0x406   :  { %2376 = vmatmul.mubr.f32.gmra.mrb[52].mxu0 %v716_v16  ;;  %v746_v16 = vld [vmem:[#allocation2 + $0x300] sm:$0xff] }
 0x407   :  { %2380 = vmatprep.mubr.f32.mxu0 %v10729_v50  ;;  %v10943_v50 = vld [vmem:[#allocation2 + $0x8] sm:$0xff] }
 0x40a   :  { %2381 = vmatmul.mubr.f32.gmra.mrb[54].mxu0 %v717_v47  ;;  %v15477_v47 = vld [vmem:[#allocation21_spill] sm:$0xff] }
 0x40b   :  { %2385 = vmatprep.mubr.f32.mxu0 %v782_v15  ;;  %v747_v15 = vld [vmem:[#allocation2 + $0x308] sm:$0xff] }
 0x40e   :  { %2386 = vmatmul.mubr.f32.gmra.mrb[56].mxu0 %v718_v26 }
 0x40f   :  { %2390 = vmatprep.mubr.f32.mxu0 %v783_v7 }
 0x412   :  { %2391 = vmatmul.mubr.f32.gmra.mrb[58].mxu0 %v719_v9 }
 0x413   :  { %2395 = vmatprep.mubr.f32.mxu0 %v784_v12  ;;  %v15478_v12 = vld [vmem:[#allocation23_spill] sm:$0xff] }
 0x416   :  { %2396 = vmatmul.mubr.f32.gmra.mrb[60].mxu0 %v720_v22 }
 0x417   :  { %2400 = vmatprep.mubr.f32.mxu0 %v785_v23  ;;  %v15479_v23 = vld [vmem:[#allocation25_spill] sm:$0xff] }
 0x41a   :  { %2401 = vmatmul.mubr.f32.gmra.mrb[62].mxu0 %v10943_v50 }
 0x41b   :  { %2405 = vmatprep.mubr.f32.mxu0 %v10748_v19  ;;  %v727_v19 = vld [vmem:[#allocation2 + $0x218] sm:$0xff] }
 0x41e   :  { %2406 = vmatmul.mubr.f32.gmra.mrb[64].mxu0 %v722_v2  ;;  %v814_v2 = vld [vmem:[#allocation2 + $0x331] sm:$0xff] }
 0x41f   :  { %2410 = vmatprep.mubr.f32.mxu0 %v10752_v59  ;;  %v728_v59 = vld [vmem:[#allocation2 + $0x228] sm:$0xff] }
 0x422   :  { %2411 = vmatmul.mubr.f32.gmra.mrb[66].mxu0 %v723_v55 }
 0x423   :  { %2415 = vmatprep.mubr.f32.mxu0 %v10756_v25  ;;  %v729_v25 = vld [vmem:[#allocation2 + $0x230] sm:$0xff] }
 0x426   :  { %2416 = vmatmul.mubr.f32.gmra.mrb[68].mxu0 %v724_v48 }
 0x427   :  { %2420 = vmatprep.mubr.f32.mxu0 %v10760_v4  ;;  %v730_v4 = vld [vmem:[#allocation2 + $0x240] sm:$0xff] }
 0x42a   :  { %2421 = vmatmul.mubr.f32.gmra.mrb[70].mxu0 %v725_v20 }
 0x42b   :  { %2425 = vmatprep.mubr.f32.mxu0 %v10764_v10  ;;  %v731_v10 = vld [vmem:[#allocation2 + $0x248] sm:$0xff] }
 0x42e   :  { %2426 = vmatmul.mubr.f32.gmra.mrb[72].mxu0 %v726_v28 }
 0x42f   :  { %2430 = vmatprep.mubr.f32.mxu0 %v10768_v14  ;;  %v732_v14 = vld [vmem:[#allocation2 + $0x258] sm:$0xff] }
 0x432   :  { %2431 = vmatmul.mubr.f32.gmra.mrb[74].mxu0 %v727_v19  ;;  %v750_v19 = vld [vmem:[#allocation2 + $0x330] sm:$0xff] }
 0x433   :  { %2435 = vmatprep.mubr.f32.mxu0 %v10772_v21  ;;  %v733_v21 = vld [vmem:[#allocation2 + $0x260] sm:$0xff] }
 0x436   :  { %2436 = vmatmul.mubr.f32.gmra.mrb[76].mxu0 %v728_v59  ;;  %v815_v59 = vld [vmem:[#allocation2 + $0x339] sm:$0xff] }
 0x437   :  { %2440 = vmatprep.mubr.f32.mxu0 %v10776_v46  ;;  %v734_v46 = vld [vmem:[#allocation2 + $0x270] sm:$0xff] }
 0x43a   :  { %2441 = vmatmul.mubr.f32.gmra.mrb[78].mxu0 %v729_v25 }
 0x43b   :  { %2445 = vmatprep.mubr.f32.mxu0 %v10784_v54  ;;  %v735_v54 = vld [vmem:[#allocation2 + $0x278] sm:$0xff] }
 0x43e   :  { %2446 = vmatmul.mubr.f32.gmra.mrb[80].mxu0 %v730_v4 }
 0x43f   :  { %2450 = vmatprep.mubr.f32.mxu0 %v10788_v61 }
 0x442   :  { %2451 = vmatmul.mubr.f32.gmra.mrb[82].mxu0 %v731_v10  ;;  %v751_v10 = vld [vmem:[#allocation2 + $0x338] sm:$0xff] }
 0x443   :  { %2455 = vmatprep.mubr.f32.mxu0 %v10792_v3  ;;  %v736_v3 = vld [vmem:[#allocation2 + $0x288] sm:$0xff] }
 0x446   :  { %2456 = vmatmul.mubr.f32.gmra.mrb[84].mxu0 %v732_v14  ;;  %v816_v14 = vld [vmem:[#allocation2 + $0x349] sm:$0xff] }
 0x447   :  { %2460 = vmatprep.mubr.f32.mxu0 %v10796_v56  ;;  %v737_v56 = vld [vmem:[#allocation2 + $0x290] sm:$0xff] }
 0x44a   :  { %2461 = vmatmul.mubr.f32.gmra.mrb[86].mxu0 %v733_v21 }
 0x44b   :  { %2465 = vmatprep.mubr.f32.mxu0 %v10800_v8  ;;  %v10960_v62 = vpop.f32.mrb[0].mxu1 }
 0x44c   :  { %v10962_v61 = vpop.f32.mrb[1].mxu1 }
 0x44e   :  { %2466 = vmatmul.mubr.f32.gmra.mrb[88].mxu0 %v734_v46 }
 0x44f   :  { %2470 = vmatprep.mubr.f32.mxu0 %v10804_v13  ;;  %v10966_v63 = vpop.f32.mrb[2].mxu1  ;;  %v738_v13 = vld [vmem:[#allocation2 + $0x2a0] sm:$0xff] }
 0x450   :  { %v10968_v8 = vpop.f32.mrb[3].mxu1 }
 0x452   :  { %2471 = vmatmul.mubr.f32.gmra.mrb[90].mxu0 %v735_v54 }
 0x453   :  { %2475 = vmatprep.mubr.f32.mxu0 %v10808_v24  ;;  %v10972_v0 = vpop.f32.mrb[4].mxu1 }
 0x454   :  { %v10974_v24 = vpop.f32.mrb[5].mxu1 }
 0x456   :  { %2476 = vmatmul.mubr.f32.gmra.mrb[92].mxu0 %v736_v3 }
 0x457   :  { %2480 = vmatprep.mubr.f32.mxu0 %v10812_v49  ;;  %v740_v49 = vld [vmem:[#allocation2 + $0x2b8] sm:$0xff] }
 0x45a   :  { %2481 = vmatmul.mubr.f32.gmra.mrb[94].mxu0 %v737_v56  ;;  %v752_v56 = vld [vmem:[#allocation2 + $0x348] sm:$0xff] }
 0x45b   :  { %2485 = vmatprep.mubr.f32.mxu0 %v15471_v37  ;;  %v817_v37 = vld [vmem:[#allocation2 + $0x351] sm:$0xff] }
 0x45c   :  { %v10978_v30 = vpop.f32.mrb[6].mxu1 }
 0x45d   :  { %v10980_v51 = vpop.f32.mrb[7].mxu1 }
 0x45e   :  { %2486 = vmatmul.mubr.f32.gmra.mrb[96].mxu0 %v738_v13 }
 0x45f   :  { %2490 = vmatprep.mubr.f32.mxu0 %v15472_v18 }
 0x462   :  { %2491 = vmatmul.mubr.f32.gmra.mrb[98].mxu0 %v739_v27  ;;  %v818_v27 = vld [vmem:[#allocation2 + $0x32] sm:$0xff] }
 0x463   :  { %2495 = vmatprep.mubr.f32.mxu0 %v15473_v5 }
 0x466   :  { %2496 = vmatmul.mubr.f32.gmra.mrb[100].mxu0 %v740_v49  ;;  %v10984_v52 = vpop.f32.mrb[8].mxu1 }
 0x467   :  { %2500 = vmatprep.mubr.f32.mxu0 %v15474_v43  ;;  %v10988_v35 = vpop.f32.mrb[9].mxu1 }
 0x46a   :  { %2501 = vmatmul.mubr.f32.gmra.mrb[102].mxu0 %v741_v41 }
 0x46b   :  { %2505 = vmatprep.mubr.f32.mxu0 %v15475_v29  ;;  %v819_v29 = vld [vmem:[#allocation2 + $0x3a] sm:$0xff] }
 0x46e   :  { %2506 = vmatmul.mubr.f32.gmra.mrb[104].mxu0 %v742_v31  ;;  %v820_v31 = vld [vmem:[#allocation2 + $0x4a] sm:$0xff] }
 0x46f   :  { %2510 = vmatprep.mubr.f32.mxu0 %v15476_v32  ;;  %v10994_v53 = vpop.f32.mrb[10].mxu1 }
 0x470   :  { %v10998_v42 = vpop.f32.mrb[11].mxu1 }
 0x471   :  { %v10986_v33 = vpop.f32.mrb[0].mxu0 }
 0x472   :  { %v2249_v57 = vpop.f32.mrb[1].mxu0  ;;  %2511 = vmatmul.mubr.f32.gmra.mrb[106].mxu0 %v743_v1 }
 0x473   :  { %2515 = vmatprep.mubr.f32.mxu0 %v10864_v44  ;;  %v821_v57 = vld [vmem:[#allocation2 + $0x52] sm:$0xff] }
 0x475   :  { %v10991_v38 = vpop.f32.mrb[2].mxu0 }
 0x476   :  { %v2254_v39 = vpop.f32.mrb[3].mxu0  ;;  %2516 = vmatmul.mubr.f32.gmra.mrb[108].mxu0 %v744_v36  ;;  %v822_v36 = vld [vmem:[#allocation2 + $0x62] sm:$0xff] }
 0x477   :  { %2520 = vmatprep.mubr.f32.mxu0 %v10869_v11 }
 0x478   :  { %v11004_v11 = vpop.f32.mrb[12].mxu1 }
 0x479   :  { %v10996_v40 = vpop.f32.mrb[4].mxu0  ;;  %v11008_v7 = vpop.f32.mrb[13].mxu1 }
 0x47a   :  { %v2259_v34 = vpop.f32.mrb[5].mxu0  ;;  %2521 = vmatmul.mubr.f32.gmra.mrb[110].mxu0 %v745_v6 }
 0x47b   :  { %2525 = vmatprep.mubr.f32.mxu0 %v10873_v58 }
 0x47d   :  { %v11001_v44 = vpop.f32.mrb[6].mxu0 }
 0x47e   :  { %v2264_v45 = vpop.f32.mrb[7].mxu0  ;;  %2526 = vmatmul.mubr.f32.gmra.mrb[112].mxu0 %v746_v16 }
 0x47f   :  { %2530 = vmatprep.mubr.f32.mxu0 %v15477_v47  ;;  %v824_v45 = vld [vmem:[#allocation2 + $0x7a] sm:$0xff] }
 0x480   :  { %v11014_v55 = vpop.f32.mrb[14].mxu1 }
 0x481   :  { %v11006_v26 = vpop.f32.mrb[8].mxu0  ;;  %v11018_v20 = vpop.f32.mrb[15].mxu1 }
 0x482   :  { %v2269_v9 = vpop.f32.mrb[9].mxu0  ;;  %2531 = vmatmul.mubr.f32.gmra.mrb[114].mxu0 %v747_v15 }
 0x483   :  { %2535 = vmatprep.mubr.f32.mxu0 %v15478_v12  ;;  %v825_v9 = vld [vmem:[#allocation2 + $0x82] sm:$0xff]  ;;  %v826_v12 = vld [vmem:[#allocation2 + $0x92] sm:$0xff] }
 0x485   :  { %v11011_v58 = vpop.f32.mrb[10].mxu0  ;;  %v11022_v21 = vpop.f32.mrb[16].mxu1 }
 0x486   :  { %v2274_v22 = vpop.f32.mrb[11].mxu0  ;;  %2536 = vmatmul.mubr.f32.gmra.mrb[116].mxu0 %v748_v17  ;;  %v11026_v54 = vpop.f32.mrb[17].mxu1 }
 0x487   :  { %2540 = vmatprep.mubr.f32.mxu0 %v15479_v23 }
 0x489   :  { %v11016_v48 = vpop.f32.mrb[12].mxu0 }
 0x48a   :  { %v2279_v28 = vpop.f32.mrb[13].mxu0  ;;  %2541 = vmatmul.mubr.f32.gmra.mrb[118].mxu0 %v749_v60 }
 0x48b   :  { %2545 = vmatprep.mubr.f32.mxu0 %v814_v2  ;;  %v827_v2 = vld [vmem:[#allocation2 + $0x9a] sm:$0xff]  ;;  %v828_v28 = vld [vmem:[#allocation2 + $0xaa] sm:$0xff] }
 0x48c   :  { %v11030_v5 = vpop.f32.mrb[18].mxu1 }
 0x48d   :  { %v11020_v25 = vpop.f32.mrb[14].mxu0  ;;  %v11034_v43 = vpop.f32.mrb[19].mxu1 }
 0x48e   :  { %v2284_v4 = vpop.f32.mrb[15].mxu0  ;;  %2546 = vmatmul.mubr.f32.gmra.mrb[120].mxu0 %v750_v19 }
 0x48f   :  { %2550 = vmatprep.mubr.f32.mxu0 %v815_v59  ;;  %v829_v4 = vld [vmem:[#allocation2 + $0xb2] sm:$0xff] }
 0x491   :  { %v11024_v46 = vpop.f32.mrb[16].mxu0 }
 0x492   :  { %v2289_v3 = vpop.f32.mrb[17].mxu0  ;;  %2551 = vmatmul.mubr.f32.gmra.mrb[122].mxu0 %v751_v10  ;;  %v830_v10 = vld [vmem:[#allocation2 + $0xc2] sm:$0xff] }
 0x493   :  { %2555 = vmatprep.mubr.f32.mxu0 %v816_v14  ;;  %v11039_v39 = vpop.f32.mrb[20].mxu1 }
 0x494   :  { %v11043_v34 = vpop.f32.mrb[21].mxu1 }
 0x495   :  { %v11028_v13 = vpop.f32.mrb[18].mxu0 }
 0x496   :  { %v2294_v18 = vpop.f32.mrb[19].mxu0  ;;  %2556 = vmatmul.mubr.f32.gmra.mrb[124].mxu0 %v752_v56 }
 0x497   :  { %2560 = vmatprep.mubr.f32.mxu0 %v817_v37  ;;  %v831_v18 = vld [vmem:[#allocation2 + $0xca] sm:$0xff] }
 0x499   :  { %v11032_v49 = vpop.f32.mrb[20].mxu0 }
 0x49a   :  { %v2299_v41 = vpop.f32.mrb[21].mxu0  ;;  %2561 = vmatmul.mubr.f32.gmra.mrb[126].mxu0 %v10943_v50  ;;  %v823_v50 = vld [vmem:[#allocation2 + $0x6a] sm:$0xff] }
 0x49b   :  { %7757 = vmatprep.mubr.f32.mxu0 %v818_v27  ;;  %v11047_v17 = vpop.f32.mrb[22].mxu1  ;;  %v832_v27 = vld [vmem:[#allocation2 + $0xda] sm:$0xff] }
 0x49c   :  { %v11051_v23 = vpop.f32.mrb[23].mxu1 }
 0x49d   :  { %v11037_v32 = vpop.f32.mrb[22].mxu0 }
 0x49e   :  { %v2304_v1 = vpop.f32.mrb[23].mxu0  ;;  %7758 = vmatmul.mubr.f32.vlgmr.msra.gmra.mrb[128].mxu0 %v819_v29 }
 0x49f   :  { %7760 = vmatprep.mubr.f32.mxu0 %v820_v31  ;;  %v833_v31 = vld [vmem:[#allocation2 + $0xe2] sm:$0xff]  ;;  %v834_v1 = vld [vmem:[#allocation2 + $0xf2] sm:$0xff] }
 0x4a1   :  { %v11041_v6 = vpop.f32.mrb[24].mxu0 }
 0x4a2   :  { %v2309_v16 = vpop.f32.mrb[25].mxu0  ;;  %7761 = vmatmul.mubr.f32.gmra.mrb[130].mxu0 %v821_v57 }
 0x4a3   :  { %7763 = vmatprep.mubr.f32.mxu0 %v822_v36  ;;  %v11055_v14 = vpop.f32.mrb[24].mxu1 }
 0x4a4   :  { %v11059_v56 = vpop.f32.mrb[25].mxu1 }
 0x4a5   :  { %v11045_v47 = vpop.f32.mrb[26].mxu0 }
 0x4a6   :  { %v2314_v15 = vpop.f32.mrb[27].mxu0  ;;  %7764 = vmatmul.mubr.f32.gmra.mrb[132].mxu0 %v823_v50 }
 0x4a7   :  { %7766 = vmatprep.mubr.f32.mxu0 %v824_v45  ;;  %v835_v45 = vld [vmem:[#allocation2 + $0xfa] sm:$0xff]  ;;  %v836_v15 = vld [vmem:[#allocation2 + $0x10a] sm:$0xff] }
 0x4a9   :  { %v11049_v22 = vpop.f32.mrb[28].mxu0 }
 0x4aa   :  { %v2319_v60 = vpop.f32.mrb[29].mxu0  ;;  %7767 = vmatmul.mubr.f32.gmra.mrb[134].mxu0 %v825_v9 }
 0x4ab   :  { %7769 = vmatprep.mubr.f32.mxu0 %v826_v12  ;;  %v11063_v57 = vpop.f32.mrb[26].mxu1  ;;  %v837_v60 = vld [vmem:[#allocation2 + $0x112] sm:$0xff] }
 0x4ac   :  { %v11067_v16 = vpop.f32.mrb[27].mxu1 }
 0x4ad   :  { %v11053_v19 = vpop.f32.mrb[30].mxu0 }
 0x4ae   :  { %v2324_v59 = vpop.f32.mrb[31].mxu0  ;;  %7770 = vmatmul.mubr.f32.gmra.mrb[136].mxu0 %v827_v2  ;;  %v838_v2 = vld [vmem:[#allocation2 + $0x122] sm:$0xff] }
 0x4af   :  { %7772 = vmatprep.mubr.f32.mxu0 %v828_v28 }
 0x4b1   :  { %v11057_v3 = vpop.f32.mrb[32].mxu0 }
 0x4b2   :  { %15480 = vst [vmem:[#allocation26_spill] sm:$0xff] %v11057_v3  ;;  %v2329_v37 = vpop.f32.mrb[33].mxu0  ;;  %7773 = vmatmul.mubr.f32.gmra.mrb[138].mxu0 %v829_v4 }
 0x4b3   :  { %7775 = vmatprep.mubr.f32.mxu0 %v830_v10  ;;  %v11071_v28 = vpop.f32.mrb[28].mxu1  ;;  %v839_v37 = vld [vmem:[#allocation2 + $0x12a] sm:$0xff] }
 0x4b4   :  { %v11075_v4 = vpop.f32.mrb[29].mxu1 }
 0x4b5   :  { %v11061_v41 = vpop.f32.mrb[34].mxu0 }
 0x4b6   :  { %v2334_v29 = vpop.f32.mrb[35].mxu0  ;;  %7776 = vmatmul.mubr.f32.gmra.mrb[140].mxu0 %v831_v18  ;;  %v840_v18 = vld [vmem:[#allocation2 + $0x13a] sm:$0xff] }
 0x4b7   :  { %7778 = vmatprep.mubr.f32.mxu0 %v832_v27 }
 0x4b9   :  { %v11065_v36 = vpop.f32.mrb[36].mxu0 }
 0x4ba   :  { %15481 = vst [vmem:[#allocation27_spill] sm:$0xff] %v11065_v36  ;;  %v2339_v50 = vpop.f32.mrb[37].mxu0  ;;  %7779 = vmatmul.mubr.f32.gmra.mrb[142].mxu0 %v833_v31  ;;  %v841_v31 = vld [vmem:[#allocation2 + $0x142] sm:$0xff] }
 0x4bb   :  { %7781 = vmatprep.mubr.f32.mxu0 %v834_v1  ;;  %v11079_v1 = vpop.f32.mrb[30].mxu1 }
 0x4bd   :  { %v11069_v9 = vpop.f32.mrb[38].mxu0 }
 0x4be   :  { %15482 = vst [vmem:[#allocation28_spill] sm:$0xff] %v11069_v9  ;;  %v2344_v12 = vpop.f32.mrb[39].mxu0  ;;  %7782 = vmatmul.mubr.f32.gmra.mrb[144].mxu0 %v835_v45  ;;  %v11083_v45 = vpop.f32.mrb[31].mxu1 }
 0x4bf   :  { %7784 = vmatprep.mubr.f32.mxu0 %v836_v15 }
 0x4c1   :  { %v11073_v59 = vpop.f32.mrb[40].mxu0 }
 0x4c2   :  { %15483 = vst [vmem:[#allocation17_spill] sm:$0xff] %v11073_v59  ;;  %v2349_v10 = vpop.f32.mrb[41].mxu0  ;;  %7785 = vmatmul.mubr.f32.gmra.mrb[146].mxu0 %v837_v60 }
 0x4c3   :  { %7787 = vmatprep.mubr.f32.mxu0 %v838_v2  ;;  %v11087_v2 = vpop.f32.mrb[32].mxu1 }
 0x4c4   :  { %v11089_v59 = vpop.f32.mrb[33].mxu1 }
 0x4c5   :  { %v11077_v27 = vpop.f32.mrb[42].mxu0 }
 0x4c6   :  { %15484 = vst [vmem:[#allocation18_spill] sm:$0xff] %v11077_v27  ;;  %v2354_v29 = vpop.f32.mrb[43].mxu0  ;;  %7788 = vmatmul.mubr.f32.gmra.mrb[148].mxu0 %v839_v37 }
 0x4c7   :  { %7790 = vmatprep.mubr.f32.mxu0 %v840_v18 }
 0x4c9   :  { %v11081_v50 = vpop.f32.mrb[44].mxu0 }
 0x4ca   :  { %15485 = vst [vmem:[#allocation22_spill] sm:$0xff] %v11081_v50  ;;  %v2359_v15 = vpop.f32.mrb[45].mxu0  ;;  %7791 = vmatmul.mubr.f32.gmra.mrb[150].mxu0 %v841_v31 }
 0x4cb   :  { %v11097_v36 = vpop.f32.mrb[34].mxu1 }
 0x4cc   :  { %v11099_v15 = vpop.f32.mrb[35].mxu1 }
 0x4cd   :  { %v11085_v12 = vpop.f32.mrb[46].mxu0 }
 0x4ce   :  { %15486 = vst [vmem:[#allocation24_spill] sm:$0xff] %v11085_v12  ;;  %v2364_v60 = vpop.f32.mrb[47].mxu0 }
 0x4d1   :  { %v2367_v10 = vpop.f32.mrb[48].mxu0 }
 0x4d2   :  { %v11092_v37 = vadd.f32 %v10962_v61, %v2367_v10  ;;  %v2369_v18 = vpop.f32.mrb[49].mxu0  ;;  %v11107_v10 = vpop.f32.mrb[36].mxu1 }
 0x4d4   :  { %15487 = vst [vmem:[#allocation29_spill] sm:$0xff] %v11092_v37 }
 0x4d5   :  { %v2372_v29 = vpop.f32.mrb[50].mxu0 }
 0x4d6   :  { %v11095_v27 = vadd.f32 %v10960_v62, %v2372_v29  ;;  %v2374_v50 = vpop.f32.mrb[51].mxu0  ;;  %v11109_v62 = vpop.f32.mrb[37].mxu1 }
 0x4d8   :  { %15488 = vst [vmem:[#allocation30_spill] sm:$0xff] %v11095_v27 }
 0x4d9   :  { %v2377_v31 = vpop.f32.mrb[52].mxu0 }
 0x4da   :  { %v11102_v60 = vadd.f32 %v10968_v8, %v2377_v31  ;;  %v2379_v12 = vpop.f32.mrb[53].mxu0 }
 0x4db   :  { %v11117_v12 = vpop.f32.mrb[38].mxu1 }
 0x4dc   :  { %15489 = vst [vmem:[#allocation19_spill] sm:$0xff] %v11102_v60 }
 0x4dd   :  { %v2382_v9 = vpop.f32.mrb[54].mxu0 }
 0x4de   :  { %v11105_v3 = vadd.f32 %v10966_v63, %v2382_v9  ;;  %v2384_v61 = vpop.f32.mrb[55].mxu0  ;;  %v11119_v63 = vpop.f32.mrb[39].mxu1 }
 0x4e0   :  { %15490 = vst [vmem:[#allocation20_spill] sm:$0xff] %v11105_v3 }
 0x4e1   :  { %v2387_v18 = vpop.f32.mrb[56].mxu0 }
 0x4e2   :  { %v11112_v50 = vadd.f32 %v10974_v24, %v2387_v18  ;;  %v2389_v29 = vpop.f32.mrb[57].mxu0 }
 0x4e4   :  { %15491 = vst [vmem:[#allocation21_spill] sm:$0xff] %v11112_v50 }
 0x4e5   :  { %v2392_v27 = vpop.f32.mrb[58].mxu0 }
 0x4e6   :  { %v11115_v37 = vadd.f32 %v10972_v0, %v2392_v27  ;;  %v2394_v8 = vpop.f32.mrb[59].mxu0 }
 0x4e8   :  { %15492 = vst [vmem:[#allocation23_spill] sm:$0xff] %v11115_v37 }
 0x4e9   :  { %v2397_v31 = vpop.f32.mrb[60].mxu0 }
 0x4ea   :  { %v11122_v9 = vadd.f32 %v10980_v51, %v2397_v31  ;;  %v2399_v61 = vpop.f32.mrb[61].mxu0 }
 0x4ec   :  { %15493 = vst [vmem:[#allocation25_spill] sm:$0xff] %v11122_v9 }
 0x4ed   :  { %v2402_v3 = vpop.f32.mrb[62].mxu0 }
 0x4ee   :  { %v11125_v60 = vadd.f32 %v10978_v30, %v2402_v3  ;;  %v2404_v24 = vpop.f32.mrb[63].mxu0 }
 0x4f1   :  { %v2407_v18 = vpop.f32.mrb[64].mxu0 }
 0x4f2   :  { %v11128_v29 = vadd.f32 %v10988_v35, %v2407_v18  ;;  %v2409_v0 = vpop.f32.mrb[65].mxu0 }
 0x4f5   :  { %v2412_v27 = vpop.f32.mrb[66].mxu0 }
 0x4f6   :  { %v11131_v8 = vadd.f32 %v10984_v52, %v2412_v27  ;;  %v2414_v37 = vpop.f32.mrb[67].mxu0 }
 0x4f9   :  { %v2417_v50 = vpop.f32.mrb[68].mxu0 }
 0x4fa   :  { %v11134_v51 = vadd.f32 %v10998_v42, %v2417_v50  ;;  %v2419_v31 = vpop.f32.mrb[69].mxu0 }
 0x4fd   :  { %v2422_v61 = vpop.f32.mrb[70].mxu0 }
 0x4fe   :  { %v11137_v30 = vadd.f32 %v10994_v53, %v2422_v61  ;;  %v2424_v3 = vpop.f32.mrb[71].mxu0 }
 0x501   :  { %v2427_v24 = vpop.f32.mrb[72].mxu0 }
 0x502   :  { %v11140_v35 = vadd.f32 %v11008_v7, %v2427_v24  ;;  %v2429_v18 = vpop.f32.mrb[73].mxu0 }
 0x505   :  { %v2432_v0 = vpop.f32.mrb[74].mxu0 }
 0x506   :  { %v11143_v52 = vadd.f32 %v11004_v11, %v2432_v0  ;;  %v2434_v37 = vpop.f32.mrb[75].mxu0 }
 0x509   :  { %v2437_v27 = vpop.f32.mrb[76].mxu0 }
 0x50a   :  { %v11146_v42 = vadd.f32 %v11018_v20, %v2437_v27  ;;  %v2439_v50 = vpop.f32.mrb[77].mxu0 }
 0x50d   :  { %v2442_v31 = vpop.f32.mrb[78].mxu0 }
 0x50e   :  { %v11149_v53 = vadd.f32 %v11014_v55, %v2442_v31  ;;  %v2444_v61 = vpop.f32.mrb[79].mxu0 }
 0x511   :  { %v2447_v3 = vpop.f32.mrb[80].mxu0 }
 0x512   :  { %v11152_v7 = vadd.f32 %v11026_v54, %v2447_v3  ;;  %v2449_v24 = vpop.f32.mrb[81].mxu0 }
 0x515   :  { %v2452_v18 = vpop.f32.mrb[82].mxu0 }
 0x516   :  { %v11155_v11 = vadd.f32 %v11022_v21, %v2452_v18  ;;  %v2454_v0 = vpop.f32.mrb[83].mxu0 }
 0x518   :  { %15494 = vst [vmem:[#allocation31_spill] sm:$0xff] %v11155_v11 }
 0x519   :  { %v2457_v37 = vpop.f32.mrb[84].mxu0 }
 0x51a   :  { %v11158_v20 = vadd.f32 %v11034_v43, %v2457_v37  ;;  %v2459_v27 = vpop.f32.mrb[85].mxu0 }
 0x51c   :  { %15495 = vst [vmem:[#allocation32_spill] sm:$0xff] %v11158_v20 }
 0x51d   :  { %v2462_v50 = vpop.f32.mrb[86].mxu0 }
 0x51e   :  { %v11161_v55 = vadd.f32 %v11030_v5, %v2462_v50  ;;  %v2464_v31 = vpop.f32.mrb[87].mxu0 }
 0x521   :  { %v2467_v61 = vpop.f32.mrb[88].mxu0 }
 0x522   :  { %v11164_v54 = vadd.f32 %v11043_v34, %v2467_v61  ;;  %v2469_v3 = vpop.f32.mrb[89].mxu0 }
 0x525   :  { %v2472_v24 = vpop.f32.mrb[90].mxu0 }
 0x526   :  { %v11167_v21 = vadd.f32 %v11039_v39, %v2472_v24  ;;  %v2474_v18 = vpop.f32.mrb[91].mxu0 }
 0x529   :  { %v2477_v0 = vpop.f32.mrb[92].mxu0 }
 0x52a   :  { %v11170_v43 = vadd.f32 %v11051_v23, %v2477_v0  ;;  %v2479_v37 = vpop.f32.mrb[93].mxu0 }
 0x52d   :  { %v2482_v27 = vpop.f32.mrb[94].mxu0 }
 0x52e   :  { %v11173_v5 = vadd.f32 %v11047_v17, %v2482_v27  ;;  %v2484_v50 = vpop.f32.mrb[95].mxu0 }
 0x531   :  { %v2487_v31 = vpop.f32.mrb[96].mxu0 }
 0x532   :  { %v11176_v34 = vadd.f32 %v11059_v56, %v2487_v31  ;;  %v2489_v61 = vpop.f32.mrb[97].mxu0 }
 0x535   :  { %v2492_v3 = vpop.f32.mrb[98].mxu0 }
 0x536   :  { %v11179_v39 = vadd.f32 %v11055_v14, %v2492_v3  ;;  %v2494_v24 = vpop.f32.mrb[99].mxu0 }
 0x539   :  { %v2497_v18 = vpop.f32.mrb[100].mxu0 }
 0x53a   :  { %v11182_v23 = vadd.f32 %v11067_v16, %v2497_v18  ;;  %v2499_v0 = vpop.f32.mrb[101].mxu0 }
 0x53d   :  { %v2502_v37 = vpop.f32.mrb[102].mxu0 }
 0x53e   :  { %v11185_v17 = vadd.f32 %v11063_v57, %v2502_v37  ;;  %v2504_v27 = vpop.f32.mrb[103].mxu0 }
 0x541   :  { %v2507_v50 = vpop.f32.mrb[104].mxu0 }
 0x542   :  { %v11188_v56 = vadd.f32 %v11075_v4, %v2507_v50  ;;  %v2509_v31 = vpop.f32.mrb[105].mxu0 }
 0x545   :  { %v2512_v61 = vpop.f32.mrb[106].mxu0 }
 0x546   :  { %v11191_v14 = vadd.f32 %v11071_v28, %v2512_v61  ;;  %v2514_v3 = vpop.f32.mrb[107].mxu0 }
 0x549   :  { %v2517_v24 = vpop.f32.mrb[108].mxu0 }
 0x54a   :  { %v11194_v16 = vadd.f32 %v11083_v45, %v2517_v24  ;;  %v2519_v18 = vpop.f32.mrb[109].mxu0 }
 0x54d   :  { %v2522_v0 = vpop.f32.mrb[110].mxu0 }
 0x54e   :  { %v11197_v57 = vadd.f32 %v11079_v1, %v2522_v0  ;;  %v2524_v37 = vpop.f32.mrb[111].mxu0 }
 0x551   :  { %v2527_v27 = vpop.f32.mrb[112].mxu0 }
 0x552   :  { %v11200_v4 = vadd.f32 %v11089_v59, %v2527_v27  ;;  %v2529_v50 = vpop.f32.mrb[113].mxu0 }
 0x555   :  { %v2532_v31 = vpop.f32.mrb[114].mxu0 }
 0x556   :  { %v11203_v28 = vadd.f32 %v11087_v2, %v2532_v31  ;;  %v2534_v61 = vpop.f32.mrb[115].mxu0 }
 0x559   :  { %v2537_v3 = vpop.f32.mrb[116].mxu0 }
 0x55a   :  { %v11206_v45 = vadd.f32 %v11099_v15, %v2537_v3  ;;  %v2539_v24 = vpop.f32.mrb[117].mxu0 }
 0x55d   :  { %v2542_v18 = vpop.f32.mrb[118].mxu0 }
 0x55e   :  { %v11209_v1 = vadd.f32 %v11097_v36, %v2542_v18  ;;  %v2544_v0 = vpop.f32.mrb[119].mxu0 }
 0x561   :  { %v2547_v37 = vpop.f32.mrb[120].mxu0 }
 0x562   :  { %v11212_v59 = vadd.f32 %v11109_v62, %v2547_v37  ;;  %v2549_v27 = vpop.f32.mrb[121].mxu0 }
 0x564   :  { %15496 = vst [vmem:[#allocation33_spill] sm:$0xff] %v11212_v59 }
 0x565   :  { %v2552_v50 = vpop.f32.mrb[122].mxu0 }
 0x566   :  { %v11215_v2 = vadd.f32 %v11107_v10, %v2552_v50  ;;  %v2554_v31 = vpop.f32.mrb[123].mxu0 }
 0x568   :  { %15497 = vst [vmem:[#allocation34_spill] sm:$0xff] %v11215_v2 }
 0x569   :  { %v2557_v61 = vpop.f32.mrb[124].mxu0 }
 0x56a   :  { %v11218_v15 = vadd.f32 %v11119_v63, %v2557_v61  ;;  %v2559_v3 = vpop.f32.mrb[125].mxu0 }
 0x56c   :  { %15498 = vst [vmem:[#allocation35_spill] sm:$0xff] %v11218_v15 }
 0x56d   :  { %v2562_v24 = vpop.f32.mrb[126].mxu0 }
 0x56e   :  { %v11221_v36 = vadd.f32 %v11117_v12, %v2562_v24  ;;  %v2564_v18 = vpop.f32.mrb[127].mxu0 }
 0x571   :  { %v7759_v0 = vpop.f32.mrb[128].mxu0 }
 0x572   :  { %v11224_v62 = vadd.f32 %v7759_v0, %v10991_v38  ;;  %v2632_v37 = vpop.f32.mrb[129].mxu0 }
 0x573   :  { %v11227_v27 = vadd.f32 %v2632_v37, %v10986_v33 }
 0x574   :  { %15499 = vst [vmem:[#allocation36_spill] sm:$0xff] %v11224_v62  ;;  %v3021_v10 = vmul.f32 %v11224_v62, %v11224_v62 }
 0x575   :  { %v3020_v63 = vmul.f32 %v11227_v27, %v11227_v27  ;;  %v7762_v50 = vpop.f32.mrb[130].mxu0  ;;  %v2951_v61 = vadd.f32 %v11224_v62, %v11227_v27 }
 0x576   :  { %v11234_v31 = vadd.f32 %v7762_v50, %v11001_v44  ;;  %v2642_v12 = vpop.f32.mrb[131].mxu0 }
 0x577   :  { %v11239_v38 = vadd.f32 %v2642_v12, %v10996_v40  ;;  %v3084_v3 = vadd.f32 %v3021_v10, %v3020_v63 }
 0x578   :  { %v3023_v44 = vmul.f32 %v11234_v31, %v11234_v31 }
 0x579   :  { %15500 = vst [vmem:[#allocation37_spill] sm:$0xff] %v11239_v38  ;;  %v2952_v33 = vadd.f32 %v2951_v61, %v11239_v38  ;;  %v3022_v24 = vmul.f32 %v11239_v38, %v11239_v38  ;;  %v7765_v18 = vpop.f32.mrb[132].mxu0 }
 0x57a   :  { %v11245_v0 = vadd.f32 %v7765_v18, %v11011_v58  ;;  %v2652_v37 = vpop.f32.mrb[133].mxu0 }
 0x57b   :  { %v3085_v50 = vadd.f32 %v3084_v3, %v3022_v24  ;;  %v11250_v62 = vadd.f32 %v2652_v37, %v11006_v26  ;;  %v2953_v40 = vadd.f32 %v2952_v33, %v11234_v31 }
 0x57c   :  { %15501 = vst [vmem:[#allocation38_spill] sm:$0xff] %v11245_v0  ;;  %v3025_v38 = vmul.f32 %v11245_v0, %v11245_v0 }
 0x57d   :  { %v2954_v10 = vadd.f32 %v2953_v40, %v11250_v62  ;;  %v3024_v63 = vmul.f32 %v11250_v62, %v11250_v62  ;;  %v3086_v12 = vadd.f32 %v3085_v50, %v3023_v44  ;;  %v7768_v61 = vpop.f32.mrb[134].mxu0 }
 0x57e   :  { %v11257_v58 = vadd.f32 %v7768_v61, %v11020_v25  ;;  %v2662_v18 = vpop.f32.mrb[135].mxu0 }
 0x57f   :  { %v3087_v3 = vadd.f32 %v3086_v12, %v3024_v63  ;;  %v11262_v26 = vadd.f32 %v2662_v18, %v11016_v48  ;;  %v2955_v33 = vadd.f32 %v2954_v10, %v11245_v0 }
 0x580   :  { %v3027_v61 = vmul.f32 %v11257_v58, %v11257_v58 }
 0x581   :  { %15502 = vst [vmem:[#allocation39_spill] sm:$0xff] %v11262_v26  ;;  %v2956_v24 = vadd.f32 %v2955_v33, %v11262_v26  ;;  %v3026_v37 = vmul.f32 %v11262_v26, %v11262_v26  ;;  %v3088_v44 = vadd.f32 %v3087_v3, %v3025_v38  ;;  %v7771_v50 = vpop.f32.mrb[136].mxu0  ;;  %v4096_v33 = vld [vmem:[#allocation9] sm:$0xff] }
 0x582   :  { %v11269_v25 = vadd.f32 %v7771_v50, %v11028_v13  ;;  %v2672_v40 = vpop.f32.mrb[137].mxu0  ;;  %v4097_v13 = vld [vmem:[#allocation9 + $0x8] sm:$0xff] }
 0x583   :  { %v3089_v63 = vadd.f32 %v3088_v44, %v3026_v37  ;;  %v11274_v48 = vadd.f32 %v2672_v40, %v11024_v46  ;;  %v2957_v10 = vadd.f32 %v2956_v24, %v11257_v58  ;;  %v8334_v0 = vpack.c.bf16 %v4097_v13, %v4096_v33  ;;  %v4099_v33 = vld [vmem:[#allocation9 + $0x18] sm:$0xff] }
 0x584   :  { %v3029_v46 = vmul.f32 %v11269_v25, %v11269_v25 }
 0x585   :  { %v2958_v12 = vadd.f32 %v2957_v10, %v11274_v48  ;;  %v3028_v18 = vmul.f32 %v11274_v48, %v11274_v48  ;;  %v3090_v38 = vadd.f32 %v3089_v63, %v3027_v61  ;;  %v7774_v3 = vpop.f32.mrb[138].mxu0  ;;  %8335 = vmatpush1.bf16.msra.mxu1 %v8334_v0  ;;  %v15503_v10 = vmov 0.0|0.0  }
 0x586   :  { %v11281_v50 = vadd.f32 %v7774_v3, %v11037_v32  ;;  %v2682_v26 = vpop.f32.mrb[139].mxu0  ;;  %8336 = vmatprep.subr.bf16.mxu1 %v15503_v10  ;;  %v4098_v3 = vld [vmem:[#allocation9 + $0x10] sm:$0xff] }
 0x587   :  { %v3091_v37 = vadd.f32 %v3090_v38, %v3028_v18  ;;  %v11286_v24 = vadd.f32 %v2682_v26, %v11032_v49  ;;  %v2959_v44 = vadd.f32 %v2958_v12, %v11269_v25  ;;  %v8337_v49 = vpack.c.bf16 %v4099_v33, %v4098_v3  ;;  %v4101_v3 = vld [vmem:[#allocation9 + $0x28] sm:$0xff] }
 0x588   :  { %v3031_v26 = vmul.f32 %v11281_v50, %v11281_v50 }
 0x589   :  { %v2960_v40 = vadd.f32 %v2959_v44, %v11286_v24  ;;  %v3030_v61 = vmul.f32 %v11286_v24, %v11286_v24  ;;  %v3092_v63 = vadd.f32 %v3091_v37, %v3029_v46  ;;  %v7777_v32 = vpop.f32.mrb[140].mxu0  ;;  %8338 = vmatpush1.bf16.msra.mxu1 %v8337_v49 }
 0x58a   :  { %v11294_v13 = vadd.f32 %v7777_v32, %v11045_v47  ;;  %v2692_v18 = vpop.f32.mrb[141].mxu0  ;;  %8339 = vmatprep.subr.bf16.mxu1 %v15503_v10  ;;  %v4100_v32 = vld [vmem:[#allocation9 + $0x20] sm:$0xff] }
 0x58b   :  { %v3093_v0 = vadd.f32 %v3092_v63, %v3030_v61  ;;  %v11299_v12 = vadd.f32 %v2692_v18, %v11041_v6  ;;  %v2961_v38 = vadd.f32 %v2960_v40, %v11281_v50  ;;  %v8340_v6 = vpack.c.bf16 %v4101_v3, %v4100_v32  ;;  %v4103_v32 = vld [vmem:[#allocation9 + $0x38] sm:$0xff] }
 0x58c   :  { %15504 = vst [vmem:[#allocation40_spill] sm:$0xff] %v11294_v13  ;;  %v3033_v40 = vmul.f32 %v11294_v13, %v11294_v13 }
 0x58d   :  { %v2962_v46 = vadd.f32 %v2961_v38, %v11299_v12  ;;  %v3032_v37 = vmul.f32 %v11299_v12, %v11299_v12  ;;  %v3094_v44 = vadd.f32 %v3093_v0, %v3031_v26  ;;  %v7780_v47 = vpop.f32.mrb[142].mxu0  ;;  %8341 = vmatpush1.bf16.msra.mxu1 %v8340_v6 }
 0x58e   :  { %v11307_v33 = vadd.f32 %v7780_v47, %v11053_v19  ;;  %v2702_v61 = vpop.f32.mrb[143].mxu0  ;;  %8342 = vmatprep.subr.bf16.mxu1 %v15503_v10  ;;  %v4102_v47 = vld [vmem:[#allocation9 + $0x30] sm:$0xff] }
 0x58f   :  { %v3095_v63 = vadd.f32 %v3094_v44, %v3032_v37  ;;  %v11312_v18 = vadd.f32 %v2702_v61, %v11049_v22  ;;  %v2963_v49 = vadd.f32 %v2962_v46, %v11294_v13  ;;  %v8343_v22 = vpack.c.bf16 %v4103_v32, %v4102_v47  ;;  %v15508_v61 = vld [vmem:[#allocation26_spill] sm:$0xff]  ;;  %v15510_v32 = vld [vmem:[#allocation28_spill] sm:$0xff] }
 0x590   :  { %15505 = vst [vmem:[#allocation41_spill] sm:$0xff] %v11307_v33  ;;  %v3035_v46 = vmul.f32 %v11307_v33, %v11307_v33  ;;  %v4105_v47 = vld [vmem:[#allocation9 + $0x48] sm:$0xff] }
 0x591   :  { %15506 = vst [vmem:[#allocation42_spill] sm:$0xff] %v11312_v18  ;;  %v2964_v26 = vadd.f32 %v2963_v49, %v11312_v18  ;;  %v3034_v0 = vmul.f32 %v11312_v18, %v11312_v18  ;;  %v3096_v38 = vadd.f32 %v3095_v63, %v3033_v40  ;;  %v7783_v19 = vpop.f32.mrb[144].mxu0  ;;  %8344 = vmatpush1.bf16.msra.mxu1 %v8343_v22  ;;  %v15512_v22 = vld [vmem:[#allocation27_spill] sm:$0xff] }
 0x592   :  { %v11320_v3 = vadd.f32 %v7783_v19, %v11061_v41  ;;  %v2712_v37 = vpop.f32.mrb[145].mxu0  ;;  %8345 = vmatprep.subr.bf16.mxu1 %v15503_v10  ;;  %v4104_v19 = vld [vmem:[#allocation9 + $0x40] sm:$0xff] }
 0x593   :  { %v3097_v44 = vadd.f32 %v3096_v38, %v3034_v0  ;;  %v11325_v6 = vadd.f32 %v2712_v37, %v15508_v61  ;;  %v2965_v49 = vadd.f32 %v2964_v26, %v11307_v33  ;;  %v8346_v38 = vpack.c.bf16 %v4105_v47, %v4104_v19  ;;  %v4106_v19 = vld [vmem:[#allocation9 + $0x50] sm:$0xff]  ;;  %v4107_v47 = vld [vmem:[#allocation9 + $0x58] sm:$0xff] }
 0x594   :  { %15507 = vst [vmem:[#allocation43_spill] sm:$0xff] %v11320_v3  ;;  %v3037_v26 = vmul.f32 %v11320_v3, %v11320_v3 }
 0x595   :  { %15509 = vst [vmem:[#allocation26_spill] sm:$0xff] %v11325_v6  ;;  %v2966_v40 = vadd.f32 %v2965_v49, %v11325_v6  ;;  %v3036_v63 = vmul.f32 %v11325_v6, %v11325_v6  ;;  %v3098_v18 = vadd.f32 %v3097_v44, %v3035_v46  ;;  %v7786_v41 = vpop.f32.mrb[146].mxu0  ;;  %8347 = vmatpush1.bf16.msra.mxu1 %v8346_v38  ;;  %v15516_v38 = vld [vmem:[#allocation17_spill] sm:$0xff] }
 0x596   :  { %v11333_v13 = vadd.f32 %v7786_v41, %v15510_v32  ;;  %v2722_v0 = vpop.f32.mrb[147].mxu0  ;;  %8348 = vmatprep.subr.bf16.mxu1 %v15503_v10  ;;  %v15514_v32 = vld [vmem:[#allocation18_spill] sm:$0xff] }
 0x597   :  { %v3099_v37 = vadd.f32 %v3098_v18, %v3036_v63  ;;  %v11338_v61 = vadd.f32 %v2722_v0, %v15512_v22  ;;  %v2967_v49 = vadd.f32 %v2966_v40, %v11320_v3  ;;  %v8349_v63 = vpack.c.bf16 %v4107_v47, %v4106_v19  ;;  %v4108_v19 = vld [vmem:[#allocation9 + $0x60] sm:$0xff]  ;;  %v4109_v47 = vld [vmem:[#allocation9 + $0x68] sm:$0xff] }
 0x598   :  { %15511 = vst [vmem:[#allocation28_spill] sm:$0xff] %v11333_v13  ;;  %v3039_v40 = vmul.f32 %v11333_v13, %v11333_v13 }
 0x599   :  { %15513 = vst [vmem:[#allocation27_spill] sm:$0xff] %v11338_v61  ;;  %v2968_v46 = vadd.f32 %v2967_v49, %v11338_v61  ;;  %v3038_v44 = vmul.f32 %v11338_v61, %v11338_v61  ;;  %v3100_v6 = vadd.f32 %v3099_v37, %v3037_v26  ;;  %v7789_v41 = vpop.f32.mrb[148].mxu0  ;;  %8350 = vmatpush1.bf16.msra.mxu1 %v8349_v63  ;;  %v15520_v63 = vld [vmem:[#allocation22_spill] sm:$0xff] }
 0x59a   :  { %v11346_v33 = vadd.f32 %v7789_v41, %v15514_v32  ;;  %v2732_v18 = vpop.f32.mrb[149].mxu0  ;;  %8351 = vmatprep.subr.bf16.mxu1 %v15503_v10  ;;  %v15518_v32 = vld [vmem:[#allocation24_spill] sm:$0xff] }
 0x59b   :  { %v3101_v0 = vadd.f32 %v3100_v6, %v3038_v44  ;;  %v11351_v22 = vadd.f32 %v2732_v18, %v15516_v38  ;;  %v2969_v49 = vadd.f32 %v2968_v46, %v11333_v13  ;;  %v8352_v44 = vpack.c.bf16 %v4109_v47, %v4108_v19  ;;  %v4111_v19 = vld [vmem:[#allocation9 + $0x78] sm:$0xff] }
 0x59c   :  { %15515 = vst [vmem:[#allocation18_spill] sm:$0xff] %v11346_v33  ;;  %v3041_v46 = vmul.f32 %v11346_v33, %v11346_v33 }
 0x59d   :  { %15517 = vst [vmem:[#allocation17_spill] sm:$0xff] %v11351_v22  ;;  %v2970_v26 = vadd.f32 %v2969_v49, %v11351_v22  ;;  %v3040_v37 = vmul.f32 %v11351_v22, %v11351_v22  ;;  %v3102_v61 = vadd.f32 %v3101_v0, %v3039_v40  ;;  %v7792_v41 = vpop.f32.mrb[150].mxu0  ;;  %8353 = vmatpush1.bf16.msra.mxu1 %v8352_v44 }
 0x59e   :  { %v11359_v3 = vadd.f32 %v7792_v41, %v15518_v32  ;;  %v2742_v6 = vpop.f32.mrb[151].mxu0  ;;  %8354 = vmatprep.subr.bf16.mxu1 %v15503_v10  ;;  %v4110_v41 = vld [vmem:[#allocation9 + $0x70] sm:$0xff] }
 0x59f   :  { %v3103_v18 = vadd.f32 %v3102_v61, %v3040_v37  ;;  %v11364_v38 = vadd.f32 %v2742_v6, %v15520_v63  ;;  %v2971_v49 = vadd.f32 %v2970_v26, %v11346_v33  ;;  %v8355_v47 = vpack.c.bf16 %v4111_v19, %v4110_v41  ;;  %v15521_v26 = vld [vmem:[#allocation29_spill] sm:$0xff]  ;;  %v15522_v33 = vld [vmem:[#allocation30_spill] sm:$0xff] }
 0x5a0   :  { %15519 = vst [vmem:[#allocation24_spill] sm:$0xff] %v11359_v3  ;;  %v3043_v61 = vmul.f32 %v11359_v3, %v11359_v3  ;;  %v3044_v6 = vmul.f32 %v15521_v26, %v15521_v26  ;;  %v3045_v41 = vmul.f32 %v15522_v33, %v15522_v33 }
 0x5a1   :  { %v2972_v40 = vadd.f32 %v2971_v49, %v11364_v38  ;;  %v3042_v0 = vmul.f32 %v11364_v38, %v11364_v38  ;;  %v3104_v22 = vadd.f32 %v3103_v18, %v3041_v46  ;;  %8356 = vmatpush1.bf16.msra.mxu1 %v8355_v47  ;;  %v4112_v46 = vld [vmem:[#allocation9 + $0x80] sm:$0xff]  ;;  %v4113_v18 = vld [vmem:[#allocation9 + $0x88] sm:$0xff] }
 0x5a2   :  { %8357 = vmatprep.subr.bf16.mxu1 %v15503_v10  ;;  %v8358_v49 = vpack.c.bf16 %v4113_v18, %v4112_v46 }
 0x5a3   :  { %v2973_v37 = vadd.f32 %v2972_v40, %v11359_v3  ;;  %v3105_v32 = vadd.f32 %v3104_v22, %v3042_v0  ;;  %v15523_v22 = vld [vmem:[#allocation19_spill] sm:$0xff] }
 0x5a4   :  { %v3046_v40 = vmul.f32 %v15523_v22, %v15523_v22 }
 0x5a5   :  { %v2974_v44 = vadd.f32 %v2973_v37, %v15521_v26  ;;  %v3106_v63 = vadd.f32 %v3105_v32, %v3043_v61  ;;  %8359 = vmatpush1.bf16.msra.mxu1 %v8358_v49  ;;  %v4114_v61 = vld [vmem:[#allocation9 + $0x90] sm:$0xff]  ;;  %v4115_v37 = vld [vmem:[#allocation9 + $0x98] sm:$0xff] }
 0x5a6   :  { %8360 = vmatprep.subr.bf16.mxu1 %v15503_v10  ;;  %v8361_v32 = vpack.c.bf16 %v4115_v37, %v4114_v61  ;;  %v15524_v26 = vld [vmem:[#allocation20_spill] sm:$0xff] }
 0x5a7   :  { %v2975_v19 = vadd.f32 %v2974_v44, %v15522_v33  ;;  %v3107_v13 = vadd.f32 %v3106_v63, %v3044_v6  ;;  %v3047_v46 = vmul.f32 %v15524_v26, %v15524_v26  ;;  %v15525_v6 = vld [vmem:[#allocation21_spill] sm:$0xff] }
 0x5a8   :  { %v3048_v44 = vmul.f32 %v15525_v6, %v15525_v6 }
 0x5a9   :  { %v2976_v0 = vadd.f32 %v2975_v19, %v15523_v22  ;;  %v3108_v47 = vadd.f32 %v3107_v13, %v3045_v41  ;;  %8362 = vmatpush1.bf16.msra.mxu1 %v8361_v32  ;;  %v4116_v13 = vld [vmem:[#allocation9 + $0xa0] sm:$0xff]  ;;  %v4117_v41 = vld [vmem:[#allocation9 + $0xa8] sm:$0xff]  ;;  %v15526_v22 = vld [vmem:[#allocation23_spill] sm:$0xff] }
 0x5aa   :  { %8363 = vmatprep.subr.bf16.mxu1 %v15503_v10  ;;  %v8364_v19 = vpack.c.bf16 %v4117_v41, %v4116_v13  ;;  %v3049_v61 = vmul.f32 %v15526_v22, %v15526_v22  ;;  %v4119_v32 = vld [vmem:[#allocation9 + $0xb8] sm:$0xff]  ;;  %v4225_v13 = vld [vmem:[#allocation9 + $0x408] sm:$0xff]  ;;  %v3051_v41 = vmul.f32 %v11125_v60, %v11125_v60 }
 0x5ab   :  { %v2977_v18 = vadd.f32 %v2976_v0, %v15524_v26  ;;  %v3109_v3 = vadd.f32 %v3108_v47, %v3046_v40  ;;  %v3050_v40 = vmul.f32 %v11122_v9, %v11122_v9 }
 0x5ad   :  { %v2978_v63 = vadd.f32 %v2977_v18, %v15525_v6  ;;  %v3110_v49 = vadd.f32 %v3109_v3, %v3047_v46  ;;  %8365 = vmatpush1.bf16.msra.mxu1 %v8364_v19  ;;  %v4118_v3 = vld [vmem:[#allocation9 + $0xb0] sm:$0xff]  ;;  %v4224_v18 = vld [vmem:[#allocation9 + $0x400] sm:$0xff]  ;;  %v3052_v19 = vmul.f32 %v11128_v29, %v11128_v29 }
 0x5ae   :  { %8366 = vmatprep.subr.bf16.mxu1 %v15503_v10  ;;  %v8367_v46 = vpack.c.bf16 %v4119_v32, %v4118_v3  ;;  %v4121_v3 = vld [vmem:[#allocation9 + $0xc8] sm:$0xff]  ;;  %v4226_v32 = vld [vmem:[#allocation9 + $0x410] sm:$0xff] }
 0x5af   :  { %v2979_v37 = vadd.f32 %v2978_v63, %v15526_v22  ;;  %v3111_v33 = vadd.f32 %v3110_v49, %v3048_v44  ;;  %v8525_v49 = vpack.c.bf16 %v4225_v13, %v4224_v18  ;;  %v3054_v18 = vmul.f32 %v11134_v51, %v11134_v51 }
 0x5b1   :  { %v2980_v0 = vadd.f32 %v2979_v37, %v11122_v9  ;;  %v3112_v47 = vadd.f32 %v3111_v33, %v3049_v61  ;;  %8368 = vmatpush1.bf16.msra.mxu1 %v8367_v46  ;;  %8526 = vmatprep.subr.bf16.mxu0 %v8525_v49  ;;  %v4120_v37 = vld [vmem:[#allocation9 + $0xc0] sm:$0xff]  ;;  %v4227_v9 = vld [vmem:[#allocation9 + $0x418] sm:$0xff] }
 0x5b2   :  { %8369 = vmatprep.subr.bf16.mxu1 %v15503_v10  ;;  %8528 = vmatpush3.bf16.msra.mxu0 %v8525_v49  ;;  %v8370_v22 = vpack.c.bf16 %v4121_v3, %v4120_v37  ;;  %v8529_v46 = vpack.c.bf16 %v4227_v9, %v4226_v32  ;;  %v4228_v49 = vld [vmem:[#allocation9 + $0x420] sm:$0xff]  ;;  %v4229_v37 = vld [vmem:[#allocation9 + $0x428] sm:$0xff] }
 0x5b3   :  { %v2981_v63 = vadd.f32 %v2980_v0, %v11125_v60  ;;  %v3113_v44 = vadd.f32 %v3112_v47, %v3050_v40  ;;  %v3053_v40 = vmul.f32 %v11131_v8, %v11131_v8 }
 0x5b4   :  { %8530 = vmatprep.subr.bf16.mxu0 %v8529_v46 }
 0x5b5   :  { %v2982_v33 = vadd.f32 %v2981_v63, %v11128_v29  ;;  %v3114_v61 = vadd.f32 %v3113_v44, %v3051_v41  ;;  %8371 = vmatpush1.bf16.msra.mxu1 %v8370_v22  ;;  %v4122_v63 = vld [vmem:[#allocation9 + $0xd0] sm:$0xff]  ;;  %v4123_v44 = vld [vmem:[#allocation9 + $0xd8] sm:$0xff] }
 0x5b6   :  { %8372 = vmatprep.subr.bf16.mxu1 %v15503_v10  ;;  %8532 = vmatpush3.bf16.msra.mxu0 %v8529_v46  ;;  %v8373_v3 = vpack.c.bf16 %v4123_v44, %v4122_v63  ;;  %v4230_v46 = vld [vmem:[#allocation9 + $0x430] sm:$0xff]  ;;  %v4231_v63 = vld [vmem:[#allocation9 + $0x438] sm:$0xff] }
 0x5b7   :  { %v2983_v0 = vadd.f32 %v2982_v33, %v11131_v8  ;;  %v3115_v47 = vadd.f32 %v3114_v61, %v3052_v19  ;;  %v3055_v19 = vmul.f32 %v11137_v30, %v11137_v30  ;;  %v8533_v33 = vpack.c.bf16 %v4229_v37, %v4228_v49 }
 0x5b8   :  { %v3056_v61 = vmul.f32 %v11140_v35, %v11140_v35  ;;  %v8537_v49 = vpack.c.bf16 %v4231_v63, %v4230_v46  ;;  %v3058_v37 = vmul.f32 %v11146_v42, %v11146_v42  ;;  %v3060_v63 = vmul.f32 %v11152_v7, %v11152_v7 }
 0x5b9   :  { %v2984_v13 = vadd.f32 %v2983_v0, %v11134_v51  ;;  %v3116_v41 = vadd.f32 %v3115_v47, %v3053_v40  ;;  %8374 = vmatpush1.bf16.msra.mxu1 %v8373_v3  ;;  %8534 = vmatprep.subr.bf16.mxu0 %v8533_v33  ;;  %v4124_v0 = vld [vmem:[#allocation9 + $0xe0] sm:$0xff]  ;;  %v4125_v47 = vld [vmem:[#allocation9 + $0xe8] sm:$0xff] }
 0x5ba   :  { %8375 = vmatprep.subr.bf16.mxu1 %v15503_v10  ;;  %8536 = vmatpush3.bf16.msra.mxu0 %v8533_v33  ;;  %v8376_v44 = vpack.c.bf16 %v4125_v47, %v4124_v0  ;;  %v4232_v33 = vld [vmem:[#allocation9 + $0x440] sm:$0xff]  ;;  %v4233_v0 = vld [vmem:[#allocation9 + $0x448] sm:$0xff] }
 0x5bb   :  { %v2985_v9 = vadd.f32 %v2984_v13, %v11137_v30  ;;  %v3117_v22 = vadd.f32 %v3116_v41, %v3054_v18  ;;  %v3057_v18 = vmul.f32 %v11143_v52, %v11143_v52  ;;  %8538 = vmatprep.subr.bf16.mxu0 %v8537_v49  ;;  %v8541_v46 = vpack.c.bf16 %v4233_v0, %v4232_v33 }
 0x5bc   :  { %v3062_v33 = vmul.f32 %v11158_v20, %v11158_v20 }
 0x5bd   :  { %v2986_v32 = vadd.f32 %v2985_v9, %v11140_v35  ;;  %v3118_v40 = vadd.f32 %v3117_v22, %v3055_v19  ;;  %8377 = vmatpush1.bf16.msra.mxu1 %v8376_v44  ;;  %v4126_v9 = vld [vmem:[#allocation9 + $0xf0] sm:$0xff]  ;;  %v4127_v22 = vld [vmem:[#allocation9 + $0xf8] sm:$0xff] }
 0x5be   :  { %8378 = vmatprep.subr.bf16.mxu1 %v15503_v10  ;;  %8540 = vmatpush3.bf16.msra.mxu0 %v8537_v49  ;;  %v8379_v47 = vpack.c.bf16 %v4127_v22, %v4126_v9  ;;  %v4235_v49 = vld [vmem:[#allocation9 + $0x458] sm:$0xff]  ;;  %v3519_v9 = vld [vmem:[#allocation3] sm:$0xff] }
 0x5bf   :  { %v2987_v13 = vadd.f32 %v2986_v32, %v11143_v52  ;;  %v3119_v41 = vadd.f32 %v3118_v40, %v3056_v61  ;;  %v3059_v61 = vmul.f32 %v11149_v53, %v11149_v53  ;;  %8542 = vmatprep.subr.bf16.mxu0 %v8541_v46 }
 0x5c1   :  { %v2988_v3 = vadd.f32 %v2987_v13, %v11146_v42  ;;  %v3120_v19 = vadd.f32 %v3119_v41, %v3057_v18  ;;  %8380 = vmatpush1.bf16.msra.mxu1 %v8379_v47  ;;  %v3583_v13 = vld [vmem:[#allocation3 + $0x1] sm:$0xff]  ;;  %v4234_v41 = vld [vmem:[#allocation9 + $0x450] sm:$0xff] }
 0x5c2   :  { %8381 = vmatprep.subr.bf16.mxu1 %v15503_v10  ;;  %8544 = vmatpush3.bf16.msra.mxu0 %v8541_v46  ;;  %v8545_v22 = vpack.c.bf16 %v4235_v49, %v4234_v41  ;;  %v3063_v46 = vmul.f32 %v11161_v55, %v11161_v55  ;;  %v4128_v41 = vld [vmem:[#allocation9 + $0x100] sm:$0xff]  ;;  %v4129_v49 = vld [vmem:[#allocation9 + $0x108] sm:$0xff] }
 0x5c3   :  { %v2989_v32 = vadd.f32 %v2988_v3, %v11149_v53  ;;  %v3121_v40 = vadd.f32 %v3120_v19, %v3058_v37  ;;  %4304 = vmatprep.mubr.f32.mxu1 %v3583_v13  ;;  %v3061_v37 = vmul.f32 %v11155_v11, %v11155_v11  ;;  %v9390_v13 = vld [vmem:[#allocation2 + $0x8] sm:$0xff] }
 0x5c4   :  { %4305 = vmatmul.mubr.f32.vlgmr.msra.gmra.mrb[40].mxu1 %v3519_v9  ;;  %8546 = vmatprep.subr.bf16.mxu0 %v8545_v22  ;;  %v4238_v9 = vld [vmem:[#allocation9 + $0x470] sm:$0xff] }
 0x5c5   :  { %v2990_v44 = vadd.f32 %v2989_v32, %v11152_v7  ;;  %v3122_v18 = vadd.f32 %v3121_v40, %v3059_v61  ;;  %v3584_v61 = vld [vmem:[#allocation3 + $0x9] sm:$0xff]  ;;  %v4236_v32 = vld [vmem:[#allocation9 + $0x460] sm:$0xff] }
 0x5c6   :  { %8548 = vmatpush3.bf16.msra.mxu0 %v8545_v22  ;;  %v4237_v40 = vld [vmem:[#allocation9 + $0x468] sm:$0xff]  ;;  %4309 = vmatprep.mubr.f32.mxu1 %v3584_v61  ;;  %v8382_v22 = vpack.c.bf16 %v4129_v49, %v4128_v41  ;;  %v4239_v61 = vld [vmem:[#allocation9 + $0x478] sm:$0xff] }
 0x5c7   :  { %v2991_v3 = vadd.f32 %v2990_v44, %v11155_v11  ;;  %v3123_v19 = vadd.f32 %v3122_v18, %v3060_v63  ;;  %v8549_v18 = vpack.c.bf16 %v4237_v40, %v4236_v32  ;;  %v4130_v11 = vld [vmem:[#allocation9 + $0x110] sm:$0xff] }
 0x5c8   :  { %4310 = vmatmul.mubr.f32.gmra.mrb[42].mxu1 %v9390_v13 }
 0x5c9   :  { %v2992_v0 = vadd.f32 %v2991_v3, %v11158_v20  ;;  %v3124_v47 = vadd.f32 %v3123_v19, %v3061_v37  ;;  %v3064_v37 = vmul.f32 %v11164_v54, %v11164_v54  ;;  %8550 = vmatprep.subr.bf16.mxu0 %v8549_v18  ;;  %v8553_v20 = vpack.c.bf16 %v4239_v61, %v4238_v9 }
 0x5ca   :  { %8552 = vmatpush3.bf16.msra.mxu0 %v8549_v18  ;;  %8383 = vmatpush1.bf16.msra.mxu1 %v8382_v22  ;;  %v3067_v18 = vmul.f32 %v11173_v5, %v11173_v5 }
 0x5cb   :  { %v2993_v44 = vadd.f32 %v2992_v0, %v11161_v55  ;;  %v3125_v63 = vadd.f32 %v3124_v47, %v3062_v33  ;;  %v4131_v0 = vld [vmem:[#allocation9 + $0x118] sm:$0xff]  ;;  %v3065_v33 = vmul.f32 %v11167_v21, %v11167_v21  ;;  %8554 = vmatprep.subr.bf16.mxu0 %v8553_v20  ;;  %8384 = vmatprep.subr.bf16.mxu1 %v15503_v10 }
 0x5cc   :  { %v8385_v40 = vpack.c.bf16 %v4131_v0, %v4130_v11  ;;  %v3068_v11 = vmul.f32 %v11176_v34, %v11176_v34  ;;  %v3071_v0 = vmul.f32 %v11185_v17, %v11185_v17 }
 0x5cd   :  { %v2994_v3 = vadd.f32 %v2993_v44, %v11164_v54  ;;  %v3126_v19 = vadd.f32 %v3125_v63, %v3063_v46  ;;  %v3066_v46 = vmul.f32 %v11170_v43, %v11170_v43 }
 0x5ce   :  { %8556 = vmatpush3.bf16.msra.mxu0 %v8553_v20  ;;  %8386 = vmatpush1.bf16.msra.mxu1 %v8385_v40 }
 0x5cf   :  { %v2995_v47 = vadd.f32 %v2994_v3, %v11167_v21  ;;  %v3127_v32 = vadd.f32 %v3126_v19, %v3064_v37  ;;  %8387 = vmatprep.subr.bf16.mxu1 %v15503_v10  ;;  %v3069_v37 = vmul.f32 %v11179_v39, %v11179_v39  ;;  %v3070_v19 = vmul.f32 %v11182_v23, %v11182_v23 }
 0x5d1   :  { %v2996_v44 = vadd.f32 %v2995_v47, %v11170_v43  ;;  %v3128_v63 = vadd.f32 %v3127_v32, %v3065_v33  ;;  %v3072_v32 = vmul.f32 %v11188_v56, %v11188_v56 }
 0x5d3   :  { %v2997_v13 = vadd.f32 %v2996_v44, %v11173_v5  ;;  %v3129_v41 = vadd.f32 %v3128_v63, %v3066_v46  ;;  %v4132_v44 = vld [vmem:[#allocation9 + $0x120] sm:$0xff]  ;;  %v4133_v63 = vld [vmem:[#allocation9 + $0x128] sm:$0xff] }
 0x5d5   :  { %v2998_v49 = vadd.f32 %v2997_v13, %v11176_v34  ;;  %v3130_v9 = vadd.f32 %v3129_v41, %v3067_v18  ;;  %v3073_v18 = vmul.f32 %v11191_v14, %v11191_v14 }
 0x5d7   :  { %v2999_v20 = vadd.f32 %v2998_v49, %v11179_v39  ;;  %v3131_v3 = vadd.f32 %v3130_v9, %v3068_v11  ;;  %v8388_v11 = vpack.c.bf16 %v4133_v63, %v4132_v44  ;;  %v3074_v49 = vmul.f32 %v11194_v16, %v11194_v16 }
 0x5d8   :  { %v3079_v63 = vmul.f32 %v11209_v1, %v11209_v1 }
 0x5d9   :  { %v3000_v22 = vadd.f32 %v2999_v20, %v11182_v23  ;;  %v3132_v61 = vadd.f32 %v3131_v3, %v3069_v37  ;;  %8389 = vmatpush1.bf16.msra.mxu1 %v8388_v11  ;;  %v3075_v20 = vmul.f32 %v11197_v57, %v11197_v57 }
 0x5da   :  { %8390 = vmatprep.subr.bf16.mxu1 %v15503_v10 }
 0x5db   :  { %v3001_v33 = vadd.f32 %v3000_v22, %v11185_v17  ;;  %v3133_v47 = vadd.f32 %v3132_v61, %v3070_v19  ;;  %v3076_v22 = vmul.f32 %v11200_v4, %v11200_v4 }
 0x5dd   :  { %v3002_v40 = vadd.f32 %v3001_v33, %v11188_v56  ;;  %v3134_v46 = vadd.f32 %v3133_v47, %v3071_v0  ;;  %v3077_v33 = vmul.f32 %v11203_v28, %v11203_v28 }
 0x5df   :  { %v3003_v13 = vadd.f32 %v3002_v40, %v11191_v14  ;;  %v3135_v41 = vadd.f32 %v3134_v46, %v3072_v32  ;;  %v3078_v40 = vmul.f32 %v11206_v45, %v11206_v45 }
 0x5e1   :  { %v3004_v9 = vadd.f32 %v3003_v13, %v11194_v16  ;;  %v3136_v37 = vadd.f32 %v3135_v41, %v3073_v18  ;;  %v3080_v41 = vmul.f32 %v11212_v59, %v11212_v59 }
 0x5e3   :  { %v3005_v3 = vadd.f32 %v3004_v9, %v11197_v57  ;;  %v3137_v19 = vadd.f32 %v3136_v37, %v3074_v49  ;;  %v4134_v9 = vld [vmem:[#allocation9 + $0x130] sm:$0xff]  ;;  %v4135_v37 = vld [vmem:[#allocation9 + $0x138] sm:$0xff] }
 0x5e5   :  { %v3006_v61 = vadd.f32 %v3005_v3, %v11200_v4  ;;  %v3138_v0 = vadd.f32 %v3137_v19, %v3075_v20  ;;  %v3081_v20 = vmul.f32 %v11215_v2, %v11215_v2 }
 0x5e7   :  { %v3007_v47 = vadd.f32 %v3006_v61, %v11203_v28  ;;  %v3139_v32 = vadd.f32 %v3138_v0, %v3076_v22  ;;  %v8391_v22 = vpack.c.bf16 %v4135_v37, %v4134_v9  ;;  %v3082_v61 = vmul.f32 %v11218_v15, %v11218_v15 }
 0x5e9   :  { %v3008_v46 = vadd.f32 %v3007_v47, %v11206_v45  ;;  %v3140_v44 = vadd.f32 %v3139_v32, %v3077_v33  ;;  %8392 = vmatpush1.bf16.msra.mxu1 %v8391_v22  ;;  %v3083_v47 = vmul.f32 %v11221_v36, %v11221_v36 }
 0x5ea   :  { %8393 = vmatprep.subr.bf16.mxu1 %v15503_v10 }
 0x5eb   :  { %v3009_v18 = vadd.f32 %v3008_v46, %v11209_v1  ;;  %v3141_v13 = vadd.f32 %v3140_v44, %v3078_v40 }
 0x5ed   :  { %v3010_v11 = vadd.f32 %v3009_v18, %v11212_v59  ;;  %v3142_v49 = vadd.f32 %v3141_v13, %v3079_v63 }
 0x5ef   :  { %v3011_v3 = vadd.f32 %v3010_v11, %v11215_v2  ;;  %v3143_v19 = vadd.f32 %v3142_v49, %v3080_v41 }
 0x5f1   :  { %v3012_v0 = vadd.f32 %v3011_v3, %v11218_v15  ;;  %v3144_v33 = vadd.f32 %v3143_v19, %v3081_v20  ;;  %v4136_v20 = vld [vmem:[#allocation9 + $0x140] sm:$0xff]  ;;  %v4137_v3 = vld [vmem:[#allocation9 + $0x148] sm:$0xff] }
 0x5f2   :  { %v8394_v15 = vpack.c.bf16 %v4137_v3, %v4136_v20 }
 0x5f3   :  { %v3013_v32 = vadd.f32 %v3012_v0, %v11221_v36  ;;  %v3145_v40 = vadd.f32 %v3144_v33, %v3082_v61 }
 0x5f4   :  { %8395 = vmatpush1.bf16.msra.mxu1 %v8394_v15  ;;  %v3158_v15 = vld [vmem:[%s15246_s4] sm:$0x1] }
 0x5f5   :  { %v3014_v46 = vrot.slane %v3013_v32, 4  ;;  %v3146_v44 = vadd.f32 %v3145_v40, %v3083_v47  ;;  %8396 = vmatprep.subr.bf16.mxu1 %v15503_v10  ;;  %v3166_v40 = vlaneseq }
 0x5f7   :  { %v3015_v63 = vadd.f32 %v3014_v46, %v3013_v32  ;;  %v3147_v18 = vrot.slane %v3146_v44, 4  ;;  %v4138_v46 = vld [vmem:[#allocation9 + $0x150] sm:$0xff] }
 0x5f9   :  { %v3016_v13 = vrot.slane %v3015_v63, 2  ;;  %v3148_v41 = vadd.f32 %v3147_v18, %v3146_v44  ;;  %v4139_v44 = vld [vmem:[#allocation9 + $0x158] sm:$0xff]  ;;  %v3167_v18 = vshrl.u32 %v3166_v40, 7 }
 0x5fb   :  { %v3017_v11 = vadd.f32 %v3016_v13, %v3015_v63  ;;  %v3149_v49 = vrot.slane %v3148_v41, 2  ;;  %v8397_v63 = vpack.c.bf16 %v4139_v44, %v4138_v46  ;;  %v11512_v13 = vsub.s32 0, %v3167_v18 }
 0x5fd   :  { %v3018_v9 = vrot.slane %v3017_v11, 1  ;;  %v3150_v37 = vadd.f32 %v3149_v49, %v3148_v41  ;;  %8398 = vmatpush1.bf16.msra.mxu1 %v8397_v63  ;;  %15527 = vst [vmem:[#allocation22_spill] sm:$0xff] %v11512_v13 }
 0x5fe   :  { %8399 = vmatprep.subr.bf16.mxu1 %v15503_v10  ;;  %v15545_v10 = vld [vmem:[#allocation30_spill] sm:$0xff] }
 0x5ff   :  { %v3019_v19 = vadd.f32 %v3018_v9, %v3017_v11  ;;  %v3151_v22 = vrot.slane %v3150_v37, 1  ;;  %v3162_v11 = vld [vmem:[%s15247_s5] sm:$0x1] }
 0x601   :  { %v3152_v2 = vadd.f32 %v3151_v22, %v3150_v37  ;;  %v3153_v59 = vmul.f32 0.001953125, %v3019_v19  ;;  %v15528_v19 = vld [vmem:[#allocation36_spill] sm:$0xff] }
 0x603   :  { %v3154_v61 = vmul.f32 0.001953125, %v3152_v2  ;;  %v3155_v0 = vmul.f32 %v3153_v59, %v3153_v59 }
 0x605   :  { %v3156_v33 = vsub.f32 %v3154_v61, %v3155_v0  ;;  %v15529_v61 = vld [vmem:[#allocation37_spill] sm:$0xff] }
 0x607   :  { %v3157_v47 = vmax.f32 %v3156_v33, 0.0 }
 0x609   :  { %v3159_v32 = vadd.f32 1e-05, %v3157_v47 }
 0x60b   :  { %9382 = vrsqrt.f32 %v3159_v32  ;;  %v15531_v32 = vld [vmem:[#allocation39_spill] sm:$0xff] }
 0x615   :  { %v9383_v2 = vpop.eup %9382 }
 0x616   :  { %v3161_v41 = vmul.f32 %v9383_v2, %v3158_v15 }
 0x618   :  { %v3163_v49 = vmul.f32 %v3161_v41, %v3153_v59  ;;  %v11518_v9 = vrot.slane %v3161_v41, %v11512_v13 }
 0x61a   :  { %v3164_v37 = vsub.f32 %v3162_v11, %v3163_v49  ;;  %v3193_v20 = vmul.f32 %v11518_v9, %v11364_v38  ;;  %v11524_v3 = vmul.f32 %v11518_v9, %v11227_v27  ;;  %v11528_v22 = vmul.f32 %v11518_v9, %v15528_v19  ;;  %v15530_v38 = vld [vmem:[#allocation38_spill] sm:$0xff]  ;;  %v15538_v19 = vld [vmem:[#allocation28_spill] sm:$0xff] }
 0x61b   :  { %v11532_v0 = vmul.f32 %v11518_v9, %v15529_v61  ;;  %v11536_v59 = vmul.f32 %v11518_v9, %v11234_v31  ;;  %v11540_v33 = vmul.f32 %v11518_v9, %v11250_v62  ;;  %v11544_v27 = vmul.f32 %v11518_v9, %v15530_v38 }
 0x61c   :  { %v11547_v47 = vrot.slane %v3164_v37, %v11512_v13  ;;  %v11551_v40 = vmul.f32 %v11518_v9, %v15531_v32  ;;  %v11555_v46 = vmul.f32 %v11518_v9, %v11257_v58  ;;  %v11559_v31 = vmul.f32 %v11518_v9, %v11274_v48  ;;  %v15532_v48 = vld [vmem:[#allocation40_spill] sm:$0xff]  ;;  %v15537_v37 = vld [vmem:[#allocation27_spill] sm:$0xff]  ;;  %v15539_v32 = vld [vmem:[#allocation17_spill] sm:$0xff] }
 0x61d   :  { %v11563_v62 = vmul.f32 %v11518_v9, %v11269_v25  ;;  %v11567_v44 = vmul.f32 %v11518_v9, %v11286_v24  ;;  %v11571_v63 = vmul.f32 %v11518_v9, %v11281_v50  ;;  %v11575_v58 = vmul.f32 %v11518_v9, %v11299_v12  ;;  %v15533_v25 = vld [vmem:[#allocation42_spill] sm:$0xff]  ;;  %v15534_v24 = vld [vmem:[#allocation41_spill] sm:$0xff]  ;;  %v15536_v12 = vld [vmem:[#allocation43_spill] sm:$0xff] }
 0x61e   :  { %v3263_v18 = vadd.f32 %v11547_v47, %v3193_v20  ;;  %v11580_v15 = vmul.f32 %v11518_v9, %v15532_v48  ;;  %v11584_v2 = vmul.f32 %v11518_v9, %v15533_v25  ;;  %v11588_v41 = vmul.f32 %v11518_v9, %v15534_v24  ;;  %v15535_v50 = vld [vmem:[#allocation26_spill] sm:$0xff]  ;;  %v15543_v13 = vld [vmem:[#allocation29_spill] sm:$0xff] }
 0x61f   :  { %v11592_v11 = vmul.f32 %v11518_v9, %v15535_v50  ;;  %v11596_v49 = vmul.f32 %v11518_v9, %v15536_v12  ;;  %v11600_v20 = vmul.f32 %v11518_v9, %v15537_v37  ;;  %v11604_v61 = vmul.f32 %v11518_v9, %v15538_v19  ;;  %v15540_v25 = vld [vmem:[#allocation18_spill] sm:$0xff]  ;;  %v15541_v50 = vld [vmem:[#allocation24_spill] sm:$0xff] }
 0x620   :  { %v3327_v38 = vmax.f32 %v3263_v18, 0.0  ;;  %v11608_v48 = vmul.f32 %v11518_v9, %v15539_v32  ;;  %v11612_v24 = vmul.f32 %v11518_v9, %v15540_v25  ;;  %v11616_v12 = vmul.f32 %v11518_v9, %v15541_v50  ;;  %v15546_v18 = vld [vmem:[#allocation19_spill] sm:$0xff] }
 0x621   :  { %v11620_v37 = vmul.f32 %v11518_v9, %v15543_v13  ;;  %v11624_v19 = vmul.f32 %v11518_v9, %v15545_v10  ;;  %v11628_v32 = vmul.f32 %v11518_v9, %v15546_v18  ;;  %v11632_v25 = vmul.f32 %v11518_v9, %v15524_v26 }
 0x622   :  { %15542 = vst [vmem:[#allocation20_spill] sm:$0xff] %v11616_v12  ;;  %3477 = vst [vmem:[#allocation3 + $0x121] sm:$0xff] %v3327_v38  ;;  %v11636_v50 = vmul.f32 %v11518_v9, %v15525_v6  ;;  %v15547_v12 = vld [vmem:[#allocation23_spill] sm:$0xff]  ;;  %v11648_v18 = vmul.f32 %v11518_v9, %v11125_v60  ;;  %v11652_v26 = vmul.f32 %v11518_v9, %v11128_v29 }
 0x623   :  { %15544 = vst [vmem:[#allocation21_spill] sm:$0xff] %v11620_v37  ;;  %v11640_v13 = vmul.f32 %v11518_v9, %v15547_v12  ;;  %v15548_v37 = vld [vmem:[#allocation25_spill] sm:$0xff]  ;;  %v11656_v6 = vmul.f32 %v11518_v9, %v11131_v8  ;;  %v11660_v38 = vmul.f32 %v11518_v9, %v11134_v51  ;;  %v11664_v12 = vmul.f32 %v11518_v9, %v11137_v30 }
 0x624   :  { %v11644_v10 = vmul.f32 %v11518_v9, %v15548_v37  ;;  %v11668_v60 = vmul.f32 %v11518_v9, %v11140_v35  ;;  %v11672_v29 = vmul.f32 %v11518_v9, %v11143_v52  ;;  %v11676_v8 = vmul.f32 %v11518_v9, %v11146_v42  ;;  %v15550_v37 = vld [vmem:[#allocation31_spill] sm:$0xff] }
 0x625   :  { %v11680_v51 = vmul.f32 %v11518_v9, %v11149_v53  ;;  %v11684_v30 = vmul.f32 %v11518_v9, %v11152_v7  ;;  %v11688_v35 = vmul.f32 %v11518_v9, %v15550_v37  ;;  %v11696_v42 = vmul.f32 %v11518_v9, %v11161_v55 }
 0x626   :  { %15549 = vst [vmem:[#allocation36_spill] sm:$0xff] %v11668_v60  ;;  %v15551_v60 = vld [vmem:[#allocation32_spill] sm:$0xff]  ;;  %v11700_v53 = vmul.f32 %v11518_v9, %v11164_v54  ;;  %v11704_v7 = vmul.f32 %v11518_v9, %v11167_v21  ;;  %v11708_v37 = vmul.f32 %v11518_v9, %v11170_v43  ;;  %v11716_v55 = vmul.f32 %v11518_v9, %v11176_v34 }
 0x627   :  { %v11692_v52 = vmul.f32 %v11518_v9, %v15551_v60  ;;  %v11712_v60 = vmul.f32 %v11518_v9, %v11173_v5  ;;  %v11720_v54 = vmul.f32 %v11518_v9, %v11179_v39  ;;  %v11724_v21 = vmul.f32 %v11518_v9, %v11182_v23 }
 0x628   :  { %v11728_v43 = vmul.f32 %v11518_v9, %v11185_v17  ;;  %v11732_v5 = vmul.f32 %v11518_v9, %v11188_v56  ;;  %v11736_v34 = vmul.f32 %v11518_v9, %v11191_v14  ;;  %v11740_v39 = vmul.f32 %v11518_v9, %v11194_v16 }
 0x629   :  { %v11744_v23 = vmul.f32 %v11518_v9, %v11197_v57  ;;  %v11748_v17 = vmul.f32 %v11518_v9, %v11200_v4  ;;  %v11752_v56 = vmul.f32 %v11518_v9, %v11203_v28  ;;  %v11756_v14 = vmul.f32 %v11518_v9, %v11206_v45 }
 0x62a   :  { %15552 = vst [vmem:[#allocation37_spill] sm:$0xff] %v11740_v39  ;;  %v11760_v16 = vmul.f32 %v11518_v9, %v11209_v1  ;;  %v15555_v39 = vld [vmem:[#allocation33_spill] sm:$0xff]  ;;  %v11776_v45 = vmul.f32 %v11518_v9, %v11221_v36  ;;  %v11780_v1 = vadd.f32 %v11547_v47, %v11524_v3  ;;  %v11796_v36 = vadd.f32 %v11547_v47, %v11540_v33 }
 0x62b   :  { %15553 = vst [vmem:[#allocation38_spill] sm:$0xff] %v11744_v23  ;;  %15554 = vst [vmem:[#allocation39_spill] sm:$0xff] %v11748_v17  ;;  %v11764_v57 = vmul.f32 %v11518_v9, %v15555_v39  ;;  %v15556_v23 = vld [vmem:[#allocation34_spill] sm:$0xff]  ;;  %v15557_v17 = vld [vmem:[#allocation35_spill] sm:$0xff]  ;;  %v11784_v39 = vadd.f32 %v11547_v47, %v11528_v22  ;;  %v11804_v3 = vadd.f32 %v11547_v47, %v11551_v40 }
 0x62c   :  { %v11768_v4 = vmul.f32 %v11518_v9, %v15556_v23  ;;  %v11772_v28 = vmul.f32 %v11518_v9, %v15557_v17  ;;  %v11788_v23 = vadd.f32 %v11547_v47, %v11532_v0  ;;  %v11792_v17 = vadd.f32 %v11547_v47, %v11536_v59 }
 0x62d   :  { %v11800_v9 = vadd.f32 %v11547_v47, %v11544_v27  ;;  %v11808_v22 = vadd.f32 %v11547_v47, %v11555_v46  ;;  %v11812_v0 = vadd.f32 %v11547_v47, %v11559_v31  ;;  %v11816_v59 = vadd.f32 %v11547_v47, %v11563_v62 }
 0x62e   :  { %v11820_v33 = vadd.f32 %v11547_v47, %v11567_v44  ;;  %v11824_v27 = vadd.f32 %v11547_v47, %v11571_v63  ;;  %v11828_v40 = vadd.f32 %v11547_v47, %v11575_v58  ;;  %v11832_v46 = vadd.f32 %v11547_v47, %v11580_v15 }
 0x62f   :  { %v11836_v31 = vadd.f32 %v11547_v47, %v11584_v2  ;;  %v11840_v62 = vadd.f32 %v11547_v47, %v11588_v41  ;;  %v11844_v44 = vadd.f32 %v11547_v47, %v11592_v11  ;;  %v11848_v63 = vadd.f32 %v11547_v47, %v11596_v49  ;;  %v15559_v11 = vld [vmem:[#allocation20_spill] sm:$0xff] }
 0x630   :  { %v11852_v58 = vadd.f32 %v11547_v47, %v11600_v20  ;;  %v11856_v15 = vadd.f32 %v11547_v47, %v11604_v61  ;;  %v11860_v2 = vadd.f32 %v11547_v47, %v11608_v48  ;;  %v11864_v41 = vadd.f32 %v11547_v47, %v11612_v24 }
 0x631   :  { %15558 = vst [vmem:[#allocation40_spill] sm:$0xff] %v11848_v63  ;;  %v11868_v49 = vadd.f32 %v11547_v47, %v15559_v11  ;;  %v15560_v63 = vld [vmem:[#allocation21_spill] sm:$0xff]  ;;  %v11876_v61 = vadd.f32 %v11547_v47, %v11624_v19  ;;  %v11880_v48 = vadd.f32 %v11547_v47, %v11628_v32  ;;  %v11884_v24 = vadd.f32 %v11547_v47, %v11632_v25 }
 0x632   :  { %v11872_v20 = vadd.f32 %v11547_v47, %v15560_v63  ;;  %v11888_v11 = vadd.f32 %v11547_v47, %v11636_v50  ;;  %v11892_v63 = vadd.f32 %v11547_v47, %v11640_v13  ;;  %v11896_v19 = vadd.f32 %v11547_v47, %v11644_v10 }
 0x633   :  { %v11900_v32 = vadd.f32 %v11547_v47, %v11648_v18  ;;  %v11904_v25 = vadd.f32 %v11547_v47, %v11652_v26  ;;  %v11908_v50 = vadd.f32 %v11547_v47, %v11656_v6  ;;  %v11912_v13 = vadd.f32 %v11547_v47, %v11660_v38 }
 0x634   :  { %15561 = vst [vmem:[#allocation42_spill] sm:$0xff] %v11896_v19  ;;  %v11916_v10 = vadd.f32 %v11547_v47, %v11664_v12  ;;  %v15562_v19 = vld [vmem:[#allocation36_spill] sm:$0xff]  ;;  %v11924_v26 = vadd.f32 %v11547_v47, %v11672_v29  ;;  %v11928_v6 = vadd.f32 %v11547_v47, %v11676_v8  ;;  %v11932_v38 = vadd.f32 %v11547_v47, %v11680_v51 }
 0x635   :  { %v11920_v18 = vadd.f32 %v11547_v47, %v15562_v19  ;;  %v11936_v12 = vadd.f32 %v11547_v47, %v11684_v30  ;;  %v11940_v19 = vadd.f32 %v11547_v47, %v11688_v35  ;;  %v11944_v29 = vadd.f32 %v11547_v47, %v11692_v52 }
 0x636   :  { %v11948_v8 = vadd.f32 %v11547_v47, %v11696_v42  ;;  %v11952_v51 = vadd.f32 %v11547_v47, %v11700_v53  ;;  %v11956_v30 = vadd.f32 %v11547_v47, %v11704_v7  ;;  %v11960_v35 = vadd.f32 %v11547_v47, %v11708_v37 }
 0x637   :  { %15563 = vst [vmem:[#allocation41_spill] sm:$0xff] %v11944_v29  ;;  %v11964_v52 = vadd.f32 %v11547_v47, %v11712_v60  ;;  %v11968_v42 = vadd.f32 %v11547_v47, %v11716_v55  ;;  %v11972_v53 = vadd.f32 %v11547_v47, %v11720_v54  ;;  %v11976_v7 = vadd.f32 %v11547_v47, %v11724_v21 }
 0x638   :  { %15564 = vst [vmem:[#allocation26_spill] sm:$0xff] %v11948_v8  ;;  %15565 = vst [vmem:[#allocation43_spill] sm:$0xff] %v11952_v51  ;;  %v11980_v37 = vadd.f32 %v11547_v47, %v11728_v43  ;;  %v11984_v60 = vadd.f32 %v11547_v47, %v11732_v5  ;;  %v11988_v55 = vadd.f32 %v11547_v47, %v11736_v34 }
 0x639   :  { %15566 = vst [vmem:[#allocation27_spill] sm:$0xff] %v11956_v30  ;;  %15567 = vst [vmem:[#allocation28_spill] sm:$0xff] %v11968_v42  ;;  %v15570_v42 = vld [vmem:[#allocation37_spill] sm:$0xff]  ;;  %v12004_v5 = vadd.f32 %v11547_v47, %v11752_v56  ;;  %v12008_v34 = vadd.f32 %v11547_v47, %v11756_v14  ;;  %v12024_v56 = vadd.f32 %v11547_v47, %v11772_v28  ;;  %v15578_v28 = vmax.f32 %v11792_v17, 0.0 }
 0x63a   :  { %15568 = vst [vmem:[#allocation17_spill] sm:$0xff] %v11972_v53  ;;  %15569 = vst [vmem:[#allocation18_spill] sm:$0xff] %v11976_v7  ;;  %v11992_v54 = vadd.f32 %v11547_v47, %v15570_v42  ;;  %v15571_v53 = vld [vmem:[#allocation38_spill] sm:$0xff]  ;;  %v15572_v7 = vld [vmem:[#allocation39_spill] sm:$0xff]  ;;  %v12012_v42 = vadd.f32 %v11547_v47, %v11760_v16  ;;  %v12028_v14 = vadd.f32 %v11547_v47, %v11776_v45  ;;  %v15321_v16 = vmax.f32 %v11784_v39, 0.0 }
 0x63b   :  { %v11996_v21 = vadd.f32 %v11547_v47, %v15571_v53  ;;  %v12000_v43 = vadd.f32 %v11547_v47, %v15572_v7  ;;  %15573 = vst [vmem:[#allocation24_spill] sm:$0xff] %v12008_v34  ;;  %v12016_v53 = vadd.f32 %v11547_v47, %v11764_v57  ;;  %v12020_v7 = vadd.f32 %v11547_v47, %v11768_v4 }
 0x63c   :  { %15574 = vst [vmem:[#allocation29_spill] sm:$0xff] %v12012_v42  ;;  %15577 = vst [vmem:[#allocation23_spill] sm:$0xff] %v12024_v56  ;;  %v3305_v34 = vmax.f32 %v11780_v1, 0.0  ;;  %v15319_v42 = vmax.f32 %v11788_v23, 0.0  ;;  %v15322_v4 = vmax.f32 %v11800_v9, 0.0  ;;  %v15324_v56 = vmax.f32 %v11812_v0, 0.0 }
 0x63d   :  { %15575 = vst [vmem:[#allocation30_spill] sm:$0xff] %v12016_v53  ;;  %15576 = vst [vmem:[#allocation19_spill] sm:$0xff] %v12020_v7  ;;  %v15320_v53 = vmax.f32 %v11796_v36, 0.0  ;;  %v15323_v7 = vmax.f32 %v11804_v3, 0.0  ;;  %v15325_v47 = vmax.f32 %v11816_v59, 0.0  ;;  %v15327_v45 = vmax.f32 %v11836_v31, 0.0 }
 0x63e   :  { %3455 = vst [vmem:[#allocation3 + $0x19] sm:$0xff] %v3305_v34  ;;  %4314 = vmatprep.mubr.f32.mxu1 %v3305_v34  ;;  %3456 = vst [vmem:[#allocation3 + $0x21] sm:$0xff] %v15321_v16  ;;  %v15326_v34 = vmax.f32 %v11832_v46, 0.0  ;;  %v15330_v16 = vmax.f32 %v11868_v49, 0.0  ;;  %v15331_v1 = vmax.f32 %v11904_v25, 0.0  ;;  %v15592_v57 = vmax.f32 %v11880_v48, 0.0 }
 0x63f   :  { %3457 = vst [vmem:[#allocation3 + $0x31] sm:$0xff] %v15319_v42  ;;  %3458 = vst [vmem:[#allocation3 + $0x39] sm:$0xff] %v15578_v28  ;;  %v15579_v42 = vmax.f32 %v11808_v22, 0.0  ;;  %v15580_v28 = vld [vmem:[#allocation40_spill] sm:$0xff] }
 0x640   :  { %3459 = vst [vmem:[#allocation3 + $0x49] sm:$0xff] %v15320_v53  ;;  %3460 = vst [vmem:[#allocation3 + $0x51] sm:$0xff] %v15322_v4  ;;  %v15328_v53 = vmax.f32 %v15580_v28, 0.0  ;;  %v15581_v4 = vmax.f32 %v11820_v33, 0.0 }
 0x641   :  { %3461 = vst [vmem:[#allocation3 + $0x61] sm:$0xff] %v15323_v7  ;;  %3462 = vst [vmem:[#allocation3 + $0x69] sm:$0xff] %v15579_v42  ;;  %v15582_v7 = vmax.f32 %v11824_v27, 0.0  ;;  %v15583_v42 = vmax.f32 %v11828_v40, 0.0 }
 0x642   :  { %3463 = vst [vmem:[#allocation3 + $0x79] sm:$0xff] %v15324_v56  ;;  %3464 = vst [vmem:[#allocation3 + $0x81] sm:$0xff] %v15325_v47  ;;  %v15329_v56 = vmax.f32 %v11864_v41, 0.0  ;;  %v3336_v47 = vmax.f32 %v11900_v32, 0.0  ;;  %v15606_v32 = vld [vmem:[#allocation17_spill] sm:$0xff] }
 0x643   :  { %3465 = vst [vmem:[#allocation3 + $0x91] sm:$0xff] %v15581_v4  ;;  %3466 = vst [vmem:[#allocation3 + $0x99] sm:$0xff] %v15582_v7  ;;  %v15584_v4 = vmax.f32 %v11840_v62, 0.0  ;;  %v15585_v7 = vmax.f32 %v11844_v44, 0.0 }
 0x644   :  { %3467 = vst [vmem:[#allocation3 + $0xa9] sm:$0xff] %v15583_v42  ;;  %3468 = vst [vmem:[#allocation3 + $0xb1] sm:$0xff] %v15326_v34  ;;  %v15586_v34 = vmax.f32 %v11852_v58, 0.0 }
 0x645   :  { %3469 = vst [vmem:[#allocation3 + $0xc1] sm:$0xff] %v15327_v45  ;;  %3470 = vst [vmem:[#allocation3 + $0xc9] sm:$0xff] %v15584_v4  ;;  %v15587_v45 = vmax.f32 %v11856_v15, 0.0  ;;  %v15588_v4 = vmax.f32 %v11860_v2, 0.0 }
 0x646   :  { %3471 = vst [vmem:[#allocation3 + $0xd9] sm:$0xff] %v15585_v7  ;;  %3472 = vst [vmem:[#allocation3 + $0xe1] sm:$0xff] %v15328_v53  ;;  %v15589_v7 = vld [vmem:[#allocation42_spill] sm:$0xff]  ;;  %v15604_v53 = vmax.f32 %v11784_v39, 0.0  ;;  %v15610_v39 = vmax.f32 %v11940_v19, 0.0 }
 0x647   :  { %3473 = vst [vmem:[#allocation3 + $0xf1] sm:$0xff] %v15586_v34  ;;  %3474 = vst [vmem:[#allocation3 + $0xf9] sm:$0xff] %v15587_v45  ;;  %v3335_v42 = vmax.f32 %v15589_v7, 0.0  ;;  %v15590_v34 = vmax.f32 %v11872_v20, 0.0  ;;  %v15591_v45 = vmax.f32 %v11876_v61, 0.0  ;;  %v15603_v7 = vmax.f32 %v11924_v26, 0.0 }
 0x648   :  { %3475 = vst [vmem:[#allocation3 + $0x109] sm:$0xff] %v15588_v4  ;;  %3476 = vst [vmem:[#allocation3 + $0x111] sm:$0xff] %v15329_v56  ;;  %v15593_v56 = vmax.f32 %v11884_v24, 0.0  ;;  %v3351_v4 = vmax.f32 %v11960_v35, 0.0  ;;  %v12166_v35 = vld [vmem:[#allocation3 + $0x4a] sm:$0xff] }
 0x649   :  { %3478 = vst [vmem:[#allocation3 + $0x129] sm:$0xff] %v15330_v16  ;;  %3479 = vst [vmem:[#allocation3 + $0x139] sm:$0xff] %v15590_v34  ;;  %v15594_v16 = vmax.f32 %v11888_v11, 0.0  ;;  %v15595_v34 = vmax.f32 %v11892_v63, 0.0 }
 0x64a   :  { %3480 = vst [vmem:[#allocation3 + $0x141] sm:$0xff] %v15591_v45  ;;  %3481 = vst [vmem:[#allocation3 + $0x151] sm:$0xff] %v15592_v57  ;;  %v12123_v45 = vld [vmem:[#allocation3 + $0x18] sm:$0xff] }
 0x64b   :  { %3482 = vst [vmem:[#allocation3 + $0x159] sm:$0xff] %v15593_v56  ;;  %3483 = vst [vmem:[#allocation3 + $0x169] sm:$0xff] %v15594_v16  ;;  %v15597_v56 = vmax.f32 %v11908_v50, 0.0  ;;  %v12133_v16 = vld [vmem:[#allocation3 + $0x32] sm:$0xff]  ;;  %4315 = vmatmul.mubr.f32.gmra.mrb[44].mxu1 %v12123_v45  ;;  %v12136_v57 = vld [vmem:[#allocation3 + $0x3a] sm:$0xff] }
 0x64c   :  { %3484 = vst [vmem:[#allocation3 + $0x171] sm:$0xff] %v15595_v34  ;;  %15596 = vst [vmem:[#allocation25_spill] sm:$0xff] %v12123_v45  ;;  %7885 = vmatprep.mubr.f32.mxu0 %v12133_v16  ;;  %4319 = vmatprep.mubr.f32.mxu1 %v15604_v53  ;;  %v15605_v34 = vld [vmem:[#allocation28_spill] sm:$0xff]  ;;  %v3354_v45 = vmax.f32 %v15606_v32, 0.0  ;;  %v15612_v53 = vld [vmem:[#allocation18_spill] sm:$0xff]  ;;  %v3356_v32 = vmax.f32 %v11980_v37, 0.0 }
 0x64d   :  { %3485 = vst [vmem:[#allocation3 + $0x181] sm:$0xff] %v3335_v42  ;;  %3486 = vst [vmem:[#allocation3 + $0x189] sm:$0xff] %v3336_v47  ;;  %v15600_v42 = vmax.f32 %v11912_v13, 0.0  ;;  %v3352_v47 = vmax.f32 %v11964_v52, 0.0  ;;  %7886 = vmatmul.mubr.f32.vlgmr.msra.gmra.mrb[152].mxu0 %v12136_v57  ;;  %v4140_v52 = vld [vmem:[#allocation9 + $0x160] sm:$0xff]  ;;  %v4141_v37 = vld [vmem:[#allocation9 + $0x168] sm:$0xff] }
 0x64e   :  { %3487 = vst [vmem:[#allocation3 + $0x1c9] sm:$0xff] %v15331_v1  ;;  %3488 = vst [vmem:[#allocation3 + $0x1d1] sm:$0xff] %v15597_v56  ;;  %v15601_v1 = vmax.f32 %v11916_v10, 0.0  ;;  %v15602_v56 = vmax.f32 %v11920_v18, 0.0  ;;  %7888 = vmatprep.mubr.f32.mxu0 %v12166_v35 }
 0x64f   :  { %15598 = vst [vmem:[#allocation31_spill] sm:$0xff] %v12133_v16  ;;  %15599 = vst [vmem:[#allocation32_spill] sm:$0xff] %v12136_v57  ;;  %v3358_v16 = vmax.f32 %v11988_v55, 0.0  ;;  %v15616_v57 = vmax.f32 %v11956_v30, 0.0  ;;  %v3360_v55 = vmax.f32 %v11996_v21, 0.0  ;;  %v15619_v30 = vld [vmem:[#allocation30_spill] sm:$0xff] }
 0x650   :  { %3489 = vst [vmem:[#allocation3 + $0x1e1] sm:$0xff] %v15600_v42  ;;  %3490 = vst [vmem:[#allocation3 + $0x1e9] sm:$0xff] %v15601_v1  ;;  %v3353_v42 = vmax.f32 %v15605_v34, 0.0  ;;  %v15607_v1 = vmax.f32 %v11928_v6, 0.0  ;;  %v3355_v34 = vmax.f32 %v15612_v53, 0.0  ;;  %v12181_v53 = vld [vmem:[#allocation3 + $0x20] sm:$0xff] }
 0x651   :  { %3491 = vst [vmem:[#allocation3 + $0x1f9] sm:$0xff] %v15602_v56  ;;  %3492 = vst [vmem:[#allocation3 + $0x201] sm:$0xff] %v15603_v7  ;;  %v15608_v56 = vmax.f32 %v11932_v38, 0.0  ;;  %v15609_v7 = vmax.f32 %v11936_v12, 0.0  ;;  %4320 = vmatmul.mubr.f32.gmra.mrb[46].mxu1 %v12181_v53  ;;  %v12192_v21 = vld [vmem:[#allocation3 + $0x52] sm:$0xff] }
 0x652   :  { %3493 = vst [vmem:[#allocation3 + $0x211] sm:$0xff] %v15607_v1  ;;  %3496 = vst [vmem:[#allocation3 + $0x231] sm:$0xff] %v15610_v39  ;;  %v3357_v1 = vmax.f32 %v11984_v60, 0.0  ;;  %v15615_v39 = vmax.f32 %v11952_v51, 0.0  ;;  %v3359_v60 = vmax.f32 %v11992_v54, 0.0  ;;  %v3365_v51 = vmax.f32 %v15619_v30, 0.0  ;;  %7889 = vmatmul.mubr.f32.gmra.mrb[154].mxu0 %v12192_v21 }
 0x653   :  { %3494 = vst [vmem:[#allocation3 + $0x219] sm:$0xff] %v15608_v56  ;;  %3495 = vst [vmem:[#allocation3 + $0x229] sm:$0xff] %v15609_v7  ;;  %v15613_v56 = vmax.f32 %v11944_v29, 0.0  ;;  %v15614_v7 = vmax.f32 %v11948_v8, 0.0  ;;  %v3362_v8 = vmax.f32 %v12004_v5, 0.0  ;;  %v15620_v29 = vld [vmem:[#allocation19_spill] sm:$0xff]  ;;  %v8400_v30 = vpack.c.bf16 %v4141_v37, %v4140_v52 }
 0x654   :  { %15611 = vst [vmem:[#allocation33_spill] sm:$0xff] %v12166_v35  ;;  %3499 = vst [vmem:[#allocation3 + $0x259] sm:$0xff] %v15615_v39  ;;  %v15618_v39 = vld [vmem:[#allocation29_spill] sm:$0xff]  ;;  %v3366_v54 = vmax.f32 %v15620_v29, 0.0  ;;  %v15622_v5 = vld [vmem:[#allocation23_spill] sm:$0xff]  ;;  %v15625_v37 = vmax.f32 %v11796_v36, 0.0 }
 0x655   :  { %3497 = vst [vmem:[#allocation3 + $0x241] sm:$0xff] %v15613_v56  ;;  %3498 = vst [vmem:[#allocation3 + $0x249] sm:$0xff] %v15614_v7  ;;  %v3361_v56 = vmax.f32 %v12000_v43, 0.0  ;;  %v3364_v35 = vmax.f32 %v15618_v39, 0.0  ;;  %v15621_v43 = vmax.f32 %v11788_v23, 0.0  ;;  %v12199_v29 = vld [vmem:[#allocation3 + $0x62] sm:$0xff]  ;;  %8401 = vmatpush1.bf16.msra.mxu1 %v8400_v30 }
 0x656   :  { %3500 = vst [vmem:[#allocation3 + $0x261] sm:$0xff] %v15616_v57  ;;  %3501 = vst [vmem:[#allocation3 + $0x271] sm:$0xff] %v3351_v4  ;;  %v15617_v57 = vld [vmem:[#allocation24_spill] sm:$0xff]  ;;  %v3367_v4 = vmax.f32 %v15622_v5, 0.0  ;;  %7891 = vmatprep.mubr.f32.mxu0 %v12199_v29  ;;  %v12202_v23 = vld [vmem:[#allocation3 + $0x30] sm:$0xff] }
 0x657   :  { %3502 = vst [vmem:[#allocation3 + $0x279] sm:$0xff] %v3352_v47  ;;  %3503 = vst [vmem:[#allocation3 + $0x289] sm:$0xff] %v3353_v42  ;;  %v3363_v7 = vmax.f32 %v15617_v57, 0.0  ;;  %4324 = vmatprep.mubr.f32.mxu1 %v15621_v43  ;;  %v4142_v47 = vld [vmem:[#allocation9 + $0x170] sm:$0xff]  ;;  %v12207_v52 = vld [vmem:[#allocation3 + $0x7a] sm:$0xff]  ;;  %v15626_v57 = vmax.f32 %v11800_v9, 0.0 }
 0x658   :  { %3504 = vst [vmem:[#allocation3 + $0x291] sm:$0xff] %v3354_v45  ;;  %3505 = vst [vmem:[#allocation3 + $0x2a1] sm:$0xff] %v3355_v34  ;;  %v3368_v45 = vmax.f32 %v12028_v14, 0.0  ;;  %4325 = vmatmul.mubr.f32.gmra.mrb[48].mxu1 %v12202_v23  ;;  %v15623_v14 = vmax.f32 %v11792_v17, 0.0  ;;  %v4145_v34 = vld [vmem:[#allocation9 + $0x188] sm:$0xff]  ;;  %v12223_v36 = vld [vmem:[#allocation3 + $0x50] sm:$0xff] }
 0x659   :  { %3506 = vst [vmem:[#allocation3 + $0x2a9] sm:$0xff] %v3356_v32  ;;  %3507 = vst [vmem:[#allocation3 + $0x2b9] sm:$0xff] %v3357_v1  ;;  %v12211_v32 = vld [vmem:[#allocation3 + $0x38] sm:$0xff]  ;;  %v4039_v1 = vld [vmem:[#allocation3 + $0x82] sm:$0xff] }
 0x65a   :  { %3508 = vst [vmem:[#allocation3 + $0x2c1] sm:$0xff] %v3358_v16  ;;  %3509 = vst [vmem:[#allocation3 + $0x2d1] sm:$0xff] %v3359_v60  ;;  %v4143_v16 = vld [vmem:[#allocation9 + $0x178] sm:$0xff]  ;;  %4329 = vmatprep.mubr.f32.mxu1 %v15623_v14  ;;  %v4044_v43 = vld [vmem:[#allocation3 + $0xc2] sm:$0xff] }
 0x65b   :  { %3510 = vst [vmem:[#allocation3 + $0x2d9] sm:$0xff] %v3360_v55  ;;  %3511 = vst [vmem:[#allocation3 + $0x2e9] sm:$0xff] %v3361_v56  ;;  %v8403_v42 = vpack.c.bf16 %v4143_v16, %v4142_v47  ;;  %v4040_v60 = vld [vmem:[#allocation3 + $0x92] sm:$0xff]  ;;  %v12217_v55 = vld [vmem:[#allocation3 + $0x48] sm:$0xff]  ;;  %v15629_v47 = vmax.f32 %v11812_v0, 0.0 }
 0x65c   :  { %3512 = vst [vmem:[#allocation3 + $0x2f1] sm:$0xff] %v3362_v8  ;;  %3513 = vst [vmem:[#allocation3 + $0x301] sm:$0xff] %v3363_v7  ;;  %v4037_v8 = vld [vmem:[#allocation3 + $0x6a] sm:$0xff]  ;;  %4330 = vmatmul.mubr.f32.gmra.mrb[50].mxu1 %v12211_v32  ;;  %v4041_v56 = vld [vmem:[#allocation3 + $0x9a] sm:$0xff] }
 0x65d   :  { %3514 = vst [vmem:[#allocation3 + $0x309] sm:$0xff] %v3364_v35  ;;  %3515 = vst [vmem:[#allocation3 + $0x319] sm:$0xff] %v3365_v51  ;;  %7892 = vmatmul.mubr.f32.gmra.mrb[156].mxu0 %v4037_v8  ;;  %v15624_v35 = vmov 0.0|0.0   ;;  %v4144_v51 = vld [vmem:[#allocation9 + $0x180] sm:$0xff]  ;;  %4334 = vmatprep.mubr.f32.mxu1 %v15625_v37  ;;  %v4042_v7 = vld [vmem:[#allocation3 + $0xaa] sm:$0xff] }
 0x65e   :  { %3516 = vst [vmem:[#allocation3 + $0x321] sm:$0xff] %v3366_v54  ;;  %3517 = vst [vmem:[#allocation3 + $0x331] sm:$0xff] %v3367_v4  ;;  %8402 = vmatprep.subr.bf16.mxu1 %v15624_v35  ;;  %7894 = vmatprep.mubr.f32.mxu0 %v12207_v52  ;;  %v8406_v17 = vpack.c.bf16 %v4145_v34, %v4144_v51  ;;  %v4043_v39 = vld [vmem:[#allocation3 + $0xb2] sm:$0xff]  ;;  %v15627_v54 = vmax.f32 %v11804_v3, 0.0  ;;  %v12228_v5 = vld [vmem:[#allocation3 + $0x60] sm:$0xff]  ;;  %v15628_v4 = vmax.f32 %v11808_v22, 0.0 }
 0x65f   :  { %3518 = vst [vmem:[#allocation3 + $0x339] sm:$0xff] %v3368_v45  ;;  %8404 = vmatpush1.bf16.msra.mxu1 %v8403_v42  ;;  %v4045_v9 = vld [vmem:[#allocation3 + $0xca] sm:$0xff]  ;;  %v4046_v45 = vld [vmem:[#allocation3 + $0xda] sm:$0xff]  ;;  %v4047_v3 = vld [vmem:[#allocation3 + $0xe2] sm:$0xff]  ;;  %v15630_v51 = vmax.f32 %v11816_v59, 0.0 }
 0x660   :  { %8405 = vmatprep.subr.bf16.mxu1 %v15624_v35  ;;  %4335 = vmatmul.mubr.f32.gmra.mrb[52].mxu1 %v12217_v55  ;;  %v12233_v30 = vld [vmem:[#allocation3 + $0x68] sm:$0xff]  ;;  %v4048_v16 = vld [vmem:[#allocation3 + $0xf2] sm:$0xff]  ;;  %v4049_v42 = vld [vmem:[#allocation3 + $0xfa] sm:$0xff] }
 0x661   :  { %7895 = vmatmul.mubr.f32.gmra.mrb[158].mxu0 %v4039_v1  ;;  %4339 = vmatprep.mubr.f32.mxu1 %v15626_v57  ;;  %v12238_v8 = vld [vmem:[#allocation3 + $0x78] sm:$0xff]  ;;  %v4146_v22 = vld [vmem:[#allocation9 + $0x190] sm:$0xff]  ;;  %v4148_v37 = vld [vmem:[#allocation9 + $0x1a0] sm:$0xff]  ;;  %v15631_v57 = vmax.f32 %v11820_v33, 0.0 }
 0x662   :  { %7897 = vmatprep.mubr.f32.mxu0 %v4040_v60  ;;  %v4147_v14 = vld [vmem:[#allocation9 + $0x198] sm:$0xff]  ;;  %v4050_v1 = vld [vmem:[#allocation3 + $0x10a] sm:$0xff]  ;;  %v12243_v0 = vld [vmem:[#allocation3 + $0x80] sm:$0xff] }
 0x663   :  { %8407 = vmatpush1.bf16.msra.mxu1 %v8406_v17  ;;  %v8409_v34 = vpack.c.bf16 %v4147_v14, %v4146_v22  ;;  %v4149_v17 = vld [vmem:[#allocation9 + $0x1a8] sm:$0xff]  ;;  %v4057_v22 = vld [vmem:[#allocation3 + $0x15a] sm:$0xff]  ;;  %v15634_v14 = vmax.f32 %v11832_v46, 0.0 }
 0x664   :  { %8408 = vmatprep.subr.bf16.mxu1 %v15624_v35  ;;  %4340 = vmatmul.mubr.f32.gmra.mrb[54].mxu1 %v12223_v36  ;;  %v8412_v60 = vpack.c.bf16 %v4149_v17, %v4148_v37  ;;  %v4052_v59 = vld [vmem:[#allocation3 + $0x122] sm:$0xff]  ;;  %v4062_v46 = vld [vmem:[#allocation3 + $0x19a] sm:$0xff]  ;;  %v4061_v17 = vld [vmem:[#allocation3 + $0x18a] sm:$0xff] }
 0x665   :  { %7898 = vmatmul.mubr.f32.gmra.mrb[160].mxu0 %v4041_v56  ;;  %4344 = vmatprep.mubr.f32.mxu1 %v15627_v54  ;;  %v4051_v56 = vld [vmem:[#allocation3 + $0x112] sm:$0xff]  ;;  %v15632_v54 = vmax.f32 %v11824_v27, 0.0  ;;  %v12261_v27 = vld [vmem:[#allocation3 + $0xa8] sm:$0xff]  ;;  %v12271_v37 = vld [vmem:[#allocation3 + $0xc0] sm:$0xff] }
 0x666   :  { %7900 = vmatprep.mubr.f32.mxu0 %v4042_v7  ;;  %v12249_v7 = vld [vmem:[#allocation3 + $0x90] sm:$0xff] }
 0x667   :  { %8410 = vmatpush1.bf16.msra.mxu1 %v8409_v34  ;;  %v15635_v34 = vmax.f32 %v11836_v31, 0.0  ;;  %v4063_v31 = vld [vmem:[#allocation3 + $0x1a2] sm:$0xff] }
 0x668   :  { %4345 = vmatmul.mubr.f32.gmra.mrb[56].mxu1 %v12228_v5  ;;  %8411 = vmatprep.subr.bf16.mxu1 %v15624_v35 }
 0x669   :  { %7901 = vmatmul.mubr.f32.gmra.mrb[162].mxu0 %v4043_v39  ;;  %4349 = vmatprep.mubr.f32.mxu1 %v15628_v4  ;;  %v4053_v39 = vld [vmem:[#allocation3 + $0x12a] sm:$0xff]  ;;  %v4054_v4 = vld [vmem:[#allocation3 + $0x13a] sm:$0xff] }
 0x66a   :  { %7903 = vmatprep.mubr.f32.mxu0 %v4044_v43  ;;  %v4150_v43 = vld [vmem:[#allocation9 + $0x1b0] sm:$0xff] }
 0x66b   :  { %8413 = vmatpush1.bf16.msra.mxu1 %v8412_v60  ;;  %v15636_v60 = vmax.f32 %v11840_v62, 0.0  ;;  %v12282_v62 = vld [vmem:[#allocation3 + $0xd8] sm:$0xff] }
 0x66c   :  { %4350 = vmatmul.mubr.f32.gmra.mrb[58].mxu1 %v12233_v30  ;;  %8414 = vmatprep.subr.bf16.mxu1 %v15624_v35 }
 0x66d   :  { %7904 = vmatmul.mubr.f32.gmra.mrb[164].mxu0 %v4045_v9  ;;  %4354 = vmatprep.mubr.f32.mxu1 %v15629_v47  ;;  %v4151_v9 = vld [vmem:[#allocation9 + $0x1b8] sm:$0xff]  ;;  %v15633_v47 = vmax.f32 %v11828_v40, 0.0 }
 0x66e   :  { %7906 = vmatprep.mubr.f32.mxu0 %v4046_v45  ;;  %v8415_v33 = vpack.c.bf16 %v4151_v9, %v4150_v43  ;;  %v12255_v45 = vld [vmem:[#allocation3 + $0x98] sm:$0xff]  ;;  %v4064_v43 = vld [vmem:[#allocation3 + $0x1e2] sm:$0xff]  ;;  %v4065_v9 = vld [vmem:[#allocation3 + $0x1ea] sm:$0xff] }
 0x66f   :  { %v4059_v40 = vld [vmem:[#allocation3 + $0x172] sm:$0xff] }
 0x670   :  { %4355 = vmatmul.mubr.f32.gmra.mrb[60].mxu1 %v12238_v8 }
 0x671   :  { %7907 = vmatmul.mubr.f32.gmra.mrb[166].mxu0 %v4047_v3  ;;  %4359 = vmatprep.mubr.f32.mxu1 %v15630_v51  ;;  %v4055_v3 = vld [vmem:[#allocation3 + $0x142] sm:$0xff]  ;;  %v12266_v51 = vld [vmem:[#allocation3 + $0xb0] sm:$0xff] }
 0x672   :  { %7909 = vmatprep.mubr.f32.mxu0 %v4048_v16  ;;  %8416 = vmatpush1.bf16.msra.mxu1 %v8415_v33  ;;  %v4056_v16 = vld [vmem:[#allocation3 + $0x152] sm:$0xff]  ;;  %v4066_v33 = vld [vmem:[#allocation3 + $0x1fa] sm:$0xff] }
 0x673   :  { %8417 = vmatprep.subr.bf16.mxu1 %v15624_v35 }
 0x674   :  { %4360 = vmatmul.mubr.f32.gmra.mrb[62].mxu1 %v12243_v0 }
 0x675   :  { %7910 = vmatmul.mubr.f32.gmra.mrb[168].mxu0 %v4049_v42  ;;  %4364 = vmatprep.mubr.f32.mxu1 %v15631_v57  ;;  %v4058_v42 = vld [vmem:[#allocation3 + $0x16a] sm:$0xff] }
 0x676   :  { %7912 = vmatprep.mubr.f32.mxu0 %v4050_v1  ;;  %v4060_v1 = vld [vmem:[#allocation3 + $0x182] sm:$0xff] }
 0x677   :  { %v4153_v57 = vld [vmem:[#allocation9 + $0x1c8] sm:$0xff] }
 0x678   :  { %4365 = vmatmul.mubr.f32.gmra.mrb[64].mxu1 %v12249_v7 }
 0x679   :  { %7913 = vmatmul.mubr.f32.gmra.mrb[170].mxu0 %v4051_v56  ;;  %4369 = vmatprep.mubr.f32.mxu1 %v15632_v54  ;;  %v4152_v56 = vld [vmem:[#allocation9 + $0x1c0] sm:$0xff]  ;;  %v15637_v54 = vmax.f32 %v11844_v44, 0.0 }
 0x67a   :  { %7915 = vmatprep.mubr.f32.mxu0 %v4052_v59  ;;  %v8418_v59 = vpack.c.bf16 %v4153_v57, %v4152_v56  ;;  %v4067_v44 = vld [vmem:[#allocation3 + $0x202] sm:$0xff]  ;;  %v4073_v56 = vld [vmem:[#allocation3 + $0x24a] sm:$0xff]  ;;  %v15642_v57 = vmax.f32 %v11864_v41, 0.0  ;;  %v15643_v41 = vmax.f32 %v11868_v49, 0.0  ;;  %v12322_v49 = vld [vmem:[#allocation3 + $0x138] sm:$0xff] }
 0x67c   :  { %4370 = vmatmul.mubr.f32.gmra.mrb[66].mxu1 %v12255_v45 }
 0x67d   :  { %7916 = vmatmul.mubr.f32.gmra.mrb[172].mxu0 %v4053_v39  ;;  %4374 = vmatprep.mubr.f32.mxu1 %v15633_v47  ;;  %v12276_v39 = vld [vmem:[#allocation3 + $0xc8] sm:$0xff]  ;;  %v15639_v47 = vmax.f32 %v11852_v58, 0.0  ;;  %v4071_v58 = vld [vmem:[#allocation3 + $0x232] sm:$0xff] }
 0x67e   :  { %7918 = vmatprep.mubr.f32.mxu0 %v4054_v4  ;;  %8419 = vmatpush1.bf16.msra.mxu1 %v8418_v59  ;;  %v15638_v4 = vmax.f32 %v15580_v28, 0.0  ;;  %v4069_v28 = vld [vmem:[#allocation3 + $0x21a] sm:$0xff] }
 0x67f   :  { %8420 = vmatprep.subr.bf16.mxu1 %v15624_v35  ;;  %v4074_v59 = vld [vmem:[#allocation3 + $0x25a] sm:$0xff] }
 0x680   :  { %4375 = vmatmul.mubr.f32.gmra.mrb[68].mxu1 %v12261_v27 }
 0x681   :  { %7919 = vmatmul.mubr.f32.gmra.mrb[174].mxu0 %v4055_v3  ;;  %4379 = vmatprep.mubr.f32.mxu1 %v15634_v14  ;;  %v12287_v3 = vld [vmem:[#allocation3 + $0xe0] sm:$0xff]  ;;  %v15640_v14 = vmax.f32 %v11856_v15, 0.0  ;;  %v12303_v15 = vld [vmem:[#allocation3 + $0x108] sm:$0xff] }
 0x682   :  { %7921 = vmatprep.mubr.f32.mxu0 %v4056_v16  ;;  %v4068_v16 = vld [vmem:[#allocation3 + $0x212] sm:$0xff] }
 0x684   :  { %4380 = vmatmul.mubr.f32.gmra.mrb[70].mxu1 %v12266_v51 }
 0x685   :  { %7922 = vmatmul.mubr.f32.gmra.mrb[176].mxu0 %v4057_v22  ;;  %4384 = vmatprep.mubr.f32.mxu1 %v15635_v34  ;;  %v12292_v22 = vld [vmem:[#allocation3 + $0xf0] sm:$0xff] }
 0x686   :  { %7924 = vmatprep.mubr.f32.mxu0 %v4058_v42  ;;  %v4154_v42 = vld [vmem:[#allocation9 + $0x1d0] sm:$0xff] }
 0x687   :  { %v4070_v34 = vld [vmem:[#allocation3 + $0x22a] sm:$0xff] }
 0x688   :  { %4385 = vmatmul.mubr.f32.gmra.mrb[72].mxu1 %v12271_v37 }
 0x689   :  { %7925 = vmatmul.mubr.f32.gmra.mrb[178].mxu0 %v4059_v40  ;;  %4389 = vmatprep.mubr.f32.mxu1 %v15636_v60  ;;  %v4155_v40 = vld [vmem:[#allocation9 + $0x1d8] sm:$0xff]  ;;  %v4072_v60 = vld [vmem:[#allocation3 + $0x242] sm:$0xff] }
 0x68a   :  { %7927 = vmatprep.mubr.f32.mxu0 %v4060_v1  ;;  %v8421_v1 = vpack.c.bf16 %v4155_v40, %v4154_v42  ;;  %v15644_v42 = vmax.f32 %v11872_v20, 0.0  ;;  %v4080_v40 = vld [vmem:[#allocation3 + $0x2a2] sm:$0xff] }
 0x68b   :  { %v4083_v20 = vld [vmem:[#allocation3 + $0x2c2] sm:$0xff] }
 0x68c   :  { %4390 = vmatmul.mubr.f32.gmra.mrb[74].mxu1 %v12276_v39 }
 0x68d   :  { %7928 = vmatmul.mubr.f32.gmra.mrb[180].mxu0 %v4061_v17  ;;  %4394 = vmatprep.mubr.f32.mxu1 %v15637_v54  ;;  %v15641_v17 = vmax.f32 %v11860_v2, 0.0  ;;  %v3607_v2 = vld [vmem:[#allocation3 + $0x121] sm:$0xff] }
 0x68e   :  { %7930 = vmatprep.mubr.f32.mxu0 %v4062_v46  ;;  %v12297_v46 = vld [vmem:[#allocation3 + $0xf8] sm:$0xff]  ;;  %8422 = vmatpush1.bf16.msra.mxu1 %v8421_v1  ;;  %v4075_v54 = vld [vmem:[#allocation3 + $0x262] sm:$0xff]  ;;  %v15645_v1 = vmax.f32 %v11876_v61, 0.0 }
 0x68f   :  { %8423 = vmatprep.subr.bf16.mxu1 %v15624_v35  ;;  %v4085_v61 = vld [vmem:[#allocation3 + $0x2da] sm:$0xff] }
 0x690   :  { %4395 = vmatmul.mubr.f32.gmra.mrb[76].mxu1 %v12282_v62 }
 0x691   :  { %7931 = vmatmul.mubr.f32.gmra.mrb[182].mxu0 %v4063_v31  ;;  %4399 = vmatprep.mubr.f32.mxu1 %v15638_v4  ;;  %v12308_v31 = vld [vmem:[#allocation3 + $0x110] sm:$0xff]  ;;  %v4077_v4 = vld [vmem:[#allocation3 + $0x27a] sm:$0xff] }
 0x692   :  { %7933 = vmatprep.mubr.f32.mxu0 %v4064_v43  ;;  %v4076_v43 = vld [vmem:[#allocation3 + $0x272] sm:$0xff] }
 0x694   :  { %4400 = vmatmul.mubr.f32.gmra.mrb[78].mxu1 %v12287_v3 }
 0x695   :  { %7934 = vmatmul.mubr.f32.gmra.mrb[184].mxu0 %v4065_v9  ;;  %4404 = vmatprep.mubr.f32.mxu1 %v15639_v47  ;;  %v12311_v9 = vld [vmem:[#allocation3 + $0x120] sm:$0xff]  ;;  %v4157_v47 = vld [vmem:[#allocation9 + $0x1e8] sm:$0xff] }
 0x696   :  { %7936 = vmatprep.mubr.f32.mxu0 %v4066_v33  ;;  %v4078_v33 = vld [vmem:[#allocation3 + $0x28a] sm:$0xff] }
 0x698   :  { %4405 = vmatmul.mubr.f32.gmra.mrb[80].mxu1 %v12292_v22 }
 0x699   :  { %7937 = vmatmul.mubr.f32.gmra.mrb[186].mxu0 %v4067_v44  ;;  %4409 = vmatprep.mubr.f32.mxu1 %v15640_v14  ;;  %v4156_v44 = vld [vmem:[#allocation9 + $0x1e0] sm:$0xff]  ;;  %v4079_v14 = vld [vmem:[#allocation3 + $0x292] sm:$0xff] }
 0x69a   :  { %7939 = vmatprep.mubr.f32.mxu0 %v4068_v16  ;;  %v12316_v16 = vld [vmem:[#allocation3 + $0x128] sm:$0xff] }
 0x69c   :  { %4410 = vmatmul.mubr.f32.gmra.mrb[82].mxu1 %v12297_v46 }
 0x69d   :  { %7940 = vmatmul.mubr.f32.gmra.mrb[188].mxu0 %v4069_v28  ;;  %4414 = vmatprep.mubr.f32.mxu1 %v15641_v17  ;;  %v8424_v28 = vpack.c.bf16 %v4157_v47, %v4156_v44  ;;  %v12327_v17 = vld [vmem:[#allocation3 + $0x140] sm:$0xff]  ;;  %v4089_v47 = vld [vmem:[#allocation3 + $0x30a] sm:$0xff] }
 0x69e   :  { %7942 = vmatprep.mubr.f32.mxu0 %v4070_v34  ;;  %v4081_v34 = vld [vmem:[#allocation3 + $0x2aa] sm:$0xff]  ;;  %v4088_v44 = vld [vmem:[#allocation3 + $0x302] sm:$0xff] }
 0x69f   :  { %8425 = vmatpush1.bf16.msra.mxu1 %v8424_v28  ;;  %v15649_v28 = vmax.f32 %v11892_v63, 0.0  ;;  %v9391_v63 = vld [vmem:[#allocation2 + $0x8] sm:$0xff] }
 0x6a0   :  { %4415 = vmatmul.mubr.f32.gmra.mrb[84].mxu1 %v12303_v15  ;;  %8426 = vmatprep.subr.bf16.mxu1 %v15624_v35 }
 0x6a1   :  { %7943 = vmatmul.mubr.f32.gmra.mrb[190].mxu0 %v4071_v58  ;;  %4419 = vmatprep.mubr.f32.mxu1 %v15642_v57  ;;  %v4082_v58 = vld [vmem:[#allocation3 + $0x2ba] sm:$0xff]  ;;  %v12332_v57 = vld [vmem:[#allocation3 + $0x150] sm:$0xff] }
 0x6a2   :  { %7945 = vmatprep.mubr.f32.mxu0 %v4072_v60  ;;  %v15646_v60 = vmax.f32 %v11880_v48, 0.0 }
 0x6a4   :  { %4420 = vmatmul.mubr.f32.gmra.mrb[86].mxu1 %v12308_v31 }
 0x6a5   :  { %7946 = vmatmul.mubr.f32.gmra.mrb[192].mxu0 %v4073_v56  ;;  %4424 = vmatprep.mubr.f32.mxu1 %v3607_v2  ;;  %v4084_v56 = vld [vmem:[#allocation3 + $0x2d2] sm:$0xff]  ;;  %v4086_v2 = vld [vmem:[#allocation3 + $0x2ea] sm:$0xff] }
 0x6a6   :  { %7948 = vmatprep.mubr.f32.mxu0 %v4074_v59  ;;  %v15647_v59 = vmax.f32 %v11884_v24, 0.0  ;;  %v12343_v24 = vld [vmem:[#allocation3 + $0x168] sm:$0xff] }
 0x6a8   :  { %4425 = vmatmul.mubr.f32.gmra.mrb[88].mxu1 %v12311_v9 }
 0x6a9   :  { %7949 = vmatmul.mubr.f32.gmra.mrb[194].mxu0 %v4075_v54  ;;  %4429 = vmatprep.mubr.f32.mxu1 %v15643_v41  ;;  %v4158_v54 = vld [vmem:[#allocation9 + $0x1f0] sm:$0xff] }
 0x6aa   :  { %7951 = vmatprep.mubr.f32.mxu0 %v4076_v43  ;;  %v4159_v43 = vld [vmem:[#allocation9 + $0x1f8] sm:$0xff] }
 0x6ab   :  { %v8427_v48 = vpack.c.bf16 %v4159_v43, %v4158_v54  ;;  %v4087_v41 = vld [vmem:[#allocation3 + $0x2f2] sm:$0xff]  ;;  %v12363_v54 = vld [vmem:[#allocation3 + $0x1e0] sm:$0xff]  ;;  %v12368_v43 = vld [vmem:[#allocation3 + $0x1e8] sm:$0xff] }
 0x6ac   :  { %4430 = vmatmul.mubr.f32.gmra.mrb[90].mxu1 %v12316_v16 }
 0x6ad   :  { %7952 = vmatmul.mubr.f32.gmra.mrb[196].mxu0 %v4077_v4  ;;  %4434 = vmatprep.mubr.f32.mxu1 %v15644_v42  ;;  %v12337_v4 = vld [vmem:[#allocation3 + $0x158] sm:$0xff] }
 0x6ae   :  { %7954 = vmatprep.mubr.f32.mxu0 %v4078_v33  ;;  %v15648_v33 = vmax.f32 %v11888_v11, 0.0  ;;  %8428 = vmatpush1.bf16.msra.mxu1 %v8427_v48  ;;  %v3615_v42 = vld [vmem:[#allocation3 + $0x1b1] sm:$0xff] }
 0x6af   :  { %8429 = vmatprep.subr.bf16.mxu1 %v15624_v35  ;;  %v12348_v11 = vld [vmem:[#allocation3 + $0x170] sm:$0xff]  ;;  %v12373_v48 = vld [vmem:[#allocation3 + $0x1f8] sm:$0xff] }
 0x6b0   :  { %4435 = vmatmul.mubr.f32.gmra.mrb[92].mxu1 %v12322_v49 }
 0x6b1   :  { %7955 = vmatmul.mubr.f32.gmra.mrb[198].mxu0 %v4079_v14  ;;  %4439 = vmatprep.mubr.f32.mxu1 %v15645_v1  ;;  %v4090_v14 = vld [vmem:[#allocation3 + $0x31a] sm:$0xff]  ;;  %v4092_v1 = vld [vmem:[#allocation3 + $0x332] sm:$0xff] }
 0x6b2   :  { %7957 = vmatprep.mubr.f32.mxu0 %v4080_v40  ;;  %v4091_v40 = vld [vmem:[#allocation3 + $0x322] sm:$0xff] }
 0x6b4   :  { %4440 = vmatmul.mubr.f32.gmra.mrb[94].mxu1 %v12327_v17 }
 0x6b5   :  { %7958 = vmatmul.mubr.f32.gmra.mrb[200].mxu0 %v4081_v34  ;;  %4444 = vmatprep.mubr.f32.mxu1 %v15646_v60  ;;  %v3551_v34 = vld [vmem:[#allocation3 + $0x1b0] sm:$0xff]  ;;  %v15650_v60 = vmax.f32 %v11904_v25, 0.0  ;;  %v15653_v25 = vmax.f32 %v11916_v10, 0.0  ;;  %v15656_v10 = vmax.f32 %v11928_v6, 0.0  ;;  %v15659_v6 = vmax.f32 %v11940_v19, 0.0 }
 0x6b6   :  { %7960 = vmatprep.mubr.f32.mxu0 %v4082_v58  ;;  %v3616_v58 = vld [vmem:[#allocation3 + $0x1b9] sm:$0xff]  ;;  %v15664_v19 = vld [vmem:[#allocation43_spill] sm:$0xff] }
 0x6b8   :  { %4445 = vmatmul.mubr.f32.gmra.mrb[96].mxu1 %v12332_v57 }
 0x6b9   :  { %7961 = vmatmul.mubr.f32.gmra.mrb[202].mxu0 %v4083_v20  ;;  %4449 = vmatprep.mubr.f32.mxu1 %v15647_v59  ;;  %v4093_v20 = vld [vmem:[#allocation3 + $0x33a] sm:$0xff]  ;;  %v12358_v59 = vld [vmem:[#allocation3 + $0x1d0] sm:$0xff] }
 0x6ba   :  { %7963 = vmatprep.mubr.f32.mxu0 %v4084_v56  ;;  %v12353_v56 = vld [vmem:[#allocation3 + $0x1c8] sm:$0xff] }
 0x6bc   :  { %4450 = vmatmul.mubr.f32.gmra.mrb[98].mxu1 %v12337_v4 }
 0x6bd   :  { %7964 = vmatmul.mubr.f32.gmra.mrb[204].mxu0 %v4085_v61  ;;  %4454 = vmatprep.mubr.f32.mxu1 %v15648_v33  ;;  %v15651_v61 = vmax.f32 %v11908_v50, 0.0  ;;  %v15654_v50 = vmax.f32 %v11920_v18, 0.0  ;;  %v12383_v33 = vld [vmem:[#allocation3 + $0x210] sm:$0xff]  ;;  %v15657_v18 = vmax.f32 %v11932_v38, 0.0  ;;  %v15660_v38 = vld [vmem:[#allocation41_spill] sm:$0xff] }
 0x6be   :  { %7966 = vmatprep.mubr.f32.mxu0 %v4086_v2  ;;  %v15652_v2 = vmax.f32 %v11912_v13, 0.0  ;;  %v15655_v13 = vmax.f32 %v11924_v26, 0.0  ;;  %v15658_v26 = vmax.f32 %v11936_v12, 0.0  ;;  %v15662_v12 = vld [vmem:[#allocation26_spill] sm:$0xff] }
 0x6c0   :  { %4455 = vmatmul.mubr.f32.gmra.mrb[100].mxu1 %v12343_v24 }
 0x6c1   :  { %7967 = vmatmul.mubr.f32.gmra.mrb[206].mxu0 %v4087_v41  ;;  %4459 = vmatprep.mubr.f32.mxu1 %v15649_v28  ;;  %v12378_v41 = vld [vmem:[#allocation3 + $0x200] sm:$0xff]  ;;  %v12398_v28 = vld [vmem:[#allocation3 + $0x230] sm:$0xff] }
 0x6c2   :  { %7969 = vmatprep.mubr.f32.mxu0 %v4088_v44  ;;  %v12388_v44 = vld [vmem:[#allocation3 + $0x218] sm:$0xff] }
 0x6c4   :  { %4460 = vmatmul.mubr.f32.gmra.mrb[102].mxu1 %v12348_v11 }
 0x6c5   :  { %7970 = vmatmul.mubr.f32.gmra.mrb[208].mxu0 %v4089_v47  ;;  %4464 = vmatprep.mubr.f32.mxu1 %v3615_v42  ;;  %v12393_v47 = vld [vmem:[#allocation3 + $0x228] sm:$0xff]  ;;  %v12403_v42 = vld [vmem:[#allocation3 + $0x240] sm:$0xff] }
 0x6c6   :  { %7972 = vmatprep.mubr.f32.mxu0 %v4090_v14  ;;  %v15661_v14 = vmax.f32 %v15660_v38, 0.0  ;;  %v12433_v38 = vld [vmem:[#allocation3 + $0x2a0] sm:$0xff] }
 0x6c7   :  { %15669 = vst [vmem:[#allocation35_spill] sm:$0xff] %v12433_v38 }
 0x6c8   :  { %4465 = vmatmul.mubr.f32.gmra.mrb[104].mxu1 %v3551_v34  ;;  %v12408_v34 = vld [vmem:[#allocation3 + $0x248] sm:$0xff] }
 0x6c9   :  { %7973 = vmatmul.mubr.f32.gmra.mrb[210].mxu0 %v4091_v40  ;;  %4469 = vmatprep.mubr.f32.mxu1 %v3616_v58  ;;  %v15663_v40 = vmax.f32 %v15662_v12, 0.0  ;;  %v12413_v58 = vld [vmem:[#allocation3 + $0x258] sm:$0xff]  ;;  %v12436_v12 = vld [vmem:[#allocation3 + $0x2a8] sm:$0xff] }
 0x6ca   :  { %7975 = vmatprep.mubr.f32.mxu0 %v4092_v1  ;;  %v15665_v1 = vmax.f32 %v15664_v19, 0.0  ;;  %15670 = vst [vmem:[#allocation20_spill] sm:$0xff] %v12436_v12  ;;  %v12439_v19 = vld [vmem:[#allocation3 + $0x2b8] sm:$0xff] }
 0x6cb   :  { %15671 = vst [vmem:[#allocation21_spill] sm:$0xff] %v12439_v19 }
 0x6cc   :  { %4470 = vmatmul.mubr.f32.gmra.mrb[106].mxu1 %v9391_v63 }
 0x6cd   :  { %7976 = vmatmul.mubr.f32.gmra.mrb[212].mxu0 %v4093_v20  ;;  %4474 = vmatprep.mubr.f32.mxu1 %v15650_v60  ;;  %v15666_v20 = vld [vmem:[#allocation27_spill] sm:$0xff]  ;;  %v12418_v60 = vld [vmem:[#allocation3 + $0x260] sm:$0xff] }
 0x6ce   :  { %v15667_v63 = vmax.f32 %v15666_v20, 0.0  ;;  %v12442_v20 = vld [vmem:[#allocation3 + $0x2c0] sm:$0xff] }
 0x6cf   :  { %15672 = vst [vmem:[#allocation36_spill] sm:$0xff] %v12442_v20 }
 0x6d0   :  { %4475 = vmatmul.mubr.f32.gmra.mrb[108].mxu1 %v12353_v56 }
 0x6d1   :  { %4479 = vmatprep.mubr.f32.mxu1 %v15651_v61  ;;  %v3631_v61 = vld [vmem:[#allocation3 + $0x271] sm:$0xff] }
 0x6d4   :  { %4480 = vmatmul.mubr.f32.gmra.mrb[110].mxu1 %v12358_v59 }
 0x6d5   :  { %4484 = vmatprep.mubr.f32.mxu1 %v15652_v2  ;;  %v12421_v2 = vld [vmem:[#allocation3 + $0x270] sm:$0xff] }
 0x6d8   :  { %4485 = vmatmul.mubr.f32.gmra.mrb[112].mxu1 %v12363_v54 }
 0x6d9   :  { %4489 = vmatprep.mubr.f32.mxu1 %v15653_v25  ;;  %v3632_v25 = vld [vmem:[#allocation3 + $0x279] sm:$0xff] }
 0x6dc   :  { %4490 = vmatmul.mubr.f32.gmra.mrb[114].mxu1 %v12368_v43 }
 0x6dd   :  { %4494 = vmatprep.mubr.f32.mxu1 %v15654_v50  ;;  %v12424_v50 = vld [vmem:[#allocation3 + $0x278] sm:$0xff] }
 0x6e0   :  { %4495 = vmatmul.mubr.f32.gmra.mrb[116].mxu1 %v12373_v48 }
 0x6e1   :  { %4499 = vmatprep.mubr.f32.mxu1 %v15655_v13  ;;  %v3633_v13 = vld [vmem:[#allocation3 + $0x289] sm:$0xff] }
 0x6e4   :  { %4500 = vmatmul.mubr.f32.gmra.mrb[118].mxu1 %v12378_v41 }
 0x6e5   :  { %4504 = vmatprep.mubr.f32.mxu1 %v15656_v10  ;;  %v12427_v10 = vld [vmem:[#allocation3 + $0x288] sm:$0xff] }
 0x6e8   :  { %4505 = vmatmul.mubr.f32.gmra.mrb[120].mxu1 %v12383_v33 }
 0x6e9   :  { %4509 = vmatprep.mubr.f32.mxu1 %v15657_v18  ;;  %v3634_v18 = vld [vmem:[#allocation3 + $0x291] sm:$0xff] }
 0x6ec   :  { %4510 = vmatmul.mubr.f32.gmra.mrb[122].mxu1 %v12388_v44 }
 0x6ed   :  { %4514 = vmatprep.mubr.f32.mxu1 %v15658_v26  ;;  %v12430_v26 = vld [vmem:[#allocation3 + $0x290] sm:$0xff] }
 0x6ee   :  { %15668 = vst [vmem:[#allocation34_spill] sm:$0xff] %v12430_v26 }
 0x6f0   :  { %4515 = vmatmul.mubr.f32.gmra.mrb[124].mxu1 %v12393_v47 }
 0x6f1   :  { %4519 = vmatprep.mubr.f32.mxu1 %v15659_v6  ;;  %v3635_v6 = vld [vmem:[#allocation3 + $0x2a1] sm:$0xff] }
 0x6f4   :  { %4520 = vmatmul.mubr.f32.gmra.mrb[126].mxu1 %v12398_v28 }
 0x6f5   :  { %4524 = vmatprep.mubr.f32.mxu1 %v15661_v14  ;;  %v3636_v14 = vld [vmem:[#allocation3 + $0x2a9] sm:$0xff] }
 0x6f8   :  { %4525 = vmatmul.mubr.f32.gmra.mrb[128].mxu1 %v12403_v42 }
 0x6f9   :  { %4529 = vmatprep.mubr.f32.mxu1 %v15663_v40  ;;  %v3637_v40 = vld [vmem:[#allocation3 + $0x2b9] sm:$0xff] }
 0x6fc   :  { %4530 = vmatmul.mubr.f32.gmra.mrb[130].mxu1 %v12408_v34 }
 0x6fd   :  { %4534 = vmatprep.mubr.f32.mxu1 %v15665_v1  ;;  %v3638_v1 = vld [vmem:[#allocation3 + $0x2c1] sm:$0xff] }
 0x700   :  { %4535 = vmatmul.mubr.f32.gmra.mrb[132].mxu1 %v12413_v58 }
 0x701   :  { %4539 = vmatprep.mubr.f32.mxu1 %v15667_v63  ;;  %v3639_v63 = vld [vmem:[#allocation3 + $0x2d1] sm:$0xff] }
 0x704   :  { %4540 = vmatmul.mubr.f32.gmra.mrb[134].mxu1 %v12418_v60 }
 0x705   :  { %4544 = vmatprep.mubr.f32.mxu1 %v3631_v61 }
 0x708   :  { %4545 = vmatmul.mubr.f32.gmra.mrb[136].mxu1 %v12421_v2 }
 0x709   :  { %4549 = vmatprep.mubr.f32.mxu1 %v3632_v25 }
 0x70c   :  { %4550 = vmatmul.mubr.f32.gmra.mrb[138].mxu1 %v12424_v50 }
 0x70d   :  { %4554 = vmatprep.mubr.f32.mxu1 %v3633_v13  ;;  %v12449_v13 = vld [vmem:[#allocation3 + $0x2d0] sm:$0xff] }
 0x70e   :  { %15675 = vst [vmem:[#allocation39_spill] sm:$0xff] %v12449_v13 }
 0x710   :  { %4555 = vmatmul.mubr.f32.gmra.mrb[140].mxu1 %v12427_v10 }
 0x711   :  { %4559 = vmatprep.mubr.f32.mxu1 %v3634_v18  ;;  %v3640_v18 = vld [vmem:[#allocation3 + $0x2d9] sm:$0xff] }
 0x714   :  { %4560 = vmatmul.mubr.f32.gmra.mrb[142].mxu1 %v12430_v26 }
 0x715   :  { %4564 = vmatprep.mubr.f32.mxu1 %v3635_v6 }
 0x718   :  { %4565 = vmatmul.mubr.f32.gmra.mrb[144].mxu1 %v12433_v38  ;;  %v4163_v38 = vld [vmem:[#allocation9 + $0x218] sm:$0xff] }
 0x719   :  { %4569 = vmatprep.mubr.f32.mxu1 %v3636_v14 }
 0x71c   :  { %4570 = vmatmul.mubr.f32.gmra.mrb[146].mxu1 %v12436_v12 }
 0x71d   :  { %4574 = vmatprep.mubr.f32.mxu1 %v3637_v40  ;;  %v12456_v40 = vld [vmem:[#allocation3 + $0x2d8] sm:$0xff] }
 0x71e   :  { %15678 = vst [vmem:[#allocation28_spill] sm:$0xff] %v12456_v40 }
 0x720   :  { %4575 = vmatmul.mubr.f32.gmra.mrb[148].mxu1 %v12439_v19  ;;  %v12445_v61 = vpop.f32.mrb[152].mxu0  ;;  %v12498_v19 = vld [vmem:[#allocation3 + $0x320] sm:$0xff] }
 0x721   :  { %4579 = vmatprep.mubr.f32.mxu1 %v3638_v1  ;;  %15673 = vst [vmem:[#allocation37_spill] sm:$0xff] %v12445_v61  ;;  %v12447_v25 = vpop.f32.mrb[153].mxu0  ;;  %v3641_v1 = vld [vmem:[#allocation3 + $0x2e9] sm:$0xff] }
 0x722   :  { %15674 = vst [vmem:[#allocation38_spill] sm:$0xff] %v12447_v25  ;;  %v12463_v61 = vld [vmem:[#allocation3 + $0x2e8] sm:$0xff]  ;;  %v3642_v25 = vld [vmem:[#allocation3 + $0x2f1] sm:$0xff] }
 0x723   :  { %15681 = vst [vmem:[#allocation24_spill] sm:$0xff] %v12463_v61 }
 0x724   :  { %4580 = vmatmul.mubr.f32.gmra.mrb[150].mxu1 %v12442_v20 }
 0x725   :  { %4584 = vmatprep.mubr.f32.mxu1 %v3639_v63  ;;  %v12452_v6 = vpop.f32.mrb[154].mxu0 }
 0x726   :  { %15676 = vst [vmem:[#allocation40_spill] sm:$0xff] %v12452_v6  ;;  %v12454_v14 = vpop.f32.mrb[155].mxu0  ;;  %v12470_v6 = vld [vmem:[#allocation3 + $0x2f0] sm:$0xff] }
 0x727   :  { %15677 = vst [vmem:[#allocation42_spill] sm:$0xff] %v12454_v14  ;;  %15684 = vst [vmem:[#allocation19_spill] sm:$0xff] %v12470_v6  ;;  %v3643_v14 = vld [vmem:[#allocation3 + $0x301] sm:$0xff] }
 0x728   :  { %4585 = vmatmul.mubr.f32.gmra.mrb[152].mxu1 %v12449_v13 }
 0x729   :  { %4589 = vmatprep.mubr.f32.mxu1 %v3640_v18 }
 0x72c   :  { %4590 = vmatmul.mubr.f32.gmra.mrb[154].mxu1 %v12456_v40 }
 0x72d   :  { %4594 = vmatprep.mubr.f32.mxu1 %v3641_v1 }
 0x730   :  { %v12459_v20 = vpop.f32.mrb[156].mxu0  ;;  %4595 = vmatmul.mubr.f32.gmra.mrb[156].mxu1 %v12463_v61 }
 0x731   :  { %15679 = vst [vmem:[#allocation17_spill] sm:$0xff] %v12459_v20  ;;  %v12461_v63 = vpop.f32.mrb[157].mxu0  ;;  %4599 = vmatprep.mubr.f32.mxu1 %v3642_v25  ;;  %v12477_v20 = vld [vmem:[#allocation3 + $0x300] sm:$0xff] }
 0x732   :  { %15680 = vst [vmem:[#allocation18_spill] sm:$0xff] %v12461_v63  ;;  %15687 = vst [vmem:[#allocation26_spill] sm:$0xff] %v12477_v20  ;;  %v3644_v63 = vld [vmem:[#allocation3 + $0x309] sm:$0xff] }
 0x734   :  { %v12466_v13 = vpop.f32.mrb[158].mxu0  ;;  %4600 = vmatmul.mubr.f32.gmra.mrb[158].mxu1 %v12470_v6 }
 0x735   :  { %15682 = vst [vmem:[#allocation29_spill] sm:$0xff] %v12466_v13  ;;  %v12468_v18 = vpop.f32.mrb[159].mxu0  ;;  %4604 = vmatprep.mubr.f32.mxu1 %v3643_v14  ;;  %v12484_v13 = vld [vmem:[#allocation3 + $0x308] sm:$0xff] }
 0x736   :  { %15683 = vst [vmem:[#allocation30_spill] sm:$0xff] %v12468_v18  ;;  %15690 = vst [vmem:[#allocation44_spill] sm:$0xff] %v12484_v13  ;;  %v3645_v18 = vld [vmem:[#allocation3 + $0x319] sm:$0xff] }
 0x738   :  { %v12473_v40 = vpop.f32.mrb[160].mxu0  ;;  %4605 = vmatmul.mubr.f32.gmra.mrb[160].mxu1 %v12477_v20 }
 0x739   :  { %15685 = vst [vmem:[#allocation23_spill] sm:$0xff] %v12473_v40  ;;  %v12475_v1 = vpop.f32.mrb[161].mxu0  ;;  %4609 = vmatprep.mubr.f32.mxu1 %v3644_v63  ;;  %v12491_v40 = vld [vmem:[#allocation3 + $0x318] sm:$0xff] }
 0x73a   :  { %15686 = vst [vmem:[#allocation41_spill] sm:$0xff] %v12475_v1  ;;  %15693 = vst [vmem:[#allocation47_spill] sm:$0xff] %v12491_v40  ;;  %v3646_v1 = vld [vmem:[#allocation3 + $0x321] sm:$0xff] }
 0x73c   :  { %v12480_v61 = vpop.f32.mrb[162].mxu0  ;;  %4610 = vmatmul.mubr.f32.gmra.mrb[162].mxu1 %v12484_v13 }
 0x73d   :  { %15688 = vst [vmem:[#allocation43_spill] sm:$0xff] %v12480_v61  ;;  %v12482_v25 = vpop.f32.mrb[163].mxu0  ;;  %4614 = vmatprep.mubr.f32.mxu1 %v3645_v18  ;;  %v4160_v61 = vld [vmem:[#allocation9 + $0x200] sm:$0xff] }
 0x73e   :  { %15689 = vst [vmem:[#allocation27_spill] sm:$0xff] %v12482_v25  ;;  %v4161_v25 = vld [vmem:[#allocation9 + $0x208] sm:$0xff]  ;;  %v15697_v18 = vld [vmem:[#allocation25_spill] sm:$0xff] }
 0x73f   :  { %v8430_v13 = vpack.c.bf16 %v4161_v25, %v4160_v61 }
 0x740   :  { %v12487_v6 = vpop.f32.mrb[164].mxu0  ;;  %4615 = vmatmul.mubr.f32.gmra.mrb[164].mxu1 %v12491_v40  ;;  %v4162_v40 = vld [vmem:[#allocation9 + $0x210] sm:$0xff] }
 0x741   :  { %15691 = vst [vmem:[#allocation45_spill] sm:$0xff] %v12487_v6  ;;  %v12489_v14 = vpop.f32.mrb[165].mxu0  ;;  %4619 = vmatprep.mubr.f32.mxu1 %v3646_v1 }
 0x742   :  { %15692 = vst [vmem:[#allocation46_spill] sm:$0xff] %v12489_v14  ;;  %v3647_v14 = vld [vmem:[#allocation3 + $0x2] sm:$0xff] }
 0x744   :  { %v12494_v20 = vpop.f32.mrb[166].mxu0  ;;  %4620 = vmatmul.mubr.f32.gmra.mrb[166].mxu1 %v12498_v19 }
 0x745   :  { %15694 = vst [vmem:[#allocation48_spill] sm:$0xff] %v12494_v20  ;;  %v12496_v63 = vpop.f32.mrb[167].mxu0  ;;  %4689 = vmatprep.mubr.f32.mxu1 %v15697_v18  ;;  %v3648_v20 = vld [vmem:[#allocation3 + $0xa] sm:$0xff] }
 0x746   :  { %15695 = vst [vmem:[#allocation49_spill] sm:$0xff] %v12496_v63  ;;  %v8433_v63 = vpack.c.bf16 %v4163_v38, %v4162_v40  ;;  %v4165_v18 = vld [vmem:[#allocation9 + $0x228] sm:$0xff]  ;;  %v12518_v38 = vld [vmem:[#allocation3 + $0x1a] sm:$0xff] }
 0x748   :  { %v12501_v6 = vpop.f32.mrb[168].mxu0  ;;  %4690 = vmatmul.mubr.f32.vlgmr.msra.gmra.mrb[40].mxu1 %v3647_v14 }
 0x749   :  { %15696 = vst [vmem:[#allocation50_spill] sm:$0xff] %v12501_v6  ;;  %v12504_v12 = vpop.f32.mrb[169].mxu0  ;;  %4694 = vmatprep.mubr.f32.mxu1 %v12181_v53  ;;  %8431 = vmatpush1.bf16.msra.mxu1 %v8430_v13  ;;  %v4164_v6 = vld [vmem:[#allocation9 + $0x220] sm:$0xff]  ;;  %v4166_v53 = vld [vmem:[#allocation9 + $0x230] sm:$0xff]  ;;  %v4167_v13 = vld [vmem:[#allocation9 + $0x238] sm:$0xff] }
 0x74a   :  { %15698 = vst [vmem:[#allocation25_spill] sm:$0xff] %v12504_v12  ;;  %8432 = vmatprep.subr.bf16.mxu1 %v15624_v35  ;;  %v8436_v25 = vpack.c.bf16 %v4165_v18, %v4164_v6  ;;  %v4169_v6 = vld [vmem:[#allocation9 + $0x248] sm:$0xff] }
 0x74b   :  { %v4197_v12 = vld [vmem:[#allocation9 + $0x328] sm:$0xff] }
 0x74c   :  { %v12506_v1 = vpop.f32.mrb[170].mxu0  ;;  %4695 = vmatmul.mubr.f32.gmra.mrb[42].mxu1 %v3648_v20  ;;  %v8439_v20 = vpack.c.bf16 %v4167_v13, %v4166_v53  ;;  %v15707_v53 = vld [vmem:[#allocation31_spill] sm:$0xff] }
 0x74d   :  { %15699 = vst [vmem:[#allocation51_spill] sm:$0xff] %v12506_v1  ;;  %v12509_v26 = vpop.f32.mrb[171].mxu0  ;;  %4699 = vmatprep.mubr.f32.mxu1 %v12202_v23  ;;  %8434 = vmatpush1.bf16.msra.mxu1 %v8433_v63  ;;  %v4168_v23 = vld [vmem:[#allocation9 + $0x240] sm:$0xff] }
 0x74e   :  { %15700 = vst [vmem:[#allocation52_spill] sm:$0xff] %v12509_v26  ;;  %8435 = vmatprep.subr.bf16.mxu1 %v15624_v35  ;;  %v12527_v63 = vld [vmem:[#allocation3 + $0x22] sm:$0xff]  ;;  %v3775_v26 = vld [vmem:[#allocation3 + $0x19] sm:$0xff] }
 0x750   :  { %v12512_v61 = vpop.f32.mrb[172].mxu0  ;;  %4700 = vmatmul.mubr.f32.gmra.mrb[44].mxu1 %v12518_v38 }
 0x751   :  { %15701 = vst [vmem:[#allocation53_spill] sm:$0xff] %v12512_v61  ;;  %v12515_v14 = vpop.f32.mrb[173].mxu0  ;;  %4704 = vmatprep.mubr.f32.mxu1 %v12211_v32  ;;  %8437 = vmatpush1.bf16.msra.mxu1 %v8436_v25  ;;  %v4170_v32 = vld [vmem:[#allocation9 + $0x250] sm:$0xff]  ;;  %v4171_v25 = vld [vmem:[#allocation9 + $0x258] sm:$0xff] }
 0x752   :  { %15702 = vst [vmem:[#allocation54_spill] sm:$0xff] %v12515_v14  ;;  %8438 = vmatprep.subr.bf16.mxu1 %v15624_v35 }
 0x754   :  { %v12521_v40 = vpop.f32.mrb[174].mxu0  ;;  %4705 = vmatmul.mubr.f32.gmra.mrb[46].mxu1 %v12527_v63 }
 0x755   :  { %15703 = vst [vmem:[#allocation55_spill] sm:$0xff] %v12521_v40  ;;  %v12524_v61 = vpop.f32.mrb[175].mxu0  ;;  %4709 = vmatprep.mubr.f32.mxu1 %v12217_v55  ;;  %8440 = vmatpush1.bf16.msra.mxu1 %v8439_v20  ;;  %v8442_v40 = vpack.c.bf16 %v4169_v6, %v4168_v23  ;;  %v4172_v55 = vld [vmem:[#allocation9 + $0x260] sm:$0xff]  ;;  %v4173_v20 = vld [vmem:[#allocation9 + $0x268] sm:$0xff]  ;;  %v15710_v23 = vld [vmem:[#allocation32_spill] sm:$0xff] }
 0x756   :  { %15704 = vst [vmem:[#allocation56_spill] sm:$0xff] %v12524_v61  ;;  %8441 = vmatprep.subr.bf16.mxu1 %v15624_v35  ;;  %v8445_v61 = vpack.c.bf16 %v4171_v25, %v4170_v32  ;;  %v15713_v32 = vld [vmem:[#allocation33_spill] sm:$0xff] }
 0x758   :  { %v12530_v18 = vpop.f32.mrb[176].mxu0  ;;  %4710 = vmatmul.mubr.f32.gmra.mrb[48].mxu1 %v15707_v53  ;;  %v8448_v53 = vpack.c.bf16 %v4173_v20, %v4172_v55 }
 0x759   :  { %15705 = vst [vmem:[#allocation57_spill] sm:$0xff] %v12530_v18  ;;  %v12533_v14 = vpop.f32.mrb[177].mxu0  ;;  %4714 = vmatprep.mubr.f32.mxu1 %v12223_v36  ;;  %8443 = vmatpush1.bf16.msra.mxu1 %v8442_v40  ;;  %v4174_v36 = vld [vmem:[#allocation9 + $0x270] sm:$0xff]  ;;  %v4175_v40 = vld [vmem:[#allocation9 + $0x278] sm:$0xff] }
 0x75a   :  { %15706 = vst [vmem:[#allocation58_spill] sm:$0xff] %v12533_v14  ;;  %8444 = vmatprep.subr.bf16.mxu1 %v15624_v35  ;;  %v4195_v14 = vld [vmem:[#allocation9 + $0x318] sm:$0xff] }
 0x75c   :  { %v12537_v13 = vpop.f32.mrb[178].mxu0  ;;  %4715 = vmatmul.mubr.f32.gmra.mrb[50].mxu1 %v15710_v23  ;;  %v8451_v23 = vpack.c.bf16 %v4175_v40, %v4174_v36 }
 0x75d   :  { %15708 = vst [vmem:[#allocation31_spill] sm:$0xff] %v12537_v13  ;;  %v12540_v1 = vpop.f32.mrb[179].mxu0  ;;  %4719 = vmatprep.mubr.f32.mxu1 %v12228_v5  ;;  %8446 = vmatpush1.bf16.msra.mxu1 %v8445_v61  ;;  %v4176_v5 = vld [vmem:[#allocation9 + $0x280] sm:$0xff]  ;;  %v4177_v61 = vld [vmem:[#allocation9 + $0x288] sm:$0xff] }
 0x75e   :  { %15709 = vst [vmem:[#allocation59_spill] sm:$0xff] %v12540_v1  ;;  %8447 = vmatprep.subr.bf16.mxu1 %v15624_v35  ;;  %v8454_v20 = vpack.c.bf16 %v4177_v61, %v4176_v5  ;;  %v12571_v5 = vld [vmem:[#allocation3 + $0x6a] sm:$0xff] }
 0x75f   :  { %v4194_v1 = vld [vmem:[#allocation9 + $0x310] sm:$0xff] }
 0x760   :  { %v12544_v6 = vpop.f32.mrb[180].mxu0  ;;  %4720 = vmatmul.mubr.f32.gmra.mrb[52].mxu1 %v15713_v32 }
 0x761   :  { %15711 = vst [vmem:[#allocation32_spill] sm:$0xff] %v12544_v6  ;;  %v12547_v18 = vpop.f32.mrb[181].mxu0  ;;  %4724 = vmatprep.mubr.f32.mxu1 %v12233_v30  ;;  %8449 = vmatpush1.bf16.msra.mxu1 %v8448_v53  ;;  %v4178_v30 = vld [vmem:[#allocation9 + $0x290] sm:$0xff]  ;;  %v4179_v53 = vld [vmem:[#allocation9 + $0x298] sm:$0xff]  ;;  %v4192_v6 = vld [vmem:[#allocation9 + $0x300] sm:$0xff] }
 0x762   :  { %15712 = vst [vmem:[#allocation60_spill] sm:$0xff] %v12547_v18  ;;  %8450 = vmatprep.subr.bf16.mxu1 %v15624_v35  ;;  %v12834_v18 = vld [vmem:[#allocation3 + $0x322] sm:$0xff] }
 0x764   :  { %v12552_v25 = vpop.f32.mrb[182].mxu0  ;;  %4725 = vmatmul.mubr.f32.gmra.mrb[54].mxu1 %v12192_v21  ;;  %v8457_v21 = vpack.c.bf16 %v4179_v53, %v4178_v30  ;;  %v12587_v30 = vld [vmem:[#allocation3 + $0x82] sm:$0xff] }
 0x765   :  { %15714 = vst [vmem:[#allocation33_spill] sm:$0xff] %v12552_v25  ;;  %v12554_v13 = vpop.f32.mrb[183].mxu0  ;;  %4729 = vmatprep.mubr.f32.mxu1 %v12238_v8  ;;  %8452 = vmatpush1.bf16.msra.mxu1 %v8451_v23  ;;  %v4180_v8 = vld [vmem:[#allocation9 + $0x2a0] sm:$0xff]  ;;  %v4181_v23 = vld [vmem:[#allocation9 + $0x2a8] sm:$0xff] }
 0x766   :  { %15715 = vst [vmem:[#allocation61_spill] sm:$0xff] %v12554_v13  ;;  %8453 = vmatprep.subr.bf16.mxu1 %v15624_v35  ;;  %v12824_v25 = vld [vmem:[#allocation3 + $0x302] sm:$0xff]  ;;  %v12831_v13 = vld [vmem:[#allocation3 + $0x31a] sm:$0xff] }
 0x768   :  { %v12558_v55 = vpop.f32.mrb[184].mxu0  ;;  %4730 = vmatmul.mubr.f32.gmra.mrb[56].mxu1 %v12199_v29  ;;  %v8460_v29 = vpack.c.bf16 %v4181_v23, %v4180_v8  ;;  %v4183_v8 = vld [vmem:[#allocation9 + $0x2b8] sm:$0xff] }
 0x769   :  { %15716 = vst [vmem:[#allocation62_spill] sm:$0xff] %v12558_v55  ;;  %v12561_v32 = vpop.f32.mrb[185].mxu0  ;;  %4734 = vmatprep.mubr.f32.mxu1 %v12243_v0  ;;  %8455 = vmatpush1.bf16.msra.mxu1 %v8454_v20  ;;  %v12816_v55 = vld [vmem:[#allocation3 + $0x2ea] sm:$0xff] }
 0x76a   :  { %15717 = vst [vmem:[#allocation63_spill] sm:$0xff] %v12561_v32  ;;  %8456 = vmatprep.subr.bf16.mxu1 %v15624_v35  ;;  %v12820_v32 = vld [vmem:[#allocation3 + $0x2f2] sm:$0xff] }
 0x76c   :  { %v12565_v36 = vpop.f32.mrb[186].mxu0  ;;  %4735 = vmatmul.mubr.f32.gmra.mrb[58].mxu1 %v12571_v5 }
 0x76d   :  { %15718 = vst [vmem:[#allocation64_spill] sm:$0xff] %v12565_v36  ;;  %v12568_v40 = vpop.f32.mrb[187].mxu0  ;;  %4739 = vmatprep.mubr.f32.mxu1 %v12249_v7  ;;  %8458 = vmatpush1.bf16.msra.mxu1 %v8457_v21  ;;  %v4182_v21 = vld [vmem:[#allocation9 + $0x2b0] sm:$0xff] }
 0x76e   :  { %15719 = vst [vmem:[#allocation65_spill] sm:$0xff] %v12568_v40  ;;  %8459 = vmatprep.subr.bf16.mxu1 %v15624_v35  ;;  %v12812_v40 = vld [vmem:[#allocation3 + $0x2da] sm:$0xff] }
 0x770   :  { %v12574_v61 = vpop.f32.mrb[188].mxu0  ;;  %4740 = vmatmul.mubr.f32.gmra.mrb[60].mxu1 %v12207_v52  ;;  %v12595_v52 = vld [vmem:[#allocation3 + $0x92] sm:$0xff] }
 0x771   :  { %15720 = vst [vmem:[#allocation66_spill] sm:$0xff] %v12574_v61  ;;  %v12577_v36 = vpop.f32.mrb[189].mxu0  ;;  %4744 = vmatprep.mubr.f32.mxu1 %v12255_v45  ;;  %8461 = vmatpush1.bf16.msra.mxu1 %v8460_v29  ;;  %v8463_v29 = vpack.c.bf16 %v4183_v8, %v4182_v21  ;;  %v12620_v8 = vld [vmem:[#allocation3 + $0xb2] sm:$0xff]  ;;  %v12804_v61 = vld [vmem:[#allocation3 + $0x2c2] sm:$0xff] }
 0x772   :  { %15721 = vst [vmem:[#allocation67_spill] sm:$0xff] %v12577_v36  ;;  %8462 = vmatprep.subr.bf16.mxu1 %v15624_v35  ;;  %v12808_v36 = vld [vmem:[#allocation3 + $0x2d2] sm:$0xff] }
 0x774   :  { %v12581_v0 = vpop.f32.mrb[190].mxu0  ;;  %4745 = vmatmul.mubr.f32.gmra.mrb[62].mxu1 %v12587_v30 }
 0x775   :  { %15722 = vst [vmem:[#allocation68_spill] sm:$0xff] %v12581_v0  ;;  %v12584_v20 = vpop.f32.mrb[191].mxu0  ;;  %4749 = vmatprep.mubr.f32.mxu1 %v12261_v27  ;;  %v12603_v0 = vld [vmem:[#allocation3 + $0x9a] sm:$0xff]  ;;  %8464 = vmatpush1.bf16.msra.mxu1 %v8463_v29 }
 0x776   :  { %15723 = vst [vmem:[#allocation69_spill] sm:$0xff] %v12584_v20  ;;  %8465 = vmatprep.subr.bf16.mxu1 %v15624_v35  ;;  %v12800_v20 = vld [vmem:[#allocation3 + $0x2ba] sm:$0xff] }
 0x778   :  { %v12590_v7 = vpop.f32.mrb[192].mxu0  ;;  %4750 = vmatmul.mubr.f32.gmra.mrb[64].mxu1 %v12595_v52 }
 0x779   :  { %15724 = vst [vmem:[#allocation70_spill] sm:$0xff] %v12590_v7  ;;  %v12593_v53 = vpop.f32.mrb[193].mxu0  ;;  %4754 = vmatprep.mubr.f32.mxu1 %v12266_v51 }
 0x77a   :  { %15725 = vst [vmem:[#allocation71_spill] sm:$0xff] %v12593_v53  ;;  %v12636_v53 = vld [vmem:[#allocation3 + $0xca] sm:$0xff] }
 0x77c   :  { %v12598_v45 = vpop.f32.mrb[194].mxu0  ;;  %4755 = vmatmul.mubr.f32.gmra.mrb[66].mxu1 %v12603_v0 }
 0x77d   :  { %15726 = vst [vmem:[#allocation72_spill] sm:$0xff] %v12598_v45  ;;  %v12601_v23 = vpop.f32.mrb[195].mxu0  ;;  %4759 = vmatprep.mubr.f32.mxu1 %v12271_v37  ;;  %v12612_v45 = vld [vmem:[#allocation3 + $0xaa] sm:$0xff] }
 0x77e   :  { %15727 = vst [vmem:[#allocation73_spill] sm:$0xff] %v12601_v23 }
 0x780   :  { %v12606_v27 = vpop.f32.mrb[196].mxu0  ;;  %4760 = vmatmul.mubr.f32.gmra.mrb[68].mxu1 %v12612_v45 }
 0x781   :  { %15728 = vst [vmem:[#allocation74_spill] sm:$0xff] %v12606_v27  ;;  %v12609_v7 = vpop.f32.mrb[197].mxu0  ;;  %4764 = vmatprep.mubr.f32.mxu1 %v12276_v39  ;;  %v12628_v27 = vld [vmem:[#allocation3 + $0xc2] sm:$0xff] }
 0x782   :  { %15729 = vst [vmem:[#allocation75_spill] sm:$0xff] %v12609_v7  ;;  %v4184_v39 = vld [vmem:[#allocation9 + $0x2c0] sm:$0xff] }
 0x784   :  { %v12615_v51 = vpop.f32.mrb[198].mxu0  ;;  %4765 = vmatmul.mubr.f32.gmra.mrb[70].mxu1 %v12620_v8 }
 0x785   :  { %15730 = vst [vmem:[#allocation76_spill] sm:$0xff] %v12615_v51  ;;  %v12618_v21 = vpop.f32.mrb[199].mxu0  ;;  %4769 = vmatprep.mubr.f32.mxu1 %v12282_v62  ;;  %v4185_v51 = vld [vmem:[#allocation9 + $0x2c8] sm:$0xff] }
 0x786   :  { %15731 = vst [vmem:[#allocation77_spill] sm:$0xff] %v12618_v21  ;;  %v8466_v23 = vpack.c.bf16 %v4185_v51, %v4184_v39  ;;  %v12653_v39 = vld [vmem:[#allocation3 + $0xe2] sm:$0xff] }
 0x788   :  { %v12623_v37 = vpop.f32.mrb[200].mxu0  ;;  %4770 = vmatmul.mubr.f32.gmra.mrb[72].mxu1 %v12628_v27 }
 0x789   :  { %15732 = vst [vmem:[#allocation78_spill] sm:$0xff] %v12623_v37  ;;  %v12626_v29 = vpop.f32.mrb[201].mxu0  ;;  %4774 = vmatprep.mubr.f32.mxu1 %v12287_v3  ;;  %8467 = vmatpush1.bf16.msra.mxu1 %v8466_v23 }
 0x78a   :  { %15733 = vst [vmem:[#allocation79_spill] sm:$0xff] %v12626_v29  ;;  %8468 = vmatprep.subr.bf16.mxu1 %v15624_v35  ;;  %v12669_v29 = vld [vmem:[#allocation3 + $0xfa] sm:$0xff] }
 0x78c   :  { %v12631_v7 = vpop.f32.mrb[202].mxu0  ;;  %4775 = vmatmul.mubr.f32.gmra.mrb[74].mxu1 %v12636_v53 }
 0x78d   :  { %15734 = vst [vmem:[#allocation80_spill] sm:$0xff] %v12631_v7  ;;  %v12634_v21 = vpop.f32.mrb[203].mxu0  ;;  %4779 = vmatprep.mubr.f32.mxu1 %v12292_v22  ;;  %v12645_v7 = vld [vmem:[#allocation3 + $0xda] sm:$0xff] }
 0x78e   :  { %15735 = vst [vmem:[#allocation81_spill] sm:$0xff] %v12634_v21 }
 0x790   :  { %v12639_v62 = vpop.f32.mrb[204].mxu0  ;;  %4780 = vmatmul.mubr.f32.gmra.mrb[76].mxu1 %v12645_v7 }
 0x791   :  { %15736 = vst [vmem:[#allocation82_spill] sm:$0xff] %v12639_v62  ;;  %v12642_v37 = vpop.f32.mrb[205].mxu0  ;;  %4784 = vmatprep.mubr.f32.mxu1 %v12297_v46  ;;  %v12661_v62 = vld [vmem:[#allocation3 + $0xf2] sm:$0xff] }
 0x792   :  { %15737 = vst [vmem:[#allocation83_spill] sm:$0xff] %v12642_v37  ;;  %v4186_v46 = vld [vmem:[#allocation9 + $0x2d0] sm:$0xff] }
 0x794   :  { %v12648_v3 = vpop.f32.mrb[206].mxu0  ;;  %4785 = vmatmul.mubr.f32.gmra.mrb[78].mxu1 %v12653_v39 }
 0x795   :  { %15738 = vst [vmem:[#allocation84_spill] sm:$0xff] %v12648_v3  ;;  %v12651_v51 = vpop.f32.mrb[207].mxu0  ;;  %4789 = vmatprep.mubr.f32.mxu1 %v12303_v15  ;;  %v4187_v3 = vld [vmem:[#allocation9 + $0x2d8] sm:$0xff] }
 0x796   :  { %15739 = vst [vmem:[#allocation85_spill] sm:$0xff] %v12651_v51  ;;  %v8469_v21 = vpack.c.bf16 %v4187_v3, %v4186_v46  ;;  %v12686_v3 = vld [vmem:[#allocation3 + $0x122] sm:$0xff] }
 0x798   :  { %v12656_v22 = vpop.f32.mrb[208].mxu0  ;;  %4790 = vmatmul.mubr.f32.gmra.mrb[80].mxu1 %v12661_v62 }
 0x799   :  { %15740 = vst [vmem:[#allocation86_spill] sm:$0xff] %v12656_v22  ;;  %v12659_v23 = vpop.f32.mrb[209].mxu0  ;;  %4794 = vmatprep.mubr.f32.mxu1 %v12308_v31  ;;  %8470 = vmatpush1.bf16.msra.mxu1 %v8469_v21  ;;  %v12682_v31 = vld [vmem:[#allocation3 + $0x112] sm:$0xff]  ;;  %v4189_v21 = vld [vmem:[#allocation9 + $0x2e8] sm:$0xff] }
 0x79a   :  { %15741 = vst [vmem:[#allocation87_spill] sm:$0xff] %v12659_v23  ;;  %8471 = vmatprep.subr.bf16.mxu1 %v15624_v35  ;;  %v12796_v23 = vld [vmem:[#allocation3 + $0x2aa] sm:$0xff] }
 0x79c   :  { %v12664_v37 = vpop.f32.mrb[210].mxu0  ;;  %4795 = vmatmul.mubr.f32.gmra.mrb[82].mxu1 %v12669_v29 }
 0x79d   :  { %15742 = vst [vmem:[#allocation88_spill] sm:$0xff] %v12664_v37  ;;  %v12667_v51 = vpop.f32.mrb[211].mxu0  ;;  %4799 = vmatprep.mubr.f32.mxu1 %v12311_v9  ;;  %v12678_v37 = vld [vmem:[#allocation3 + $0x10a] sm:$0xff]  ;;  %v4188_v9 = vld [vmem:[#allocation9 + $0x2e0] sm:$0xff] }
 0x79e   :  { %15743 = vst [vmem:[#allocation89_spill] sm:$0xff] %v12667_v51  ;;  %v8472_v46 = vpack.c.bf16 %v4189_v21, %v4188_v9  ;;  %v4191_v9 = vld [vmem:[#allocation9 + $0x2f8] sm:$0xff] }
 0x79f   :  { %v12714_v51 = vld [vmem:[#allocation3 + $0x172] sm:$0xff] }
 0x7a0   :  { %v12672_v15 = vpop.f32.mrb[212].mxu0  ;;  %4800 = vmatmul.mubr.f32.gmra.mrb[84].mxu1 %v12678_v37 }
 0x7a1   :  { %15744 = vst [vmem:[#allocation90_spill] sm:$0xff] %v12672_v15  ;;  %v12675_v22 = vpop.f32.mrb[213].mxu0  ;;  %4804 = vmatprep.mubr.f32.mxu1 %v12316_v16  ;;  %v12690_v15 = vld [vmem:[#allocation3 + $0x12a] sm:$0xff]  ;;  %8473 = vmatpush1.bf16.msra.mxu1 %v8472_v46  ;;  %v12695_v16 = vld [vmem:[#allocation3 + $0x13a] sm:$0xff] }
 0x7a2   :  { %15745 = vst [vmem:[#allocation91_spill] sm:$0xff] %v12675_v22  ;;  %8474 = vmatprep.subr.bf16.mxu1 %v15624_v35  ;;  %v12707_v46 = vld [vmem:[#allocation3 + $0x15a] sm:$0xff]  ;;  %v12711_v22 = vld [vmem:[#allocation3 + $0x16a] sm:$0xff] }
 0x7a4   :  { %4805 = vmatmul.mubr.f32.gmra.mrb[86].mxu1 %v12682_v31 }
 0x7a5   :  { %4809 = vmatprep.mubr.f32.mxu1 %v12322_v49  ;;  %v12699_v49 = vld [vmem:[#allocation3 + $0x142] sm:$0xff] }
 0x7a8   :  { %4810 = vmatmul.mubr.f32.gmra.mrb[88].mxu1 %v12686_v3 }
 0x7a9   :  { %4814 = vmatprep.mubr.f32.mxu1 %v12327_v17  ;;  %v12703_v17 = vld [vmem:[#allocation3 + $0x152] sm:$0xff] }
 0x7ac   :  { %4815 = vmatmul.mubr.f32.gmra.mrb[90].mxu1 %v12690_v15 }
 0x7ad   :  { %4819 = vmatprep.mubr.f32.mxu1 %v12332_v57  ;;  %v4190_v57 = vld [vmem:[#allocation9 + $0x2f0] sm:$0xff] }
 0x7ae   :  { %v8475_v21 = vpack.c.bf16 %v4191_v9, %v4190_v57  ;;  %v3680_v57 = vld [vmem:[#allocation3 + $0x1ba] sm:$0xff]  ;;  %v12720_v9 = vld [vmem:[#allocation3 + $0x1ca] sm:$0xff] }
 0x7b0   :  { %4820 = vmatmul.mubr.f32.gmra.mrb[92].mxu1 %v12695_v16 }
 0x7b1   :  { %4824 = vmatprep.mubr.f32.mxu1 %v12337_v4  ;;  %v3741_v4 = vld [vmem:[#allocation3 + $0x180] sm:$0xff]  ;;  %8476 = vmatpush1.bf16.msra.mxu1 %v8475_v21  ;;  %v12724_v21 = vld [vmem:[#allocation3 + $0x1d2] sm:$0xff] }
 0x7b2   :  { %8477 = vmatprep.subr.bf16.mxu1 %v15624_v35 }
 0x7b4   :  { %4825 = vmatmul.mubr.f32.gmra.mrb[94].mxu1 %v12699_v49 }
 0x7b5   :  { %4829 = vmatprep.mubr.f32.mxu1 %v12343_v24  ;;  %v3742_v24 = vld [vmem:[#allocation3 + $0x188] sm:$0xff] }
 0x7b8   :  { %4830 = vmatmul.mubr.f32.gmra.mrb[96].mxu1 %v12703_v17 }
 0x7b9   :  { %4834 = vmatprep.mubr.f32.mxu1 %v12348_v11  ;;  %v3679_v11 = vld [vmem:[#allocation3 + $0x1b2] sm:$0xff] }
 0x7bc   :  { %4835 = vmatmul.mubr.f32.gmra.mrb[98].mxu1 %v12707_v46 }
 0x7bd   :  { %4839 = vmatprep.mubr.f32.mxu1 %v3741_v4  ;;  %v12780_v4 = vld [vmem:[#allocation3 + $0x27a] sm:$0xff] }
 0x7c0   :  { %4840 = vmatmul.mubr.f32.gmra.mrb[100].mxu1 %v12711_v22 }
 0x7c1   :  { %4844 = vmatprep.mubr.f32.mxu1 %v3742_v24  ;;  %v12784_v24 = vld [vmem:[#allocation3 + $0x28a] sm:$0xff] }
 0x7c4   :  { %4845 = vmatmul.mubr.f32.gmra.mrb[102].mxu1 %v12714_v51 }
 0x7c5   :  { %4849 = vmatprep.mubr.f32.mxu1 %v12353_v56  ;;  %v12728_v56 = vld [vmem:[#allocation3 + $0x1e2] sm:$0xff] }
 0x7c8   :  { %4850 = vmatmul.mubr.f32.gmra.mrb[104].mxu1 %v3679_v11  ;;  %v12788_v11 = vld [vmem:[#allocation3 + $0x292] sm:$0xff] }
 0x7c9   :  { %4854 = vmatprep.mubr.f32.mxu1 %v12358_v59  ;;  %v12732_v59 = vld [vmem:[#allocation3 + $0x1ea] sm:$0xff] }
 0x7cc   :  { %4855 = vmatmul.mubr.f32.gmra.mrb[106].mxu1 %v3680_v57  ;;  %v12792_v57 = vld [vmem:[#allocation3 + $0x2a2] sm:$0xff] }
 0x7cd   :  { %4859 = vmatprep.mubr.f32.mxu1 %v12363_v54  ;;  %v12736_v54 = vld [vmem:[#allocation3 + $0x1fa] sm:$0xff] }
 0x7d0   :  { %4860 = vmatmul.mubr.f32.gmra.mrb[108].mxu1 %v12720_v9 }
 0x7d1   :  { %4864 = vmatprep.mubr.f32.mxu1 %v12368_v43  ;;  %v12740_v43 = vld [vmem:[#allocation3 + $0x202] sm:$0xff] }
 0x7d4   :  { %4865 = vmatmul.mubr.f32.gmra.mrb[110].mxu1 %v12724_v21 }
 0x7d5   :  { %4869 = vmatprep.mubr.f32.mxu1 %v12373_v48  ;;  %v12744_v48 = vld [vmem:[#allocation3 + $0x212] sm:$0xff] }
 0x7d8   :  { %4870 = vmatmul.mubr.f32.gmra.mrb[112].mxu1 %v12728_v56 }
 0x7d9   :  { %4874 = vmatprep.mubr.f32.mxu1 %v12378_v41  ;;  %v12748_v41 = vld [vmem:[#allocation3 + $0x21a] sm:$0xff] }
 0x7dc   :  { %4875 = vmatmul.mubr.f32.gmra.mrb[114].mxu1 %v12732_v59 }
 0x7dd   :  { %4879 = vmatprep.mubr.f32.mxu1 %v12383_v33  ;;  %v12752_v33 = vld [vmem:[#allocation3 + $0x22a] sm:$0xff] }
 0x7e0   :  { %4880 = vmatmul.mubr.f32.gmra.mrb[116].mxu1 %v12736_v54 }
 0x7e1   :  { %4884 = vmatprep.mubr.f32.mxu1 %v12388_v44  ;;  %v12756_v44 = vld [vmem:[#allocation3 + $0x232] sm:$0xff] }
 0x7e4   :  { %4885 = vmatmul.mubr.f32.gmra.mrb[118].mxu1 %v12740_v43 }
 0x7e5   :  { %4889 = vmatprep.mubr.f32.mxu1 %v12393_v47  ;;  %v12760_v47 = vld [vmem:[#allocation3 + $0x242] sm:$0xff] }
 0x7e8   :  { %4890 = vmatmul.mubr.f32.gmra.mrb[120].mxu1 %v12744_v48 }
 0x7e9   :  { %4894 = vmatprep.mubr.f32.mxu1 %v12398_v28  ;;  %v12764_v28 = vld [vmem:[#allocation3 + $0x24a] sm:$0xff] }
 0x7ec   :  { %4895 = vmatmul.mubr.f32.gmra.mrb[122].mxu1 %v12748_v41 }
 0x7ed   :  { %4899 = vmatprep.mubr.f32.mxu1 %v12403_v42  ;;  %v12768_v42 = vld [vmem:[#allocation3 + $0x25a] sm:$0xff] }
 0x7f0   :  { %4900 = vmatmul.mubr.f32.gmra.mrb[124].mxu1 %v12752_v33 }
 0x7f1   :  { %4904 = vmatprep.mubr.f32.mxu1 %v12408_v34  ;;  %v12772_v34 = vld [vmem:[#allocation3 + $0x262] sm:$0xff] }
 0x7f4   :  { %4905 = vmatmul.mubr.f32.gmra.mrb[126].mxu1 %v12756_v44 }
 0x7f5   :  { %4909 = vmatprep.mubr.f32.mxu1 %v12413_v58  ;;  %v12776_v58 = vld [vmem:[#allocation3 + $0x272] sm:$0xff] }
 0x7f8   :  { %4910 = vmatmul.mubr.f32.gmra.mrb[128].mxu1 %v12760_v47 }
 0x7f9   :  { %4914 = vmatprep.mubr.f32.mxu1 %v12418_v60  ;;  %v15746_v60 = vld [vmem:[#allocation34_spill] sm:$0xff] }
 0x7fc   :  { %4915 = vmatmul.mubr.f32.gmra.mrb[130].mxu1 %v12764_v28 }
 0x7fd   :  { %4919 = vmatprep.mubr.f32.mxu1 %v12421_v2  ;;  %v15747_v2 = vld [vmem:[#allocation35_spill] sm:$0xff] }
 0x7fe   :  { %15759 = vst [vmem:[#allocation35_spill] sm:$0xff] %v12831_v13 }
 0x800   :  { %4920 = vmatmul.mubr.f32.gmra.mrb[132].mxu1 %v12768_v42 }
 0x801   :  { %4924 = vmatprep.mubr.f32.mxu1 %v12424_v50  ;;  %v15748_v50 = vld [vmem:[#allocation20_spill] sm:$0xff] }
 0x802   :  { %15760 = vst [vmem:[#allocation20_spill] sm:$0xff] %v12834_v18 }
 0x804   :  { %4925 = vmatmul.mubr.f32.gmra.mrb[134].mxu1 %v12772_v34 }
 0x805   :  { %4929 = vmatprep.mubr.f32.mxu1 %v12427_v10  ;;  %v15749_v10 = vld [vmem:[#allocation21_spill] sm:$0xff] }
 0x808   :  { %4930 = vmatmul.mubr.f32.gmra.mrb[136].mxu1 %v12776_v58 }
 0x809   :  { %4934 = vmatprep.mubr.f32.mxu1 %v15746_v60  ;;  %v15750_v60 = vld [vmem:[#allocation36_spill] sm:$0xff] }
 0x80c   :  { %4935 = vmatmul.mubr.f32.gmra.mrb[138].mxu1 %v12780_v4 }
 0x80d   :  { %4939 = vmatprep.mubr.f32.mxu1 %v15747_v2  ;;  %v15751_v2 = vld [vmem:[#allocation39_spill] sm:$0xff] }
 0x810   :  { %4940 = vmatmul.mubr.f32.gmra.mrb[140].mxu1 %v12784_v24 }
 0x811   :  { %4944 = vmatprep.mubr.f32.mxu1 %v15748_v50  ;;  %v15752_v50 = vld [vmem:[#allocation28_spill] sm:$0xff] }
 0x814   :  { %4945 = vmatmul.mubr.f32.gmra.mrb[142].mxu1 %v12788_v11 }
 0x815   :  { %4949 = vmatprep.mubr.f32.mxu1 %v15749_v10  ;;  %v15753_v10 = vld [vmem:[#allocation24_spill] sm:$0xff] }
 0x818   :  { %4950 = vmatmul.mubr.f32.gmra.mrb[144].mxu1 %v12792_v57 }
 0x819   :  { %4954 = vmatprep.mubr.f32.mxu1 %v15750_v60  ;;  %v15754_v60 = vld [vmem:[#allocation19_spill] sm:$0xff] }
 0x81c   :  { %4955 = vmatmul.mubr.f32.gmra.mrb[146].mxu1 %v12796_v23 }
 0x81d   :  { %4959 = vmatprep.mubr.f32.mxu1 %v15751_v2  ;;  %v15755_v2 = vld [vmem:[#allocation26_spill] sm:$0xff] }
 0x820   :  { %4960 = vmatmul.mubr.f32.gmra.mrb[148].mxu1 %v12800_v20 }
 0x821   :  { %4964 = vmatprep.mubr.f32.mxu1 %v15752_v50  ;;  %v15756_v50 = vld [vmem:[#allocation44_spill] sm:$0xff] }
 0x824   :  { %4965 = vmatmul.mubr.f32.gmra.mrb[150].mxu1 %v12804_v61 }
 0x825   :  { %4969 = vmatprep.mubr.f32.mxu1 %v15753_v10  ;;  %v15757_v10 = vld [vmem:[#allocation47_spill] sm:$0xff] }
 0x828   :  { %4970 = vmatmul.mubr.f32.gmra.mrb[152].mxu1 %v12808_v36 }
 0x829   :  { %4974 = vmatprep.mubr.f32.mxu1 %v15754_v60  ;;  %v12828_v60 = vld [vmem:[#allocation3 + $0x30a] sm:$0xff] }
 0x82a   :  { %15758 = vst [vmem:[#allocation34_spill] sm:$0xff] %v12828_v60 }
 0x82c   :  { %4975 = vmatmul.mubr.f32.gmra.mrb[154].mxu1 %v12812_v40 }
 0x82d   :  { %4979 = vmatprep.mubr.f32.mxu1 %v15755_v2  ;;  %v3773_v2 = vld [vmem:[#allocation3 + $0x330] sm:$0xff] }
 0x830   :  { %4980 = vmatmul.mubr.f32.gmra.mrb[156].mxu1 %v12816_v55 }
 0x831   :  { %4984 = vmatprep.mubr.f32.mxu1 %v15756_v50  ;;  %v3774_v50 = vld [vmem:[#allocation3 + $0x338] sm:$0xff] }
 0x834   :  { %4985 = vmatmul.mubr.f32.gmra.mrb[158].mxu1 %v12820_v32 }
 0x835   :  { %4989 = vmatprep.mubr.f32.mxu1 %v15757_v10  ;;  %v4193_v10 = vld [vmem:[#allocation9 + $0x308] sm:$0xff] }
 0x838   :  { %4990 = vmatmul.mubr.f32.gmra.mrb[160].mxu1 %v12824_v25 }
 0x839   :  { %4994 = vmatprep.mubr.f32.mxu1 %v12498_v19  ;;  %v8478_v19 = vpack.c.bf16 %v4193_v10, %v4192_v6  ;;  %v4199_v6 = vld [vmem:[#allocation9 + $0x338] sm:$0xff] }
 0x83a   :  { %v12841_v10 = vld [vmem:[#allocation3 + $0x31] sm:$0xff] }
 0x83c   :  { %4995 = vmatmul.mubr.f32.gmra.mrb[162].mxu1 %v12828_v60  ;;  %v3841_v60 = vld [vmem:[#allocation3 + $0x32] sm:$0xff] }
 0x83d   :  { %4999 = vmatprep.mubr.f32.mxu1 %v3773_v2  ;;  %v8481_v2 = vpack.c.bf16 %v4195_v14, %v4194_v1  ;;  %v4200_v14 = vld [vmem:[#allocation9 + $0x340] sm:$0xff] }
 0x840   :  { %5000 = vmatmul.mubr.f32.gmra.mrb[164].mxu1 %v12831_v13  ;;  %v3776_v13 = vld [vmem:[#allocation3 + $0x21] sm:$0xff] }
 0x841   :  { %5004 = vmatprep.mubr.f32.mxu1 %v3774_v50  ;;  %v4196_v50 = vld [vmem:[#allocation9 + $0x320] sm:$0xff] }
 0x844   :  { %5005 = vmatmul.mubr.f32.gmra.mrb[166].mxu1 %v12834_v18  ;;  %v8484_v18 = vpack.c.bf16 %v4197_v12, %v4196_v50  ;;  %v3843_v12 = vld [vmem:[#allocation3 + $0x4a] sm:$0xff] }
 0x845   :  { %5074 = vmatprep.mubr.f32.mxu1 %v12518_v38  ;;  %v4198_v38 = vld [vmem:[#allocation9 + $0x330] sm:$0xff] }
 0x846   :  { %v8487_v1 = vpack.c.bf16 %v4199_v6, %v4198_v38  ;;  %v12849_v50 = vld [vmem:[#allocation3 + $0x49] sm:$0xff]  ;;  %v4204_v6 = vld [vmem:[#allocation9 + $0x360] sm:$0xff] }
 0x847   :  { %15762 = vst [vmem:[#allocation36_spill] sm:$0xff] %v12849_v50 }
 0x848   :  { %5075 = vmatmul.mubr.f32.vlgmr.msra.gmra.mrb[40].mxu1 %v3775_v26  ;;  %v3842_v26 = vld [vmem:[#allocation3 + $0x3a] sm:$0xff] }
 0x849   :  { %5079 = vmatprep.mubr.f32.mxu1 %v12527_v63  ;;  %8479 = vmatpush1.bf16.msra.mxu1 %v8478_v19  ;;  %v4201_v63 = vld [vmem:[#allocation9 + $0x348] sm:$0xff]  ;;  %v4202_v19 = vld [vmem:[#allocation9 + $0x350] sm:$0xff] }
 0x84a   :  { %8480 = vmatprep.subr.bf16.mxu1 %v15624_v35 }
 0x84c   :  { %5080 = vmatmul.mubr.f32.gmra.mrb[42].mxu1 %v3776_v13  ;;  %v12845_v13 = vld [vmem:[#allocation3 + $0x39] sm:$0xff] }
 0x84d   :  { %5084 = vmatprep.mubr.f32.mxu1 %v3841_v60  ;;  %8482 = vmatpush1.bf16.msra.mxu1 %v8481_v2  ;;  %15761 = vst [vmem:[#allocation21_spill] sm:$0xff] %v12845_v13  ;;  %v8490_v60 = vpack.c.bf16 %v4201_v63, %v4200_v14  ;;  %v4203_v2 = vld [vmem:[#allocation9 + $0x358] sm:$0xff]  ;;  %v4206_v63 = vld [vmem:[#allocation9 + $0x370] sm:$0xff] }
 0x84e   :  { %8483 = vmatprep.subr.bf16.mxu1 %v15624_v35  ;;  %v8493_v38 = vpack.c.bf16 %v4203_v2, %v4202_v19  ;;  %v4208_v19 = vld [vmem:[#allocation9 + $0x380] sm:$0xff]  ;;  %v4209_v2 = vld [vmem:[#allocation9 + $0x388] sm:$0xff] }
 0x850   :  { %5085 = vmatmul.mubr.f32.gmra.mrb[44].mxu1 %v12841_v10 }
 0x851   :  { %5089 = vmatprep.mubr.f32.mxu1 %v3842_v26  ;;  %8485 = vmatpush1.bf16.msra.mxu1 %v8484_v18  ;;  %v3844_v18 = vld [vmem:[#allocation3 + $0x52] sm:$0xff]  ;;  %v4205_v26 = vld [vmem:[#allocation9 + $0x368] sm:$0xff] }
 0x852   :  { %8486 = vmatprep.subr.bf16.mxu1 %v15624_v35  ;;  %v8496_v14 = vpack.c.bf16 %v4205_v26, %v4204_v6  ;;  %v8502_v6 = vpack.c.bf16 %v4209_v2, %v4208_v19  ;;  %v4210_v26 = vld [vmem:[#allocation9 + $0x390] sm:$0xff] }
 0x853   :  { %v12876_v19 = vld [vmem:[#allocation3 + $0x91] sm:$0xff] }
 0x854   :  { %5090 = vmatmul.mubr.f32.gmra.mrb[46].mxu1 %v12845_v13  ;;  %v12853_v13 = vld [vmem:[#allocation3 + $0x51] sm:$0xff] }
 0x855   :  { %5094 = vmatprep.mubr.f32.mxu1 %v3843_v12  ;;  %8488 = vmatpush1.bf16.msra.mxu1 %v8487_v1  ;;  %v3845_v1 = vld [vmem:[#allocation3 + $0x62] sm:$0xff]  ;;  %v4207_v12 = vld [vmem:[#allocation9 + $0x378] sm:$0xff]  ;;  %v4214_v2 = vld [vmem:[#allocation9 + $0x3b0] sm:$0xff] }
 0x856   :  { %8489 = vmatprep.subr.bf16.mxu1 %v15624_v35 }
 0x858   :  { %5095 = vmatmul.mubr.f32.gmra.mrb[48].mxu1 %v12849_v50  ;;  %v12857_v50 = vld [vmem:[#allocation3 + $0x61] sm:$0xff] }
 0x859   :  { %5099 = vmatprep.mubr.f32.mxu1 %v3844_v18  ;;  %8491 = vmatpush1.bf16.msra.mxu1 %v8490_v60  ;;  %15763 = vst [vmem:[#allocation39_spill] sm:$0xff] %v12857_v50  ;;  %v8499_v60 = vpack.c.bf16 %v4207_v12, %v4206_v63  ;;  %v12862_v18 = vld [vmem:[#allocation3 + $0x69] sm:$0xff]  ;;  %v12871_v12 = vld [vmem:[#allocation3 + $0x81] sm:$0xff] }
 0x85a   :  { %8492 = vmatprep.subr.bf16.mxu1 %v15624_v35  ;;  %v4213_v63 = vld [vmem:[#allocation9 + $0x3a8] sm:$0xff] }
 0x85c   :  { %5100 = vmatmul.mubr.f32.gmra.mrb[50].mxu1 %v12853_v13 }
 0x85d   :  { %5104 = vmatprep.mubr.f32.mxu1 %v3845_v1  ;;  %8494 = vmatpush1.bf16.msra.mxu1 %v8493_v38  ;;  %v3847_v38 = vld [vmem:[#allocation3 + $0x7a] sm:$0xff] }
 0x85e   :  { %8495 = vmatprep.subr.bf16.mxu1 %v15624_v35  ;;  %v4211_v1 = vld [vmem:[#allocation9 + $0x398] sm:$0xff] }
 0x860   :  { %5105 = vmatmul.mubr.f32.gmra.mrb[52].mxu1 %v12857_v50  ;;  %v12866_v50 = vld [vmem:[#allocation3 + $0x79] sm:$0xff] }
 0x861   :  { %5109 = vmatprep.mubr.f32.mxu1 %v12571_v5  ;;  %8497 = vmatpush1.bf16.msra.mxu1 %v8496_v14  ;;  %v8505_v5 = vpack.c.bf16 %v4211_v1, %v4210_v26  ;;  %v4212_v14 = vld [vmem:[#allocation9 + $0x3a0] sm:$0xff]  ;;  %v12889_v26 = vld [vmem:[#allocation3 + $0xb1] sm:$0xff]  ;;  %v4217_v1 = vld [vmem:[#allocation9 + $0x3c8] sm:$0xff] }
 0x862   :  { %8498 = vmatprep.subr.bf16.mxu1 %v15624_v35 }
 0x864   :  { %5110 = vmatmul.mubr.f32.gmra.mrb[54].mxu1 %v12862_v18 }
 0x865   :  { %5114 = vmatprep.mubr.f32.mxu1 %v3847_v38  ;;  %8500 = vmatpush1.bf16.msra.mxu1 %v8499_v60  ;;  %v8508_v60 = vpack.c.bf16 %v4213_v63, %v4212_v14  ;;  %v4215_v38 = vld [vmem:[#allocation9 + $0x3b8] sm:$0xff]  ;;  %v12906_v14 = vld [vmem:[#allocation3 + $0xe1] sm:$0xff] }
 0x866   :  { %8501 = vmatprep.subr.bf16.mxu1 %v15624_v35  ;;  %v4219_v63 = vld [vmem:[#allocation9 + $0x3d8] sm:$0xff] }
 0x868   :  { %5115 = vmatmul.mubr.f32.gmra.mrb[56].mxu1 %v12866_v50 }
 0x869   :  { %5119 = vmatprep.mubr.f32.mxu1 %v12587_v30  ;;  %8503 = vmatpush1.bf16.msra.mxu1 %v8502_v6  ;;  %v12881_v30 = vld [vmem:[#allocation3 + $0x99] sm:$0xff]  ;;  %v8511_v6 = vpack.c.bf16 %v4215_v38, %v4214_v2  ;;  %v12923_v2 = vld [vmem:[#allocation3 + $0x111] sm:$0xff]  ;;  %v4221_v38 = vld [vmem:[#allocation9 + $0x3e8] sm:$0xff] }
 0x86a   :  { %8504 = vmatprep.subr.bf16.mxu1 %v15624_v35 }
 0x86c   :  { %5120 = vmatmul.mubr.f32.gmra.mrb[58].mxu1 %v12871_v12 }
 0x86d   :  { %5124 = vmatprep.mubr.f32.mxu1 %v12595_v52  ;;  %8506 = vmatpush1.bf16.msra.mxu1 %v8505_v5  ;;  %v12885_v52 = vld [vmem:[#allocation3 + $0xa9] sm:$0xff] }
 0x86e   :  { %8507 = vmatprep.subr.bf16.mxu1 %v15624_v35 }
 0x870   :  { %5125 = vmatmul.mubr.f32.gmra.mrb[60].mxu1 %v12876_v19 }
 0x871   :  { %5129 = vmatprep.mubr.f32.mxu1 %v12603_v0  ;;  %8509 = vmatpush1.bf16.msra.mxu1 %v8508_v60  ;;  %v12894_v0 = vld [vmem:[#allocation3 + $0xc1] sm:$0xff] }
 0x872   :  { %8510 = vmatprep.subr.bf16.mxu1 %v15624_v35 }
 0x874   :  { %5130 = vmatmul.mubr.f32.gmra.mrb[62].mxu1 %v12881_v30 }
 0x875   :  { %5134 = vmatprep.mubr.f32.mxu1 %v12612_v45  ;;  %8512 = vmatpush1.bf16.msra.mxu1 %v8511_v6  ;;  %v12898_v45 = vld [vmem:[#allocation3 + $0xc9] sm:$0xff] }
 0x876   :  { %8513 = vmatprep.subr.bf16.mxu1 %v15624_v35 }
 0x878   :  { %5135 = vmatmul.mubr.f32.gmra.mrb[64].mxu1 %v12885_v52 }
 0x879   :  { %5139 = vmatprep.mubr.f32.mxu1 %v12620_v8  ;;  %v12902_v8 = vld [vmem:[#allocation3 + $0xd9] sm:$0xff] }
 0x87c   :  { %5140 = vmatmul.mubr.f32.gmra.mrb[66].mxu1 %v12889_v26 }
 0x87d   :  { %5144 = vmatprep.mubr.f32.mxu1 %v12628_v27  ;;  %v4216_v27 = vld [vmem:[#allocation9 + $0x3c0] sm:$0xff] }
 0x87e   :  { %v8514_v5 = vpack.c.bf16 %v4217_v1, %v4216_v27  ;;  %v12940_v27 = vld [vmem:[#allocation3 + $0x141] sm:$0xff] }
 0x880   :  { %5145 = vmatmul.mubr.f32.gmra.mrb[68].mxu1 %v12894_v0 }
 0x881   :  { %5149 = vmatprep.mubr.f32.mxu1 %v12636_v53  ;;  %8515 = vmatpush1.bf16.msra.mxu1 %v8514_v5  ;;  %v12911_v53 = vld [vmem:[#allocation3 + $0xf1] sm:$0xff] }
 0x882   :  { %8516 = vmatprep.subr.bf16.mxu1 %v15624_v35  ;;  %v12957_v5 = vld [vmem:[#allocation3 + $0x171] sm:$0xff] }
 0x884   :  { %5150 = vmatmul.mubr.f32.gmra.mrb[70].mxu1 %v12898_v45 }
 0x885   :  { %5154 = vmatprep.mubr.f32.mxu1 %v12645_v7  ;;  %v12915_v7 = vld [vmem:[#allocation3 + $0xf9] sm:$0xff] }
 0x888   :  { %5155 = vmatmul.mubr.f32.gmra.mrb[72].mxu1 %v12902_v8 }
 0x889   :  { %5159 = vmatprep.mubr.f32.mxu1 %v12653_v39  ;;  %v12919_v39 = vld [vmem:[#allocation3 + $0x109] sm:$0xff] }
 0x88c   :  { %5160 = vmatmul.mubr.f32.gmra.mrb[74].mxu1 %v12906_v14 }
 0x88d   :  { %5164 = vmatprep.mubr.f32.mxu1 %v12661_v62  ;;  %v4218_v62 = vld [vmem:[#allocation9 + $0x3d0] sm:$0xff] }
 0x88e   :  { %v8517_v60 = vpack.c.bf16 %v4219_v63, %v4218_v62  ;;  %v12960_v62 = vld [vmem:[#allocation3 + $0x181] sm:$0xff]  ;;  %v12963_v63 = vld [vmem:[#allocation3 + $0x189] sm:$0xff] }
 0x890   :  { %5165 = vmatmul.mubr.f32.gmra.mrb[76].mxu1 %v12911_v53 }
 0x891   :  { %5169 = vmatprep.mubr.f32.mxu1 %v12669_v29  ;;  %8518 = vmatpush1.bf16.msra.mxu1 %v8517_v60  ;;  %v12928_v29 = vld [vmem:[#allocation3 + $0x121] sm:$0xff] }
 0x892   :  { %8519 = vmatprep.subr.bf16.mxu1 %v15624_v35  ;;  %v6519_v60 = vld [vmem:[#allocation10] sm:$0xff] }
 0x894   :  { %5170 = vmatmul.mubr.f32.gmra.mrb[78].mxu1 %v12915_v7 }
 0x895   :  { %5174 = vmatprep.mubr.f32.mxu1 %v12678_v37  ;;  %v12932_v37 = vld [vmem:[#allocation3 + $0x129] sm:$0xff] }
 0x898   :  { %5175 = vmatmul.mubr.f32.gmra.mrb[80].mxu1 %v12919_v39 }
 0x899   :  { %5179 = vmatprep.mubr.f32.mxu1 %v12682_v31  ;;  %v12936_v31 = vld [vmem:[#allocation3 + $0x139] sm:$0xff] }
 0x89c   :  { %5180 = vmatmul.mubr.f32.gmra.mrb[82].mxu1 %v12923_v2 }
 0x89d   :  { %5184 = vmatprep.mubr.f32.mxu1 %v12686_v3  ;;  %v4220_v3 = vld [vmem:[#allocation9 + $0x3e0] sm:$0xff] }
 0x89e   :  { %v8520_v6 = vpack.c.bf16 %v4221_v38, %v4220_v3  ;;  %v6520_v3 = vld [vmem:[#allocation10 + $0x8] sm:$0xff] }
 0x89f   :  { %v12968_v38 = vpack.c.bf16 %v6520_v3, %v6519_v60  ;;  %v3902_v60 = vld [vmem:[#allocation3 + $0x33a] sm:$0xff] }
 0x8a0   :  { %5185 = vmatmul.mubr.f32.gmra.mrb[84].mxu1 %v12928_v29  ;;  %v13086_v3 = vld [vmem:[#allocation3 + $0x339] sm:$0xff] }
 0x8a1   :  { %5189 = vmatprep.mubr.f32.mxu1 %v12690_v15  ;;  %8521 = vmatpush1.bf16.msra.mxu1 %v8520_v6  ;;  %v12945_v15 = vld [vmem:[#allocation3 + $0x151] sm:$0xff] }
 0x8a2   :  { %8522 = vmatprep.subr.bf16.mxu1 %v15624_v35  ;;  %v4223_v35 = vld [vmem:[#allocation9 + $0x3f8] sm:$0xff] }
 0x8a3   :  { %v3808_v6 = vld [vmem:[#allocation3 + $0x1d1] sm:$0xff] }
 0x8a4   :  { %5190 = vmatmul.mubr.f32.gmra.mrb[86].mxu1 %v12932_v37 }
 0x8a5   :  { %5194 = vmatprep.mubr.f32.mxu1 %v12695_v16  ;;  %v12949_v16 = vld [vmem:[#allocation3 + $0x159] sm:$0xff] }
 0x8a8   :  { %5195 = vmatmul.mubr.f32.gmra.mrb[88].mxu1 %v12936_v31 }
 0x8a9   :  { %5199 = vmatprep.mubr.f32.mxu1 %v12699_v49  ;;  %v12953_v49 = vld [vmem:[#allocation3 + $0x169] sm:$0xff] }
 0x8ac   :  { %5200 = vmatmul.mubr.f32.gmra.mrb[90].mxu1 %v12940_v27 }
 0x8ad   :  { %5204 = vmatprep.mubr.f32.mxu1 %v12703_v17  ;;  %v4222_v17 = vld [vmem:[#allocation9 + $0x3f0] sm:$0xff] }
 0x8ae   :  { %v8523_v1 = vpack.c.bf16 %v4223_v35, %v4222_v17  ;;  %v12972_v17 = vld [vmem:[#allocation3 + $0x1e1] sm:$0xff] }
 0x8af   :  { %v12984_v35 = vld [vmem:[#allocation3 + $0x201] sm:$0xff] }
 0x8b0   :  { %5205 = vmatmul.mubr.f32.gmra.mrb[92].mxu1 %v12945_v15 }
 0x8b1   :  { %5209 = vmatprep.mubr.f32.mxu1 %v12707_v46  ;;  %v3869_v46 = vld [vmem:[#allocation3 + $0x182] sm:$0xff]  ;;  %8524 = vmatpush1.bf16.msra.mxu1 %v8523_v1 }
 0x8b2   :  { %8558 = vmatprep.subr.bf16.mxu1 %v12968_v38  ;;  %v13072_v1 = vld [vmem:[#allocation3 + $0x309] sm:$0xff] }
 0x8b3   :  { %15767 = vst [vmem:[#allocation19_spill] sm:$0xff] %v13072_v1 }
 0x8b4   :  { %5210 = vmatmul.mubr.f32.gmra.mrb[94].mxu1 %v12949_v16 }
 0x8b5   :  { %5214 = vmatprep.mubr.f32.mxu1 %v12711_v22  ;;  %v3870_v22 = vld [vmem:[#allocation3 + $0x18a] sm:$0xff] }
 0x8b8   :  { %5215 = vmatmul.mubr.f32.gmra.mrb[96].mxu1 %v12953_v49 }
 0x8b9   :  { %5219 = vmatprep.mubr.f32.mxu1 %v12714_v51  ;;  %v3807_v51 = vld [vmem:[#allocation3 + $0x1c9] sm:$0xff] }
 0x8bc   :  { %5220 = vmatmul.mubr.f32.gmra.mrb[98].mxu1 %v12957_v5 }
 0x8bd   :  { %5224 = vmatprep.mubr.f32.mxu1 %v3869_v46  ;;  %v13076_v46 = vld [vmem:[#allocation3 + $0x319] sm:$0xff] }
 0x8be   :  { %15769 = vst [vmem:[#allocation26_spill] sm:$0xff] %v13076_v46 }
 0x8c0   :  { %5225 = vmatmul.mubr.f32.gmra.mrb[100].mxu1 %v12960_v62 }
 0x8c1   :  { %5229 = vmatprep.mubr.f32.mxu1 %v3870_v22  ;;  %v13080_v22 = vld [vmem:[#allocation3 + $0x321] sm:$0xff] }
 0x8c2   :  { %15771 = vst [vmem:[#allocation44_spill] sm:$0xff] %v13080_v22 }
 0x8c4   :  { %5230 = vmatmul.mubr.f32.gmra.mrb[102].mxu1 %v12963_v63 }
 0x8c5   :  { %5234 = vmatprep.mubr.f32.mxu1 %v12720_v9  ;;  %v12976_v9 = vld [vmem:[#allocation3 + $0x1e9] sm:$0xff] }
 0x8c8   :  { %5235 = vmatmul.mubr.f32.gmra.mrb[104].mxu1 %v3807_v51  ;;  %v13083_v51 = vld [vmem:[#allocation3 + $0x331] sm:$0xff] }
 0x8c9   :  { %5239 = vmatprep.mubr.f32.mxu1 %v12724_v21  ;;  %v12980_v21 = vld [vmem:[#allocation3 + $0x1f9] sm:$0xff]  ;;  %15772 = vst [vmem:[#allocation47_spill] sm:$0xff] %v13083_v51 }
 0x8cc   :  { %5240 = vmatmul.mubr.f32.gmra.mrb[106].mxu1 %v3808_v6  ;;  %v6521_v6 = vld [vmem:[#allocation10 + $0x10] sm:$0xff] }
 0x8cd   :  { %5244 = vmatprep.mubr.f32.mxu1 %v12728_v56  ;;  %v12988_v56 = vld [vmem:[#allocation3 + $0x211] sm:$0xff] }
 0x8d0   :  { %5245 = vmatmul.mubr.f32.gmra.mrb[108].mxu1 %v12972_v17 }
 0x8d1   :  { %5249 = vmatprep.mubr.f32.mxu1 %v12732_v59  ;;  %v12992_v59 = vld [vmem:[#allocation3 + $0x219] sm:$0xff] }
 0x8d4   :  { %5250 = vmatmul.mubr.f32.gmra.mrb[110].mxu1 %v12976_v9 }
 0x8d5   :  { %5254 = vmatprep.mubr.f32.mxu1 %v12736_v54  ;;  %v12996_v54 = vld [vmem:[#allocation3 + $0x229] sm:$0xff] }
 0x8d8   :  { %5255 = vmatmul.mubr.f32.gmra.mrb[112].mxu1 %v12980_v21 }
 0x8d9   :  { %5259 = vmatprep.mubr.f32.mxu1 %v12740_v43  ;;  %v13000_v43 = vld [vmem:[#allocation3 + $0x231] sm:$0xff] }
 0x8dc   :  { %5260 = vmatmul.mubr.f32.gmra.mrb[114].mxu1 %v12984_v35 }
 0x8dd   :  { %5264 = vmatprep.mubr.f32.mxu1 %v12744_v48  ;;  %v13004_v48 = vld [vmem:[#allocation3 + $0x241] sm:$0xff] }
 0x8e0   :  { %5265 = vmatmul.mubr.f32.gmra.mrb[116].mxu1 %v12988_v56 }
 0x8e1   :  { %5269 = vmatprep.mubr.f32.mxu1 %v12748_v41  ;;  %v13008_v41 = vld [vmem:[#allocation3 + $0x249] sm:$0xff] }
 0x8e4   :  { %5270 = vmatmul.mubr.f32.gmra.mrb[118].mxu1 %v12992_v59 }
 0x8e5   :  { %5274 = vmatprep.mubr.f32.mxu1 %v12752_v33  ;;  %v13012_v33 = vld [vmem:[#allocation3 + $0x259] sm:$0xff] }
 0x8e8   :  { %5275 = vmatmul.mubr.f32.gmra.mrb[120].mxu1 %v12996_v54 }
 0x8e9   :  { %5279 = vmatprep.mubr.f32.mxu1 %v12756_v44  ;;  %v13016_v44 = vld [vmem:[#allocation3 + $0x261] sm:$0xff] }
 0x8ec   :  { %5280 = vmatmul.mubr.f32.gmra.mrb[122].mxu1 %v13000_v43 }
 0x8ed   :  { %5284 = vmatprep.mubr.f32.mxu1 %v12760_v47  ;;  %v13020_v47 = vld [vmem:[#allocation3 + $0x271] sm:$0xff] }
 0x8f0   :  { %5285 = vmatmul.mubr.f32.gmra.mrb[124].mxu1 %v13004_v48 }
 0x8f1   :  { %5289 = vmatprep.mubr.f32.mxu1 %v12764_v28  ;;  %v13024_v28 = vld [vmem:[#allocation3 + $0x279] sm:$0xff] }
 0x8f4   :  { %5290 = vmatmul.mubr.f32.gmra.mrb[126].mxu1 %v13008_v41 }
 0x8f5   :  { %5294 = vmatprep.mubr.f32.mxu1 %v12768_v42  ;;  %v13028_v42 = vld [vmem:[#allocation3 + $0x289] sm:$0xff] }
 0x8f8   :  { %5295 = vmatmul.mubr.f32.gmra.mrb[128].mxu1 %v13012_v33 }
 0x8f9   :  { %5299 = vmatprep.mubr.f32.mxu1 %v12772_v34  ;;  %v13032_v34 = vld [vmem:[#allocation3 + $0x291] sm:$0xff] }
 0x8fc   :  { %5300 = vmatmul.mubr.f32.gmra.mrb[130].mxu1 %v13016_v44 }
 0x8fd   :  { %5304 = vmatprep.mubr.f32.mxu1 %v12776_v58  ;;  %v13036_v58 = vld [vmem:[#allocation3 + $0x2a1] sm:$0xff] }
 0x900   :  { %5305 = vmatmul.mubr.f32.gmra.mrb[132].mxu1 %v13020_v47 }
 0x901   :  { %5309 = vmatprep.mubr.f32.mxu1 %v12780_v4  ;;  %v13040_v4 = vld [vmem:[#allocation3 + $0x2a9] sm:$0xff] }
 0x904   :  { %5310 = vmatmul.mubr.f32.gmra.mrb[134].mxu1 %v13024_v28 }
 0x905   :  { %5314 = vmatprep.mubr.f32.mxu1 %v12784_v24  ;;  %v13044_v24 = vld [vmem:[#allocation3 + $0x2b9] sm:$0xff] }
 0x908   :  { %5315 = vmatmul.mubr.f32.gmra.mrb[136].mxu1 %v13028_v42 }
 0x909   :  { %5319 = vmatprep.mubr.f32.mxu1 %v12788_v11  ;;  %v13048_v11 = vld [vmem:[#allocation3 + $0x2c1] sm:$0xff] }
 0x90c   :  { %5320 = vmatmul.mubr.f32.gmra.mrb[138].mxu1 %v13032_v34 }
 0x90d   :  { %5324 = vmatprep.mubr.f32.mxu1 %v12792_v57  ;;  %v13052_v57 = vld [vmem:[#allocation3 + $0x2d1] sm:$0xff] }
 0x910   :  { %5325 = vmatmul.mubr.f32.gmra.mrb[140].mxu1 %v13036_v58 }
 0x911   :  { %5329 = vmatprep.mubr.f32.mxu1 %v12796_v23  ;;  %v13056_v23 = vld [vmem:[#allocation3 + $0x2d9] sm:$0xff] }
 0x914   :  { %5330 = vmatmul.mubr.f32.gmra.mrb[142].mxu1 %v13040_v4 }
 0x915   :  { %5334 = vmatprep.mubr.f32.mxu1 %v12800_v20  ;;  %v13060_v20 = vld [vmem:[#allocation3 + $0x2e9] sm:$0xff] }
 0x918   :  { %5335 = vmatmul.mubr.f32.gmra.mrb[144].mxu1 %v13044_v24 }
 0x919   :  { %5339 = vmatprep.mubr.f32.mxu1 %v12804_v61  ;;  %v13064_v61 = vld [vmem:[#allocation3 + $0x2f1] sm:$0xff] }
 0x91a   :  { %15764 = vst [vmem:[#allocation28_spill] sm:$0xff] %v13064_v61 }
 0x91c   :  { %5340 = vmatmul.mubr.f32.gmra.mrb[146].mxu1 %v13048_v11 }
 0x91d   :  { %5344 = vmatprep.mubr.f32.mxu1 %v12808_v36  ;;  %v13068_v36 = vld [vmem:[#allocation3 + $0x301] sm:$0xff] }
 0x91e   :  { %15765 = vst [vmem:[#allocation24_spill] sm:$0xff] %v13068_v36 }
 0x920   :  { %5345 = vmatmul.mubr.f32.gmra.mrb[148].mxu1 %v13052_v57 }
 0x921   :  { %5349 = vmatprep.mubr.f32.mxu1 %v12812_v40  ;;  %v15766_v40 = vld [vmem:[#allocation34_spill] sm:$0xff] }
 0x922   :  { %15773 = vst [vmem:[#allocation34_spill] sm:$0xff] %v13086_v3 }
 0x924   :  { %5350 = vmatmul.mubr.f32.gmra.mrb[150].mxu1 %v13056_v23 }
 0x925   :  { %5354 = vmatprep.mubr.f32.mxu1 %v12816_v55  ;;  %v15768_v55 = vld [vmem:[#allocation35_spill] sm:$0xff] }
 0x928   :  { %5355 = vmatmul.mubr.f32.gmra.mrb[152].mxu1 %v13060_v20 }
 0x929   :  { %5359 = vmatprep.mubr.f32.mxu1 %v12820_v32  ;;  %v15770_v32 = vld [vmem:[#allocation20_spill] sm:$0xff] }
 0x92c   :  { %5360 = vmatmul.mubr.f32.gmra.mrb[154].mxu1 %v13064_v61  ;;  %v15775_v61 = vld [vmem:[#allocation36_spill] sm:$0xff] }
 0x92d   :  { %5364 = vmatprep.mubr.f32.mxu1 %v12824_v25  ;;  %v3901_v25 = vld [vmem:[#allocation3 + $0x332] sm:$0xff] }
 0x930   :  { %5365 = vmatmul.mubr.f32.gmra.mrb[156].mxu1 %v13068_v36  ;;  %v6526_v36 = vld [vmem:[#allocation10 + $0x38] sm:$0xff] }
 0x931   :  { %5369 = vmatprep.mubr.f32.mxu1 %v15766_v40  ;;  %v6522_v40 = vld [vmem:[#allocation10 + $0x18] sm:$0xff] }
 0x934   :  { %5370 = vmatmul.mubr.f32.gmra.mrb[158].mxu1 %v13072_v1  ;;  %v6525_v1 = vld [vmem:[#allocation10 + $0x30] sm:$0xff] }
 0x935   :  { %5374 = vmatprep.mubr.f32.mxu1 %v15768_v55  ;;  %v8561_v55 = vpack.c.bf16 %v6522_v40, %v6521_v6  ;;  %v3906_v6 = vld [vmem:[#allocation3 + $0x48] sm:$0xff]  ;;  %v6527_v40 = vld [vmem:[#allocation10 + $0x40] sm:$0xff] }
 0x938   :  { %5375 = vmatmul.mubr.f32.gmra.mrb[160].mxu1 %v13076_v46  ;;  %v6523_v46 = vld [vmem:[#allocation10 + $0x20] sm:$0xff] }
 0x939   :  { %5379 = vmatprep.mubr.f32.mxu1 %v15770_v32  ;;  %v3904_v32 = vld [vmem:[#allocation3 + $0x30] sm:$0xff] }
 0x93c   :  { %5380 = vmatmul.mubr.f32.gmra.mrb[162].mxu1 %v13080_v22  ;;  %v6524_v22 = vld [vmem:[#allocation10 + $0x28] sm:$0xff] }
 0x93d   :  { %5384 = vmatprep.mubr.f32.mxu1 %v3901_v25  ;;  %v15774_v25 = vld [vmem:[#allocation21_spill] sm:$0xff] }
 0x940   :  { %5385 = vmatmul.mubr.f32.gmra.mrb[164].mxu1 %v13083_v51  ;;  %v8565_v51 = vpack.c.bf16 %v6524_v22, %v6523_v46  ;;  %v15776_v46 = vld [vmem:[#allocation39_spill] sm:$0xff]  ;;  %v3908_v22 = vld [vmem:[#allocation3 + $0x60] sm:$0xff] }
 0x941   :  { %5389 = vmatprep.mubr.f32.mxu1 %v3902_v60  ;;  %v3905_v60 = vld [vmem:[#allocation3 + $0x38] sm:$0xff] }
 0x944   :  { %5390 = vmatmul.mubr.f32.gmra.mrb[166].mxu1 %v13086_v3  ;;  %v6528_v3 = vld [vmem:[#allocation10 + $0x48] sm:$0xff] }
 0x945   :  { %5459 = vmatprep.mubr.f32.mxu1 %v12841_v10  ;;  %v8569_v10 = vpack.c.bf16 %v6526_v36, %v6525_v1  ;;  %v3910_v36 = vld [vmem:[#allocation3 + $0x78] sm:$0xff]  ;;  %v3912_v1 = vld [vmem:[#allocation3 + $0x90] sm:$0xff] }
 0x948   :  { %5460 = vmatmul.mubr.f32.vlgmr.msra.gmra.mrb[40].mxu1 %v3904_v32  ;;  %v3907_v32 = vld [vmem:[#allocation3 + $0x50] sm:$0xff] }
 0x949   :  { %5464 = vmatprep.mubr.f32.mxu1 %v15774_v25  ;;  %8560 = vmatpush3.bf16.msra.mxu1 %v12968_v38  ;;  %v8573_v38 = vpack.c.bf16 %v6528_v3, %v6527_v40  ;;  %v6530_v3 = vld [vmem:[#allocation10 + $0x58] sm:$0xff]  ;;  %v6533_v40 = vld [vmem:[#allocation10 + $0x70] sm:$0xff] }
 0x94a   :  { %8562 = vmatprep.subr.bf16.mxu1 %v8561_v55  ;;  %v3918_v25 = vld [vmem:[#allocation3 + $0xd8] sm:$0xff] }
 0x94c   :  { %5465 = vmatmul.mubr.f32.gmra.mrb[42].mxu1 %v3905_v60  ;;  %v6531_v60 = vld [vmem:[#allocation10 + $0x60] sm:$0xff] }
 0x94d   :  { %5469 = vmatprep.mubr.f32.mxu1 %v15775_v61  ;;  %8564 = vmatpush3.bf16.msra.mxu1 %v8561_v55  ;;  %v3909_v61 = vld [vmem:[#allocation3 + $0x68] sm:$0xff]  ;;  %v3913_v55 = vld [vmem:[#allocation3 + $0x98] sm:$0xff] }
 0x94e   :  { %8566 = vmatprep.subr.bf16.mxu1 %v8565_v51 }
 0x950   :  { %5470 = vmatmul.mubr.f32.gmra.mrb[44].mxu1 %v3906_v6  ;;  %v3926_v6 = vld [vmem:[#allocation3 + $0x138] sm:$0xff] }
 0x951   :  { %5474 = vmatprep.mubr.f32.mxu1 %v12853_v13  ;;  %8568 = vmatpush3.bf16.msra.mxu1 %v8565_v51  ;;  %v3911_v13 = vld [vmem:[#allocation3 + $0x80] sm:$0xff]  ;;  %v6529_v51 = vld [vmem:[#allocation10 + $0x50] sm:$0xff] }
 0x952   :  { %8570 = vmatprep.subr.bf16.mxu1 %v8569_v10 }
 0x954   :  { %5475 = vmatmul.mubr.f32.gmra.mrb[46].mxu1 %v3907_v32  ;;  %v3933_v32 = vld [vmem:[#allocation3 + $0x188] sm:$0xff] }
 0x955   :  { %5479 = vmatprep.mubr.f32.mxu1 %v15776_v46  ;;  %8572 = vmatpush3.bf16.msra.mxu1 %v8569_v10  ;;  %v3999_v46 = vld [vmem:[#allocation3 + $0x1a1] sm:$0xff] }
 0x956   :  { %8574 = vmatprep.subr.bf16.mxu1 %v8573_v38 }
 0x958   :  { %5480 = vmatmul.mubr.f32.gmra.mrb[48].mxu1 %v3908_v22  ;;  %v4094_v22 = vld [vmem:[#allocation3 + $0x34a] sm:$0xff] }
 0x959   :  { %5484 = vmatprep.mubr.f32.mxu1 %v12862_v18  ;;  %8576 = vmatpush3.bf16.msra.mxu1 %v8573_v38  ;;  %v8577_v18 = vpack.c.bf16 %v6530_v3, %v6529_v51  ;;  %v3957_v51 = vld [vmem:[#allocation3 + $0x2d8] sm:$0xff]  ;;  %v15777_v3 = vld [vmem:[#allocation38_spill] sm:$0xff] }
 0x95a   :  { %7978 = vmatprep.mubr.f32.mxu0 %v4094_v22  ;;  %v15789_v22 = vld [vmem:[#allocation47_spill] sm:$0xff] }
 0x95b   :  { %8578 = vmatprep.subr.bf16.mxu1 %v8577_v18 }
 0x95c   :  { %5485 = vmatmul.mubr.f32.gmra.mrb[50].mxu1 %v3909_v61  ;;  %v4095_v61 = vld [vmem:[#allocation3 + $0x352] sm:$0xff] }
 0x95d   :  { %5489 = vmatprep.mubr.f32.mxu1 %v12866_v50  ;;  %8580 = vmatpush3.bf16.msra.mxu1 %v8577_v18  ;;  %v3914_v50 = vld [vmem:[#allocation3 + $0xa8] sm:$0xff] }
 0x95e   :  { %7979 = vmatmul.mubr.f32.gmra.mrb[214].mxu0 %v4095_v61 }
 0x960   :  { %5490 = vmatmul.mubr.f32.gmra.mrb[52].mxu1 %v3910_v36  ;;  %v3938_v36 = vld [vmem:[#allocation3 + $0x1f8] sm:$0xff] }
 0x961   :  { %5494 = vmatprep.mubr.f32.mxu1 %v12871_v12  ;;  %v3915_v12 = vld [vmem:[#allocation3 + $0xb0] sm:$0xff] }
 0x964   :  { %5495 = vmatmul.mubr.f32.gmra.mrb[54].mxu1 %v3911_v13  ;;  %v3939_v13 = vld [vmem:[#allocation3 + $0x200] sm:$0xff] }
 0x965   :  { %5499 = vmatprep.mubr.f32.mxu1 %v12876_v19  ;;  %v3916_v19 = vld [vmem:[#allocation3 + $0xc0] sm:$0xff] }
 0x968   :  { %5500 = vmatmul.mubr.f32.gmra.mrb[56].mxu1 %v3912_v1  ;;  %v3940_v1 = vld [vmem:[#allocation3 + $0x210] sm:$0xff] }
 0x969   :  { %5504 = vmatprep.mubr.f32.mxu1 %v12881_v30  ;;  %v3917_v30 = vld [vmem:[#allocation3 + $0xc8] sm:$0xff] }
 0x96c   :  { %5505 = vmatmul.mubr.f32.gmra.mrb[58].mxu1 %v3913_v55  ;;  %v3958_v55 = vld [vmem:[#allocation3 + $0x2e8] sm:$0xff] }
 0x96d   :  { %5509 = vmatprep.mubr.f32.mxu1 %v12885_v52  ;;  %v3919_v52 = vld [vmem:[#allocation3 + $0xe0] sm:$0xff] }
 0x970   :  { %5510 = vmatmul.mubr.f32.gmra.mrb[60].mxu1 %v3914_v50 }
 0x971   :  { %5514 = vmatprep.mubr.f32.mxu1 %v12889_v26  ;;  %v3920_v26 = vld [vmem:[#allocation3 + $0xf0] sm:$0xff] }
 0x974   :  { %5515 = vmatmul.mubr.f32.gmra.mrb[62].mxu1 %v3915_v12 }
 0x975   :  { %5519 = vmatprep.mubr.f32.mxu1 %v12894_v0  ;;  %v6532_v0 = vld [vmem:[#allocation10 + $0x68] sm:$0xff] }
 0x976   :  { %v8581_v10 = vpack.c.bf16 %v6532_v0, %v6531_v60  ;;  %v15782_v0 = vld [vmem:[#allocation40_spill] sm:$0xff] }
 0x978   :  { %5520 = vmatmul.mubr.f32.gmra.mrb[64].mxu1 %v3916_v19  ;;  %8582 = vmatprep.subr.bf16.mxu1 %v8581_v10 }
 0x979   :  { %5524 = vmatprep.mubr.f32.mxu1 %v12898_v45  ;;  %v3921_v45 = vld [vmem:[#allocation3 + $0xf8] sm:$0xff]  ;;  %8584 = vmatpush3.bf16.msra.mxu1 %v8581_v10 }
 0x97c   :  { %5525 = vmatmul.mubr.f32.gmra.mrb[66].mxu1 %v3917_v30  ;;  %v15780_v30 = vld [vmem:[#allocation42_spill] sm:$0xff] }
 0x97d   :  { %5529 = vmatprep.mubr.f32.mxu1 %v12902_v8  ;;  %v3922_v8 = vld [vmem:[#allocation3 + $0x108] sm:$0xff] }
 0x980   :  { %5530 = vmatmul.mubr.f32.gmra.mrb[68].mxu1 %v3918_v25 }
 0x981   :  { %5534 = vmatprep.mubr.f32.mxu1 %v12906_v14  ;;  %v3923_v14 = vld [vmem:[#allocation3 + $0x110] sm:$0xff] }
 0x984   :  { %5535 = vmatmul.mubr.f32.gmra.mrb[70].mxu1 %v3919_v52 }
 0x985   :  { %5539 = vmatprep.mubr.f32.mxu1 %v12911_v53  ;;  %v3924_v53 = vld [vmem:[#allocation3 + $0x120] sm:$0xff] }
 0x988   :  { %5540 = vmatmul.mubr.f32.gmra.mrb[72].mxu1 %v3920_v26  ;;  %v15781_v26 = vld [vmem:[#allocation24_spill] sm:$0xff] }
 0x989   :  { %5544 = vmatprep.mubr.f32.mxu1 %v12915_v7  ;;  %v3925_v7 = vld [vmem:[#allocation3 + $0x128] sm:$0xff] }
 0x98c   :  { %5545 = vmatmul.mubr.f32.gmra.mrb[74].mxu1 %v3921_v45 }
 0x98d   :  { %5549 = vmatprep.mubr.f32.mxu1 %v12919_v39  ;;  %v3927_v39 = vld [vmem:[#allocation3 + $0x140] sm:$0xff] }
 0x990   :  { %5550 = vmatmul.mubr.f32.gmra.mrb[76].mxu1 %v3922_v8  ;;  %v15783_v8 = vld [vmem:[#allocation19_spill] sm:$0xff] }
 0x991   :  { %5554 = vmatprep.mubr.f32.mxu1 %v12923_v2  ;;  %v3928_v2 = vld [vmem:[#allocation3 + $0x150] sm:$0xff] }
 0x994   :  { %5555 = vmatmul.mubr.f32.gmra.mrb[78].mxu1 %v3923_v14 }
 0x995   :  { %5559 = vmatprep.mubr.f32.mxu1 %v12928_v29  ;;  %v3929_v29 = vld [vmem:[#allocation3 + $0x158] sm:$0xff] }
 0x998   :  { %5560 = vmatmul.mubr.f32.gmra.mrb[80].mxu1 %v3924_v53  ;;  %v3961_v53 = vld [vmem:[#allocation3 + $0x308] sm:$0xff] }
 0x999   :  { %5564 = vmatprep.mubr.f32.mxu1 %v12932_v37  ;;  %v6534_v37 = vld [vmem:[#allocation10 + $0x78] sm:$0xff] }
 0x99a   :  { %v8585_v38 = vpack.c.bf16 %v6534_v37, %v6533_v40  ;;  %v3962_v40 = vld [vmem:[#allocation3 + $0x318] sm:$0xff]  ;;  %v15786_v37 = vld [vmem:[#allocation17_spill] sm:$0xff] }
 0x99c   :  { %5565 = vmatmul.mubr.f32.gmra.mrb[82].mxu1 %v3925_v7  ;;  %8586 = vmatprep.subr.bf16.mxu1 %v8585_v38  ;;  %v15784_v7 = vld [vmem:[#allocation18_spill] sm:$0xff] }
 0x99d   :  { %5569 = vmatprep.mubr.f32.mxu1 %v12936_v31  ;;  %v3930_v31 = vld [vmem:[#allocation3 + $0x168] sm:$0xff]  ;;  %8588 = vmatpush3.bf16.msra.mxu1 %v8585_v38 }
 0x9a0   :  { %5570 = vmatmul.mubr.f32.gmra.mrb[84].mxu1 %v3926_v6 }
 0x9a1   :  { %5574 = vmatprep.mubr.f32.mxu1 %v12940_v27  ;;  %v3931_v27 = vld [vmem:[#allocation3 + $0x170] sm:$0xff] }
 0x9a4   :  { %5575 = vmatmul.mubr.f32.gmra.mrb[86].mxu1 %v3927_v39 }
 0x9a5   :  { %5579 = vmatprep.mubr.f32.mxu1 %v12945_v15  ;;  %v3932_v15 = vld [vmem:[#allocation3 + $0x180] sm:$0xff] }
 0x9a8   :  { %5580 = vmatmul.mubr.f32.gmra.mrb[88].mxu1 %v3928_v2  ;;  %v15785_v2 = vld [vmem:[#allocation26_spill] sm:$0xff] }
 0x9a9   :  { %5584 = vmatprep.mubr.f32.mxu1 %v12949_v16  ;;  %v3998_v16 = vld [vmem:[#allocation3 + $0x199] sm:$0xff] }
 0x9ac   :  { %5585 = vmatmul.mubr.f32.gmra.mrb[90].mxu1 %v3929_v29 }
 0x9ad   :  { %5589 = vmatprep.mubr.f32.mxu1 %v12953_v49  ;;  %v3934_v49 = vld [vmem:[#allocation3 + $0x198] sm:$0xff] }
 0x9b0   :  { %5590 = vmatmul.mubr.f32.gmra.mrb[92].mxu1 %v3930_v31 }
 0x9b1   :  { %5594 = vmatprep.mubr.f32.mxu1 %v12957_v5  ;;  %v13120_v5 = vld [vmem:[#allocation2 + $0x8] sm:$0xff] }
 0x9b4   :  { %5595 = vmatmul.mubr.f32.gmra.mrb[94].mxu1 %v3931_v27  ;;  %v15787_v27 = vld [vmem:[#allocation44_spill] sm:$0xff] }
 0x9b5   :  { %5599 = vmatprep.mubr.f32.mxu1 %v12960_v62  ;;  %v3936_v62 = vld [vmem:[#allocation3 + $0x1e0] sm:$0xff] }
 0x9b8   :  { %5600 = vmatmul.mubr.f32.gmra.mrb[96].mxu1 %v3932_v15 }
 0x9b9   :  { %5604 = vmatprep.mubr.f32.mxu1 %v12963_v63  ;;  %v3937_v63 = vld [vmem:[#allocation3 + $0x1e8] sm:$0xff] }
 0x9bc   :  { %5605 = vmatmul.mubr.f32.gmra.mrb[98].mxu1 %v3933_v32  ;;  %v15788_v32 = vld [vmem:[#allocation30_spill] sm:$0xff] }
 0x9bd   :  { %5609 = vmatprep.mubr.f32.mxu1 %v3998_v16  ;;  %v3963_v16 = vld [vmem:[#allocation3 + $0x320] sm:$0xff] }
 0x9c0   :  { %5610 = vmatmul.mubr.f32.gmra.mrb[100].mxu1 %v3934_v49 }
 0x9c1   :  { %5614 = vmatprep.mubr.f32.mxu1 %v3999_v46 }
 0x9c4   :  { %5615 = vmatmul.mubr.f32.gmra.mrb[102].mxu1 %v13120_v5 }
 0x9c5   :  { %5619 = vmatprep.mubr.f32.mxu1 %v12972_v17  ;;  %v3941_v17 = vld [vmem:[#allocation3 + $0x218] sm:$0xff] }
 0x9c8   :  { %5620 = vmatmul.mubr.f32.gmra.mrb[104].mxu1 %v3936_v62  ;;  %v3964_v62 = vld [vmem:[#allocation3 + $0x330] sm:$0xff] }
 0x9c9   :  { %5624 = vmatprep.mubr.f32.mxu1 %v12976_v9  ;;  %v3942_v9 = vld [vmem:[#allocation3 + $0x228] sm:$0xff] }
 0x9cc   :  { %5625 = vmatmul.mubr.f32.gmra.mrb[106].mxu1 %v3937_v63  ;;  %v15790_v63 = vld [vmem:[#allocation29_spill] sm:$0xff] }
 0x9cd   :  { %5629 = vmatprep.mubr.f32.mxu1 %v12980_v21  ;;  %v3943_v21 = vld [vmem:[#allocation3 + $0x230] sm:$0xff] }
 0x9d0   :  { %5630 = vmatmul.mubr.f32.gmra.mrb[108].mxu1 %v3938_v36 }
 0x9d1   :  { %5634 = vmatprep.mubr.f32.mxu1 %v12984_v35  ;;  %v3944_v35 = vld [vmem:[#allocation3 + $0x240] sm:$0xff] }
 0x9d4   :  { %5635 = vmatmul.mubr.f32.gmra.mrb[110].mxu1 %v3939_v13 }
 0x9d5   :  { %5639 = vmatprep.mubr.f32.mxu1 %v12988_v56  ;;  %v3945_v56 = vld [vmem:[#allocation3 + $0x248] sm:$0xff] }
 0x9d8   :  { %5640 = vmatmul.mubr.f32.gmra.mrb[112].mxu1 %v3940_v1  ;;  %v15791_v1 = vld [vmem:[#allocation34_spill] sm:$0xff] }
 0x9d9   :  { %5644 = vmatprep.mubr.f32.mxu1 %v12992_v59  ;;  %v3946_v59 = vld [vmem:[#allocation3 + $0x258] sm:$0xff] }
 0x9dc   :  { %5645 = vmatmul.mubr.f32.gmra.mrb[114].mxu1 %v3941_v17  ;;  %v4030_v17 = vld [vmem:[#allocation3 + $0x349] sm:$0xff] }
 0x9dd   :  { %5649 = vmatprep.mubr.f32.mxu1 %v12996_v54  ;;  %v3947_v54 = vld [vmem:[#allocation3 + $0x260] sm:$0xff] }
 0x9e0   :  { %5650 = vmatmul.mubr.f32.gmra.mrb[116].mxu1 %v3942_v9 }
 0x9e1   :  { %5654 = vmatprep.mubr.f32.mxu1 %v13000_v43  ;;  %v3948_v43 = vld [vmem:[#allocation3 + $0x270] sm:$0xff] }
 0x9e4   :  { %5655 = vmatmul.mubr.f32.gmra.mrb[118].mxu1 %v3943_v21  ;;  %v3965_v21 = vld [vmem:[#allocation3 + $0x338] sm:$0xff] }
 0x9e5   :  { %5659 = vmatprep.mubr.f32.mxu1 %v13004_v48  ;;  %v3949_v48 = vld [vmem:[#allocation3 + $0x278] sm:$0xff] }
 0x9e8   :  { %5660 = vmatmul.mubr.f32.gmra.mrb[120].mxu1 %v3944_v35  ;;  %v15792_v35 = vld [vmem:[#allocation41_spill] sm:$0xff] }
 0x9e9   :  { %5664 = vmatprep.mubr.f32.mxu1 %v13008_v41  ;;  %v3950_v41 = vld [vmem:[#allocation3 + $0x288] sm:$0xff] }
 0x9ec   :  { %5665 = vmatmul.mubr.f32.gmra.mrb[122].mxu1 %v3945_v56 }
 0x9ed   :  { %5669 = vmatprep.mubr.f32.mxu1 %v13012_v33  ;;  %v3951_v33 = vld [vmem:[#allocation3 + $0x290] sm:$0xff] }
 0x9f0   :  { %5670 = vmatmul.mubr.f32.gmra.mrb[124].mxu1 %v3946_v59 }
 0x9f1   :  { %5674 = vmatprep.mubr.f32.mxu1 %v13016_v44  ;;  %v3952_v44 = vld [vmem:[#allocation3 + $0x2a0] sm:$0xff] }
 0x9f4   :  { %5675 = vmatmul.mubr.f32.gmra.mrb[126].mxu1 %v3947_v54  ;;  %v3966_v54 = vld [vmem:[#allocation3 + $0x348] sm:$0xff] }
 0x9f5   :  { %5679 = vmatprep.mubr.f32.mxu1 %v13020_v47  ;;  %v3953_v47 = vld [vmem:[#allocation3 + $0x2a8] sm:$0xff] }
 0x9f8   :  { %5680 = vmatmul.mubr.f32.gmra.mrb[128].mxu1 %v3948_v43  ;;  %v4031_v43 = vld [vmem:[#allocation3 + $0x351] sm:$0xff] }
 0x9f9   :  { %5684 = vmatprep.mubr.f32.mxu1 %v13024_v28  ;;  %v3954_v28 = vld [vmem:[#allocation3 + $0x2b8] sm:$0xff] }
 0x9fc   :  { %5685 = vmatmul.mubr.f32.gmra.mrb[130].mxu1 %v3949_v48 }
 0x9fd   :  { %5689 = vmatprep.mubr.f32.mxu1 %v13028_v42  ;;  %v3955_v42 = vld [vmem:[#allocation3 + $0x2c0] sm:$0xff] }
 0xa00   :  { %5690 = vmatmul.mubr.f32.gmra.mrb[132].mxu1 %v3950_v41  ;;  %v15793_v41 = vld [vmem:[#allocation23_spill] sm:$0xff] }
 0xa01   :  { %5694 = vmatprep.mubr.f32.mxu1 %v13032_v34  ;;  %v3956_v34 = vld [vmem:[#allocation3 + $0x2d0] sm:$0xff] }
 0xa04   :  { %5695 = vmatmul.mubr.f32.gmra.mrb[134].mxu1 %v3951_v33 }
 0xa05   :  { %5699 = vmatprep.mubr.f32.mxu1 %v13036_v58 }
 0xa08   :  { %5700 = vmatmul.mubr.f32.gmra.mrb[136].mxu1 %v3952_v44 }
 0xa09   :  { %5704 = vmatprep.mubr.f32.mxu1 %v13040_v4 }
 0xa0c   :  { %5705 = vmatmul.mubr.f32.gmra.mrb[138].mxu1 %v3953_v47 }
 0xa0d   :  { %5709 = vmatprep.mubr.f32.mxu1 %v13044_v24 }
 0xa10   :  { %5710 = vmatmul.mubr.f32.gmra.mrb[140].mxu1 %v3954_v28  ;;  %v15794_v28 = vld [vmem:[#allocation27_spill] sm:$0xff] }
 0xa11   :  { %5714 = vmatprep.mubr.f32.mxu1 %v13048_v11  ;;  %v15778_v11 = vld [vmem:[#allocation37_spill] sm:$0xff] }
 0xa14   :  { %5715 = vmatmul.mubr.f32.gmra.mrb[142].mxu1 %v3955_v42 }
 0xa15   :  { %5719 = vmatprep.mubr.f32.mxu1 %v13052_v57  ;;  %v15779_v57 = vld [vmem:[#allocation28_spill] sm:$0xff] }
 0xa18   :  { %5720 = vmatmul.mubr.f32.gmra.mrb[144].mxu1 %v3956_v34 }
 0xa19   :  { %5724 = vmatprep.mubr.f32.mxu1 %v13056_v23  ;;  %v3959_v23 = vld [vmem:[#allocation3 + $0x2f0] sm:$0xff] }
 0xa1b   :  { %v5461_v58 = vpop.f32.mrb[40].mxu1 }
 0xa1c   :  { %v13146_v4 = vadd.f32 %v15777_v3, %v5461_v58  ;;  %v5463_v18 = vpop.f32.mrb[41].mxu1  ;;  %5725 = vmatmul.mubr.f32.gmra.mrb[146].mxu1 %v3957_v51  ;;  %v9393_v58 = vld [vmem:[#allocation2 + $0x19] sm:$0xff]  ;;  %v15795_v3 = vld [vmem:[#allocation43_spill] sm:$0xff] }
 0xa1d   :  { %5729 = vmatprep.mubr.f32.mxu1 %v13060_v20  ;;  %v3960_v20 = vld [vmem:[#allocation3 + $0x300] sm:$0xff] }
 0xa1f   :  { %v5466_v24 = vpop.f32.mrb[42].mxu1 }
 0xa20   :  { %v13150_v50 = vadd.f32 %v15778_v11, %v5466_v24  ;;  %v5468_v12 = vpop.f32.mrb[43].mxu1  ;;  %5730 = vmatmul.mubr.f32.gmra.mrb[148].mxu1 %v3958_v55  ;;  %v9394_v55 = vld [vmem:[#allocation2 + $0x21] sm:$0xff]  ;;  %v9395_v11 = vld [vmem:[#allocation2 + $0x31] sm:$0xff] }
 0xa21   :  { %5734 = vmatprep.mubr.f32.mxu1 %v15779_v57  ;;  %v15796_v57 = vld [vmem:[#allocation46_spill] sm:$0xff] }
 0xa23   :  { %v5471_v19 = vpop.f32.mrb[44].mxu1 }
 0xa24   :  { %v13154_v25 = vadd.f32 %v15780_v30, %v5471_v19  ;;  %v5473_v52 = vpop.f32.mrb[45].mxu1  ;;  %5735 = vmatmul.mubr.f32.gmra.mrb[150].mxu1 %v3959_v23  ;;  %v9396_v30 = vld [vmem:[#allocation2 + $0x39] sm:$0xff] }
 0xa25   :  { %5739 = vmatprep.mubr.f32.mxu1 %v15781_v26  ;;  %v9397_v52 = vld [vmem:[#allocation2 + $0x49] sm:$0xff]  ;;  %v15797_v26 = vld [vmem:[#allocation45_spill] sm:$0xff] }
 0xa27   :  { %v5476_v60 = vpop.f32.mrb[46].mxu1 }
 0xa28   :  { %v13158_v10 = vadd.f32 %v15782_v0, %v5476_v60  ;;  %v5478_v45 = vpop.f32.mrb[47].mxu1  ;;  %5740 = vmatmul.mubr.f32.gmra.mrb[152].mxu1 %v3960_v20  ;;  %v9398_v0 = vld [vmem:[#allocation2 + $0x51] sm:$0xff] }
 0xa29   :  { %5744 = vmatprep.mubr.f32.mxu1 %v15783_v8  ;;  %v9399_v45 = vld [vmem:[#allocation2 + $0x61] sm:$0xff] }
 0xa2b   :  { %v5481_v14 = vpop.f32.mrb[48].mxu1 }
 0xa2c   :  { %v13162_v6 = vadd.f32 %v15784_v7, %v5481_v14  ;;  %v5483_v39 = vpop.f32.mrb[49].mxu1  ;;  %5745 = vmatmul.mubr.f32.gmra.mrb[154].mxu1 %v3961_v53  ;;  %v15798_v14 = vld [vmem:[#allocation49_spill] sm:$0xff] }
 0xa2d   :  { %5749 = vmatprep.mubr.f32.mxu1 %v15785_v2  ;;  %v9400_v39 = vld [vmem:[#allocation2 + $0x69] sm:$0xff]  ;;  %v9401_v2 = vld [vmem:[#allocation2 + $0x79] sm:$0xff] }
 0xa2f   :  { %v5486_v29 = vpop.f32.mrb[50].mxu1 }
 0xa30   :  { %v13166_v38 = vadd.f32 %v15786_v37, %v5486_v29  ;;  %v5488_v31 = vpop.f32.mrb[51].mxu1  ;;  %5750 = vmatmul.mubr.f32.gmra.mrb[156].mxu1 %v3962_v40  ;;  %v15799_v40 = vld [vmem:[#allocation48_spill] sm:$0xff] }
 0xa31   :  { %5754 = vmatprep.mubr.f32.mxu1 %v15787_v27  ;;  %v9402_v27 = vld [vmem:[#allocation2 + $0x81] sm:$0xff] }
 0xa33   :  { %v5491_v15 = vpop.f32.mrb[52].mxu1 }
 0xa34   :  { %v13170_v49 = vadd.f32 %v15788_v32, %v5491_v15  ;;  %v5493_v46 = vpop.f32.mrb[53].mxu1  ;;  %5755 = vmatmul.mubr.f32.gmra.mrb[158].mxu1 %v3963_v16  ;;  %v9403_v15 = vld [vmem:[#allocation2 + $0x91] sm:$0xff]  ;;  %v15800_v32 = vld [vmem:[#allocation25_spill] sm:$0xff] }
 0xa35   :  { %5759 = vmatprep.mubr.f32.mxu1 %v15789_v22 }
 0xa37   :  { %v5496_v61 = vpop.f32.mrb[54].mxu1 }
 0xa38   :  { %v13174_v36 = vadd.f32 %v15790_v63, %v5496_v61  ;;  %v5498_v13 = vpop.f32.mrb[55].mxu1  ;;  %5760 = vmatmul.mubr.f32.gmra.mrb[160].mxu1 %v3964_v62  ;;  %v9404_v61 = vld [vmem:[#allocation2 + $0x99] sm:$0xff]  ;;  %v9405_v62 = vld [vmem:[#allocation2 + $0xa9] sm:$0xff] }
 0xa39   :  { %5764 = vmatprep.mubr.f32.mxu1 %v15791_v1  ;;  %v15801_v13 = vld [vmem:[#allocation50_spill] sm:$0xff] }
 0xa3b   :  { %v5501_v9 = vpop.f32.mrb[56].mxu1 }
 0xa3c   :  { %v13178_v56 = vadd.f32 %v15792_v35, %v5501_v9  ;;  %v5503_v59 = vpop.f32.mrb[57].mxu1  ;;  %5765 = vmatmul.mubr.f32.gmra.mrb[162].mxu1 %v3965_v21  ;;  %v9406_v9 = vld [vmem:[#allocation2 + $0xb1] sm:$0xff]  ;;  %v9407_v21 = vld [vmem:[#allocation2 + $0xc1] sm:$0xff] }
 0xa3d   :  { %5769 = vmatprep.mubr.f32.mxu1 %v4030_v17  ;;  %v15802_v59 = vld [vmem:[#allocation52_spill] sm:$0xff] }
 0xa3f   :  { %v5506_v48 = vpop.f32.mrb[58].mxu1 }
 0xa40   :  { %v13181_v33 = vadd.f32 %v15793_v41, %v5506_v48  ;;  %v5508_v44 = vpop.f32.mrb[59].mxu1  ;;  %5770 = vmatmul.mubr.f32.gmra.mrb[164].mxu1 %v3966_v54  ;;  %v9408_v48 = vld [vmem:[#allocation2 + $0xc9] sm:$0xff]  ;;  %v9409_v41 = vld [vmem:[#allocation2 + $0xd9] sm:$0xff] }
 0xa41   :  { %5774 = vmatprep.mubr.f32.mxu1 %v4031_v43 }
 0xa43   :  { %v5511_v47 = vpop.f32.mrb[60].mxu1 }
 0xa44   :  { %v13184_v42 = vadd.f32 %v15794_v28, %v5511_v47  ;;  %v5513_v34 = vpop.f32.mrb[61].mxu1  ;;  %5775 = vmatmul.mubr.f32.gmra.mrb[166].mxu1 %v13120_v5  ;;  %v15803_v47 = vld [vmem:[#allocation51_spill] sm:$0xff] }
 0xa45   :  { %8013 = vmatprep.mubr.f32.mxu1 %v9393_v58  ;;  %v9410_v58 = vld [vmem:[#allocation2 + $0xe1] sm:$0xff] }
 0xa47   :  { %v5516_v51 = vpop.f32.mrb[62].mxu1 }
 0xa48   :  { %v13188_v18 = vadd.f32 %v15795_v3, %v5516_v51  ;;  %v5518_v24 = vpop.f32.mrb[63].mxu1  ;;  %8014 = vmatmul.mubr.f32.vlgmr.msra.gmra.mrb[168].mxu1 %v9394_v55  ;;  %v9411_v51 = vld [vmem:[#allocation2 + $0xf1] sm:$0xff] }
 0xa49   :  { %8016 = vmatprep.mubr.f32.mxu1 %v9395_v11  ;;  %v15804_v24 = vld [vmem:[#allocation54_spill] sm:$0xff] }
 0xa4b   :  { %v5521_v12 = vpop.f32.mrb[64].mxu1 }
 0xa4c   :  { %v13191_v19 = vadd.f32 %v15796_v57, %v5521_v12  ;;  %v5523_v23 = vpop.f32.mrb[65].mxu1  ;;  %8017 = vmatmul.mubr.f32.gmra.mrb[170].mxu1 %v9396_v30  ;;  %v9412_v12 = vld [vmem:[#allocation2 + $0xf9] sm:$0xff]  ;;  %v9413_v57 = vld [vmem:[#allocation2 + $0x109] sm:$0xff] }
 0xa4d   :  { %8019 = vmatprep.mubr.f32.mxu1 %v9397_v52  ;;  %v15805_v30 = vld [vmem:[#allocation53_spill] sm:$0xff] }
 0xa4f   :  { %v5526_v5 = vpop.f32.mrb[66].mxu1 }
 0xa50   :  { %v13194_v60 = vadd.f32 %v15797_v26, %v5526_v5  ;;  %v5528_v20 = vpop.f32.mrb[67].mxu1  ;;  %8020 = vmatmul.mubr.f32.gmra.mrb[172].mxu1 %v9398_v0  ;;  %v9414_v26 = vld [vmem:[#allocation2 + $0x111] sm:$0xff] }
 0xa51   :  { %8022 = vmatprep.mubr.f32.mxu1 %v9399_v45  ;;  %v9415_v20 = vld [vmem:[#allocation2 + $0x121] sm:$0xff]  ;;  %v15806_v45 = vld [vmem:[#allocation56_spill] sm:$0xff] }
 0xa53   :  { %v5531_v8 = vpop.f32.mrb[68].mxu1 }
 0xa54   :  { %v13197_v53 = vadd.f32 %v15798_v14, %v5531_v8  ;;  %v5533_v7 = vpop.f32.mrb[69].mxu1  ;;  %8023 = vmatmul.mubr.f32.gmra.mrb[174].mxu1 %v9400_v39  ;;  %v9417_v39 = vld [vmem:[#allocation2 + $0x139] sm:$0xff] }
 0xa55   :  { %8025 = vmatprep.mubr.f32.mxu1 %v9401_v2  ;;  %v9416_v7 = vld [vmem:[#allocation2 + $0x129] sm:$0xff] }
 0xa57   :  { %v5536_v29 = vpop.f32.mrb[70].mxu1 }
 0xa58   :  { %v13200_v37 = vadd.f32 %v15799_v40, %v5536_v29  ;;  %v5538_v31 = vpop.f32.mrb[71].mxu1  ;;  %8026 = vmatmul.mubr.f32.gmra.mrb[176].mxu1 %v9402_v27  ;;  %v15807_v29 = vld [vmem:[#allocation55_spill] sm:$0xff]  ;;  %v9418_v27 = vld [vmem:[#allocation2 + $0x141] sm:$0xff] }
 0xa59   :  { %8028 = vmatprep.mubr.f32.mxu1 %v9403_v15  ;;  %v9419_v15 = vld [vmem:[#allocation2 + $0x151] sm:$0xff] }
 0xa5b   :  { %v5541_v16 = vpop.f32.mrb[72].mxu1 }
 0xa5c   :  { %v13203_v46 = vadd.f32 %v15800_v32, %v5541_v16  ;;  %v5543_v22 = vpop.f32.mrb[73].mxu1  ;;  %8029 = vmatmul.mubr.f32.gmra.mrb[178].mxu1 %v9404_v61  ;;  %v15808_v32 = vld [vmem:[#allocation58_spill] sm:$0xff] }
 0xa5d   :  { %8031 = vmatprep.mubr.f32.mxu1 %v9405_v62  ;;  %v9420_v62 = vld [vmem:[#allocation2 + $0x159] sm:$0xff] }
 0xa5f   :  { %v5546_v63 = vpop.f32.mrb[74].mxu1 }
 0xa60   :  { %v13206_v1 = vadd.f32 %v15801_v13, %v5546_v63  ;;  %v5548_v17 = vpop.f32.mrb[75].mxu1  ;;  %8032 = vmatmul.mubr.f32.gmra.mrb[180].mxu1 %v9406_v9  ;;  %v9421_v63 = vld [vmem:[#allocation2 + $0x169] sm:$0xff] }
 0xa61   :  { %8034 = vmatprep.mubr.f32.mxu1 %v9407_v21  ;;  %v15809_v17 = vld [vmem:[#allocation57_spill] sm:$0xff] }
 0xa63   :  { %v5551_v35 = vpop.f32.mrb[76].mxu1 }
 0xa64   :  { %v13209_v54 = vadd.f32 %v15802_v59, %v5551_v35  ;;  %v5553_v43 = vpop.f32.mrb[77].mxu1  ;;  %8035 = vmatmul.mubr.f32.gmra.mrb[182].mxu1 %v9408_v48  ;;  %v9422_v35 = vld [vmem:[#allocation2 + $0x171] sm:$0xff]  ;;  %v9423_v59 = vld [vmem:[#allocation2 + $0x181] sm:$0xff] }
 0xa65   :  { %8037 = vmatprep.mubr.f32.mxu1 %v9409_v41  ;;  %v15810_v48 = vld [vmem:[#allocation59_spill] sm:$0xff] }
 0xa67   :  { %v5556_v44 = vpop.f32.mrb[78].mxu1 }
 0xa68   :  { %v13212_v28 = vadd.f32 %v15803_v47, %v5556_v44  ;;  %v5558_v34 = vpop.f32.mrb[79].mxu1  ;;  %8038 = vmatmul.mubr.f32.gmra.mrb[184].mxu1 %v9410_v58  ;;  %v9424_v47 = vld [vmem:[#allocation2 + $0x189] sm:$0xff] }
 0xa69   :  { %8040 = vmatprep.mubr.f32.mxu1 %v9411_v51  ;;  %v9425_v34 = vld [vmem:[#allocation2 + $0x1c9] sm:$0xff] }
 0xa6a   :  { %v15811_v51 = vld [vmem:[#allocation31_spill] sm:$0xff] }
 0xa6b   :  { %v5561_v3 = vpop.f32.mrb[80].mxu1 }
 0xa6c   :  { %v13215_v55 = vadd.f32 %v15804_v24, %v5561_v3  ;;  %v5563_v11 = vpop.f32.mrb[81].mxu1  ;;  %8041 = vmatmul.mubr.f32.gmra.mrb[186].mxu1 %v9412_v12  ;;  %v9427_v12 = vld [vmem:[#allocation2 + $0x1e1] sm:$0xff] }
 0xa6d   :  { %8043 = vmatprep.mubr.f32.mxu1 %v9413_v57  ;;  %v9426_v11 = vld [vmem:[#allocation2 + $0x1d1] sm:$0xff] }
 0xa6f   :  { %v5566_v23 = vpop.f32.mrb[82].mxu1 }
 0xa70   :  { %v13218_v52 = vadd.f32 %v15805_v30, %v5566_v23  ;;  %v5568_v5 = vpop.f32.mrb[83].mxu1  ;;  %8044 = vmatmul.mubr.f32.gmra.mrb[188].mxu1 %v9414_v26  ;;  %v15813_v23 = vld [vmem:[#allocation60_spill] sm:$0xff]  ;;  %v9428_v26 = vld [vmem:[#allocation2 + $0x1e9] sm:$0xff] }
 0xa71   :  { %8046 = vmatprep.mubr.f32.mxu1 %v9415_v20  ;;  %v9429_v20 = vld [vmem:[#allocation2 + $0x1f9] sm:$0xff] }
 0xa73   :  { %v5571_v0 = vpop.f32.mrb[84].mxu1 }
 0xa74   :  { %v13221_v8 = vadd.f32 %v15806_v45, %v5571_v0  ;;  %v5573_v14 = vpop.f32.mrb[85].mxu1  ;;  %8047 = vmatmul.mubr.f32.gmra.mrb[190].mxu1 %v9416_v7  ;;  %v15814_v45 = vld [vmem:[#allocation32_spill] sm:$0xff] }
 0xa75   :  { %8049 = vmatprep.mubr.f32.mxu1 %v9417_v39  ;;  %v9430_v39 = vld [vmem:[#allocation2 + $0x201] sm:$0xff] }
 0xa77   :  { %v5576_v2 = vpop.f32.mrb[86].mxu1 }
 0xa78   :  { %v13224_v40 = vadd.f32 %v15807_v29, %v5576_v2  ;;  %v5578_v31 = vpop.f32.mrb[87].mxu1  ;;  %8050 = vmatmul.mubr.f32.gmra.mrb[192].mxu1 %v9418_v27  ;;  %v9431_v2 = vld [vmem:[#allocation2 + $0x211] sm:$0xff] }
 0xa79   :  { %8052 = vmatprep.mubr.f32.mxu1 %v9419_v15  ;;  %v15816_v31 = vld [vmem:[#allocation61_spill] sm:$0xff] }
 0xa7b   :  { %v5581_v16 = vpop.f32.mrb[88].mxu1 }
 0xa7c   :  { %v13227_v22 = vadd.f32 %v15808_v32, %v5581_v16  ;;  %v5583_v61 = vpop.f32.mrb[89].mxu1  ;;  %8053 = vmatmul.mubr.f32.gmra.mrb[194].mxu1 %v9420_v62  ;;  %v9432_v16 = vld [vmem:[#allocation2 + $0x219] sm:$0xff]  ;;  %v9433_v32 = vld [vmem:[#allocation2 + $0x229] sm:$0xff] }
 0xa7d   :  { %8055 = vmatprep.mubr.f32.mxu1 %v9421_v63  ;;  %v15817_v62 = vld [vmem:[#allocation33_spill] sm:$0xff] }
 0xa7f   :  { %v5586_v13 = vpop.f32.mrb[90].mxu1 }
 0xa80   :  { %v13230_v9 = vadd.f32 %v15809_v17, %v5586_v13  ;;  %v5588_v21 = vpop.f32.mrb[91].mxu1  ;;  %8056 = vmatmul.mubr.f32.gmra.mrb[196].mxu1 %v9422_v35  ;;  %v9434_v17 = vld [vmem:[#allocation2 + $0x231] sm:$0xff]  ;;  %v9435_v35 = vld [vmem:[#allocation2 + $0x241] sm:$0xff] }
 0xa81   :  { %8058 = vmatprep.mubr.f32.mxu1 %v9423_v59  ;;  %v13250_v21 = vpop.f32.mrb[214].mxu0 }
 0xa82   :  { %v13252_v59 = vpop.f32.mrb[215].mxu0 }
 0xa83   :  { %v5591_v43 = vpop.f32.mrb[92].mxu1 }
 0xa84   :  { %v13233_v41 = vadd.f32 %v15810_v48, %v5591_v43  ;;  %v5593_v44 = vpop.f32.mrb[93].mxu1  ;;  %8059 = vmatmul.mubr.f32.gmra.mrb[198].mxu1 %v9424_v47  ;;  %v6235_v43 = vmul.f32 %v13150_v50, %v13150_v50  ;;  %v6165_v47 = vadd.f32 %v13150_v50, %v13146_v4 }
 0xa85   :  { %8061 = vmatprep.mubr.f32.mxu1 %v9425_v34  ;;  %v6234_v44 = vmul.f32 %v13146_v4, %v13146_v4  ;;  %v6236_v34 = vmul.f32 %v13154_v25, %v13154_v25 }
 0xa87   :  { %v5596_v58 = vpop.f32.mrb[94].mxu1 }
 0xa88   :  { %v13236_v3 = vadd.f32 %v15811_v51, %v5596_v58  ;;  %v5598_v24 = vpop.f32.mrb[95].mxu1  ;;  %8062 = vmatmul.mubr.f32.gmra.mrb[200].mxu1 %v9426_v11  ;;  %v15819_v58 = vld [vmem:[#allocation63_spill] sm:$0xff] }
 0xa89   :  { %8064 = vmatprep.mubr.f32.mxu1 %v9427_v12  ;;  %v9436_v11 = vld [vmem:[#allocation2 + $0x249] sm:$0xff]  ;;  %v9437_v12 = vld [vmem:[#allocation2 + $0x259] sm:$0xff] }
 0xa8a   :  { %15812 = vst [vmem:[#allocation35_spill] sm:$0xff] %v13236_v3 }
 0xa8b   :  { %v5601_v57 = vpop.f32.mrb[96].mxu1 }
 0xa8c   :  { %v13239_v30 = vadd.f32 %v15813_v23, %v5601_v57  ;;  %v5603_v5 = vpop.f32.mrb[97].mxu1  ;;  %8065 = vmatmul.mubr.f32.gmra.mrb[202].mxu1 %v9428_v26  ;;  %v6298_v57 = vadd.f32 %v6235_v43, %v6234_v44  ;;  %v6166_v23 = vadd.f32 %v6165_v47, %v13154_v25  ;;  %v9440_v44 = vld [vmem:[#allocation2 + $0x279] sm:$0xff]  ;;  %v9441_v47 = vld [vmem:[#allocation2 + $0x289] sm:$0xff] }
 0xa8d   :  { %8067 = vmatprep.mubr.f32.mxu1 %v9429_v20  ;;  %v6237_v5 = vmul.f32 %v13158_v10, %v13158_v10 }
 0xa8e   :  { %v6299_v20 = vadd.f32 %v6298_v57, %v6236_v34 }
 0xa8f   :  { %v5606_v0 = vpop.f32.mrb[98].mxu1 }
 0xa90   :  { %v13242_v14 = vadd.f32 %v15814_v45, %v5606_v0  ;;  %v5608_v7 = vpop.f32.mrb[99].mxu1  ;;  %8068 = vmatmul.mubr.f32.gmra.mrb[204].mxu1 %v9430_v39  ;;  %v6167_v0 = vadd.f32 %v6166_v23, %v13158_v10  ;;  %v6238_v45 = vmul.f32 %v13162_v6, %v13162_v6  ;;  %v6242_v23 = vmul.f32 %v13178_v56, %v13178_v56 }
 0xa91   :  { %8070 = vmatprep.mubr.f32.mxu1 %v9431_v2  ;;  %v15820_v7 = vld [vmem:[#allocation62_spill] sm:$0xff] }
 0xa92   :  { %15815 = vst [vmem:[#allocation20_spill] sm:$0xff] %v13242_v14 }
 0xa93   :  { %v5611_v29 = vpop.f32.mrb[100].mxu1 }
 0xa94   :  { %v13245_v27 = vadd.f32 %v15816_v31, %v5611_v29  ;;  %v5613_v15 = vpop.f32.mrb[101].mxu1  ;;  %8071 = vmatmul.mubr.f32.gmra.mrb[206].mxu1 %v9432_v16  ;;  %v9438_v29 = vld [vmem:[#allocation2 + $0x261] sm:$0xff]  ;;  %v9439_v31 = vld [vmem:[#allocation2 + $0x271] sm:$0xff]  ;;  %v6168_v16 = vadd.f32 %v6167_v0, %v13162_v6 }
 0xa95   :  { %8073 = vmatprep.mubr.f32.mxu1 %v9433_v32  ;;  %v6300_v15 = vadd.f32 %v6299_v20, %v6237_v5  ;;  %v6239_v32 = vmul.f32 %v13166_v38, %v13166_v38  ;;  %v15823_v5 = vld [vmem:[#allocation64_spill] sm:$0xff] }
 0xa96   :  { %v9442_v0 = vld [vmem:[#allocation2 + $0x291] sm:$0xff] }
 0xa97   :  { %v5616_v61 = vpop.f32.mrb[102].mxu1 }
 0xa98   :  { %v13248_v63 = vadd.f32 %v15817_v62, %v5616_v61  ;;  %v5618_v13 = vpop.f32.mrb[103].mxu1  ;;  %8074 = vmatmul.mubr.f32.gmra.mrb[208].mxu1 %v9434_v17  ;;  %v6301_v62 = vadd.f32 %v6300_v15, %v6238_v45  ;;  %v6240_v17 = vmul.f32 %v13170_v49, %v13170_v49  ;;  %v9443_v45 = vld [vmem:[#allocation2 + $0x2a1] sm:$0xff] }
 0xa99   :  { %8076 = vmatprep.mubr.f32.mxu1 %v9435_v35  ;;  %v6169_v13 = vadd.f32 %v6168_v16, %v13166_v38  ;;  %v15822_v35 = vld [vmem:[#allocation65_spill] sm:$0xff] }
 0xa9a   :  { %15818 = vst [vmem:[#allocation21_spill] sm:$0xff] %v13248_v63  ;;  %v6302_v34 = vadd.f32 %v6301_v62, %v6239_v32  ;;  %v6244_v32 = vmul.f32 %v13184_v42, %v13184_v42 }
 0xa9b   :  { %v5621_v48 = vpop.f32.mrb[104].mxu1 }
 0xa9c   :  { %v13263_v51 = vadd.f32 %v15819_v58, %v5621_v48  ;;  %v5623_v24 = vpop.f32.mrb[105].mxu1  ;;  %8077 = vmatmul.mubr.f32.gmra.mrb[210].mxu1 %v9436_v11  ;;  %v6170_v58 = vadd.f32 %v6169_v13, %v13170_v49 }
 0xa9d   :  { %8079 = vmatprep.mubr.f32.mxu1 %v9437_v12  ;;  %v6241_v24 = vmul.f32 %v13174_v36, %v13174_v36  ;;  %v6303_v12 = vadd.f32 %v6302_v34, %v6240_v17  ;;  %v9444_v17 = vld [vmem:[#allocation2 + $0x2a9] sm:$0xff] }
 0xa9e   :  { %v6171_v57 = vadd.f32 %v6170_v58, %v13174_v36 }
 0xa9f   :  { %v5626_v26 = vpop.f32.mrb[106].mxu1 }
 0xaa0   :  { %v13272_v39 = vadd.f32 %v15820_v7, %v5626_v26  ;;  %v5628_v2 = vpop.f32.mrb[107].mxu1  ;;  %8080 = vmatmul.mubr.f32.gmra.mrb[212].mxu1 %v9438_v29  ;;  %v6304_v7 = vadd.f32 %v6303_v12, %v6241_v24  ;;  %v6243_v29 = vmul.f32 %v13181_v33, %v13181_v33  ;;  %v15826_v12 = vld [vmem:[#allocation66_spill] sm:$0xff] }
 0xaa1   :  { %8082 = vmatprep.mubr.f32.mxu1 %v9439_v31  ;;  %v6172_v2 = vadd.f32 %v6171_v57, %v13178_v56 }
 0xaa2   :  { %15821 = vst [vmem:[#allocation36_spill] sm:$0xff] %v13272_v39  ;;  %v6305_v15 = vadd.f32 %v6304_v7, %v6242_v23  ;;  %v6247_v7 = vmul.f32 %v13194_v60, %v13194_v60 }
 0xaa3   :  { %v5631_v61 = vpop.f32.mrb[108].mxu1  ;;  %v6173_v16 = vadd.f32 %v6172_v2, %v13181_v33 }
 0xaa4   :  { %v13281_v43 = vadd.f32 %v15822_v35, %v5631_v61  ;;  %v5633_v48 = vpop.f32.mrb[109].mxu1  ;;  %8083 = vmatmul.mubr.f32.gmra.mrb[214].mxu1 %v9440_v44  ;;  %v15825_v61 = vld [vmem:[#allocation67_spill] sm:$0xff]  ;;  %v9445_v35 = vld [vmem:[#allocation2 + $0x2b9] sm:$0xff] }
 0xaa5   :  { %8085 = vmatprep.mubr.f32.mxu1 %v9441_v47  ;;  %v6306_v48 = vadd.f32 %v6305_v15, %v6243_v29  ;;  %v6174_v44 = vadd.f32 %v6173_v16, %v13184_v42  ;;  %v6245_v47 = vmul.f32 %v13188_v18, %v13188_v18  ;;  %v6248_v15 = vmul.f32 %v13197_v53, %v13197_v53  ;;  %v15828_v16 = vld [vmem:[#allocation69_spill] sm:$0xff] }
 0xaa7   :  { %v5636_v11 = vpop.f32.mrb[110].mxu1  ;;  %v6307_v58 = vadd.f32 %v6306_v48, %v6244_v32  ;;  %v6175_v24 = vadd.f32 %v6174_v44, %v13188_v18  ;;  %v6249_v44 = vmul.f32 %v13200_v37, %v13200_v37 }
 0xaa8   :  { %v13290_v26 = vadd.f32 %v15823_v5, %v5636_v11  ;;  %v5638_v20 = vpop.f32.mrb[111].mxu1  ;;  %8086 = vmatmul.mubr.f32.gmra.mrb[216].mxu1 %v9442_v0  ;;  %v6246_v11 = vmul.f32 %v13191_v19, %v13191_v19  ;;  %v9446_v5 = vld [vmem:[#allocation2 + $0x2c1] sm:$0xff] }
 0xaa9   :  { %8088 = vmatprep.mubr.f32.mxu1 %v9443_v45  ;;  %v9447_v20 = vld [vmem:[#allocation2 + $0x2d1] sm:$0xff]  ;;  %v6308_v0 = vadd.f32 %v6307_v58, %v6245_v47  ;;  %v6176_v45 = vadd.f32 %v6175_v24, %v13191_v19  ;;  %v6250_v24 = vmul.f32 %v13203_v46, %v13203_v46 }
 0xaaa   :  { %15824 = vst [vmem:[#allocation39_spill] sm:$0xff] %v13290_v26 }
 0xaab   :  { %v5641_v31 = vpop.f32.mrb[112].mxu1  ;;  %v6309_v29 = vadd.f32 %v6308_v0, %v6246_v11  ;;  %v15829_v11 = vld [vmem:[#allocation68_spill] sm:$0xff] }
 0xaac   :  { %v13299_v62 = vadd.f32 %v15825_v61, %v5641_v31  ;;  %v5643_v13 = vpop.f32.mrb[113].mxu1  ;;  %8089 = vmatmul.mubr.f32.gmra.mrb[218].mxu1 %v9444_v17  ;;  %v6177_v31 = vadd.f32 %v6176_v45, %v13194_v60  ;;  %v9449_v17 = vld [vmem:[#allocation2 + $0x2e9] sm:$0xff] }
 0xaad   :  { %8091 = vmatprep.mubr.f32.mxu1 %v9445_v35  ;;  %v9448_v13 = vld [vmem:[#allocation2 + $0x2d9] sm:$0xff]  ;;  %v6310_v35 = vadd.f32 %v6309_v29, %v6247_v7  ;;  %v6251_v7 = vmul.f32 %v13206_v1, %v13206_v1 }
 0xaae   :  { %v6178_v48 = vadd.f32 %v6177_v31, %v13197_v53 }
 0xaaf   :  { %v5646_v34 = vpop.f32.mrb[114].mxu1 }
 0xab0   :  { %v13308_v57 = vadd.f32 %v15826_v12, %v5646_v34  ;;  %v5648_v23 = vpop.f32.mrb[115].mxu1  ;;  %8092 = vmatmul.mubr.f32.gmra.mrb[220].mxu1 %v9446_v5  ;;  %v6311_v34 = vadd.f32 %v6310_v35, %v6248_v15  ;;  %v6179_v58 = vadd.f32 %v6178_v48, %v13200_v37  ;;  %v9450_v5 = vld [vmem:[#allocation2 + $0x2f1] sm:$0xff]  ;;  %v6252_v15 = vmul.f32 %v13209_v54, %v13209_v54  ;;  %v9453_v35 = vld [vmem:[#allocation2 + $0x319] sm:$0xff] }
 0xab1   :  { %8094 = vmatprep.mubr.f32.mxu1 %v9447_v20  ;;  %v9451_v20 = vld [vmem:[#allocation2 + $0x301] sm:$0xff] }
 0xab2   :  { %15827 = vst [vmem:[#allocation38_spill] sm:$0xff] %v13308_v57  ;;  %v6312_v0 = vadd.f32 %v6311_v34, %v6249_v44  ;;  %v6180_v45 = vadd.f32 %v6179_v58, %v13203_v46 }
 0xab3   :  { %v5651_v2 = vpop.f32.mrb[116].mxu1 }
 0xab4   :  { %v13317_v32 = vadd.f32 %v15828_v16, %v5651_v2  ;;  %v5653_v61 = vpop.f32.mrb[117].mxu1  ;;  %8095 = vmatmul.mubr.f32.gmra.mrb[222].mxu1 %v9448_v13  ;;  %v6313_v29 = vadd.f32 %v6312_v0, %v6250_v24  ;;  %v6181_v31 = vadd.f32 %v6180_v45, %v13206_v1  ;;  %v15831_v16 = vld [vmem:[#allocation71_spill] sm:$0xff]  ;;  %v9454_v0 = vld [vmem:[#allocation2 + $0x321] sm:$0xff] }
 0xab5   :  { %8097 = vmatprep.mubr.f32.mxu1 %v9449_v17  ;;  %v9452_v17 = vld [vmem:[#allocation2 + $0x309] sm:$0xff]  ;;  %v9455_v45 = vld [vmem:[#allocation2 + $0x331] sm:$0xff] }
 0xab6   :  { %v6314_v48 = vadd.f32 %v6313_v29, %v6251_v7  ;;  %v6182_v44 = vadd.f32 %v6181_v31, %v13209_v54  ;;  %v6255_v29 = vmul.f32 %v13218_v52, %v13218_v52 }
 0xab7   :  { %v5656_v47 = vpop.f32.mrb[118].mxu1 }
 0xab8   :  { %v13326_v12 = vadd.f32 %v15829_v11, %v5656_v47  ;;  %v5658_v23 = vpop.f32.mrb[119].mxu1  ;;  %8098 = vmatmul.mubr.f32.gmra.mrb[224].mxu1 %v9450_v5  ;;  %v6253_v47 = vmul.f32 %v13212_v28, %v13212_v28  ;;  %v6315_v58 = vadd.f32 %v6314_v48, %v6252_v15  ;;  %v6183_v24 = vadd.f32 %v6182_v44, %v13212_v28  ;;  %v9456_v44 = vld [vmem:[#allocation2 + $0x339] sm:$0xff] }
 0xab9   :  { %8100 = vmatprep.mubr.f32.mxu1 %v9451_v20  ;;  %v6254_v11 = vmul.f32 %v13215_v55, %v13215_v55  ;;  %v15832_v23 = vld [vmem:[#allocation70_spill] sm:$0xff] }
 0xaba   :  { %15830 = vst [vmem:[#allocation37_spill] sm:$0xff] %v13326_v12  ;;  %v6316_v7 = vadd.f32 %v6315_v58, %v6253_v47  ;;  %v6257_v58 = vmul.f32 %v13224_v40, %v13224_v40 }
 0xabb   :  { %v5661_v2 = vpop.f32.mrb[120].mxu1 }
 0xabc   :  { %v13335_v61 = vadd.f32 %v15831_v16, %v5661_v2  ;;  %v5663_v13 = vpop.f32.mrb[121].mxu1  ;;  %8101 = vmatmul.mubr.f32.gmra.mrb[226].mxu1 %v9452_v17  ;;  %v6184_v2 = vadd.f32 %v6183_v24, %v13215_v55  ;;  %v6317_v15 = vadd.f32 %v6316_v7, %v6254_v11  ;;  %v15834_v17 = vld [vmem:[#allocation73_spill] sm:$0xff] }
 0xabd   :  { %8103 = vmatprep.mubr.f32.mxu1 %v9453_v35  ;;  %v6256_v13 = vmul.f32 %v13221_v8, %v13221_v8 }
 0xabe   :  { %v6185_v16 = vadd.f32 %v6184_v2, %v13218_v52 }
 0xabf   :  { %v5666_v34 = vpop.f32.mrb[122].mxu1 }
 0xac0   :  { %v13344_v5 = vadd.f32 %v15832_v23, %v5666_v34  ;;  %v5668_v20 = vpop.f32.mrb[123].mxu1  ;;  %8104 = vmatmul.mubr.f32.gmra.mrb[228].mxu1 %v9454_v0  ;;  %v6318_v34 = vadd.f32 %v6317_v15, %v6255_v29  ;;  %v6186_v47 = vadd.f32 %v6185_v16, %v13221_v8  ;;  %v15835_v0 = vld [vmem:[#allocation72_spill] sm:$0xff]  ;;  %v6259_v29 = vmul.f32 %v13230_v9, %v13230_v9 }
 0xac1   :  { %8106 = vmatprep.mubr.f32.mxu1 %v9455_v45  ;;  %v6258_v20 = vmul.f32 %v13227_v22, %v13227_v22 }
 0xac2   :  { %15833 = vst [vmem:[#allocation28_spill] sm:$0xff] %v13344_v5  ;;  %v6319_v23 = vadd.f32 %v6318_v34, %v6256_v13  ;;  %v6187_v11 = vadd.f32 %v6186_v47, %v13224_v40  ;;  %v6260_v13 = vmul.f32 %v13233_v41, %v13233_v41 }
 0xac3   :  { %v5671_v31 = vpop.f32.mrb[124].mxu1 }
 0xac4   :  { %v13353_v35 = vadd.f32 %v15834_v17, %v5671_v31  ;;  %v5673_v48 = vpop.f32.mrb[125].mxu1  ;;  %8107 = vmatmul.mubr.f32.gmra.mrb[230].mxu1 %v9456_v44  ;;  %v6320_v2 = vadd.f32 %v6319_v23, %v6257_v58  ;;  %v6188_v31 = vadd.f32 %v6187_v11, %v13227_v22  ;;  %v6261_v58 = vmul.f32 %v13236_v3, %v13236_v3 }
 0xac5   :  { %v15837_v48 = vld [vmem:[#allocation75_spill] sm:$0xff] }
 0xac6   :  { %v6321_v16 = vadd.f32 %v6320_v2, %v6258_v20  ;;  %v6189_v17 = vadd.f32 %v6188_v31, %v13230_v9  ;;  %v6262_v20 = vmul.f32 %v13239_v30, %v13239_v30 }
 0xac7   :  { %v5676_v24 = vpop.f32.mrb[126].mxu1 }
 0xac8   :  { %v13362_v45 = vadd.f32 %v15835_v0, %v5676_v24  ;;  %v5678_v7 = vpop.f32.mrb[127].mxu1  ;;  %v6322_v47 = vadd.f32 %v6321_v16, %v6259_v29  ;;  %v6190_v24 = vadd.f32 %v6189_v17, %v13233_v41  ;;  %v6263_v29 = vmul.f32 %v13242_v14, %v13242_v14 }
 0xac9   :  { %v15838_v7 = vld [vmem:[#allocation74_spill] sm:$0xff] }
 0xaca   :  { %15836 = vst [vmem:[#allocation42_spill] sm:$0xff] %v13362_v45  ;;  %v6323_v11 = vadd.f32 %v6322_v47, %v6260_v13  ;;  %v6191_v0 = vadd.f32 %v6190_v24, %v13236_v3  ;;  %v6264_v13 = vmul.f32 %v13245_v27, %v13245_v27  ;;  %v15840_v47 = vld [vmem:[#allocation77_spill] sm:$0xff] }
 0xacb   :  { %v5681_v15 = vpop.f32.mrb[128].mxu1 }
 0xacc   :  { %v13371_v44 = vadd.f32 %v15837_v48, %v5681_v15  ;;  %v5683_v34 = vpop.f32.mrb[129].mxu1  ;;  %v6324_v15 = vadd.f32 %v6323_v11, %v6261_v58  ;;  %v6192_v48 = vadd.f32 %v6191_v0, %v13239_v30  ;;  %v6265_v58 = vmul.f32 %v13248_v63, %v13248_v63 }
 0xace   :  { %v6325_v17 = vadd.f32 %v6324_v15, %v6262_v20  ;;  %v6193_v34 = vadd.f32 %v6192_v48, %v13242_v14  ;;  %v6266_v20 = vmul.f32 %v13263_v51, %v13263_v51  ;;  %v15841_v15 = vld [vmem:[#allocation76_spill] sm:$0xff] }
 0xacf   :  { %v5686_v23 = vpop.f32.mrb[130].mxu1 }
 0xad0   :  { %v13380_v2 = vadd.f32 %v15838_v7, %v5686_v23  ;;  %v5688_v31 = vpop.f32.mrb[131].mxu1  ;;  %v6326_v23 = vadd.f32 %v6325_v17, %v6263_v29  ;;  %v6194_v7 = vadd.f32 %v6193_v34, %v13245_v27  ;;  %v6267_v29 = vmul.f32 %v13272_v39, %v13272_v39 }
 0xad2   :  { %15839 = vst [vmem:[#allocation24_spill] sm:$0xff] %v13380_v2  ;;  %v6327_v0 = vadd.f32 %v6326_v23, %v6264_v13  ;;  %v6195_v31 = vadd.f32 %v6194_v7, %v13248_v63  ;;  %v6268_v13 = vmul.f32 %v13281_v43, %v13281_v43  ;;  %v15843_v23 = vld [vmem:[#allocation79_spill] sm:$0xff] }
 0xad3   :  { %v5691_v16 = vpop.f32.mrb[132].mxu1 }
 0xad4   :  { %v13389_v24 = vadd.f32 %v15840_v47, %v5691_v16  ;;  %v5693_v3 = vpop.f32.mrb[133].mxu1  ;;  %v6328_v16 = vadd.f32 %v6327_v0, %v6265_v58  ;;  %v6269_v58 = vmul.f32 %v13290_v26, %v13290_v26 }
 0xad5   :  { %v6196_v3 = vadd.f32 %v6195_v31, %v13263_v51 }
 0xad6   :  { %v6329_v34 = vadd.f32 %v6328_v16, %v6266_v20  ;;  %v6270_v20 = vmul.f32 %v13299_v62, %v13299_v62  ;;  %v15844_v16 = vld [vmem:[#allocation78_spill] sm:$0xff] }
 0xad7   :  { %v5696_v11 = vpop.f32.mrb[134].mxu1  ;;  %v6197_v47 = vadd.f32 %v6196_v3, %v13272_v39 }
 0xad8   :  { %v13398_v48 = vadd.f32 %v15841_v15, %v5696_v11  ;;  %v5698_v14 = vpop.f32.mrb[135].mxu1  ;;  %v6330_v11 = vadd.f32 %v6329_v34, %v6267_v29  ;;  %v6271_v29 = vmul.f32 %v13308_v57, %v13308_v57 }
 0xad9   :  { %v6198_v14 = vadd.f32 %v6197_v47, %v13281_v43 }
 0xada   :  { %15842 = vst [vmem:[#allocation40_spill] sm:$0xff] %v13398_v48  ;;  %v6331_v31 = vadd.f32 %v6330_v11, %v6268_v13  ;;  %v6272_v13 = vmul.f32 %v13317_v32, %v13317_v32  ;;  %v15846_v11 = vld [vmem:[#allocation81_spill] sm:$0xff] }
 0xadb   :  { %v5701_v17 = vpop.f32.mrb[136].mxu1  ;;  %v6199_v15 = vadd.f32 %v6198_v14, %v13290_v26 }
 0xadc   :  { %v13407_v7 = vadd.f32 %v15843_v23, %v5701_v17  ;;  %v5703_v63 = vpop.f32.mrb[137].mxu1  ;;  %v6332_v17 = vadd.f32 %v6331_v31, %v6269_v58  ;;  %v6273_v58 = vmul.f32 %v13326_v12, %v13326_v12 }
 0xadd   :  { %v6200_v63 = vadd.f32 %v6199_v15, %v13299_v62 }
 0xade   :  { %v6333_v47 = vadd.f32 %v6332_v17, %v6270_v20  ;;  %v6274_v20 = vmul.f32 %v13335_v61, %v13335_v61  ;;  %v15847_v17 = vld [vmem:[#allocation80_spill] sm:$0xff] }
 0xadf   :  { %v5706_v0 = vpop.f32.mrb[138].mxu1  ;;  %v6201_v23 = vadd.f32 %v6200_v63, %v13308_v57 }
 0xae0   :  { %v13416_v3 = vadd.f32 %v15844_v16, %v5706_v0  ;;  %v5708_v39 = vpop.f32.mrb[139].mxu1  ;;  %v6334_v0 = vadd.f32 %v6333_v47, %v6271_v29  ;;  %v6275_v29 = vmul.f32 %v13344_v5, %v13344_v5 }
 0xae1   :  { %v6202_v39 = vadd.f32 %v6201_v23, %v13317_v32 }
 0xae2   :  { %15845 = vst [vmem:[#allocation19_spill] sm:$0xff] %v13416_v3  ;;  %v6335_v15 = vadd.f32 %v6334_v0, %v6272_v13  ;;  %v6276_v13 = vmul.f32 %v13353_v35, %v13353_v35  ;;  %v15849_v0 = vld [vmem:[#allocation83_spill] sm:$0xff] }
 0xae3   :  { %v5711_v34 = vpop.f32.mrb[140].mxu1  ;;  %v6203_v16 = vadd.f32 %v6202_v39, %v13326_v12 }
 0xae4   :  { %v13425_v14 = vadd.f32 %v15846_v11, %v5711_v34  ;;  %v5713_v26 = vpop.f32.mrb[141].mxu1  ;;  %v6336_v34 = vadd.f32 %v6335_v15, %v6273_v58  ;;  %v6277_v58 = vmul.f32 %v13362_v45, %v13362_v45 }
 0xae5   :  { %v6204_v26 = vadd.f32 %v6203_v16, %v13335_v61 }
 0xae6   :  { %v6337_v23 = vadd.f32 %v6336_v34, %v6274_v20  ;;  %v6278_v20 = vmul.f32 %v13371_v44, %v13371_v44  ;;  %v15850_v34 = vld [vmem:[#allocation82_spill] sm:$0xff] }
 0xae7   :  { %v5716_v31 = vpop.f32.mrb[142].mxu1  ;;  %v6205_v11 = vadd.f32 %v6204_v26, %v13344_v5 }
 0xae8   :  { %v13434_v63 = vadd.f32 %v15847_v17, %v5716_v31  ;;  %v5718_v57 = vpop.f32.mrb[143].mxu1  ;;  %v6338_v31 = vadd.f32 %v6337_v23, %v6275_v29  ;;  %v6279_v29 = vmul.f32 %v13380_v2, %v13380_v2 }
 0xae9   :  { %v6206_v57 = vadd.f32 %v6205_v11, %v13353_v35 }
 0xaea   :  { %15848 = vst [vmem:[#allocation18_spill] sm:$0xff] %v13434_v63  ;;  %v6339_v16 = vadd.f32 %v6338_v31, %v6276_v13  ;;  %v6280_v13 = vmul.f32 %v13389_v24, %v13389_v24  ;;  %v15852_v31 = vld [vmem:[#allocation85_spill] sm:$0xff] }
 0xaeb   :  { %v5721_v47 = vpop.f32.mrb[144].mxu1  ;;  %v6207_v17 = vadd.f32 %v6206_v57, %v13362_v45 }
 0xaec   :  { %v13443_v39 = vadd.f32 %v15849_v0, %v5721_v47  ;;  %v5723_v12 = vpop.f32.mrb[145].mxu1  ;;  %v6340_v47 = vadd.f32 %v6339_v16, %v6277_v58  ;;  %v6281_v58 = vmul.f32 %v13398_v48, %v13398_v48 }
 0xaed   :  { %v6208_v12 = vadd.f32 %v6207_v17, %v13371_v44 }
 0xaee   :  { %v6341_v11 = vadd.f32 %v6340_v47, %v6278_v20  ;;  %v6282_v20 = vmul.f32 %v13407_v7, %v13407_v7  ;;  %v15853_v47 = vld [vmem:[#allocation84_spill] sm:$0xff] }
 0xaef   :  { %v5726_v15 = vpop.f32.mrb[146].mxu1  ;;  %v6209_v0 = vadd.f32 %v6208_v12, %v13380_v2 }
 0xaf0   :  { %v13452_v26 = vadd.f32 %v15850_v34, %v5726_v15  ;;  %v5728_v5 = vpop.f32.mrb[147].mxu1  ;;  %v6342_v15 = vadd.f32 %v6341_v11, %v6279_v29  ;;  %v6283_v29 = vmul.f32 %v13416_v3, %v13416_v3 }
 0xaf1   :  { %v6210_v5 = vadd.f32 %v6209_v0, %v13389_v24 }
 0xaf2   :  { %15851 = vst [vmem:[#allocation26_spill] sm:$0xff] %v13452_v26  ;;  %v6343_v17 = vadd.f32 %v6342_v15, %v6280_v13  ;;  %v6284_v13 = vmul.f32 %v13425_v14, %v13425_v14  ;;  %v15855_v15 = vld [vmem:[#allocation87_spill] sm:$0xff] }
 0xaf3   :  { %v5731_v23 = vpop.f32.mrb[148].mxu1  ;;  %v6211_v34 = vadd.f32 %v6210_v5, %v13398_v48 }
 0xaf4   :  { %v13461_v57 = vadd.f32 %v15852_v31, %v5731_v23  ;;  %v5733_v45 = vpop.f32.mrb[149].mxu1  ;;  %v6344_v23 = vadd.f32 %v6343_v17, %v6281_v58  ;;  %v6285_v58 = vmul.f32 %v13434_v63, %v13434_v63 }
 0xaf5   :  { %v6212_v45 = vadd.f32 %v6211_v34, %v13407_v7 }
 0xaf6   :  { %v6345_v0 = vadd.f32 %v6344_v23, %v6282_v20  ;;  %v6286_v20 = vmul.f32 %v13443_v39, %v13443_v39  ;;  %v15856_v23 = vld [vmem:[#allocation86_spill] sm:$0xff] }
 0xaf7   :  { %v5736_v16 = vpop.f32.mrb[150].mxu1  ;;  %v6213_v31 = vadd.f32 %v6212_v45, %v13416_v3 }
 0xaf8   :  { %v13470_v12 = vadd.f32 %v15853_v47, %v5736_v16  ;;  %v5738_v2 = vpop.f32.mrb[151].mxu1  ;;  %v6346_v16 = vadd.f32 %v6345_v0, %v6283_v29  ;;  %v6287_v29 = vmul.f32 %v13452_v26, %v13452_v26 }
 0xaf9   :  { %v6214_v2 = vadd.f32 %v6213_v31, %v13425_v14 }
 0xafa   :  { %15854 = vst [vmem:[#allocation17_spill] sm:$0xff] %v13470_v12  ;;  %v6347_v34 = vadd.f32 %v6346_v16, %v6284_v13  ;;  %v6288_v13 = vmul.f32 %v13461_v57, %v13461_v57  ;;  %v15858_v16 = vld [vmem:[#allocation89_spill] sm:$0xff] }
 0xafb   :  { %v5741_v11 = vpop.f32.mrb[152].mxu1  ;;  %v6215_v47 = vadd.f32 %v6214_v2, %v13434_v63 }
 0xafc   :  { %v13479_v5 = vadd.f32 %v15855_v15, %v5741_v11  ;;  %v5743_v48 = vpop.f32.mrb[153].mxu1  ;;  %v6348_v11 = vadd.f32 %v6347_v34, %v6285_v58  ;;  %v6289_v58 = vmul.f32 %v13470_v12, %v13470_v12 }
 0xafd   :  { %v6216_v48 = vadd.f32 %v6215_v47, %v13443_v39 }
 0xafe   :  { %v6349_v31 = vadd.f32 %v6348_v11, %v6286_v20  ;;  %v6290_v20 = vmul.f32 %v13479_v5, %v13479_v5  ;;  %v15860_v11 = vld [vmem:[#allocation88_spill] sm:$0xff] }
 0xaff   :  { %v5746_v17 = vpop.f32.mrb[154].mxu1  ;;  %v6217_v15 = vadd.f32 %v6216_v48, %v13452_v26 }
 0xb00   :  { %v13488_v45 = vadd.f32 %v15856_v23, %v5746_v17  ;;  %v5748_v3 = vpop.f32.mrb[155].mxu1  ;;  %v6350_v17 = vadd.f32 %v6349_v31, %v6287_v29 }
 0xb01   :  { %v6218_v3 = vadd.f32 %v6217_v15, %v13461_v57 }
 0xb02   :  { %15857 = vst [vmem:[#allocation44_spill] sm:$0xff] %v13488_v45  ;;  %v6351_v47 = vadd.f32 %v6350_v17, %v6288_v13  ;;  %v6291_v29 = vmul.f32 %v13488_v45, %v13488_v45  ;;  %v15862_v17 = vld [vmem:[#allocation91_spill] sm:$0xff] }
 0xb03   :  { %v5751_v0 = vpop.f32.mrb[156].mxu1  ;;  %v6219_v23 = vadd.f32 %v6218_v3, %v13470_v12 }
 0xb04   :  { %v13497_v2 = vadd.f32 %v15858_v16, %v5751_v0  ;;  %v5753_v63 = vpop.f32.mrb[157].mxu1  ;;  %v6352_v0 = vadd.f32 %v6351_v47, %v6289_v58 }
 0xb05   :  { %v6220_v63 = vadd.f32 %v6219_v23, %v13479_v5 }
 0xb06   :  { %15859 = vst [vmem:[#allocation30_spill] sm:$0xff] %v13497_v2  ;;  %v6353_v15 = vadd.f32 %v6352_v0, %v6290_v20  ;;  %v6292_v13 = vmul.f32 %v13497_v2, %v13497_v2  ;;  %v15864_v0 = vld [vmem:[#allocation90_spill] sm:$0xff] }
 0xb07   :  { %v5756_v34 = vpop.f32.mrb[158].mxu1  ;;  %v6221_v16 = vadd.f32 %v6220_v63, %v13488_v45 }
 0xb08   :  { %v13506_v48 = vadd.f32 %v15860_v11, %v5756_v34  ;;  %v5758_v26 = vpop.f32.mrb[159].mxu1  ;;  %v6354_v34 = vadd.f32 %v6353_v15, %v6291_v29 }
 0xb09   :  { %v6222_v26 = vadd.f32 %v6221_v16, %v13497_v2 }
 0xb0a   :  { %15861 = vst [vmem:[#allocation47_spill] sm:$0xff] %v13506_v48  ;;  %v6293_v58 = vmul.f32 %v13506_v48, %v13506_v48  ;;  %v6355_v23 = vadd.f32 %v6354_v34, %v6292_v13 }
 0xb0b   :  { %v5761_v31 = vpop.f32.mrb[160].mxu1  ;;  %v6223_v11 = vadd.f32 %v6222_v26, %v13506_v48 }
 0xb0c   :  { %v13515_v3 = vadd.f32 %v15862_v17, %v5761_v31  ;;  %v5763_v12 = vpop.f32.mrb[161].mxu1  ;;  %v6356_v31 = vadd.f32 %v6355_v23, %v6293_v58 }
 0xb0e   :  { %15863 = vst [vmem:[#allocation29_spill] sm:$0xff] %v13515_v3  ;;  %v6294_v20 = vmul.f32 %v13515_v3, %v13515_v3  ;;  %v6224_v12 = vadd.f32 %v6223_v11, %v13515_v3 }
 0xb0f   :  { %v5766_v47 = vpop.f32.mrb[162].mxu1 }
 0xb10   :  { %v13524_v63 = vadd.f32 %v15864_v0, %v5766_v47  ;;  %v5768_v45 = vpop.f32.mrb[163].mxu1  ;;  %v6357_v16 = vadd.f32 %v6356_v31, %v6294_v20 }
 0xb12   :  { %15865 = vst [vmem:[#allocation34_spill] sm:$0xff] %v13524_v63  ;;  %v6295_v29 = vmul.f32 %v13524_v63, %v13524_v63  ;;  %v6225_v17 = vadd.f32 %v6224_v12, %v13524_v63 }
 0xb13   :  { %v5771_v15 = vpop.f32.mrb[164].mxu1 }
 0xb14   :  { %v13531_v13 = vadd.f32 %v13252_v59, %v5771_v15  ;;  %v5773_v34 = vpop.f32.mrb[165].mxu1  ;;  %v6358_v26 = vadd.f32 %v6357_v16, %v6295_v29 }
 0xb16   :  { %15866 = vst [vmem:[#allocation41_spill] sm:$0xff] %v13531_v13  ;;  %v6226_v48 = vadd.f32 %v6225_v17, %v13531_v13  ;;  %v6296_v45 = vmul.f32 %v13531_v13, %v13531_v13 }
 0xb17   :  { %v5776_v58 = vpop.f32.mrb[166].mxu1 }
 0xb18   :  { %v6359_v47 = vadd.f32 %v6358_v26, %v6296_v45  ;;  %v13537_v23 = vadd.f32 %v13250_v21, %v5776_v58  ;;  %v5778_v11 = vpop.f32.mrb[167].mxu1 }
 0xb1a   :  { %v6227_v20 = vadd.f32 %v6226_v48, %v13537_v23  ;;  %v6297_v0 = vmul.f32 %v13537_v23, %v13537_v23 }
 0xb1b   :  { %v13542_v59 = vpop.f32.mrb[168].mxu1 }
 0xb1c   :  { %15867 = vst [vmem:[#allocation23_spill] sm:$0xff] %v13542_v59  ;;  %v6228_v31 = vrot.slane %v6227_v20, 4  ;;  %v6360_v12 = vadd.f32 %v6359_v47, %v6297_v0  ;;  %v6990_v29 = vmul.f32 %v13542_v59, %v13542_v59  ;;  %v13546_v15 = vpop.f32.mrb[169].mxu1 }
 0xb1d   :  { %15868 = vst [vmem:[#allocation27_spill] sm:$0xff] %v13546_v15  ;;  %v6920_v16 = vadd.f32 %v13542_v59, %v13546_v15  ;;  %v6989_v21 = vmul.f32 %v13546_v15, %v13546_v15 }
 0xb1e   :  { %v6229_v17 = vadd.f32 %v6228_v31, %v6227_v20  ;;  %v6361_v48 = vrot.slane %v6360_v12, 4 }
 0xb1f   :  { %v7053_v34 = vadd.f32 %v6990_v29, %v6989_v21  ;;  %v13552_v26 = vpop.f32.mrb[170].mxu1 }
 0xb20   :  { %15869 = vst [vmem:[#allocation43_spill] sm:$0xff] %v13552_v26  ;;  %v6230_v45 = vrot.slane %v6229_v17, 2  ;;  %v6362_v58 = vadd.f32 %v6361_v48, %v6360_v12  ;;  %v13554_v11 = vpop.f32.mrb[171].mxu1  ;;  %v6992_v59 = vmul.f32 %v13552_v26, %v13552_v26 }
 0xb21   :  { %15870 = vst [vmem:[#allocation46_spill] sm:$0xff] %v13554_v11  ;;  %v6921_v47 = vadd.f32 %v6920_v16, %v13554_v11  ;;  %v6991_v0 = vmul.f32 %v13554_v11, %v13554_v11 }
 0xb22   :  { %v6231_v13 = vadd.f32 %v6230_v45, %v6229_v17  ;;  %v6363_v63 = vrot.slane %v6362_v58, 2 }
 0xb23   :  { %v6922_v20 = vadd.f32 %v13552_v26, %v6921_v47  ;;  %v7054_v31 = vadd.f32 %v7053_v34, %v6991_v0  ;;  %v13562_v29 = vpop.f32.mrb[172].mxu1  ;;  %v15900_v26 = vld [vmem:[#allocation39_spill] sm:$0xff] }
 0xb24   :  { %15871 = vst [vmem:[#allocation45_spill] sm:$0xff] %v13562_v29  ;;  %v6232_v21 = vrot.slane %v6231_v13, 1  ;;  %v6364_v15 = vadd.f32 %v6363_v63, %v6362_v58  ;;  %v13564_v12 = vpop.f32.mrb[173].mxu1  ;;  %v6994_v3 = vmul.f32 %v13562_v29, %v13562_v29 }
 0xb25   :  { %15872 = vst [vmem:[#allocation49_spill] sm:$0xff] %v13564_v12  ;;  %v7055_v48 = vadd.f32 %v7054_v31, %v6992_v59  ;;  %v6923_v16 = vadd.f32 %v6922_v20, %v13564_v12  ;;  %v6993_v11 = vmul.f32 %v13564_v12, %v13564_v12 }
 0xb26   :  { %v6233_v17 = vadd.f32 %v6232_v21, %v6231_v13  ;;  %v6365_v45 = vrot.slane %v6364_v15, 1 }
 0xb27   :  { %v7056_v2 = vadd.f32 %v7055_v48, %v6993_v11  ;;  %v13571_v47 = vpop.f32.mrb[174].mxu1  ;;  %v6924_v34 = vadd.f32 %v13562_v29, %v6923_v16 }
 0xb28   :  { %15873 = vst [vmem:[#allocation48_spill] sm:$0xff] %v13571_v47  ;;  %v6366_v0 = vadd.f32 %v6365_v45, %v6364_v15  ;;  %v6367_v63 = vmul.f32 0.001953125, %v6233_v17  ;;  %v13574_v58 = vpop.f32.mrb[175].mxu1  ;;  %v6996_v12 = vmul.f32 %v13571_v47, %v13571_v47 }
 0xb29   :  { %15874 = vst [vmem:[#allocation25_spill] sm:$0xff] %v13574_v58  ;;  %v6925_v59 = vadd.f32 %v6924_v34, %v13574_v58  ;;  %v6995_v20 = vmul.f32 %v13574_v58, %v13574_v58  ;;  %v7057_v31 = vadd.f32 %v7056_v2, %v6994_v3 }
 0xb2a   :  { %v6368_v13 = vmul.f32 0.001953125, %v6366_v0  ;;  %v6369_v21 = vmul.f32 %v6367_v63, %v6367_v63 }
 0xb2b   :  { %v7058_v11 = vadd.f32 %v7057_v31, %v6995_v20  ;;  %v13581_v48 = vpop.f32.mrb[176].mxu1  ;;  %v6926_v16 = vadd.f32 %v13571_v47, %v6925_v59  ;;  %v15899_v47 = vld [vmem:[#allocation36_spill] sm:$0xff] }
 0xb2c   :  { %15875 = vst [vmem:[#allocation50_spill] sm:$0xff] %v13581_v48  ;;  %v6370_v15 = vsub.f32 %v6368_v13, %v6369_v21  ;;  %v13584_v17 = vpop.f32.mrb[177].mxu1  ;;  %v6998_v3 = vmul.f32 %v13581_v48, %v13581_v48 }
 0xb2d   :  { %15876 = vst [vmem:[#allocation52_spill] sm:$0xff] %v13584_v17  ;;  %v6927_v45 = vadd.f32 %v6926_v16, %v13584_v17  ;;  %v6997_v34 = vmul.f32 %v13584_v17, %v13584_v17  ;;  %v7059_v58 = vadd.f32 %v7058_v11, %v6996_v12 }
 0xb2e   :  { %v6371_v2 = vmax.f32 %v6370_v15, 0.0 }
 0xb2f   :  { %v7060_v0 = vadd.f32 %v7059_v58, %v6997_v34  ;;  %v13591_v29 = vpop.f32.mrb[178].mxu1  ;;  %v6928_v20 = vadd.f32 %v13581_v48, %v6927_v45 }
 0xb30   :  { %15877 = vst [vmem:[#allocation51_spill] sm:$0xff] %v13591_v29  ;;  %v6373_v31 = vadd.f32 1e-05, %v6371_v2  ;;  %v13594_v59 = vpop.f32.mrb[179].mxu1  ;;  %v7000_v12 = vmul.f32 %v13591_v29, %v13591_v29 }
 0xb31   :  { %15878 = vst [vmem:[#allocation54_spill] sm:$0xff] %v13594_v59  ;;  %v6929_v13 = vadd.f32 %v6928_v20, %v13594_v59  ;;  %v6999_v21 = vmul.f32 %v13594_v59, %v13594_v59  ;;  %v7061_v16 = vadd.f32 %v7060_v0, %v6998_v3 }
 0xb32   :  { %9384 = vrsqrt.f32 %v6373_v31 }
 0xb33   :  { %v7062_v11 = vadd.f32 %v7061_v16, %v6999_v21  ;;  %v13601_v15 = vpop.f32.mrb[180].mxu1  ;;  %v6930_v58 = vadd.f32 %v13591_v29, %v6929_v13 }
 0xb34   :  { %15879 = vst [vmem:[#allocation53_spill] sm:$0xff] %v13601_v15  ;;  %v13604_v34 = vpop.f32.mrb[181].mxu1  ;;  %v7002_v3 = vmul.f32 %v13601_v15, %v13601_v15 }
 0xb35   :  { %15880 = vst [vmem:[#allocation56_spill] sm:$0xff] %v13604_v34  ;;  %v6931_v45 = vadd.f32 %v6930_v58, %v13604_v34  ;;  %v7001_v2 = vmul.f32 %v13604_v34, %v13604_v34  ;;  %v7063_v20 = vadd.f32 %v7062_v11, %v7000_v12  ;;  %v6372_v12 = vld [vmem:[%s15248_s6] sm:$0x1] }
 0xb37   :  { %v7064_v0 = vadd.f32 %v7063_v20, %v7001_v2  ;;  %v13611_v31 = vpop.f32.mrb[182].mxu1  ;;  %v6932_v21 = vadd.f32 %v13601_v15, %v6931_v45 }
 0xb38   :  { %15881 = vst [vmem:[#allocation55_spill] sm:$0xff] %v13611_v31  ;;  %v13614_v16 = vpop.f32.mrb[183].mxu1  ;;  %v7004_v11 = vmul.f32 %v13611_v31, %v13611_v31 }
 0xb39   :  { %15882 = vst [vmem:[#allocation58_spill] sm:$0xff] %v13614_v16  ;;  %v6933_v13 = vadd.f32 %v6932_v21, %v13614_v16  ;;  %v7003_v29 = vmul.f32 %v13614_v16, %v13614_v16  ;;  %v7065_v58 = vadd.f32 %v7064_v0, %v7002_v3  ;;  %v6376_v16 = vld [vmem:[%s15249_s7] sm:$0x1] }
 0xb3b   :  { %v7066_v2 = vadd.f32 %v7065_v58, %v7003_v29  ;;  %v13624_v20 = vpop.f32.mrb[184].mxu1  ;;  %v6934_v45 = vadd.f32 %v13611_v31, %v6933_v13  ;;  %v15885_v29 = vld [vmem:[#allocation22_spill] sm:$0xff] }
 0xb3c   :  { %15883 = vst [vmem:[#allocation57_spill] sm:$0xff] %v13624_v20  ;;  %v9385_v15 = vpop.eup %9384  ;;  %v13627_v34 = vpop.f32.mrb[185].mxu1 }
 0xb3d   :  { %15884 = vst [vmem:[#allocation59_spill] sm:$0xff] %v13627_v34  ;;  %v6375_v21 = vmul.f32 %v9385_v15, %v6372_v12  ;;  %v6935_v59 = vadd.f32 %v6934_v45, %v13627_v34  ;;  %v7005_v3 = vmul.f32 %v13627_v34, %v13627_v34  ;;  %v7067_v0 = vadd.f32 %v7066_v2, %v7004_v11 }
 0xb3e   :  { %v13647_v12 = vmul.f32 %v13624_v20, %v13624_v20 }
 0xb3f   :  { %v6377_v48 = vmul.f32 %v6375_v21, %v6367_v63  ;;  %v13636_v58 = vrot.slane %v6375_v21, %v15885_v29  ;;  %v13638_v17 = vadd.f32 %v7067_v0, %v7005_v3  ;;  %v13640_v13 = vpop.f32.mrb[186].mxu1  ;;  %v13643_v15 = vadd.f32 %v13624_v20, %v6935_v59 }
 0xb40   :  { %15887 = vst [vmem:[#allocation60_spill] sm:$0xff] %v13640_v13  ;;  %15889 = vst [vmem:[#allocation61_spill] sm:$0xff] %v13647_v12  ;;  %v13649_v11 = vpop.f32.mrb[187].mxu1  ;;  %v15911_v12 = vld [vmem:[#allocation18_spill] sm:$0xff] }
 0xb41   :  { %15886 = vst [vmem:[#allocation31_spill] sm:$0xff] %v13638_v17  ;;  %15888 = vst [vmem:[#allocation32_spill] sm:$0xff] %v13643_v15  ;;  %v6378_v2 = vsub.f32 %v6376_v16, %v6377_v48  ;;  %v6448_v63 = vmul.f32 %v13636_v58, %v13537_v23  ;;  %v13655_v45 = vmul.f32 %v13636_v58, %v13146_v4  ;;  %v15913_v15 = vld [vmem:[#allocation26_spill] sm:$0xff] }
 0xb42   :  { %15890 = vst [vmem:[#allocation33_spill] sm:$0xff] %v13649_v11  ;;  %v13659_v21 = vmul.f32 %v13636_v58, %v13150_v50  ;;  %v13663_v59 = vmul.f32 %v13636_v58, %v13154_v25  ;;  %v13667_v3 = vmul.f32 %v13636_v58, %v13158_v10  ;;  %v13671_v48 = vmul.f32 %v13636_v58, %v13162_v6  ;;  %v15916_v11 = vld [vmem:[#allocation17_spill] sm:$0xff] }
 0xb43   :  { %v13675_v4 = vmul.f32 %v13636_v58, %v13166_v38  ;;  %v13678_v23 = vrot.slane %v6378_v2, %v15885_v29  ;;  %v13682_v50 = vmul.f32 %v13636_v58, %v13170_v49  ;;  %v13686_v25 = vmul.f32 %v13636_v58, %v13174_v36  ;;  %v13692_v6 = vpop.f32.mrb[188].mxu1  ;;  %v15901_v29 = vld [vmem:[#allocation38_spill] sm:$0xff] }
 0xb44   :  { %v13690_v10 = vmul.f32 %v13636_v58, %v13178_v56  ;;  %15891 = vst [vmem:[#allocation63_spill] sm:$0xff] %v13692_v6  ;;  %v13696_v38 = vmul.f32 %v13636_v58, %v13181_v33  ;;  %v13700_v16 = vmul.f32 %v13636_v58, %v13184_v42  ;;  %v13704_v49 = vmul.f32 %v13636_v58, %v13188_v18  ;;  %v13710_v56 = vpop.f32.mrb[189].mxu1 }
 0xb45   :  { %v13708_v36 = vmul.f32 %v13636_v58, %v13191_v19  ;;  %15892 = vst [vmem:[#allocation62_spill] sm:$0xff] %v13710_v56  ;;  %v13713_v0 = vadd.f32 %v13678_v23, %v6448_v63  ;;  %v13717_v33 = vmul.f32 %v13636_v58, %v13194_v60  ;;  %v13721_v42 = vmul.f32 %v13636_v58, %v13197_v53 }
 0xb46   :  { %v13725_v18 = vmul.f32 %v13636_v58, %v13200_v37  ;;  %v13729_v19 = vmul.f32 %v13636_v58, %v13203_v46  ;;  %v13733_v2 = vmul.f32 %v13636_v58, %v13206_v1  ;;  %v13737_v60 = vmul.f32 %v13636_v58, %v13209_v54 }
 0xb47   :  { %15893 = vst [vmem:[#allocation65_spill] sm:$0xff] %v13713_v0  ;;  %v13741_v53 = vmul.f32 %v13636_v58, %v13212_v28  ;;  %v13745_v37 = vmul.f32 %v13636_v58, %v13215_v55  ;;  %v13749_v46 = vmul.f32 %v13636_v58, %v13218_v52  ;;  %v13753_v1 = vmul.f32 %v13636_v58, %v13221_v8  ;;  %v13759_v63 = vpop.f32.mrb[190].mxu1  ;;  %v15895_v8 = vld [vmem:[#allocation35_spill] sm:$0xff] }
 0xb48   :  { %v13757_v54 = vmul.f32 %v13636_v58, %v13224_v40  ;;  %15894 = vst [vmem:[#allocation64_spill] sm:$0xff] %v13759_v63  ;;  %v13763_v28 = vmul.f32 %v13636_v58, %v13227_v22  ;;  %v13767_v55 = vmul.f32 %v13636_v58, %v13230_v9  ;;  %v13771_v52 = vmul.f32 %v13636_v58, %v13233_v41  ;;  %v13777_v40 = vpop.f32.mrb[191].mxu1  ;;  %v15897_v22 = vld [vmem:[#allocation20_spill] sm:$0xff]  ;;  %v15898_v41 = vld [vmem:[#allocation21_spill] sm:$0xff] }
 0xb49   :  { %v13775_v0 = vmul.f32 %v13636_v58, %v15895_v8  ;;  %15896 = vst [vmem:[#allocation67_spill] sm:$0xff] %v13777_v40  ;;  %v13781_v20 = vmul.f32 %v13636_v58, %v13239_v30  ;;  %v13785_v34 = vmul.f32 %v13636_v58, %v15897_v22  ;;  %v13789_v9 = vmul.f32 %v13636_v58, %v13245_v27  ;;  %v15902_v63 = vld [vmem:[#allocation37_spill] sm:$0xff] }
 0xb4a   :  { %v13793_v31 = vmul.f32 %v13636_v58, %v15898_v41  ;;  %v13797_v8 = vmul.f32 %v13636_v58, %v13263_v51  ;;  %v13801_v30 = vmul.f32 %v13636_v58, %v15899_v47  ;;  %v13805_v22 = vmul.f32 %v13636_v58, %v13281_v43 }
 0xb4b   :  { %v13809_v27 = vmul.f32 %v13636_v58, %v15900_v26  ;;  %v13813_v41 = vmul.f32 %v13636_v58, %v13299_v62  ;;  %v13817_v51 = vmul.f32 %v13636_v58, %v15901_v29  ;;  %v13821_v47 = vmul.f32 %v13636_v58, %v13317_v32  ;;  %v13827_v40 = vpop.f32.mrb[192].mxu1  ;;  %v15904_v62 = vld [vmem:[#allocation28_spill] sm:$0xff]  ;;  %v15905_v32 = vld [vmem:[#allocation42_spill] sm:$0xff] }
 0xb4c   :  { %v13825_v43 = vmul.f32 %v13636_v58, %v15902_v63  ;;  %15903 = vst [vmem:[#allocation66_spill] sm:$0xff] %v13827_v40  ;;  %v13831_v26 = vmul.f32 %v13636_v58, %v13335_v61  ;;  %v13835_v6 = vmul.f32 %v13636_v58, %v15904_v62  ;;  %v13839_v29 = vmul.f32 %v13636_v58, %v13353_v35  ;;  %v13845_v63 = vpop.f32.mrb[193].mxu1  ;;  %v15907_v61 = vld [vmem:[#allocation24_spill] sm:$0xff] }
 0xb4d   :  { %v13843_v56 = vmul.f32 %v13636_v58, %v15905_v32  ;;  %15906 = vst [vmem:[#allocation69_spill] sm:$0xff] %v13845_v63  ;;  %v13849_v40 = vmul.f32 %v13636_v58, %v13371_v44  ;;  %v13853_v13 = vmul.f32 %v13636_v58, %v15907_v61  ;;  %v13857_v62 = vmul.f32 %v13636_v58, %v13389_v24  ;;  %v15908_v35 = vld [vmem:[#allocation40_spill] sm:$0xff]  ;;  %v15909_v63 = vld [vmem:[#allocation19_spill] sm:$0xff] }
 0xb4e   :  { %v13861_v17 = vmul.f32 %v13636_v58, %v15908_v35  ;;  %v13865_v32 = vmul.f32 %v13636_v58, %v13407_v7  ;;  %v13869_v44 = vmul.f32 %v13636_v58, %v15909_v63  ;;  %v13873_v61 = vmul.f32 %v13636_v58, %v13425_v14 }
 0xb4f   :  { %v13877_v24 = vmul.f32 %v13636_v58, %v15911_v12  ;;  %v13881_v35 = vmul.f32 %v13636_v58, %v13443_v39  ;;  %v13885_v7 = vmul.f32 %v13636_v58, %v15913_v15  ;;  %v13889_v63 = vmul.f32 %v13636_v58, %v13461_v57  ;;  %v15920_v39 = vld [vmem:[#allocation44_spill] sm:$0xff]  ;;  %v15922_v15 = vld [vmem:[#allocation30_spill] sm:$0xff]  ;;  %v15923_v57 = vld [vmem:[#allocation47_spill] sm:$0xff] }
 0xb50   :  { %15910 = vst [vmem:[#allocation68_spill] sm:$0xff] %v13873_v61  ;;  %v13893_v14 = vmul.f32 %v13636_v58, %v15916_v11  ;;  %v13895_v61 = vpop.f32.mrb[194].mxu1  ;;  %v13899_v12 = vmul.f32 %v13636_v58, %v13479_v5  ;;  %v15925_v5 = vld [vmem:[#allocation34_spill] sm:$0xff] }
 0xb51   :  { %15912 = vst [vmem:[#allocation71_spill] sm:$0xff] %v13881_v35  ;;  %15914 = vst [vmem:[#allocation70_spill] sm:$0xff] %v13885_v7  ;;  %v13903_v35 = vmul.f32 %v13636_v58, %v15920_v39  ;;  %v13907_v7 = vmul.f32 %v13636_v58, %v15922_v15  ;;  %v13913_v11 = vpop.f32.mrb[195].mxu1  ;;  %v15926_v39 = vld [vmem:[#allocation41_spill] sm:$0xff]  ;;  %v13929_v15 = vadd.f32 %v13678_v23, %v13655_v45 }
 0xb52   :  { %15915 = vst [vmem:[#allocation73_spill] sm:$0xff] %v13889_v63  ;;  %15917 = vst [vmem:[#allocation72_spill] sm:$0xff] %v13893_v14  ;;  %v13911_v63 = vmul.f32 %v13636_v58, %v15923_v57  ;;  %v15924_v14 = vld [vmem:[#allocation29_spill] sm:$0xff]  ;;  %v13933_v57 = vadd.f32 %v13678_v23, %v13659_v21  ;;  %v13949_v45 = vadd.f32 %v13678_v23, %v13675_v4 }
 0xb53   :  { %15918 = vst [vmem:[#allocation75_spill] sm:$0xff] %v13895_v61  ;;  %15919 = vst [vmem:[#allocation74_spill] sm:$0xff] %v13899_v12  ;;  %v13917_v61 = vmul.f32 %v13636_v58, %v15924_v14  ;;  %v13921_v12 = vmul.f32 %v13636_v58, %v15925_v5  ;;  %v13937_v14 = vadd.f32 %v13678_v23, %v13663_v59 }
 0xb54   :  { %15921 = vst [vmem:[#allocation77_spill] sm:$0xff] %v13903_v35  ;;  %v13925_v35 = vmul.f32 %v13636_v58, %v15926_v39  ;;  %15927 = vst [vmem:[#allocation76_spill] sm:$0xff] %v13929_v15  ;;  %v13941_v5 = vadd.f32 %v13678_v23, %v13667_v3  ;;  %v13945_v58 = vadd.f32 %v13678_v23, %v13671_v48  ;;  %v13963_v39 = vpop.f32.mrb[196].mxu1 }
 0xb55   :  { %15928 = vst [vmem:[#allocation79_spill] sm:$0xff] %v13933_v57  ;;  %15929 = vst [vmem:[#allocation78_spill] sm:$0xff] %v13937_v14  ;;  %v13953_v21 = vadd.f32 %v13678_v23, %v13682_v50  ;;  %v13957_v59 = vadd.f32 %v13678_v23, %v13686_v25  ;;  %v13961_v3 = vadd.f32 %v13678_v23, %v13690_v10  ;;  %v13981_v10 = vpop.f32.mrb[197].mxu1 }
 0xb56   :  { %15930 = vst [vmem:[#allocation81_spill] sm:$0xff] %v13941_v5  ;;  %15931 = vst [vmem:[#allocation80_spill] sm:$0xff] %v13945_v58  ;;  %v13967_v48 = vadd.f32 %v13678_v23, %v13696_v38  ;;  %v13971_v4 = vadd.f32 %v13678_v23, %v13700_v16  ;;  %v13975_v50 = vadd.f32 %v13678_v23, %v13704_v49 }
 0xb57   :  { %15932 = vst [vmem:[#allocation83_spill] sm:$0xff] %v13949_v45  ;;  %15933 = vst [vmem:[#allocation82_spill] sm:$0xff] %v13953_v21  ;;  %v13979_v25 = vadd.f32 %v13678_v23, %v13708_v36  ;;  %v13989_v38 = vadd.f32 %v13678_v23, %v13721_v42  ;;  %v13993_v16 = vadd.f32 %v13678_v23, %v13725_v18 }
 0xb58   :  { %15934 = vst [vmem:[#allocation85_spill] sm:$0xff] %v13957_v59  ;;  %15935 = vst [vmem:[#allocation84_spill] sm:$0xff] %v13961_v3  ;;  %v13985_v3 = vadd.f32 %v13678_v23, %v13717_v33  ;;  %v13997_v49 = vadd.f32 %v13678_v23, %v13729_v19  ;;  %v14001_v36 = vadd.f32 %v13678_v23, %v13733_v2 }
 0xb59   :  { %15936 = vst [vmem:[#allocation87_spill] sm:$0xff] %v13967_v48  ;;  %15937 = vst [vmem:[#allocation86_spill] sm:$0xff] %v13971_v4  ;;  %v14005_v33 = vadd.f32 %v13678_v23, %v13737_v60  ;;  %v14009_v42 = vadd.f32 %v13678_v23, %v13741_v53  ;;  %v14013_v18 = vadd.f32 %v13678_v23, %v13745_v37 }
 0xb5a   :  { %15938 = vst [vmem:[#allocation89_spill] sm:$0xff] %v13975_v50  ;;  %15939 = vst [vmem:[#allocation88_spill] sm:$0xff] %v13979_v25  ;;  %v14017_v19 = vadd.f32 %v13678_v23, %v13749_v46  ;;  %v14021_v2 = vadd.f32 %v13678_v23, %v13753_v1  ;;  %v14025_v60 = vadd.f32 %v13678_v23, %v13757_v54 }
 0xb5b   :  { %15940 = vst [vmem:[#allocation91_spill] sm:$0xff] %v13985_v3  ;;  %15941 = vst [vmem:[#allocation90_spill] sm:$0xff] %v13989_v38  ;;  %v14029_v53 = vadd.f32 %v13678_v23, %v13763_v28  ;;  %v14035_v37 = vadd.f32 %v13678_v23, %v13767_v55  ;;  %v14039_v46 = vadd.f32 %v13678_v23, %v13771_v52 }
 0xb5c   :  { %15942 = vst [vmem:[#allocation35_spill] sm:$0xff] %v13993_v16  ;;  %15943 = vst [vmem:[#allocation20_spill] sm:$0xff] %v13997_v49  ;;  %v14043_v1 = vadd.f32 %v13678_v23, %v13775_v0  ;;  %v14047_v54 = vadd.f32 %v13678_v23, %v13781_v20  ;;  %v14057_v55 = vadd.f32 %v13678_v23, %v13789_v9 }
 0xb5d   :  { %15944 = vst [vmem:[#allocation21_spill] sm:$0xff] %v14001_v36  ;;  %15945 = vst [vmem:[#allocation36_spill] sm:$0xff] %v14005_v33  ;;  %v14061_v52 = vadd.f32 %v13678_v23, %v13793_v31  ;;  %v14065_v0 = vadd.f32 %v13678_v23, %v13797_v8  ;;  %v14069_v20 = vadd.f32 %v13678_v23, %v13801_v30 }
 0xb5e   :  { %15946 = vst [vmem:[#allocation39_spill] sm:$0xff] %v14009_v42  ;;  %15947 = vst [vmem:[#allocation38_spill] sm:$0xff] %v14013_v18  ;;  %v14031_v42 = vpop.f32.mrb[198].mxu1  ;;  %v14077_v9 = vadd.f32 %v13678_v23, %v13809_v27  ;;  %v14081_v31 = vadd.f32 %v13678_v23, %v13813_v41  ;;  %v14085_v8 = vadd.f32 %v13678_v23, %v13817_v51 }
 0xb5f   :  { %15948 = vst [vmem:[#allocation37_spill] sm:$0xff] %v14017_v19  ;;  %15949 = vst [vmem:[#allocation28_spill] sm:$0xff] %v14021_v2  ;;  %v14049_v28 = vpop.f32.mrb[199].mxu1  ;;  %v14089_v30 = vadd.f32 %v13678_v23, %v13821_v47  ;;  %v14097_v27 = vadd.f32 %v13678_v23, %v13831_v26  ;;  %v14103_v41 = vadd.f32 %v13678_v23, %v13835_v6 }
 0xb60   :  { %15950 = vst [vmem:[#allocation42_spill] sm:$0xff] %v14025_v60  ;;  %15951 = vst [vmem:[#allocation24_spill] sm:$0xff] %v14029_v53  ;;  %v14053_v53 = vadd.f32 %v13678_v23, %v13785_v34  ;;  %v14073_v34 = vadd.f32 %v13678_v23, %v13805_v22  ;;  %v14093_v22 = vadd.f32 %v13678_v23, %v13825_v43 }
 0xb61   :  { %15952 = vst [vmem:[#allocation40_spill] sm:$0xff] %v14035_v37  ;;  %15953 = vst [vmem:[#allocation19_spill] sm:$0xff] %v14039_v46  ;;  %v14107_v51 = vadd.f32 %v13678_v23, %v13839_v29  ;;  %v14111_v47 = vadd.f32 %v13678_v23, %v13843_v56  ;;  %v14115_v43 = vadd.f32 %v13678_v23, %v13849_v40 }
 0xb62   :  { %15954 = vst [vmem:[#allocation18_spill] sm:$0xff] %v14043_v1  ;;  %15955 = vst [vmem:[#allocation26_spill] sm:$0xff] %v14047_v54  ;;  %v14125_v6 = vadd.f32 %v13678_v23, %v13857_v62  ;;  %v14129_v29 = vadd.f32 %v13678_v23, %v13861_v17  ;;  %v14133_v56 = vadd.f32 %v13678_v23, %v13865_v32  ;;  %v16007_v54 = vld [vmem:[#allocation75_spill] sm:$0xff] }
 0xb63   :  { %15956 = vst [vmem:[#allocation17_spill] sm:$0xff] %v14053_v53  ;;  %15957 = vst [vmem:[#allocation44_spill] sm:$0xff] %v14057_v55  ;;  %v14137_v40 = vadd.f32 %v13678_v23, %v13869_v44  ;;  %v14145_v62 = vadd.f32 %v13678_v23, %v13877_v24 }
 0xb64   :  { %15958 = vst [vmem:[#allocation30_spill] sm:$0xff] %v14061_v52  ;;  %15959 = vst [vmem:[#allocation47_spill] sm:$0xff] %v14065_v0  ;;  %v16006_v52 = vld [vmem:[#allocation66_spill] sm:$0xff] }
 0xb65   :  { %15960 = vst [vmem:[#allocation29_spill] sm:$0xff] %v14069_v20  ;;  %15961 = vst [vmem:[#allocation34_spill] sm:$0xff] %v14073_v34 }
 0xb66   :  { %15962 = vst [vmem:[#allocation41_spill] sm:$0xff] %v14077_v9  ;;  %15963 = vst [vmem:[#allocation92_spill] sm:$0xff] %v14081_v31  ;;  %v14099_v9 = vpop.f32.mrb[200].mxu1  ;;  %v16004_v31 = vld [vmem:[#allocation64_spill] sm:$0xff] }
 0xb67   :  { %15964 = vst [vmem:[#allocation93_spill] sm:$0xff] %v14085_v8  ;;  %15965 = vst [vmem:[#allocation94_spill] sm:$0xff] %v14089_v30  ;;  %v14117_v26 = vpop.f32.mrb[201].mxu1 }
 0xb68   :  { %15966 = vst [vmem:[#allocation95_spill] sm:$0xff] %v14093_v22  ;;  %15967 = vst [vmem:[#allocation96_spill] sm:$0xff] %v14097_v27  ;;  %v14121_v27 = vadd.f32 %v13678_v23, %v13853_v13 }
 0xb69   :  { %15968 = vst [vmem:[#allocation97_spill] sm:$0xff] %v14103_v41  ;;  %15969 = vst [vmem:[#allocation98_spill] sm:$0xff] %v14107_v51  ;;  %v16002_v51 = vld [vmem:[#allocation63_spill] sm:$0xff] }
 0xb6a   :  { %15970 = vst [vmem:[#allocation99_spill] sm:$0xff] %v14111_v47  ;;  %15971 = vst [vmem:[#allocation100_spill] sm:$0xff] %v14115_v43  ;;  %v15977_v43 = vld [vmem:[#allocation68_spill] sm:$0xff] }
 0xb6b   :  { %15972 = vst [vmem:[#allocation101_spill] sm:$0xff] %v14121_v27  ;;  %15973 = vst [vmem:[#allocation102_spill] sm:$0xff] %v14125_v6  ;;  %v14141_v13 = vadd.f32 %v13678_v23, %v15977_v43  ;;  %v15980_v6 = vld [vmem:[#allocation71_spill] sm:$0xff]  ;;  %v16001_v27 = vld [vmem:[#allocation62_spill] sm:$0xff] }
 0xb6c   :  { %15974 = vst [vmem:[#allocation103_spill] sm:$0xff] %v14129_v29  ;;  %15975 = vst [vmem:[#allocation104_spill] sm:$0xff] %v14133_v56  ;;  %v14149_v17 = vadd.f32 %v13678_v23, %v15980_v6  ;;  %v15982_v29 = vld [vmem:[#allocation70_spill] sm:$0xff]  ;;  %v15984_v56 = vld [vmem:[#allocation73_spill] sm:$0xff] }
 0xb6d   :  { %15976 = vst [vmem:[#allocation105_spill] sm:$0xff] %v14137_v40  ;;  %15978 = vst [vmem:[#allocation68_spill] sm:$0xff] %v14141_v13  ;;  %v14153_v32 = vadd.f32 %v13678_v23, %v15982_v29  ;;  %v14157_v44 = vadd.f32 %v13678_v23, %v15984_v56  ;;  %v15986_v40 = vld [vmem:[#allocation72_spill] sm:$0xff]  ;;  %v15988_v13 = vld [vmem:[#allocation74_spill] sm:$0xff]  ;;  %v14175_v29 = vadd.f32 %v13678_v23, %v13907_v7 }
 0xb6e   :  { %15979 = vst [vmem:[#allocation106_spill] sm:$0xff] %v14145_v62  ;;  %15981 = vst [vmem:[#allocation71_spill] sm:$0xff] %v14149_v17  ;;  %v14161_v43 = vadd.f32 %v13678_v23, %v15986_v40  ;;  %v14165_v24 = vadd.f32 %v13678_v23, %v15988_v13  ;;  %v14167_v62 = vpop.f32.mrb[202].mxu1  ;;  %v15990_v6 = vld [vmem:[#allocation77_spill] sm:$0xff]  ;;  %v14179_v56 = vadd.f32 %v13678_v23, %v13911_v63 }
 0xb6f   :  { %15983 = vst [vmem:[#allocation70_spill] sm:$0xff] %v14153_v32  ;;  %15985 = vst [vmem:[#allocation73_spill] sm:$0xff] %v14157_v44  ;;  %v14171_v17 = vadd.f32 %v13678_v23, %v15990_v6  ;;  %v14183_v40 = vadd.f32 %v13678_v23, %v13917_v61  ;;  %v14185_v13 = vpop.f32.mrb[203].mxu1  ;;  %v14193_v6 = vadd.f32 %v13678_v23, %v13925_v35  ;;  %v15996_v7 = vld [vmem:[#allocation33_spill] sm:$0xff] }
 0xb70   :  { %15987 = vst [vmem:[#allocation72_spill] sm:$0xff] %v14161_v43  ;;  %15989 = vst [vmem:[#allocation74_spill] sm:$0xff] %v14165_v24  ;;  %v14189_v24 = vadd.f32 %v13678_v23, %v13921_v12  ;;  %v7007_v63 = vmul.f32 %v15996_v7, %v15996_v7  ;;  %v15999_v43 = vld [vmem:[#allocation31_spill] sm:$0xff]  ;;  %v14202_v32 = vpop.f32.mrb[204].mxu1  ;;  %v7009_v23 = vmul.f32 %v16001_v27, %v16001_v27 }
 0xb71   :  { %15991 = vst [vmem:[#allocation77_spill] sm:$0xff] %v14171_v17  ;;  %15992 = vst [vmem:[#allocation107_spill] sm:$0xff] %v14175_v29  ;;  %v15997_v29 = vld [vmem:[#allocation32_spill] sm:$0xff]  ;;  %v14208_v35 = vpop.f32.mrb[205].mxu1 }
 0xb72   :  { %15993 = vst [vmem:[#allocation108_spill] sm:$0xff] %v14179_v56  ;;  %15994 = vst [vmem:[#allocation109_spill] sm:$0xff] %v14183_v40  ;;  %v6937_v17 = vadd.f32 %v15997_v29, %v15996_v7  ;;  %v15998_v56 = vld [vmem:[#allocation61_spill] sm:$0xff]  ;;  %v16000_v40 = vld [vmem:[#allocation60_spill] sm:$0xff]  ;;  %v14212_v22 = vpop.f32.mrb[206].mxu1 }
 0xb73   :  { %15995 = vst [vmem:[#allocation110_spill] sm:$0xff] %v14189_v24  ;;  %v7069_v61 = vadd.f32 %v15999_v43, %v15998_v56  ;;  %v7008_v12 = vmul.f32 %v16000_v40, %v16000_v40  ;;  %v16003_v56 = vld [vmem:[#allocation67_spill] sm:$0xff] }
 0xb74   :  { %v6938_v44 = vadd.f32 %v16000_v40, %v6937_v17  ;;  %v7010_v17 = vmul.f32 %v16002_v51, %v16002_v51  ;;  %v7011_v30 = vmul.f32 %v16003_v56, %v16003_v56 }
 0xb75   :  { %v7070_v24 = vadd.f32 %v7069_v61, %v7007_v63  ;;  %v14218_v63 = vpop.f32.mrb[207].mxu1 }
 0xb76   :  { %v6939_v29 = vadd.f32 %v6938_v44, %v16001_v27  ;;  %v14222_v44 = vpop.f32.mrb[208].mxu1 }
 0xb77   :  { %v7071_v47 = vadd.f32 %v7070_v24, %v7008_v12  ;;  %v7012_v24 = vmul.f32 %v16004_v31, %v16004_v31 }
 0xb78   :  { %v6940_v41 = vadd.f32 %v16002_v51, %v6939_v29  ;;  %v16005_v29 = vld [vmem:[#allocation69_spill] sm:$0xff] }
 0xb79   :  { %v7072_v43 = vadd.f32 %v7071_v47, %v7009_v23  ;;  %v7013_v20 = vmul.f32 %v16005_v29, %v16005_v29  ;;  %v14228_v47 = vpop.f32.mrb[209].mxu1 }
 0xb7a   :  { %v6941_v61 = vadd.f32 %v6940_v41, %v16003_v56  ;;  %v14232_v41 = vpop.f32.mrb[210].mxu1 }
 0xb7b   :  { %v7073_v8 = vadd.f32 %v7072_v43, %v7010_v17  ;;  %v7014_v17 = vmul.f32 %v16006_v52, %v16006_v52 }
 0xb7c   :  { %v6942_v34 = vadd.f32 %v16004_v31, %v6941_v61  ;;  %v7015_v61 = vmul.f32 %v13913_v11, %v13913_v11 }
 0xb7d   :  { %v7074_v12 = vadd.f32 %v7073_v8, %v7011_v30  ;;  %v14238_v8 = vpop.f32.mrb[211].mxu1 }
 0xb7e   :  { %v6943_v23 = vadd.f32 %v6942_v34, %v16005_v29  ;;  %v14242_v34 = vpop.f32.mrb[212].mxu1 }
 0xb7f   :  { %v7075_v0 = vadd.f32 %v7074_v12, %v7012_v24  ;;  %v7016_v24 = vmul.f32 %v16007_v54, %v16007_v54 }
 0xb80   :  { %v6944_v55 = vadd.f32 %v16006_v52, %v6943_v23  ;;  %v7017_v23 = vmul.f32 %v13981_v10, %v13981_v10 }
 0xb81   :  { %v7076_v43 = vadd.f32 %v7075_v0, %v7013_v20  ;;  %v14248_v0 = vpop.f32.mrb[213].mxu1 }
 0xb82   :  { %v6945_v30 = vadd.f32 %v6944_v55, %v13913_v11  ;;  %v14252_v55 = vpop.f32.mrb[214].mxu1 }
 0xb83   :  { %v7077_v53 = vadd.f32 %v7076_v43, %v7014_v17  ;;  %v7018_v17 = vmul.f32 %v13963_v39, %v13963_v39 }
 0xb84   :  { %v6946_v1 = vadd.f32 %v16007_v54, %v6945_v30  ;;  %v7019_v30 = vmul.f32 %v14049_v28, %v14049_v28 }
 0xb85   :  { %v7078_v12 = vadd.f32 %v7077_v53, %v7015_v61  ;;  %v14258_v53 = vpop.f32.mrb[215].mxu1 }
 0xb86   :  { %v6947_v20 = vadd.f32 %v6946_v1, %v13981_v10  ;;  %v14262_v1 = vpop.f32.mrb[216].mxu1 }
 0xb87   :  { %v7079_v46 = vadd.f32 %v7078_v12, %v7016_v24  ;;  %v7020_v24 = vmul.f32 %v14031_v42, %v14031_v42  ;;  %v7038_v5 = vmul.f32 %v14262_v1, %v14262_v1 }
 0xb88   :  { %v6948_v37 = vadd.f32 %v13963_v39, %v6947_v20  ;;  %v7021_v20 = vmul.f32 %v14117_v26, %v14117_v26 }
 0xb89   :  { %v7080_v43 = vadd.f32 %v7079_v46, %v7017_v23  ;;  %v14268_v46 = vpop.f32.mrb[217].mxu1 }
 0xb8a   :  { %v6949_v61 = vadd.f32 %v6948_v37, %v14049_v28  ;;  %v14272_v37 = vpop.f32.mrb[218].mxu1 }
 0xb8b   :  { %v7081_v60 = vadd.f32 %v7080_v43, %v7018_v17  ;;  %v7022_v17 = vmul.f32 %v14099_v9, %v14099_v9 }
 0xb8c   :  { %v6950_v2 = vadd.f32 %v14031_v42, %v6949_v61  ;;  %v7023_v61 = vmul.f32 %v14185_v13, %v14185_v13 }
 0xb8d   :  { %v7082_v12 = vadd.f32 %v7081_v60, %v7019_v30  ;;  %v14278_v60 = vpop.f32.mrb[219].mxu1 }
 0xb8e   :  { %v6951_v23 = vadd.f32 %v6950_v2, %v14117_v26  ;;  %v14282_v2 = vpop.f32.mrb[220].mxu1 }
 0xb8f   :  { %v7083_v19 = vadd.f32 %v7082_v12, %v7020_v24  ;;  %v7024_v24 = vmul.f32 %v14167_v62, %v14167_v62 }
 0xb90   :  { %v6952_v18 = vadd.f32 %v14099_v9, %v6951_v23  ;;  %v7025_v23 = vmul.f32 %v14208_v35, %v14208_v35 }
 0xb91   :  { %v7084_v43 = vadd.f32 %v7083_v19, %v7021_v20  ;;  %v14288_v19 = vpop.f32.mrb[221].mxu1 }
 0xb92   :  { %v6953_v30 = vadd.f32 %v6952_v18, %v14185_v13  ;;  %v14292_v18 = vpop.f32.mrb[222].mxu1 }
 0xb93   :  { %v7085_v33 = vadd.f32 %v7084_v43, %v7022_v17  ;;  %v7026_v17 = vmul.f32 %v14202_v32, %v14202_v32 }
 0xb94   :  { %v6954_v36 = vadd.f32 %v14167_v62, %v6953_v30  ;;  %v7027_v30 = vmul.f32 %v14218_v63, %v14218_v63 }
 0xb95   :  { %v7086_v12 = vadd.f32 %v7085_v33, %v7023_v61  ;;  %v14298_v33 = vpop.f32.mrb[223].mxu1 }
 0xb96   :  { %v6955_v20 = vadd.f32 %v6954_v36, %v14208_v35  ;;  %v14302_v36 = vpop.f32.mrb[224].mxu1 }
 0xb97   :  { %v7087_v49 = vadd.f32 %v7086_v12, %v7024_v24  ;;  %16008 = vst [vmem:[#allocation33_spill] sm:$0xff] %v14302_v36  ;;  %v7028_v24 = vmul.f32 %v14212_v22, %v14212_v22 }
 0xb98   :  { %v6956_v16 = vadd.f32 %v14202_v32, %v6955_v20  ;;  %v7029_v20 = vmul.f32 %v14228_v47, %v14228_v47 }
 0xb99   :  { %v7088_v43 = vadd.f32 %v7087_v49, %v7025_v23  ;;  %v14308_v49 = vpop.f32.mrb[225].mxu1 }
 0xb9a   :  { %v6957_v61 = vadd.f32 %v6956_v16, %v14218_v63  ;;  %16009 = vst [vmem:[#allocation32_spill] sm:$0xff] %v14308_v49  ;;  %v14312_v16 = vpop.f32.mrb[226].mxu1 }
 0xb9b   :  { %v7089_v38 = vadd.f32 %v7088_v43, %v7026_v17  ;;  %16010 = vst [vmem:[#allocation61_spill] sm:$0xff] %v14312_v16  ;;  %v7030_v17 = vmul.f32 %v14222_v44, %v14222_v44 }
 0xb9c   :  { %v6958_v3 = vadd.f32 %v14212_v22, %v6957_v61  ;;  %v7031_v61 = vmul.f32 %v14238_v8, %v14238_v8 }
 0xb9d   :  { %v7090_v12 = vadd.f32 %v7089_v38, %v7027_v30  ;;  %v14318_v38 = vpop.f32.mrb[227].mxu1 }
 0xb9e   :  { %v6959_v23 = vadd.f32 %v6958_v3, %v14228_v47  ;;  %16011 = vst [vmem:[#allocation31_spill] sm:$0xff] %v14318_v38  ;;  %v14322_v3 = vpop.f32.mrb[228].mxu1 }
 0xb9f   :  { %v7091_v25 = vadd.f32 %v7090_v12, %v7028_v24  ;;  %16012 = vst [vmem:[#allocation60_spill] sm:$0xff] %v14322_v3  ;;  %v7032_v24 = vmul.f32 %v14232_v41, %v14232_v41 }
 0xba0   :  { %v6960_v50 = vadd.f32 %v14222_v44, %v6959_v23  ;;  %v7033_v23 = vmul.f32 %v14248_v0, %v14248_v0 }
 0xba1   :  { %v7092_v43 = vadd.f32 %v7091_v25, %v7029_v20  ;;  %v14328_v25 = vpop.f32.mrb[229].mxu1 }
 0xba2   :  { %v6961_v30 = vadd.f32 %v6960_v50, %v14238_v8  ;;  %16013 = vst [vmem:[#allocation62_spill] sm:$0xff] %v14328_v25  ;;  %v14332_v50 = vpop.f32.mrb[230].mxu1 }
 0xba3   :  { %v7093_v4 = vadd.f32 %v7092_v43, %v7030_v17  ;;  %16014 = vst [vmem:[#allocation63_spill] sm:$0xff] %v14332_v50  ;;  %v7034_v17 = vmul.f32 %v14242_v34, %v14242_v34 }
 0xba4   :  { %v6962_v48 = vadd.f32 %v14232_v41, %v6961_v30  ;;  %v7035_v30 = vmul.f32 %v14258_v53, %v14258_v53 }
 0xba5   :  { %v7094_v12 = vadd.f32 %v7093_v4, %v7031_v61  ;;  %v14338_v4 = vpop.f32.mrb[231].mxu1 }
 0xba6   :  { %v6963_v20 = vadd.f32 %v6962_v48, %v14248_v0  ;;  %v7036_v48 = vmul.f32 %v14252_v55, %v14252_v55 }
 0xba7   :  { %v7095_v59 = vadd.f32 %v7094_v12, %v7032_v24  ;;  %v7037_v12 = vmul.f32 %v14268_v46, %v14268_v46 }
 0xba8   :  { %v6964_v21 = vadd.f32 %v14242_v34, %v6963_v20 }
 0xba9   :  { %v7096_v43 = vadd.f32 %v7095_v59, %v7033_v23 }
 0xbaa   :  { %v6965_v61 = vadd.f32 %v6964_v21, %v14258_v53  ;;  %v7039_v21 = vmul.f32 %v14278_v60, %v14278_v60 }
 0xbab   :  { %v7097_v45 = vadd.f32 %v7096_v43, %v7034_v17 }
 0xbac   :  { %v6966_v58 = vadd.f32 %v14252_v55, %v6965_v61 }
 0xbad   :  { %v7098_v24 = vadd.f32 %v7097_v45, %v7035_v30  ;;  %v7040_v30 = vmul.f32 %v14272_v37, %v14272_v37 }
 0xbae   :  { %v6967_v20 = vadd.f32 %v6966_v58, %v14268_v46  ;;  %v7041_v58 = vmul.f32 %v14288_v19, %v14288_v19 }
 0xbaf   :  { %v7099_v59 = vadd.f32 %v7098_v24, %v7036_v48 }
 0xbb0   :  { %v6968_v23 = vadd.f32 %v14262_v1, %v6967_v20  ;;  %v7042_v20 = vmul.f32 %v14282_v2, %v14282_v2 }
 0xbb1   :  { %v7100_v14 = vadd.f32 %v7099_v59, %v7037_v12 }
 0xbb2   :  { %v6969_v17 = vadd.f32 %v6968_v23, %v14278_v60 }
 0xbb3   :  { %v7101_v43 = vadd.f32 %v7100_v14, %v7038_v5  ;;  %v7043_v14 = vmul.f32 %v14298_v33, %v14298_v33 }
 0xbb4   :  { %v6970_v45 = vadd.f32 %v14272_v37, %v6969_v17  ;;  %v7044_v17 = vmul.f32 %v14292_v18, %v14292_v18 }
 0xbb5   :  { %v7102_v61 = vadd.f32 %v7101_v43, %v7039_v21 }
 0xbb6   :  { %v6971_v48 = vadd.f32 %v6970_v45, %v14288_v19  ;;  %v7045_v45 = vmul.f32 %v14308_v49, %v14308_v49 }
 0xbb7   :  { %v7103_v24 = vadd.f32 %v7102_v61, %v7040_v30 }
 0xbb8   :  { %v6972_v12 = vadd.f32 %v14282_v2, %v6971_v48  ;;  %v7046_v48 = vmul.f32 %v14302_v36, %v14302_v36 }
 0xbb9   :  { %v7104_v59 = vadd.f32 %v7103_v24, %v7041_v58 }
 0xbba   :  { %v6973_v5 = vadd.f32 %v6972_v12, %v14298_v33  ;;  %v7047_v12 = vmul.f32 %v14318_v38, %v14318_v38 }
 0xbbb   :  { %v7105_v23 = vadd.f32 %v7104_v59, %v7042_v20 }
 0xbbc   :  { %v6974_v21 = vadd.f32 %v14292_v18, %v6973_v5  ;;  %v7048_v5 = vmul.f32 %v14312_v16, %v14312_v16 }
 0xbbd   :  { %v7106_v43 = vadd.f32 %v7105_v23, %v7043_v14 }
 0xbbe   :  { %v6975_v30 = vadd.f32 %v6974_v21, %v14308_v49  ;;  %v7049_v21 = vmul.f32 %v14328_v25, %v14328_v25 }
 0xbbf   :  { %v7107_v61 = vadd.f32 %v7106_v43, %v7044_v17 }
 0xbc0   :  { %v6976_v58 = vadd.f32 %v14302_v36, %v6975_v30  ;;  %v7050_v30 = vmul.f32 %v14322_v3, %v14322_v3 }
 0xbc1   :  { %v7108_v24 = vadd.f32 %v7107_v61, %v7045_v45 }
 0xbc2   :  { %v6977_v20 = vadd.f32 %v6976_v58, %v14318_v38  ;;  %v7051_v58 = vmul.f32 %v14338_v4, %v14338_v4 }
 0xbc3   :  { %v7109_v59 = vadd.f32 %v7108_v24, %v7046_v48 }
 0xbc4   :  { %v6978_v14 = vadd.f32 %v14312_v16, %v6977_v20  ;;  %v7052_v20 = vmul.f32 %v14332_v50, %v14332_v50 }
 0xbc5   :  { %v7110_v23 = vadd.f32 %v7109_v59, %v7047_v12 }
 0xbc6   :  { %v6979_v17 = vadd.f32 %v6978_v14, %v14328_v25 }
 0xbc7   :  { %v7111_v43 = vadd.f32 %v7110_v23, %v7048_v5 }
 0xbc8   :  { %v6980_v45 = vadd.f32 %v14322_v3, %v6979_v17 }
 0xbc9   :  { %v7112_v61 = vadd.f32 %v7111_v43, %v7049_v21 }
 0xbca   :  { %v6981_v48 = vadd.f32 %v6980_v45, %v14338_v4 }
 0xbcb   :  { %v7113_v24 = vadd.f32 %v7112_v61, %v7050_v30 }
 0xbcc   :  { %v6982_v12 = vadd.f32 %v14332_v50, %v6981_v48 }
 0xbcd   :  { %v7114_v59 = vadd.f32 %v7113_v24, %v7051_v58  ;;  %v7127_v58 = vld [vmem:[%s15250_s8] sm:$0x1]  ;;  %s9583_s8 = smov [#allocation12]  }
 0xbce   :  { %v6983_v14 = vrot.slane %v6982_v12, 4 }
 0xbcf   :  { %v7115_v5 = vadd.f32 %v7114_v59, %v7052_v20  ;;  %v16018_v59 = vld [vmem:[#allocation46_spill] sm:$0xff] }
 0xbd0   :  { %v6984_v23 = vadd.f32 %v6983_v14, %v6982_v12 }
 0xbd1   :  { %v7116_v17 = vrot.slane %v7115_v5, 4 }
 0xbd2   :  { %v6985_v57 = vrot.slane %v6984_v23, 2 }
 0xbd3   :  { %v7117_v15 = vadd.f32 %v7116_v17, %v7115_v5  ;;  %v16019_v5 = vld [vmem:[#allocation43_spill] sm:$0xff]  ;;  %v16020_v17 = vld [vmem:[#allocation49_spill] sm:$0xff] }
 0xbd4   :  { %v6986_v3 = vadd.f32 %v6985_v57, %v6984_v23 }
 0xbd5   :  { %v7118_v21 = vrot.slane %v7117_v15, 2 }
 0xbd6   :  { %v6987_v43 = vrot.slane %v6986_v3, 1 }
 0xbd7   :  { %v7119_v25 = vadd.f32 %v7118_v21, %v7117_v15  ;;  %v7131_v15 = vld [vmem:[%s15251_s9] sm:$0x1]  ;;  %s7471_s9 = sshll.u32 %s9583_s8, 4  ;;  %s7472_s9 = int_to_ptr.vmem [resolvable:$true] %s7471_s9 }
 0xbd8   :  { %v6988_v16 = vadd.f32 %v6987_v43, %v6986_v3  ;;  %v16015_v3 = vld [vmem:[#allocation22_spill] sm:$0xff]  ;;  %s9545_s11 = scalar_lea.vmem %s7472_s9, 8192  ;;  %p9550_p5 = scmp.lt.s32.totalorder %s7472_s9, %s7472_s9 }
 0xbd9   :  { %v7120_v38 = vrot.slane %v7119_v25, 1  ;;  %p9546_p4 = scmp.ne.s32.totalorder %s7472_s9, %s9545_s11  ;;  %p9551_p6 = scmp.lt.s32.totalorder %s9545_s11, %s9545_s11 }
 0xbda   :  { %v7122_v45 = vmul.f32 0.001953125, %v6988_v16 }
 0xbdb   :  { %v7121_v30 = vadd.f32 %v7120_v38, %v7119_v25  ;;  %p9552_p7 = por %p9551_p6, %p9550_p5 }
 0xbdc   :  { %v7124_v61 = vmul.f32 %v7122_v45, %v7122_v45 }
 0xbdd   :  { %v7123_v48 = vmul.f32 0.001953125, %v7121_v30  ;;  %v16022_v30 = vld [vmem:[#allocation25_spill] sm:$0xff]  ;;  %p9553_p8 = pnand %p9552_p7, %p9546_p4 }
 0xbdf   :  { %v7125_v36 = vsub.f32 %v7123_v48, %v7124_v61  ;;  %v16023_v48 = vld [vmem:[#allocation48_spill] sm:$0xff] }
 0xbe1   :  { %v7126_v49 = vmax.f32 %v7125_v36, 0.0 }
 0xbe3   :  { %v7128_v50 = vadd.f32 1e-05, %v7126_v49  ;;  %v16016_v49 = vld [vmem:[#allocation27_spill] sm:$0xff] }
 0xbe5   :  { %9386 = vrsqrt.f32 %v7128_v50  ;;  %v16017_v50 = vld [vmem:[#allocation23_spill] sm:$0xff] }
 0xbef   :  { %v9387_v24 = vpop.eup %9386 }
 0xbf0   :  { %v7130_v12 = vmul.f32 %v9387_v24, %v7127_v58  ;;  %v16024_v24 = vld [vmem:[#allocation52_spill] sm:$0xff] }
 0xbf2   :  { %v7132_v57 = vmul.f32 %v7130_v12, %v7122_v45  ;;  %v14399_v16 = vrot.slane %v7130_v12, %v16015_v3 }
 0xbf4   :  { %v7133_v38 = vsub.f32 %v7131_v15, %v7132_v57  ;;  %v7202_v36 = vmul.f32 %v14399_v16, %v14338_v4  ;;  %v14405_v25 = vmul.f32 %v14399_v16, %v16016_v49  ;;  %v14409_v20 = vmul.f32 %v16017_v50, %v14399_v16  ;;  %v16021_v4 = vld [vmem:[#allocation45_spill] sm:$0xff]  ;;  %v16025_v15 = vld [vmem:[#allocation50_spill] sm:$0xff] }
 0xbf5   :  { %v14413_v14 = vmul.f32 %v14399_v16, %v16018_v59  ;;  %v14417_v23 = vmul.f32 %v16019_v5, %v14399_v16  ;;  %v14421_v21 = vmul.f32 %v14399_v16, %v16020_v17  ;;  %v14425_v43 = vmul.f32 %v16021_v4, %v14399_v16  ;;  %v16026_v49 = vld [vmem:[#allocation54_spill] sm:$0xff]  ;;  %v16029_v59 = vld [vmem:[#allocation56_spill] sm:$0xff]  ;;  %v16031_v4 = vld [vmem:[#allocation53_spill] sm:$0xff] }
 0xbf6   :  { %v14428_v45 = vrot.slane %v7133_v38, %v16015_v3  ;;  %v14432_v61 = vmul.f32 %v14399_v16, %v16022_v30  ;;  %v14436_v58 = vmul.f32 %v16023_v48, %v14399_v16  ;;  %v14440_v12 = vmul.f32 %v14399_v16, %v16024_v24  ;;  %v16027_v38 = vld [vmem:[#allocation51_spill] sm:$0xff]  ;;  %v16032_v48 = vld [vmem:[#allocation58_spill] sm:$0xff] }
 0xbf7   :  { %v14444_v57 = vmul.f32 %v16025_v15, %v14399_v16  ;;  %v14448_v3 = vmul.f32 %v14399_v16, %v16026_v49  ;;  %v14452_v50 = vmul.f32 %v16027_v38, %v14399_v16  ;;  %v14456_v5 = vmul.f32 %v14399_v16, %v16029_v59  ;;  %v16033_v15 = vld [vmem:[#allocation55_spill] sm:$0xff]  ;;  %v16035_v59 = vld [vmem:[#allocation57_spill] sm:$0xff] }
 0xbf8   :  { %v7272_v17 = vadd.f32 %v14428_v45, %v7202_v36  ;;  %v14461_v30 = vmul.f32 %v16031_v4, %v14399_v16  ;;  %v14465_v24 = vmul.f32 %v14399_v16, %v16032_v48  ;;  %v14469_v49 = vmul.f32 %v16033_v15, %v14399_v16  ;;  %v16034_v38 = vld [vmem:[#allocation59_spill] sm:$0xff] }
 0xbf9   :  { %16028 = vst [vmem:[#allocation67_spill] sm:$0xff] %v14452_v50  ;;  %16030 = vst [vmem:[#allocation64_spill] sm:$0xff] %v14456_v5  ;;  %v14473_v50 = vmul.f32 %v14399_v16, %v16034_v38  ;;  %v14477_v5 = vmul.f32 %v16035_v59, %v14399_v16  ;;  %v14481_v36 = vmul.f32 %v14399_v16, %v15996_v7 }
 0xbfa   :  { %v14485_v4 = vmul.f32 %v16000_v40, %v14399_v16  ;;  %v7336_v48 = vadd.f32 %v7272_v17, %v14193_v6  ;;  %v14490_v15 = vmul.f32 %v14399_v16, %v16001_v27  ;;  %v14494_v38 = vmul.f32 %v16002_v51, %v14399_v16  ;;  %v16039_v17 = vld [vmem:[#allocation32_spill] sm:$0xff] }
 0xbfb   :  { %v14498_v59 = vmul.f32 %v14399_v16, %v16003_v56  ;;  %v14502_v7 = vmul.f32 %v16004_v31, %v14399_v16  ;;  %v14506_v40 = vmul.f32 %v14399_v16, %v16005_v29  ;;  %v14510_v27 = vmul.f32 %v16006_v52, %v14399_v16 }
 0xbfc   :  { %v14514_v51 = vmul.f32 %v14399_v16, %v13913_v11  ;;  %v7400_v6 = vmax.f32 %v7336_v48, 0.0  ;;  %v14518_v56 = vmul.f32 %v16007_v54, %v14399_v16  ;;  %v14522_v31 = vmul.f32 %v14399_v16, %v13981_v10  ;;  %v16041_v48 = vld [vmem:[#allocation33_spill] sm:$0xff] }
 0xbfd   :  { %v14526_v29 = vmul.f32 %v13963_v39, %v14399_v16  ;;  %v14530_v52 = vmul.f32 %v14399_v16, %v14049_v28  ;;  %v14534_v11 = vmul.f32 %v14031_v42, %v14399_v16  ;;  %v14538_v54 = vmul.f32 %v14399_v16, %v14117_v26 }
 0xbfe   :  { %v14542_v10 = vmul.f32 %v14099_v9, %v14399_v16  ;;  %7464 = vst [vmem:[#allocation12 + $0x1f0] sm:$0xff] %v7400_v6  ;;  %v14546_v39 = vmul.f32 %v14399_v16, %v14185_v13  ;;  %v14550_v28 = vmul.f32 %v14167_v62, %v14399_v16  ;;  %v14554_v42 = vmul.f32 %v14399_v16, %v14208_v35  ;;  %v16042_v6 = vld [vmem:[#allocation31_spill] sm:$0xff] }
 0xbff   :  { %v14558_v26 = vmul.f32 %v14202_v32, %v14399_v16  ;;  %v14562_v9 = vmul.f32 %v14399_v16, %v14218_v63  ;;  %v14566_v13 = vmul.f32 %v14212_v22, %v14399_v16  ;;  %v14570_v62 = vmul.f32 %v14399_v16, %v14228_v47 }
 0xc00   :  { %v14574_v35 = vmul.f32 %v14222_v44, %v14399_v16  ;;  %v14578_v32 = vmul.f32 %v14399_v16, %v14238_v8  ;;  %v14582_v63 = vmul.f32 %v14232_v41, %v14399_v16  ;;  %v14586_v22 = vmul.f32 %v14399_v16, %v14248_v0 }
 0xc01   :  { %v14590_v47 = vmul.f32 %v14242_v34, %v14399_v16  ;;  %v14594_v44 = vmul.f32 %v14399_v16, %v14258_v53  ;;  %v14598_v8 = vmul.f32 %v14252_v55, %v14399_v16  ;;  %v14602_v41 = vmul.f32 %v14399_v16, %v14268_v46 }
 0xc02   :  { %v14606_v0 = vmul.f32 %v14262_v1, %v14399_v16  ;;  %v14610_v34 = vmul.f32 %v14399_v16, %v14278_v60  ;;  %v14614_v53 = vmul.f32 %v14272_v37, %v14399_v16  ;;  %v14618_v55 = vmul.f32 %v14399_v16, %v14288_v19 }
 0xc03   :  { %v14622_v46 = vmul.f32 %v14282_v2, %v14399_v16  ;;  %v14626_v1 = vmul.f32 %v14399_v16, %v14298_v33  ;;  %v14630_v60 = vmul.f32 %v14292_v18, %v14399_v16  ;;  %v14634_v37 = vmul.f32 %v14399_v16, %v16039_v17 }
 0xc04   :  { %v14638_v19 = vmul.f32 %v16041_v48, %v14399_v16  ;;  %v14642_v2 = vmul.f32 %v14399_v16, %v16042_v6  ;;  %v14662_v6 = vadd.f32 %v14428_v45, %v14405_v25  ;;  %v14682_v25 = vadd.f32 %v14428_v45, %v14425_v43 }
 0xc05   :  { %16036 = vst [vmem:[#allocation69_spill] sm:$0xff] %v14622_v46  ;;  %16037 = vst [vmem:[#allocation66_spill] sm:$0xff] %v14626_v1  ;;  %v16043_v46 = vld [vmem:[#allocation61_spill] sm:$0xff]  ;;  %v16044_v1 = vld [vmem:[#allocation62_spill] sm:$0xff]  ;;  %v14702_v43 = vadd.f32 %v14428_v45, %v14448_v3  ;;  %v14722_v3 = vadd.f32 %v14428_v45, %v14469_v49  ;;  %v14742_v49 = vadd.f32 %v14428_v45, %v14490_v15 }
 0xc06   :  { %16038 = vst [vmem:[#allocation75_spill] sm:$0xff] %v14630_v60  ;;  %16040 = vst [vmem:[#allocation22_spill] sm:$0xff] %v14634_v37  ;;  %v14646_v33 = vmul.f32 %v16043_v46, %v14399_v16  ;;  %v14650_v18 = vmul.f32 %v14399_v16, %v16044_v1  ;;  %v16045_v60 = vld [vmem:[#allocation60_spill] sm:$0xff]  ;;  %v16046_v37 = vld [vmem:[#allocation63_spill] sm:$0xff]  ;;  %v14666_v46 = vadd.f32 %v14428_v45, %v14409_v20 }
 0xc07   :  { %v14654_v17 = vmul.f32 %v16045_v60, %v14399_v16  ;;  %v14658_v48 = vmul.f32 %v16046_v37, %v14399_v16  ;;  %v14670_v1 = vadd.f32 %v14428_v45, %v14413_v14  ;;  %v14674_v60 = vadd.f32 %v14428_v45, %v14417_v23  ;;  %v16048_v37 = vld [vmem:[#allocation67_spill] sm:$0xff] }
 0xc08   :  { %v14678_v16 = vadd.f32 %v14428_v45, %v14421_v21  ;;  %v14686_v20 = vadd.f32 %v14428_v45, %v14432_v61  ;;  %v14690_v14 = vadd.f32 %v14428_v45, %v14436_v58  ;;  %v14694_v23 = vadd.f32 %v14428_v45, %v14440_v12 }
 0xc09   :  { %v14698_v21 = vadd.f32 %v14428_v45, %v14444_v57  ;;  %v14706_v61 = vadd.f32 %v14428_v45, %v16048_v37  ;;  %v14714_v12 = vadd.f32 %v14428_v45, %v14461_v30  ;;  %v14718_v57 = vadd.f32 %v14428_v45, %v14465_v24 }
 0xc0a   :  { %16047 = vst [vmem:[#allocation27_spill] sm:$0xff] %v14686_v20  ;;  %v16049_v20 = vld [vmem:[#allocation64_spill] sm:$0xff]  ;;  %v14726_v37 = vadd.f32 %v14428_v45, %v14473_v50  ;;  %v14734_v30 = vadd.f32 %v14428_v45, %v14481_v36  ;;  %v14738_v24 = vadd.f32 %v14428_v45, %v14485_v4  ;;  %v14746_v50 = vadd.f32 %v14428_v45, %v14494_v38 }
 0xc0b   :  { %v14710_v58 = vadd.f32 %v14428_v45, %v16049_v20  ;;  %v14730_v20 = vadd.f32 %v14428_v45, %v14477_v5  ;;  %v14750_v5 = vadd.f32 %v14428_v45, %v14498_v59  ;;  %v14754_v36 = vadd.f32 %v14428_v45, %v14502_v7 }
 0xc0c   :  { %v14758_v4 = vadd.f32 %v14428_v45, %v14506_v40  ;;  %v14762_v15 = vadd.f32 %v14428_v45, %v14510_v27  ;;  %v14766_v38 = vadd.f32 %v14428_v45, %v14514_v51  ;;  %v14770_v59 = vadd.f32 %v14428_v45, %v14518_v56 }
 0xc0d   :  { %v14774_v7 = vadd.f32 %v14428_v45, %v14522_v31  ;;  %v14778_v40 = vadd.f32 %v14428_v45, %v14526_v29  ;;  %v14782_v27 = vadd.f32 %v14428_v45, %v14530_v52  ;;  %v14786_v51 = vadd.f32 %v14428_v45, %v14534_v11 }
 0xc0e   :  { %v14790_v56 = vadd.f32 %v14428_v45, %v14538_v54  ;;  %v14794_v31 = vadd.f32 %v14428_v45, %v14542_v10  ;;  %v14798_v29 = vadd.f32 %v14428_v45, %v14546_v39  ;;  %v14802_v52 = vadd.f32 %v14428_v45, %v14550_v28 }
 0xc0f   :  { %v14806_v11 = vadd.f32 %v14428_v45, %v14554_v42  ;;  %v14810_v54 = vadd.f32 %v14428_v45, %v14558_v26  ;;  %v14814_v10 = vadd.f32 %v14428_v45, %v14562_v9  ;;  %v14818_v39 = vadd.f32 %v14428_v45, %v14566_v13 }
 0xc10   :  { %v14822_v28 = vadd.f32 %v14428_v45, %v14570_v62  ;;  %v14826_v42 = vadd.f32 %v14428_v45, %v14574_v35  ;;  %v14830_v26 = vadd.f32 %v14428_v45, %v14578_v32  ;;  %v14834_v9 = vadd.f32 %v14428_v45, %v14582_v63 }
 0xc11   :  { %v14838_v13 = vadd.f32 %v14428_v45, %v14586_v22  ;;  %v14842_v62 = vadd.f32 %v14428_v45, %v14590_v47  ;;  %v14846_v35 = vadd.f32 %v14428_v45, %v14594_v44  ;;  %v14850_v32 = vadd.f32 %v14428_v45, %v14598_v8 }
 0xc12   :  { %v14854_v63 = vadd.f32 %v14428_v45, %v14602_v41  ;;  %v14858_v22 = vadd.f32 %v14428_v45, %v14606_v0  ;;  %v14862_v47 = vadd.f32 %v14428_v45, %v14610_v34  ;;  %v14866_v44 = vadd.f32 %v14428_v45, %v14614_v53 }
 0xc13   :  { %16050 = vst [vmem:[#allocation23_spill] sm:$0xff] %v14850_v32  ;;  %v14870_v8 = vadd.f32 %v14428_v45, %v14618_v55  ;;  %v16054_v32 = vld [vmem:[#allocation69_spill] sm:$0xff]  ;;  %v14890_v55 = vadd.f32 %v14428_v45, %v14638_v19  ;;  %v14910_v19 = vadd.f32 %v14428_v45, %v14658_v48  ;;  %v16069_v48 = vld [vmem:[#allocation83_spill] sm:$0xff] }
 0xc14   :  { %16051 = vst [vmem:[#allocation46_spill] sm:$0xff] %v14854_v63  ;;  %16052 = vst [vmem:[#allocation43_spill] sm:$0xff] %v14858_v22  ;;  %v14874_v41 = vadd.f32 %v14428_v45, %v16054_v32  ;;  %v16055_v63 = vld [vmem:[#allocation66_spill] sm:$0xff]  ;;  %v16056_v22 = vld [vmem:[#allocation75_spill] sm:$0xff]  ;;  %v14894_v32 = vadd.f32 %v14428_v45, %v14642_v2 }
 0xc15   :  { %16053 = vst [vmem:[#allocation49_spill] sm:$0xff] %v14862_v47  ;;  %v14878_v0 = vadd.f32 %v14428_v45, %v16055_v63  ;;  %v14882_v34 = vadd.f32 %v14428_v45, %v16056_v22  ;;  %v16057_v47 = vld [vmem:[#allocation22_spill] sm:$0xff]  ;;  %16058 = vst [vmem:[#allocation45_spill] sm:$0xff] %v14890_v55  ;;  %v14898_v63 = vadd.f32 %v14428_v45, %v14646_v33  ;;  %v16063_v55 = vld [vmem:[#allocation76_spill] sm:$0xff] }
 0xc16   :  { %v14886_v53 = vadd.f32 %v14428_v45, %v16057_v47  ;;  %16059 = vst [vmem:[#allocation25_spill] sm:$0xff] %v14894_v32  ;;  %v14902_v22 = vadd.f32 %v14428_v45, %v14650_v18  ;;  %v14906_v47 = vadd.f32 %v14428_v45, %v14654_v17  ;;  %v14914_v2 = vadd.f32 %v14662_v6, %v16063_v55  ;;  %v16065_v32 = vld [vmem:[#allocation79_spill] sm:$0xff]  ;;  %v16070_v55 = vld [vmem:[#allocation82_spill] sm:$0xff] }
 0xc17   :  { %16060 = vst [vmem:[#allocation48_spill] sm:$0xff] %v14898_v63  ;;  %v14918_v33 = vadd.f32 %v14666_v46, %v16065_v32  ;;  %v16066_v63 = vld [vmem:[#allocation78_spill] sm:$0xff]  ;;  %v14934_v6 = vadd.f32 %v14682_v25, %v16069_v48  ;;  %v16072_v32 = vld [vmem:[#allocation85_spill] sm:$0xff] }
 0xc18   :  { %16061 = vst [vmem:[#allocation52_spill] sm:$0xff] %v14902_v22  ;;  %16062 = vst [vmem:[#allocation50_spill] sm:$0xff] %v14906_v47  ;;  %v14922_v18 = vadd.f32 %v14670_v1, %v16066_v63  ;;  %v16067_v22 = vld [vmem:[#allocation81_spill] sm:$0xff]  ;;  %v16068_v47 = vld [vmem:[#allocation80_spill] sm:$0xff]  ;;  %v14942_v1 = vadd.f32 %v14690_v14, %v16072_v32 }
 0xc19   :  { %16064 = vst [vmem:[#allocation54_spill] sm:$0xff] %v14914_v2  ;;  %v14926_v17 = vadd.f32 %v14674_v60, %v16067_v22  ;;  %v14930_v45 = vadd.f32 %v14678_v16, %v16068_v47  ;;  %v16071_v2 = vld [vmem:[#allocation27_spill] sm:$0xff]  ;;  %v16073_v63 = vld [vmem:[#allocation84_spill] sm:$0xff]  ;;  %v16075_v47 = vld [vmem:[#allocation86_spill] sm:$0xff] }
 0xc1a   :  { %v14938_v46 = vadd.f32 %v16071_v2, %v16070_v55  ;;  %v14946_v60 = vadd.f32 %v14694_v23, %v16073_v63  ;;  %v16074_v22 = vld [vmem:[#allocation87_spill] sm:$0xff]  ;;  %v14954_v25 = vadd.f32 %v14702_v43, %v16075_v47  ;;  %v16076_v48 = vld [vmem:[#allocation89_spill] sm:$0xff]  ;;  %v16077_v55 = vld [vmem:[#allocation88_spill] sm:$0xff] }
 0xc1b   :  { %v14950_v16 = vadd.f32 %v14698_v21, %v16074_v22  ;;  %v14958_v2 = vadd.f32 %v14706_v61, %v16076_v48  ;;  %v14962_v14 = vadd.f32 %v14710_v58, %v16077_v55  ;;  %v16078_v32 = vld [vmem:[#allocation91_spill] sm:$0xff]  ;;  %v16079_v63 = vld [vmem:[#allocation90_spill] sm:$0xff]  ;;  %v16081_v47 = vld [vmem:[#allocation20_spill] sm:$0xff] }
 0xc1c   :  { %v14966_v23 = vadd.f32 %v14714_v12, %v16078_v32  ;;  %v14970_v21 = vadd.f32 %v14718_v57, %v16079_v63  ;;  %v16080_v22 = vld [vmem:[#allocation35_spill] sm:$0xff]  ;;  %v14978_v61 = vadd.f32 %v14726_v37, %v16081_v47  ;;  %v16082_v48 = vld [vmem:[#allocation21_spill] sm:$0xff]  ;;  %v16083_v55 = vld [vmem:[#allocation36_spill] sm:$0xff] }
 0xc1d   :  { %v14974_v43 = vadd.f32 %v14722_v3, %v16080_v22  ;;  %v14982_v58 = vadd.f32 %v14730_v20, %v16082_v48  ;;  %v14986_v12 = vadd.f32 %v14734_v30, %v16083_v55  ;;  %v16084_v32 = vld [vmem:[#allocation39_spill] sm:$0xff]  ;;  %v16085_v63 = vld [vmem:[#allocation38_spill] sm:$0xff]  ;;  %v16086_v22 = vld [vmem:[#allocation37_spill] sm:$0xff] }
 0xc1e   :  { %v14990_v57 = vadd.f32 %v14738_v24, %v16084_v32  ;;  %v14994_v3 = vadd.f32 %v14742_v49, %v16085_v63  ;;  %v14998_v37 = vadd.f32 %v14746_v50, %v16086_v22  ;;  %v16087_v47 = vld [vmem:[#allocation28_spill] sm:$0xff]  ;;  %v16088_v48 = vld [vmem:[#allocation42_spill] sm:$0xff]  ;;  %v16091_v63 = vld [vmem:[#allocation19_spill] sm:$0xff] }
 0xc1f   :  { %v15002_v20 = vadd.f32 %v14750_v5, %v16087_v47  ;;  %v15006_v30 = vadd.f32 %v14754_v36, %v16088_v48  ;;  %v16089_v55 = vld [vmem:[#allocation24_spill] sm:$0xff]  ;;  %v15018_v50 = vadd.f32 %v14766_v38, %v16091_v63  ;;  %v16092_v22 = vld [vmem:[#allocation18_spill] sm:$0xff]  ;;  %v16094_v48 = vld [vmem:[#allocation17_spill] sm:$0xff] }
 0xc20   :  { %v15010_v24 = vadd.f32 %v14758_v4, %v16089_v55  ;;  %v16090_v32 = vld [vmem:[#allocation40_spill] sm:$0xff]  ;;  %v15022_v5 = vadd.f32 %v14770_v59, %v16092_v22  ;;  %v16093_v47 = vld [vmem:[#allocation26_spill] sm:$0xff]  ;;  %v15030_v4 = vadd.f32 %v14778_v40, %v16094_v48  ;;  %v16097_v63 = vld [vmem:[#allocation47_spill] sm:$0xff] }
 0xc21   :  { %v15014_v49 = vadd.f32 %v14762_v15, %v16090_v32  ;;  %v15026_v36 = vadd.f32 %v14774_v7, %v16093_v47  ;;  %v16095_v55 = vld [vmem:[#allocation44_spill] sm:$0xff]  ;;  %v16096_v32 = vld [vmem:[#allocation30_spill] sm:$0xff]  ;;  %v15042_v59 = vadd.f32 %v14790_v56, %v16097_v63  ;;  %v16098_v22 = vld [vmem:[#allocation29_spill] sm:$0xff] }
 0xc22   :  { %v15034_v15 = vadd.f32 %v14782_v27, %v16095_v55  ;;  %v15038_v38 = vadd.f32 %v14786_v51, %v16096_v32  ;;  %v15046_v7 = vadd.f32 %v14794_v31, %v16098_v22  ;;  %v16099_v47 = vld [vmem:[#allocation34_spill] sm:$0xff]  ;;  %v16100_v48 = vld [vmem:[#allocation41_spill] sm:$0xff]  ;;  %v16101_v55 = vld [vmem:[#allocation92_spill] sm:$0xff] }
 0xc23   :  { %v15050_v40 = vadd.f32 %v14798_v29, %v16099_v47  ;;  %v15054_v27 = vadd.f32 %v14802_v52, %v16100_v48  ;;  %v15058_v51 = vadd.f32 %v14806_v11, %v16101_v55  ;;  %v16102_v32 = vld [vmem:[#allocation93_spill] sm:$0xff]  ;;  %v16103_v63 = vld [vmem:[#allocation94_spill] sm:$0xff]  ;;  %v16104_v22 = vld [vmem:[#allocation95_spill] sm:$0xff] }
 0xc24   :  { %v15062_v56 = vadd.f32 %v14810_v54, %v16102_v32  ;;  %v15066_v31 = vadd.f32 %v14814_v10, %v16103_v63  ;;  %v15070_v29 = vadd.f32 %v14818_v39, %v16104_v22  ;;  %v16105_v47 = vld [vmem:[#allocation96_spill] sm:$0xff]  ;;  %v16106_v48 = vld [vmem:[#allocation97_spill] sm:$0xff]  ;;  %v16108_v55 = vld [vmem:[#allocation98_spill] sm:$0xff] }
 0xc25   :  { %v15074_v52 = vadd.f32 %v14822_v28, %v16105_v47  ;;  %v15078_v11 = vadd.f32 %v14826_v42, %v16106_v48  ;;  %v15082_v54 = vadd.f32 %v14830_v26, %v16108_v55  ;;  %v16110_v32 = vld [vmem:[#allocation99_spill] sm:$0xff]  ;;  %v16112_v63 = vld [vmem:[#allocation100_spill] sm:$0xff]  ;;  %v16114_v22 = vld [vmem:[#allocation101_spill] sm:$0xff] }
 0xc26   :  { %v15086_v10 = vadd.f32 %v14834_v9, %v16110_v32  ;;  %v15090_v39 = vadd.f32 %v14838_v13, %v16112_v63  ;;  %v15094_v28 = vadd.f32 %v14842_v62, %v16114_v22  ;;  %v16115_v47 = vld [vmem:[#allocation102_spill] sm:$0xff]  ;;  %v16116_v48 = vld [vmem:[#allocation103_spill] sm:$0xff]  ;;  %v16118_v55 = vld [vmem:[#allocation104_spill] sm:$0xff] }
 0xc27   :  { %16107 = vst [vmem:[#allocation51_spill] sm:$0xff] %v15078_v11  ;;  %16109 = vst [vmem:[#allocation56_spill] sm:$0xff] %v15082_v54  ;;  %v15098_v42 = vadd.f32 %v14846_v35, %v16115_v47  ;;  %v16117_v11 = vld [vmem:[#allocation23_spill] sm:$0xff]  ;;  %v16119_v54 = vld [vmem:[#allocation46_spill] sm:$0xff] }
 0xc28   :  { %16111 = vst [vmem:[#allocation53_spill] sm:$0xff] %v15086_v10  ;;  %16113 = vst [vmem:[#allocation58_spill] sm:$0xff] %v15090_v39  ;;  %v15102_v26 = vadd.f32 %v16117_v11, %v16116_v48  ;;  %v15106_v9 = vadd.f32 %v16119_v54, %v16118_v55  ;;  %v16120_v32 = vld [vmem:[#allocation105_spill] sm:$0xff]  ;;  %v16121_v10 = vld [vmem:[#allocation43_spill] sm:$0xff] }
 0xc29   :  { %v15110_v13 = vadd.f32 %v16121_v10, %v16120_v32  ;;  %v16122_v63 = vld [vmem:[#allocation68_spill] sm:$0xff]  ;;  %v16123_v39 = vld [vmem:[#allocation49_spill] sm:$0xff]  ;;  %v16124_v22 = vld [vmem:[#allocation106_spill] sm:$0xff] }
 0xc2a   :  { %v15114_v62 = vadd.f32 %v16123_v39, %v16122_v63  ;;  %v15118_v35 = vadd.f32 %v14866_v44, %v16124_v22  ;;  %v16126_v47 = vld [vmem:[#allocation71_spill] sm:$0xff]  ;;  %v16128_v48 = vld [vmem:[#allocation70_spill] sm:$0xff]  ;;  %v16130_v55 = vld [vmem:[#allocation73_spill] sm:$0xff] }
 0xc2b   :  { %v15122_v11 = vadd.f32 %v14870_v8, %v16126_v47  ;;  %v15126_v54 = vadd.f32 %v14874_v41, %v16128_v48  ;;  %v15130_v10 = vadd.f32 %v14878_v0, %v16130_v55  ;;  %v16132_v32 = vld [vmem:[#allocation72_spill] sm:$0xff]  ;;  %v16134_v63 = vld [vmem:[#allocation74_spill] sm:$0xff]  ;;  %v16135_v22 = vld [vmem:[#allocation77_spill] sm:$0xff] }
 0xc2c   :  { %16125 = vst [vmem:[#allocation55_spill] sm:$0xff] %v15118_v35  ;;  %v15134_v39 = vadd.f32 %v14882_v34, %v16132_v32  ;;  %v15138_v44 = vadd.f32 %v14886_v53, %v16134_v63  ;;  %v16136_v35 = vld [vmem:[#allocation45_spill] sm:$0xff]  ;;  %v16138_v47 = vld [vmem:[#allocation107_spill] sm:$0xff]  ;;  %v16140_v48 = vld [vmem:[#allocation108_spill] sm:$0xff] }
 0xc2d   :  { %16127 = vst [vmem:[#allocation59_spill] sm:$0xff] %v15122_v11  ;;  %16129 = vst [vmem:[#allocation57_spill] sm:$0xff] %v15126_v54  ;;  %v15142_v8 = vadd.f32 %v16136_v35, %v16135_v22  ;;  %v16139_v11 = vld [vmem:[#allocation25_spill] sm:$0xff]  ;;  %v16141_v54 = vld [vmem:[#allocation48_spill] sm:$0xff] }
 0xc2e   :  { %16131 = vst [vmem:[#allocation32_spill] sm:$0xff] %v15130_v10  ;;  %16133 = vst [vmem:[#allocation33_spill] sm:$0xff] %v15134_v39  ;;  %v15146_v41 = vadd.f32 %v16139_v11, %v16138_v47  ;;  %v15150_v0 = vadd.f32 %v16141_v54, %v16140_v48  ;;  %v16142_v55 = vld [vmem:[#allocation109_spill] sm:$0xff]  ;;  %v16143_v10 = vld [vmem:[#allocation52_spill] sm:$0xff]  ;;  %v7339_v11 = vmax.f32 %v14918_v33, 0.0  ;;  %v7340_v47 = vmax.f32 %v14922_v18, 0.0 }
 0xc2f   :  { %16137 = vst [vmem:[#allocation31_spill] sm:$0xff] %v15142_v8  ;;  %v15154_v34 = vadd.f32 %v16143_v10, %v16142_v55  ;;  %v16144_v32 = vld [vmem:[#allocation110_spill] sm:$0xff]  ;;  %v16146_v63 = vld [vmem:[#allocation65_spill] sm:$0xff]  ;;  %v7341_v54 = vmax.f32 %v14926_v17, 0.0  ;;  %v7342_v48 = vmax.f32 %v14930_v45, 0.0  ;;  %v7343_v10 = vmax.f32 %v14934_v6, 0.0 }
 0xc30   :  { %v16145_v39 = vld [vmem:[#allocation50_spill] sm:$0xff]  ;;  %v15162_v35 = vadd.f32 %v14910_v19, %v16146_v63  ;;  %v7344_v55 = vmax.f32 %v14938_v46, 0.0  ;;  %v7347_v19 = vmax.f32 %v14950_v16, 0.0  ;;  %v7348_v63 = vmax.f32 %v14954_v25, 0.0  ;;  %7403 = vst [vmem:[#allocation12 + $0x8] sm:$0xff] %v7339_v11  ;;  %7404 = vst [vmem:[#allocation12 + $0x10] sm:$0xff] %v7340_v47 }
 0xc31   :  { %v15158_v53 = vadd.f32 %v16145_v39, %v16144_v32  ;;  %v16147_v22 = vld [vmem:[#allocation54_spill] sm:$0xff]  ;;  %v7345_v39 = vmax.f32 %v14942_v1, 0.0  ;;  %v7346_v32 = vmax.f32 %v14946_v60, 0.0  ;;  %v7349_v33 = vmax.f32 %v14958_v2, 0.0  ;;  %7405 = vst [vmem:[#allocation12 + $0x18] sm:$0xff] %v7341_v54  ;;  %7406 = vst [vmem:[#allocation12 + $0x20] sm:$0xff] %v7342_v48 }
 0xc32   :  { %v7338_v8 = vmax.f32 %v16147_v22, 0.0  ;;  %v7350_v18 = vmax.f32 %v14962_v14, 0.0  ;;  %v7351_v17 = vmax.f32 %v14966_v23, 0.0  ;;  %v7352_v45 = vmax.f32 %v14970_v21, 0.0  ;;  %7407 = vst [vmem:[#allocation12 + $0x28] sm:$0xff] %v7343_v10  ;;  %7408 = vst [vmem:[#allocation12 + $0x30] sm:$0xff] %v7344_v55 }
 0xc33   :  { %v7353_v6 = vmax.f32 %v14974_v43, 0.0  ;;  %v7354_v46 = vmax.f32 %v14978_v61, 0.0  ;;  %7409 = vst [vmem:[#allocation12 + $0x38] sm:$0xff] %v7345_v39  ;;  %7410 = vst [vmem:[#allocation12 + $0x40] sm:$0xff] %v7346_v32  ;;  %v7355_v1 = vmax.f32 %v14982_v58, 0.0  ;;  %v7356_v60 = vmax.f32 %v14986_v12, 0.0 }
 0xc34   :  { %7402 = vst [vmem:[#allocation12] sm:$0xff] %v7338_v8  ;;  %v7357_v16 = vmax.f32 %v14990_v57, 0.0  ;;  %v7358_v25 = vmax.f32 %v14994_v3, 0.0  ;;  %7411 = vst [vmem:[#allocation12 + $0x48] sm:$0xff] %v7347_v19  ;;  %v7359_v2 = vmax.f32 %v14998_v37, 0.0  ;;  %v7360_v14 = vmax.f32 %v15002_v20, 0.0 }
 0xc35   :  { %7412 = vst [vmem:[#allocation12 + $0x50] sm:$0xff] %v7348_v63  ;;  %7413 = vst [vmem:[#allocation12 + $0x58] sm:$0xff] %v7349_v33  ;;  %v7361_v23 = vmax.f32 %v15006_v30, 0.0  ;;  %v7362_v21 = vmax.f32 %v15010_v24, 0.0  ;;  %v7363_v43 = vmax.f32 %v15014_v49, 0.0  ;;  %v7364_v61 = vmax.f32 %v15018_v50, 0.0 }
 0xc36   :  { %7414 = vst [vmem:[#allocation12 + $0x60] sm:$0xff] %v7350_v18  ;;  %7415 = vst [vmem:[#allocation12 + $0x68] sm:$0xff] %v7351_v17  ;;  %v7365_v58 = vmax.f32 %v15022_v5, 0.0  ;;  %v7366_v12 = vmax.f32 %v15026_v36, 0.0  ;;  %v7367_v57 = vmax.f32 %v15030_v4, 0.0  ;;  %v7368_v3 = vmax.f32 %v15034_v15, 0.0 }
 0xc37   :  { %7416 = vst [vmem:[#allocation12 + $0x70] sm:$0xff] %v7352_v45  ;;  %7417 = vst [vmem:[#allocation12 + $0x78] sm:$0xff] %v7353_v6  ;;  %v7369_v37 = vmax.f32 %v15038_v38, 0.0  ;;  %v7370_v20 = vmax.f32 %v15042_v59, 0.0  ;;  %v7371_v30 = vmax.f32 %v15046_v7, 0.0  ;;  %v7372_v24 = vmax.f32 %v15050_v40, 0.0 }
 0xc38   :  { %7418 = vst [vmem:[#allocation12 + $0x80] sm:$0xff] %v7354_v46  ;;  %7419 = vst [vmem:[#allocation12 + $0x88] sm:$0xff] %v7355_v1  ;;  %v7373_v49 = vmax.f32 %v15054_v27, 0.0  ;;  %v7374_v50 = vmax.f32 %v15058_v51, 0.0  ;;  %v7375_v5 = vmax.f32 %v15062_v56, 0.0  ;;  %v7376_v36 = vmax.f32 %v15066_v31, 0.0 }
 0xc39   :  { %7420 = vst [vmem:[#allocation12 + $0x90] sm:$0xff] %v7356_v60  ;;  %7421 = vst [vmem:[#allocation12 + $0x98] sm:$0xff] %v7357_v16  ;;  %v7377_v4 = vmax.f32 %v15070_v29, 0.0  ;;  %v7378_v15 = vmax.f32 %v15074_v52, 0.0  ;;  %v16148_v38 = vld [vmem:[#allocation51_spill] sm:$0xff]  ;;  %v16149_v7 = vld [vmem:[#allocation56_spill] sm:$0xff] }
 0xc3a   :  { %7422 = vst [vmem:[#allocation12 + $0xa0] sm:$0xff] %v7358_v25  ;;  %7423 = vst [vmem:[#allocation12 + $0xa8] sm:$0xff] %v7359_v2  ;;  %v7379_v59 = vmax.f32 %v16148_v38, 0.0  ;;  %v7380_v40 = vmax.f32 %v16149_v7, 0.0  ;;  %v16150_v27 = vld [vmem:[#allocation53_spill] sm:$0xff]  ;;  %v16151_v8 = vld [vmem:[#allocation58_spill] sm:$0xff] }
 0xc3b   :  { %7424 = vst [vmem:[#allocation12 + $0xb0] sm:$0xff] %v7360_v14  ;;  %7425 = vst [vmem:[#allocation12 + $0xb8] sm:$0xff] %v7361_v23  ;;  %v7381_v51 = vmax.f32 %v16150_v27, 0.0  ;;  %v7382_v22 = vmax.f32 %v16151_v8, 0.0  ;;  %v7383_v56 = vmax.f32 %v15094_v28, 0.0  ;;  %v7384_v31 = vmax.f32 %v15098_v42, 0.0 }
 0xc3c   :  { %7426 = vst [vmem:[#allocation12 + $0xc0] sm:$0xff] %v7362_v21  ;;  %7427 = vst [vmem:[#allocation12 + $0xc8] sm:$0xff] %v7363_v43  ;;  %v7385_v29 = vmax.f32 %v15102_v26, 0.0  ;;  %v7386_v52 = vmax.f32 %v15106_v9, 0.0  ;;  %v7387_v11 = vmax.f32 %v15110_v13, 0.0  ;;  %v7388_v47 = vmax.f32 %v15114_v62, 0.0 }
 0xc3d   :  { %7428 = vst [vmem:[#allocation12 + $0xd0] sm:$0xff] %v7364_v61  ;;  %7429 = vst [vmem:[#allocation12 + $0xd8] sm:$0xff] %v7365_v58  ;;  %v16152_v54 = vld [vmem:[#allocation55_spill] sm:$0xff]  ;;  %v16154_v28 = vld [vmem:[#allocation57_spill] sm:$0xff]  ;;  %v7394_v13 = vmax.f32 %v15138_v44, 0.0  ;;  %v7396_v63 = vmax.f32 %v15146_v41, 0.0 }
 0xc3e   :  { %7430 = vst [vmem:[#allocation12 + $0xe0] sm:$0xff] %v7366_v12  ;;  %7431 = vst [vmem:[#allocation12 + $0xe8] sm:$0xff] %v7367_v57  ;;  %v7389_v48 = vmax.f32 %v16152_v54, 0.0  ;;  %v16153_v10 = vld [vmem:[#allocation59_spill] sm:$0xff]  ;;  %v7391_v42 = vmax.f32 %v16154_v28, 0.0  ;;  %v16155_v26 = vld [vmem:[#allocation32_spill] sm:$0xff] }
 0xc3f   :  { %7432 = vst [vmem:[#allocation12 + $0xf0] sm:$0xff] %v7368_v3  ;;  %7433 = vst [vmem:[#allocation12 + $0xf8] sm:$0xff] %v7369_v37  ;;  %v7390_v55 = vmax.f32 %v16153_v10, 0.0  ;;  %v7392_v9 = vmax.f32 %v16155_v26, 0.0  ;;  %v16156_v39 = vld [vmem:[#allocation33_spill] sm:$0xff]  ;;  %v16157_v62 = vld [vmem:[#allocation31_spill] sm:$0xff] }
 0xc40   :  { %7434 = vst [vmem:[#allocation12 + $0x100] sm:$0xff] %v7370_v20  ;;  %7435 = vst [vmem:[#allocation12 + $0x108] sm:$0xff] %v7371_v30  ;;  %v7393_v32 = vmax.f32 %v16156_v39, 0.0  ;;  %v7395_v19 = vmax.f32 %v16157_v62, 0.0  ;;  %v7397_v33 = vmax.f32 %v15150_v0, 0.0  ;;  %v7398_v18 = vmax.f32 %v15154_v34, 0.0 }
 0xc41   :  { %7436 = vst [vmem:[#allocation12 + $0x110] sm:$0xff] %v7372_v24  ;;  %7437 = vst [vmem:[#allocation12 + $0x118] sm:$0xff] %v7373_v49  ;;  %v7399_v17 = vmax.f32 %v15158_v53, 0.0  ;;  %v7401_v44 = vmax.f32 %v15162_v35, 0.0 }
 0xc42   :  { %7438 = vst [vmem:[#allocation12 + $0x120] sm:$0xff] %v7374_v50  ;;  %7439 = vst [vmem:[#allocation12 + $0x128] sm:$0xff] %v7375_v5 }
 0xc43   :  { %7440 = vst [vmem:[#allocation12 + $0x130] sm:$0xff] %v7376_v36  ;;  %7441 = vst [vmem:[#allocation12 + $0x138] sm:$0xff] %v7377_v4 }
 0xc44   :  { %7442 = vst [vmem:[#allocation12 + $0x140] sm:$0xff] %v7378_v15  ;;  %7443 = vst [vmem:[#allocation12 + $0x148] sm:$0xff] %v7379_v59 }
 0xc45   :  { %7444 = vst [vmem:[#allocation12 + $0x150] sm:$0xff] %v7380_v40  ;;  %7445 = vst [vmem:[#allocation12 + $0x158] sm:$0xff] %v7381_v51 }
 0xc46   :  { %7446 = vst [vmem:[#allocation12 + $0x160] sm:$0xff] %v7382_v22  ;;  %7447 = vst [vmem:[#allocation12 + $0x168] sm:$0xff] %v7383_v56 }
 0xc47   :  { %7448 = vst [vmem:[#allocation12 + $0x170] sm:$0xff] %v7384_v31  ;;  %7449 = vst [vmem:[#allocation12 + $0x178] sm:$0xff] %v7385_v29 }
 0xc48   :  { %7450 = vst [vmem:[#allocation12 + $0x180] sm:$0xff] %v7386_v52  ;;  %7451 = vst [vmem:[#allocation12 + $0x188] sm:$0xff] %v7387_v11 }
 0xc49   :  { %7452 = vst [vmem:[#allocation12 + $0x190] sm:$0xff] %v7388_v47  ;;  %7453 = vst [vmem:[#allocation12 + $0x198] sm:$0xff] %v7389_v48 }
 0xc4a   :  { %7454 = vst [vmem:[#allocation12 + $0x1a0] sm:$0xff] %v7390_v55  ;;  %7455 = vst [vmem:[#allocation12 + $0x1a8] sm:$0xff] %v7391_v42 }
 0xc4b   :  { %7456 = vst [vmem:[#allocation12 + $0x1b0] sm:$0xff] %v7392_v9  ;;  %7457 = vst [vmem:[#allocation12 + $0x1b8] sm:$0xff] %v7393_v32 }
 0xc4c   :  { %7458 = vst [vmem:[#allocation12 + $0x1c0] sm:$0xff] %v7394_v13  ;;  %7459 = vst [vmem:[#allocation12 + $0x1c8] sm:$0xff] %v7395_v19 }
 0xc4d   :  { %7460 = vst [vmem:[#allocation12 + $0x1d0] sm:$0xff] %v7396_v63  ;;  %7461 = vst [vmem:[#allocation12 + $0x1d8] sm:$0xff] %v7397_v33 }
 0xc4e   :  { %7462 = vst [vmem:[#allocation12 + $0x1e0] sm:$0xff] %v7398_v18  ;;  %7463 = vst [vmem:[#allocation12 + $0x1e8] sm:$0xff] %v7399_v17 }
 0xc4f   :  { %7465 = vst [vmem:[#allocation12 + $0x1f8] sm:$0xff] %v7401_v44 }
 0xc50   :  { %9556 = shalt.err (!%p9553_p8)
}
 0xc51   :  { %s9557_s12 = scalar_lea.hbm %s15252_s10, 8192 }
 0xc52   :  { %p9558_p9 = scmp.ne.s32.totalorder %s15252_s10, %s9557_s12  ;;  %p9561_p10 = scmp.lt.u32.totalorder %s9557_s12, %s15252_s10 }
 0xc54   :  { %p9563_p11 = pnand %p9561_p10, %p9558_p9 }
 0xc56   :  { %9566 = shalt.err (!%p9563_p11)
}
 0xc57   :  { %7477 = dma.vmem_to_hbm [thread:$0]  %s7472_s9, 8192, %s15252_s10, [#allocation6], %s9577_s25, %s9577_s25, %s9578_s26  }
 0xc58   :  { %9573 = dma.done.wait [#allocation6], 8192  }
 0xc59   :  { %9574 = vsyncadd [#allocation6], 4294959104 }
 0xc5a   :  { %7481 = vsyncpa [#allocation5], 1 }
 0xc5b   :  { %7482 = vsyncpa [#allocation8], 1 }
 0xc5c   :  { %7483 = vsyncpa [#allocation11], 1 }
 0xc5d   :  { %7484 = vsyncpa [#allocation6], 1 }

</bundles_post_ra>
